<compile_context>
chip_gen: v7x
topology: tpu7x:2x2x1
jax: 0.10.0
libtpu: 0.0.40
codegen_flags: <defaults>
</compile_context>

<pallas_src>
import jax
import jax.numpy as jnp
from jax.experimental import pallas as pl
from jax.experimental.pallas import tpu as pltpu

# ----------------------------- configuration --------------------------------
B = 2                      # batch
LAT_CH = 4                 # latent channels of noisy_latents / model_pred
H = W = 16                 # latent spatial size
HW = H * W
GUIDANCE_TYPES = ("flame", "depth", "alignment")
GUIDANCE_INPUT_CHANNELS = (3, 1, 3)        # per-guidance input channels
GUID_HID = 16              # guidance encoder hidden channels
MODEL_CH = 32              # UNet base channels == guidance embedding channels
TIME_DIM = 32              # timestep embedding dim
CROSS_DIM = 32             # encoder_hidden_states feature dim
SEQ = 8                    # encoder_hidden_states sequence length

CG = sum(GUIDANCE_INPUT_CHANNELS)      # 7  : packed guidance input channels
GH = len(GUIDANCE_TYPES) * GUID_HID    # 48 : packed guidance hidden channels
PAD_C = max(GH, MODEL_CH, CG, LAT_CH)  # 48 : channel width of the halo scratch


# ----------------------------- fused Pallas kernel ---------------------------
def _champ_fused_kernel(
        cond_ref, lat_ref, ehs_ref, temb_ref,
        gw1_ref, gb1_ref, gw2_ref, gb2_ref, gw3_ref, gb3_ref,
        tw1_ref, tb1_ref, tw2_ref, tb2_ref,
        uwin_ref, ubin_ref, wq_ref, bq_ref, wkv_ref, bkv_ref, wo_ref, bo_ref,
        uwout_ref, ubout_ref,
        out_ref,
        pad_ref):
    """One grid step == one batch element; everything stays on-chip."""
    f32 = jnp.float32
    bf16 = jnp.bfloat16

    # zero the halo scratch once (its borders realize the 'same' zero padding)
    pad_ref[...] = jnp.zeros_like(pad_ref)

    def write_interior(x_hwc, c):
        pad_ref[1:1 + H, 1:1 + W, 0:c] = x_hwc.astype(pad_ref.dtype)

    def conv3x3(w_ref, b_ref, cin, silu):
        # 3x3 / stride 1 / 'same' conv reading channels [:cin] of the halo
        # scratch.  Column-grouped im2col: ONE slice+cast per dx tap (3 per
        # layer); the 3 dy taps are aligned row windows of that slice, so all
        # 9 MXU dots feed from just 3 realigned loads.
        cout = w_ref.shape[2]
        acc = jnp.zeros((HW, cout), f32)
        for dx in range(3):
            xs = pad_ref[:, dx:dx + W, 0:cin]              # (H+2, W, cin)
            xs = xs.reshape((H + 2) * W, cin).astype(bf16)  # (288, cin)
            for dy in range(3):
                win = xs[dy * W:dy * W + HW]                # aligned (256,cin)
                acc = acc + jnp.dot(win, w_ref[dy * 3 + dx],
                                    preferred_element_type=f32)
        acc = acc + b_ref[...]
        if silu:
            acc = acc * jax.nn.sigmoid(acc)     # f32 elementwise (v5e-safe)
        return acc

    # ---- three guidance encoders fused via block-diagonal weights ----------
    # conv_out weight is Cin-concatenated, so its single matmul already SUMS
    # the three per-guidance feature maps (== torch.stack(fea_lst, 0).sum(0)).
    write_interior(cond_ref[0], CG)
    g = conv3x3(gw1_ref, gb1_ref, CG, silu=True)
    write_interior(g.reshape(H, W, GH), GH)
    g = conv3x3(gw2_ref, gb2_ref, GH, silu=True)
    write_interior(g.reshape(H, W, GH), GH)
    gfea = conv3x3(gw3_ref, gb3_ref, GH, silu=False)          # (HW, MODEL_CH)

    # ---- timestep-embedding MLP ---------------------------------------------
    t = temb_ref[0]                                           # (1, TIME_DIM)
    t = jnp.dot(t.astype(bf16), tw1_ref[...], preferred_element_type=f32) + tb1_ref[...]
    t = t * jax.nn.sigmoid(t)
    temb = jnp.dot(t.astype(bf16), tw2_ref[...], preferred_element_type=f32) + tb2_ref[...]

    # ---- reference UNet stand-in --------------------------------------------
    write_interior(lat_ref[0], LAT_CH)
    h = conv3x3(uwin_ref, ubin_ref, LAT_CH, silu=False)       # (HW, MODEL_CH)
    h = h + gfea + temb                                       # temb broadcasts

    # single-head cross attention against encoder_hidden_states
    # (1/sqrt(d) already folded into wq/bq at pack time)
    ehs = ehs_ref[0]                                          # (SEQ, CROSS_DIM)
    q = jnp.dot(h.astype(bf16), wq_ref[...], preferred_element_type=f32) + bq_ref[...]
    kv = jnp.dot(ehs.astype(bf16), wkv_ref[...], preferred_element_type=f32) + bkv_ref[...]
    k = kv[:, 0:MODEL_CH]
    v = kv[:, MODEL_CH:2 * MODEL_CH]
    s = jax.lax.dot_general(q.astype(bf16), k.astype(bf16),
                            dimension_numbers=(((1,), (1,)), ((), ())),
                            preferred_element_type=f32)
    s = s - jnp.max(s, axis=-1, keepdims=True)
    p = jnp.exp(s)
    p = p * pl.reciprocal(jnp.sum(p, axis=-1, keepdims=True), approx=True)
    attn = jnp.dot(p.astype(bf16), v.astype(bf16), preferred_element_type=f32)
    attn = jnp.dot(attn.astype(bf16), wo_ref[...], preferred_element_type=f32) + bo_ref[...]
    h = h + attn

    # output head
    h = h * jax.nn.sigmoid(h)
    write_interior(h.reshape(H, W, MODEL_CH), MODEL_CH)
    out = conv3x3(uwout_ref, ubout_ref, MODEL_CH, silu=False)  # (HW, LAT_CH)
    out_ref[0] = out.astype(out_ref.dtype)


# ----------------------------- parameter init --------------------------------
def _conv_w(key, cin, cout, scale=0.05):
    return scale * jax.random.normal(key, (3, 3, cin, cout), jnp.float32)


def _lin_w(key, din, dout, scale=0.05):
    return scale * jax.random.normal(key, (din, dout), jnp.float32)


def init_params(key):
    keys = iter(jax.random.split(key, 64))
    params = {}
    # guidance encoders (Champ GuidanceEncoder stand-in: conv_in->SiLU->conv->SiLU->conv_out)
    # NOTE: real Champ zero-inits conv_out; we init it small-nonzero so the
    # kernel computation is exercised (deterministic either way).
    for gtype, cin in zip(GUIDANCE_TYPES, GUIDANCE_INPUT_CHANNELS):
        params[f"guidance_encoder_{gtype}"] = {
            "conv_in_w": _conv_w(next(keys), cin, GUID_HID),
            "conv_in_b": jnp.zeros((GUID_HID,), jnp.float32),
            "conv_mid_w": _conv_w(next(keys), GUID_HID, GUID_HID),
            "conv_mid_b": jnp.zeros((GUID_HID,), jnp.float32),
            "conv_out_w": _conv_w(next(keys), GUID_HID, MODEL_CH, scale=0.01),
            "conv_out_b": jnp.zeros((MODEL_CH,), jnp.float32),
        }
    # minimal conditional reference UNet stand-in
    # TODO(synk): full diffusers UNet2DConditionModel (down/mid/up blocks,
    # multi-head attention, GroupNorm, reference_control_writer hooks) has no
    # clean single-kernel equivalent; replaced by one conv_in + time-MLP +
    # cross-attention + conv_out block.
    params["reference_unet"] = {
        "time_w1": _lin_w(next(keys), TIME_DIM, TIME_DIM),
        "time_b1": jnp.zeros((TIME_DIM,), jnp.float32),
        "time_w2": _lin_w(next(keys), TIME_DIM, MODEL_CH),
        "time_b2": jnp.zeros((MODEL_CH,), jnp.float32),
        "conv_in_w": _conv_w(next(keys), LAT_CH, MODEL_CH),
        "conv_in_b": jnp.zeros((MODEL_CH,), jnp.float32),
        "wq": _lin_w(next(keys), MODEL_CH, MODEL_CH),
        "bq": jnp.zeros((MODEL_CH,), jnp.float32),
        "wk": _lin_w(next(keys), CROSS_DIM, MODEL_CH),
        "bk": jnp.zeros((MODEL_CH,), jnp.float32),
        "wv": _lin_w(next(keys), CROSS_DIM, MODEL_CH),
        "bv": jnp.zeros((MODEL_CH,), jnp.float32),
        "wo": _lin_w(next(keys), MODEL_CH, MODEL_CH),
        "bo": jnp.zeros((MODEL_CH,), jnp.float32),
        "conv_out_w": _conv_w(next(keys), MODEL_CH, LAT_CH),
        "conv_out_b": jnp.zeros((LAT_CH,), jnp.float32),
    }
    return params


# ----------------------------- weight packing (glue, bf16) -------------------
def _conv_flat(w):   # (3,3,cin,cout) -> (9,cin,cout) bf16, tap t = dy*3+dx
    return w.reshape(9, w.shape[2], w.shape[3]).astype(jnp.bfloat16)


def _bias_row(b):    # (n,) -> (1,n) f32
    return b.reshape(1, -1).astype(jnp.float32)


def _pack_weights(params):
    gs = [params[f"guidance_encoder_{t}"] for t in GUIDANCE_TYPES]
    # block-diagonal conv_in / conv_mid keep the three encoders independent;
    # Cin-concatenated conv_out realizes stack(...).sum(0) inside one matmul.
    w_in = jnp.zeros((3, 3, CG, GH), jnp.float32)
    w_mid = jnp.zeros((3, 3, GH, GH), jnp.float32)
    ci = 0
    for gi, (g, cin) in enumerate(zip(gs, GUIDANCE_INPUT_CHANNELS)):
        co = gi * GUID_HID
        w_in = w_in.at[:, :, ci:ci + cin, co:co + GUID_HID].set(g["conv_in_w"])
        w_mid = w_mid.at[:, :, co:co + GUID_HID, co:co + GUID_HID].set(g["conv_mid_w"])
        ci += cin
    b_in = jnp.concatenate([g["conv_in_b"] for g in gs])
    b_mid = jnp.concatenate([g["conv_mid_b"] for g in gs])
    w_out = jnp.concatenate([g["conv_out_w"] for g in gs], axis=2)
    b_out = jnp.sum(jnp.stack([g["conv_out_b"] for g in gs], axis=0), axis=0)

    u = params["reference_unet"]
    wkv = jnp.concatenate([u["wk"], u["wv"]], axis=1)     # widen N: 32 -> 64
    bkv = jnp.concatenate([u["bk"], u["bv"]])
    scale = 1.0 / (MODEL_CH ** 0.5)                       # fold attn scale into q-proj
    wq = u["wq"] * scale
    bq = u["bq"] * scale

    return (
        _conv_flat(w_in), _bias_row(b_in),
        _conv_flat(w_mid), _bias_row(b_mid),
        _conv_flat(w_out), _bias_row(b_out),
        u["time_w1"].astype(jnp.bfloat16), _bias_row(u["time_b1"]),
        u["time_w2"].astype(jnp.bfloat16), _bias_row(u["time_b2"]),
        _conv_flat(u["conv_in_w"]), _bias_row(u["conv_in_b"]),
        wq.astype(jnp.bfloat16), _bias_row(bq),
        wkv.astype(jnp.bfloat16), _bias_row(bkv),
        u["wo"].astype(jnp.bfloat16), _bias_row(u["bo"]),
        _conv_flat(u["conv_out_w"]), _bias_row(u["conv_out_b"]),
    )


# ----------------------------- forward ---------------------------------------
def sinusoidal_timestep_embedding(t, dim):
    half = dim // 2
    freqs = jnp.exp(-jnp.log(10000.0) * jnp.arange(half, dtype=jnp.float32) / half)
    args = t.astype(jnp.float32)[:, None] * freqs[None, :]
    return jnp.concatenate([jnp.cos(args), jnp.sin(args)], axis=-1)


def champ_flame_forward(params, noisy_latents, timesteps, encoder_hidden_states,
                        multi_guidance_cond):
    Bb = noisy_latents.shape[0]
    # layout glue, done ONCE at the model boundary
    cond = jnp.transpose(multi_guidance_cond, (0, 2, 3, 1)).astype(jnp.float32)  # NHWC
    lat = jnp.transpose(noisy_latents, (0, 2, 3, 1)).astype(jnp.float32)         # NHWC
    temb = sinusoidal_timestep_embedding(timesteps, TIME_DIM)[:, None, :]        # (B,1,T)
    ehs = encoder_hidden_states.astype(jnp.float32)

    weights = _pack_weights(params)

    def _wspec(shape):
        n = len(shape)
        return pl.BlockSpec(shape, lambda b: (0,) * n)   # constant index -> resident

    in_specs = [
        pl.BlockSpec((1, H, W, CG), lambda b: (b, 0, 0, 0)),
        pl.BlockSpec((1, H, W, LAT_CH), lambda b: (b, 0, 0, 0)),
        pl.BlockSpec((1, SEQ, CROSS_DIM), lambda b: (b, 0, 0)),
        pl.BlockSpec((1, 1, TIME_DIM), lambda b: (b, 0, 0)),
    ] + [_wspec(w.shape) for w in weights]

    out = pl.pallas_call(
        _champ_fused_kernel,
        out_shape=jax.ShapeDtypeStruct((Bb, HW, LAT_CH), jnp.float32),
        grid=(Bb,),
        in_specs=in_specs,
        out_specs=pl.BlockSpec((1, HW, LAT_CH), lambda b: (b, 0, 0)),
        scratch_shapes=[pltpu.VMEM((H + 2, W + 2, PAD_C), jnp.float32)],
        compiler_params=pltpu.CompilerParams(
            dimension_semantics=("parallel",)),   # batch shards onto v7x's 2 TCs
    )(cond, lat, ehs, temb, *weights)

    # (B, H*W, LAT_CH) -> NCHW (single small boundary transpose)
    return jnp.transpose(out.reshape(Bb, H, W, LAT_CH), (0, 3, 1, 2))


# ----------------------------- main -------------------------------------------
if __name__ == "__main__":
    root = jax.random.PRNGKey(0)
    k_param, k_lat, k_ehs, k_cond = jax.random.split(root, 4)

    params = init_params(k_param)
    noisy_latents = jax.random.normal(k_lat, (B, LAT_CH, H, W), jnp.float32)
    timesteps = jnp.array([10, 500], dtype=jnp.int32)
    encoder_hidden_states = jax.random.normal(k_ehs, (B, SEQ, CROSS_DIM), jnp.float32)
    multi_guidance_cond = jax.random.normal(k_cond, (B, CG, H, W), jnp.float32)

    fwd = jax.jit(champ_flame_forward)
    model_pred = fwd(params, noisy_latents, timesteps, encoder_hidden_states,
                     multi_guidance_cond)
    jax.block_until_ready(model_pred)
    assert model_pred.shape == (B, LAT_CH, H, W)
    assert bool(jnp.all(jnp.isfinite(model_pred)))
    print("KERNEL_OK")
</pallas_src>

<mosaic_0001>
module attributes {stable_mosaic.version = 11 : i64} {
  func.func @_champ_fused_kernel(%arg0: i32, %arg1: memref<1x16x16x7xf32, #tpu.memory_space<vmem>>, %arg2: memref<1x16x16x4xf32, #tpu.memory_space<vmem>>, %arg3: memref<1x8x32xf32, #tpu.memory_space<vmem>>, %arg4: memref<1x1x32xf32, #tpu.memory_space<vmem>>, %arg5: memref<9x7x48xbf16, #tpu.memory_space<vmem>>, %arg6: memref<1x48xf32, #tpu.memory_space<vmem>>, %arg7: memref<9x48x48xbf16, #tpu.memory_space<vmem>>, %arg8: memref<1x48xf32, #tpu.memory_space<vmem>>, %arg9: memref<9x48x32xbf16, #tpu.memory_space<vmem>>, %arg10: memref<1x32xf32, #tpu.memory_space<vmem>>, %arg11: memref<32x32xbf16, #tpu.memory_space<vmem>>, %arg12: memref<1x32xf32, #tpu.memory_space<vmem>>, %arg13: memref<32x32xbf16, #tpu.memory_space<vmem>>, %arg14: memref<1x32xf32, #tpu.memory_space<vmem>>, %arg15: memref<9x4x32xbf16, #tpu.memory_space<vmem>>, %arg16: memref<1x32xf32, #tpu.memory_space<vmem>>, %arg17: memref<32x32xbf16, #tpu.memory_space<vmem>>, %arg18: memref<1x32xf32, #tpu.memory_space<vmem>>, %arg19: memref<32x64xbf16, #tpu.memory_space<vmem>>, %arg20: memref<1x64xf32, #tpu.memory_space<vmem>>, %arg21: memref<32x32xbf16, #tpu.memory_space<vmem>>, %arg22: memref<1x32xf32, #tpu.memory_space<vmem>>, %arg23: memref<9x32x4xbf16, #tpu.memory_space<vmem>>, %arg24: memref<1x4xf32, #tpu.memory_space<vmem>>, %arg25: memref<1x256x4xf32, #tpu.memory_space<vmem>>, %arg26: memref<18x18x48xf32, #tpu.memory_space<vmem>>) attributes {dimension_semantics = [#tpu.dimension_semantics<parallel>], iteration_bounds = array<i64: 2>, scalar_prefetch = 0 : i64, scratch_operands = 1 : i64, tpu.core_type = #tpu.core_type<tc>, window_params = [{transform_indices = @transform_0, window_bounds = array<i64: 1, 16, 16, 7>}, {transform_indices = @transform_1, window_bounds = array<i64: 1, 16, 16, 4>}, {transform_indices = @transform_2, window_bounds = array<i64: 1, 8, 32>}, {transform_indices = @transform_3, window_bounds = array<i64: 1, 1, 32>}, {pipeline_mode = #tpu.pipeline_mode<synchronous>, transform_indices = @transform_4, window_bounds = array<i64: 9, 7, 48>}, {pipeline_mode = #tpu.pipeline_mode<synchronous>, transform_indices = @transform_5, window_bounds = array<i64: 1, 48>}, {pipeline_mode = #tpu.pipeline_mode<synchronous>, transform_indices = @transform_6, window_bounds = array<i64: 9, 48, 48>}, {pipeline_mode = #tpu.pipeline_mode<synchronous>, transform_indices = @transform_7, window_bounds = array<i64: 1, 48>}, {pipeline_mode = #tpu.pipeline_mode<synchronous>, transform_indices = @transform_8, window_bounds = array<i64: 9, 48, 32>}, {pipeline_mode = #tpu.pipeline_mode<synchronous>, transform_indices = @transform_9, window_bounds = array<i64: 1, 32>}, {pipeline_mode = #tpu.pipeline_mode<synchronous>, transform_indices = @transform_10, window_bounds = array<i64: 32, 32>}, {pipeline_mode = #tpu.pipeline_mode<synchronous>, transform_indices = @transform_11, window_bounds = array<i64: 1, 32>}, {pipeline_mode = #tpu.pipeline_mode<synchronous>, transform_indices = @transform_12, window_bounds = array<i64: 32, 32>}, {pipeline_mode = #tpu.pipeline_mode<synchronous>, transform_indices = @transform_13, window_bounds = array<i64: 1, 32>}, {pipeline_mode = #tpu.pipeline_mode<synchronous>, transform_indices = @transform_14, window_bounds = array<i64: 9, 4, 32>}, {pipeline_mode = #tpu.pipeline_mode<synchronous>, transform_indices = @transform_15, window_bounds = array<i64: 1, 32>}, {pipeline_mode = #tpu.pipeline_mode<synchronous>, transform_indices = @transform_16, window_bounds = array<i64: 32, 32>}, {pipeline_mode = #tpu.pipeline_mode<synchronous>, transform_indices = @transform_17, window_bounds = array<i64: 1, 32>}, {pipeline_mode = #tpu.pipeline_mode<synchronous>, transform_indices = @transform_18, window_bounds = array<i64: 32, 64>}, {pipeline_mode = #tpu.pipeline_mode<synchronous>, transform_indices = @transform_19, window_bounds = array<i64: 1, 64>}, {pipeline_mode = #tpu.pipeline_mode<synchronous>, transform_indices = @transform_20, window_bounds = array<i64: 32, 32>}, {pipeline_mode = #tpu.pipeline_mode<synchronous>, transform_indices = @transform_21, window_bounds = array<i64: 1, 32>}, {pipeline_mode = #tpu.pipeline_mode<synchronous>, transform_indices = @transform_22, window_bounds = array<i64: 9, 32, 4>}, {pipeline_mode = #tpu.pipeline_mode<synchronous>, transform_indices = @transform_23, window_bounds = array<i64: 1, 4>}, {transform_indices = @transform_24, window_bounds = array<i64: 1, 256, 4>}]} {
    %cst = arith.constant 0.000000e+00 : f32
    %0 = vector.broadcast %cst : f32 to vector<18x18x48xf32>
    %c0 = arith.constant 0 : index
    %c0_0 = arith.constant 0 : index
    %c0_1 = arith.constant 0 : index
    %1 = vector.load %arg26[%c0, %c0_0, %c0_1] : memref<18x18x48xf32, #tpu.memory_space<vmem>>, vector<18x18x48xf32>
    tpu.vector_store %arg26[%c0, %c0_0, %c0_1], %0 {strides = array<i32>} : memref<18x18x48xf32, #tpu.memory_space<vmem>>, vector<18x18x48xf32>,
    %c0_2 = arith.constant 0 : index
    %c0_3 = arith.constant 0 : index
    %c0_4 = arith.constant 0 : index
    %c0_5 = arith.constant 0 : index
    %2 = vector.load %arg1[%c0_2, %c0_3, %c0_4, %c0_5] : memref<1x16x16x7xf32, #tpu.memory_space<vmem>>, vector<1x16x16x7xf32>
    %3 = vector.shape_cast %2 : vector<1x16x16x7xf32> to vector<16x16x7xf32>
    %c1 = arith.constant 1 : index
    %c1_6 = arith.constant 1 : index
    %c0_7 = arith.constant 0 : index
    %4 = vector.load %arg26[%c1, %c1_6, %c0_7] : memref<18x18x48xf32, #tpu.memory_space<vmem>>, vector<16x16x7xf32>
    tpu.vector_store %arg26[%c1, %c1_6, %c0_7], %3 {strides = array<i32>} : memref<18x18x48xf32, #tpu.memory_space<vmem>>, vector<16x16x7xf32>,
    %cst_8 = arith.constant 0.000000e+00 : f32
    %5 = vector.broadcast %cst_8 : f32 to vector<256x48xf32>
    %c0_9 = arith.constant 0 : index
    %c0_10 = arith.constant 0 : index
    %c0_11 = arith.constant 0 : index
    %6 = vector.load %arg26[%c0_9, %c0_10, %c0_11] : memref<18x18x48xf32, #tpu.memory_space<vmem>>, vector<18x16x7xf32>
    %7 = vector.shape_cast %6 : vector<18x16x7xf32> to vector<288x7xf32>
    %8 = arith.truncf %7 : vector<288x7xf32> to vector<288x7xbf16>
    %9 = vector.extract_strided_slice %8 {offsets = [0, 0], sizes = [256, 7], strides = [1, 1]} : vector<288x7xbf16> to vector<256x7xbf16>
    %c0_12 = arith.constant 0 : index
    %c0_13 = arith.constant 0 : index
    %c0_14 = arith.constant 0 : index
    %10 = vector.load %arg5[%c0_12, %c0_13, %c0_14] : memref<9x7x48xbf16, #tpu.memory_space<vmem>>, vector<1x7x48xbf16>
    %11 = vector.shape_cast %10 : vector<1x7x48xbf16> to vector<7x48xbf16>
    %cst_15 = arith.constant dense<0.000000e+00> : vector<256x48xf32>
    %12 = tpu.matmul %9, %11, %cst_15 {dimension_numbers = #tpu.dot_dimension_numbers<[1], [0], [0], [1], [0, 0, 1, 1], [], []>} : vector<256x7xbf16>, vector<7x48xbf16>, vector<256x48xf32> -> vector<256x48xf32>
    %13 = arith.addf %5, %12 : vector<256x48xf32>
    %14 = vector.extract_strided_slice %8 {offsets = [16, 0], sizes = [256, 7], strides = [1, 1]} : vector<288x7xbf16> to vector<256x7xbf16>
    %c3 = arith.constant 3 : index
    %c0_16 = arith.constant 0 : index
    %c0_17 = arith.constant 0 : index
    %15 = vector.load %arg5[%c3, %c0_16, %c0_17] : memref<9x7x48xbf16, #tpu.memory_space<vmem>>, vector<1x7x48xbf16>
    %16 = vector.shape_cast %15 : vector<1x7x48xbf16> to vector<7x48xbf16>
    %cst_18 = arith.constant dense<0.000000e+00> : vector<256x48xf32>
    %17 = tpu.matmul %14, %16, %cst_18 {dimension_numbers = #tpu.dot_dimension_numbers<[1], [0], [0], [1], [0, 0, 1, 1], [], []>} : vector<256x7xbf16>, vector<7x48xbf16>, vector<256x48xf32> -> vector<256x48xf32>
    %18 = arith.addf %13, %17 : vector<256x48xf32>
    %19 = vector.extract_strided_slice %8 {offsets = [32, 0], sizes = [256, 7], strides = [1, 1]} : vector<288x7xbf16> to vector<256x7xbf16>
    %c6 = arith.constant 6 : index
    %c0_19 = arith.constant 0 : index
    %c0_20 = arith.constant 0 : index
    %20 = vector.load %arg5[%c6, %c0_19, %c0_20] : memref<9x7x48xbf16, #tpu.memory_space<vmem>>, vector<1x7x48xbf16>
    %21 = vector.shape_cast %20 : vector<1x7x48xbf16> to vector<7x48xbf16>
    %cst_21 = arith.constant dense<0.000000e+00> : vector<256x48xf32>
    %22 = tpu.matmul %19, %21, %cst_21 {dimension_numbers = #tpu.dot_dimension_numbers<[1], [0], [0], [1], [0, 0, 1, 1], [], []>} : vector<256x7xbf16>, vector<7x48xbf16>, vector<256x48xf32> -> vector<256x48xf32>
    %23 = arith.addf %18, %22 : vector<256x48xf32>
    %c0_22 = arith.constant 0 : index
    %c1_23 = arith.constant 1 : index
    %c0_24 = arith.constant 0 : index
    %24 = vector.load %arg26[%c0_22, %c1_23, %c0_24] : memref<18x18x48xf32, #tpu.memory_space<vmem>>, vector<18x16x7xf32>
    %25 = vector.shape_cast %24 : vector<18x16x7xf32> to vector<288x7xf32>
    %26 = arith.truncf %25 : vector<288x7xf32> to vector<288x7xbf16>
    %27 = vector.extract_strided_slice %26 {offsets = [0, 0], sizes = [256, 7], strides = [1, 1]} : vector<288x7xbf16> to vector<256x7xbf16>
    %c1_25 = arith.constant 1 : index
    %c0_26 = arith.constant 0 : index
    %c0_27 = arith.constant 0 : index
    %28 = vector.load %arg5[%c1_25, %c0_26, %c0_27] : memref<9x7x48xbf16, #tpu.memory_space<vmem>>, vector<1x7x48xbf16>
    %29 = vector.shape_cast %28 : vector<1x7x48xbf16> to vector<7x48xbf16>
    %cst_28 = arith.constant dense<0.000000e+00> : vector<256x48xf32>
    %30 = tpu.matmul %27, %29, %cst_28 {dimension_numbers = #tpu.dot_dimension_numbers<[1], [0], [0], [1], [0, 0, 1, 1], [], []>} : vector<256x7xbf16>, vector<7x48xbf16>, vector<256x48xf32> -> vector<256x48xf32>
    %31 = arith.addf %23, %30 : vector<256x48xf32>
    %32 = vector.extract_strided_slice %26 {offsets = [16, 0], sizes = [256, 7], strides = [1, 1]} : vector<288x7xbf16> to vector<256x7xbf16>
    %c4 = arith.constant 4 : index
    %c0_29 = arith.constant 0 : index
    %c0_30 = arith.constant 0 : index
    %33 = vector.load %arg5[%c4, %c0_29, %c0_30] : memref<9x7x48xbf16, #tpu.memory_space<vmem>>, vector<1x7x48xbf16>
    %34 = vector.shape_cast %33 : vector<1x7x48xbf16> to vector<7x48xbf16>
    %cst_31 = arith.constant dense<0.000000e+00> : vector<256x48xf32>
    %35 = tpu.matmul %32, %34, %cst_31 {dimension_numbers = #tpu.dot_dimension_numbers<[1], [0], [0], [1], [0, 0, 1, 1], [], []>} : vector<256x7xbf16>, vector<7x48xbf16>, vector<256x48xf32> -> vector<256x48xf32>
    %36 = arith.addf %31, %35 : vector<256x48xf32>
    %37 = vector.extract_strided_slice %26 {offsets = [32, 0], sizes = [256, 7], strides = [1, 1]} : vector<288x7xbf16> to vector<256x7xbf16>
    %c7 = arith.constant 7 : index
    %c0_32 = arith.constant 0 : index
    %c0_33 = arith.constant 0 : index
    %38 = vector.load %arg5[%c7, %c0_32, %c0_33] : memref<9x7x48xbf16, #tpu.memory_space<vmem>>, vector<1x7x48xbf16>
    %39 = vector.shape_cast %38 : vector<1x7x48xbf16> to vector<7x48xbf16>
    %cst_34 = arith.constant dense<0.000000e+00> : vector<256x48xf32>
    %40 = tpu.matmul %37, %39, %cst_34 {dimension_numbers = #tpu.dot_dimension_numbers<[1], [0], [0], [1], [0, 0, 1, 1], [], []>} : vector<256x7xbf16>, vector<7x48xbf16>, vector<256x48xf32> -> vector<256x48xf32>
    %41 = arith.addf %36, %40 : vector<256x48xf32>
    %c0_35 = arith.constant 0 : index
    %c2 = arith.constant 2 : index
    %c0_36 = arith.constant 0 : index
    %42 = vector.load %arg26[%c0_35, %c2, %c0_36] : memref<18x18x48xf32, #tpu.memory_space<vmem>>, vector<18x16x7xf32>
    %43 = vector.shape_cast %42 : vector<18x16x7xf32> to vector<288x7xf32>
    %44 = arith.truncf %43 : vector<288x7xf32> to vector<288x7xbf16>
    %45 = vector.extract_strided_slice %44 {offsets = [0, 0], sizes = [256, 7], strides = [1, 1]} : vector<288x7xbf16> to vector<256x7xbf16>
    %c2_37 = arith.constant 2 : index
    %c0_38 = arith.constant 0 : index
    %c0_39 = arith.constant 0 : index
    %46 = vector.load %arg5[%c2_37, %c0_38, %c0_39] : memref<9x7x48xbf16, #tpu.memory_space<vmem>>, vector<1x7x48xbf16>
    %47 = vector.shape_cast %46 : vector<1x7x48xbf16> to vector<7x48xbf16>
    %cst_40 = arith.constant dense<0.000000e+00> : vector<256x48xf32>
    %48 = tpu.matmul %45, %47, %cst_40 {dimension_numbers = #tpu.dot_dimension_numbers<[1], [0], [0], [1], [0, 0, 1, 1], [], []>} : vector<256x7xbf16>, vector<7x48xbf16>, vector<256x48xf32> -> vector<256x48xf32>
    %49 = arith.addf %41, %48 : vector<256x48xf32>
    %50 = vector.extract_strided_slice %44 {offsets = [16, 0], sizes = [256, 7], strides = [1, 1]} : vector<288x7xbf16> to vector<256x7xbf16>
    %c5 = arith.constant 5 : index
    %c0_41 = arith.constant 0 : index
    %c0_42 = arith.constant 0 : index
    %51 = vector.load %arg5[%c5, %c0_41, %c0_42] : memref<9x7x48xbf16, #tpu.memory_space<vmem>>, vector<1x7x48xbf16>
    %52 = vector.shape_cast %51 : vector<1x7x48xbf16> to vector<7x48xbf16>
    %cst_43 = arith.constant dense<0.000000e+00> : vector<256x48xf32>
    %53 = tpu.matmul %50, %52, %cst_43 {dimension_numbers = #tpu.dot_dimension_numbers<[1], [0], [0], [1], [0, 0, 1, 1], [], []>} : vector<256x7xbf16>, vector<7x48xbf16>, vector<256x48xf32> -> vector<256x48xf32>
    %54 = arith.addf %49, %53 : vector<256x48xf32>
    %55 = vector.extract_strided_slice %44 {offsets = [32, 0], sizes = [256, 7], strides = [1, 1]} : vector<288x7xbf16> to vector<256x7xbf16>
    %c8 = arith.constant 8 : index
    %c0_44 = arith.constant 0 : index
    %c0_45 = arith.constant 0 : index
    %56 = vector.load %arg5[%c8, %c0_44, %c0_45] : memref<9x7x48xbf16, #tpu.memory_space<vmem>>, vector<1x7x48xbf16>
    %57 = vector.shape_cast %56 : vector<1x7x48xbf16> to vector<7x48xbf16>
    %cst_46 = arith.constant dense<0.000000e+00> : vector<256x48xf32>
    %58 = tpu.matmul %55, %57, %cst_46 {dimension_numbers = #tpu.dot_dimension_numbers<[1], [0], [0], [1], [0, 0, 1, 1], [], []>} : vector<256x7xbf16>, vector<7x48xbf16>, vector<256x48xf32> -> vector<256x48xf32>
    %59 = arith.addf %54, %58 : vector<256x48xf32>
    %c0_47 = arith.constant 0 : index
    %c0_48 = arith.constant 0 : index
    %60 = vector.load %arg6[%c0_47, %c0_48] : memref<1x48xf32, #tpu.memory_space<vmem>>, vector<1x48xf32>
    %61 = vector.broadcast %60 : vector<1x48xf32> to vector<256x48xf32>
    %62 = arith.addf %59, %61 : vector<256x48xf32>
    %63 = arith.negf %62 : vector<256x48xf32>
    %64 = math.exp %63 : vector<256x48xf32>
    %cst_49 = arith.constant 1.000000e+00 : f32
    %65 = vector.broadcast %cst_49 : f32 to vector<256x48xf32>
    %66 = arith.addf %65, %64 : vector<256x48xf32>
    %67 = arith.divf %65, %66 : vector<256x48xf32>
    %68 = arith.mulf %62, %67 : vector<256x48xf32>
    %69 = vector.shape_cast %68 : vector<256x48xf32> to vector<16x16x48xf32>
    %c1_50 = arith.constant 1 : index
    %c1_51 = arith.constant 1 : index
    %c0_52 = arith.constant 0 : index
    %70 = vector.load %arg26[%c1_50, %c1_51, %c0_52] : memref<18x18x48xf32, #tpu.memory_space<vmem>>, vector<16x16x48xf32>
    tpu.vector_store %arg26[%c1_50, %c1_51, %c0_52], %69 {strides = array<i32>} : memref<18x18x48xf32, #tpu.memory_space<vmem>>, vector<16x16x48xf32>,
    %cst_53 = arith.constant 0.000000e+00 : f32
    %71 = vector.broadcast %cst_53 : f32 to vector<256x48xf32>
    %c0_54 = arith.constant 0 : index
    %c0_55 = arith.constant 0 : index
    %c0_56 = arith.constant 0 : index
    %72 = vector.load %arg26[%c0_54, %c0_55, %c0_56] : memref<18x18x48xf32, #tpu.memory_space<vmem>>, vector<18x16x48xf32>
    %73 = vector.shape_cast %72 : vector<18x16x48xf32> to vector<288x48xf32>
    %74 = arith.truncf %73 : vector<288x48xf32> to vector<288x48xbf16>
    %75 = vector.extract_strided_slice %74 {offsets = [0, 0], sizes = [256, 48], strides = [1, 1]} : vector<288x48xbf16> to vector<256x48xbf16>
    %c0_57 = arith.constant 0 : index
    %c0_58 = arith.constant 0 : index
    %c0_59 = arith.constant 0 : index
    %76 = vector.load %arg7[%c0_57, %c0_58, %c0_59] : memref<9x48x48xbf16, #tpu.memory_space<vmem>>, vector<1x48x48xbf16>
    %77 = vector.shape_cast %76 : vector<1x48x48xbf16> to vector<48x48xbf16>
    %cst_60 = arith.constant dense<0.000000e+00> : vector<256x48xf32>
    %78 = tpu.matmul %75, %77, %cst_60 {dimension_numbers = #tpu.dot_dimension_numbers<[1], [0], [0], [1], [0, 0, 1, 1], [], []>} : vector<256x48xbf16>, vector<48x48xbf16>, vector<256x48xf32> -> vector<256x48xf32>
    %79 = arith.addf %71, %78 : vector<256x48xf32>
    %80 = vector.extract_strided_slice %74 {offsets = [16, 0], sizes = [256, 48], strides = [1, 1]} : vector<288x48xbf16> to vector<256x48xbf16>
    %c3_61 = arith.constant 3 : index
    %c0_62 = arith.constant 0 : index
    %c0_63 = arith.constant 0 : index
    %81 = vector.load %arg7[%c3_61, %c0_62, %c0_63] : memref<9x48x48xbf16, #tpu.memory_space<vmem>>, vector<1x48x48xbf16>
    %82 = vector.shape_cast %81 : vector<1x48x48xbf16> to vector<48x48xbf16>
    %cst_64 = arith.constant dense<0.000000e+00> : vector<256x48xf32>
    %83 = tpu.matmul %80, %82, %cst_64 {dimension_numbers = #tpu.dot_dimension_numbers<[1], [0], [0], [1], [0, 0, 1, 1], [], []>} : vector<256x48xbf16>, vector<48x48xbf16>, vector<256x48xf32> -> vector<256x48xf32>
    %84 = arith.addf %79, %83 : vector<256x48xf32>
    %85 = vector.extract_strided_slice %74 {offsets = [32, 0], sizes = [256, 48], strides = [1, 1]} : vector<288x48xbf16> to vector<256x48xbf16>
    %c6_65 = arith.constant 6 : index
    %c0_66 = arith.constant 0 : index
    %c0_67 = arith.constant 0 : index
    %86 = vector.load %arg7[%c6_65, %c0_66, %c0_67] : memref<9x48x48xbf16, #tpu.memory_space<vmem>>, vector<1x48x48xbf16>
    %87 = vector.shape_cast %86 : vector<1x48x48xbf16> to vector<48x48xbf16>
    %cst_68 = arith.constant dense<0.000000e+00> : vector<256x48xf32>
    %88 = tpu.matmul %85, %87, %cst_68 {dimension_numbers = #tpu.dot_dimension_numbers<[1], [0], [0], [1], [0, 0, 1, 1], [], []>} : vector<256x48xbf16>, vector<48x48xbf16>, vector<256x48xf32> -> vector<256x48xf32>
    %89 = arith.addf %84, %88 : vector<256x48xf32>
    %c0_69 = arith.constant 0 : index
    %c1_70 = arith.constant 1 : index
    %c0_71 = arith.constant 0 : index
    %90 = vector.load %arg26[%c0_69, %c1_70, %c0_71] : memref<18x18x48xf32, #tpu.memory_space<vmem>>, vector<18x16x48xf32>
    %91 = vector.shape_cast %90 : vector<18x16x48xf32> to vector<288x48xf32>
    %92 = arith.truncf %91 : vector<288x48xf32> to vector<288x48xbf16>
    %93 = vector.extract_strided_slice %92 {offsets = [0, 0], sizes = [256, 48], strides = [1, 1]} : vector<288x48xbf16> to vector<256x48xbf16>
    %c1_72 = arith.constant 1 : index
    %c0_73 = arith.constant 0 : index
    %c0_74 = arith.constant 0 : index
    %94 = vector.load %arg7[%c1_72, %c0_73, %c0_74] : memref<9x48x48xbf16, #tpu.memory_space<vmem>>, vector<1x48x48xbf16>
    %95 = vector.shape_cast %94 : vector<1x48x48xbf16> to vector<48x48xbf16>
    %cst_75 = arith.constant dense<0.000000e+00> : vector<256x48xf32>
    %96 = tpu.matmul %93, %95, %cst_75 {dimension_numbers = #tpu.dot_dimension_numbers<[1], [0], [0], [1], [0, 0, 1, 1], [], []>} : vector<256x48xbf16>, vector<48x48xbf16>, vector<256x48xf32> -> vector<256x48xf32>
    %97 = arith.addf %89, %96 : vector<256x48xf32>
    %98 = vector.extract_strided_slice %92 {offsets = [16, 0], sizes = [256, 48], strides = [1, 1]} : vector<288x48xbf16> to vector<256x48xbf16>
    %c4_76 = arith.constant 4 : index
    %c0_77 = arith.constant 0 : index
    %c0_78 = arith.constant 0 : index
    %99 = vector.load %arg7[%c4_76, %c0_77, %c0_78] : memref<9x48x48xbf16, #tpu.memory_space<vmem>>, vector<1x48x48xbf16>
    %100 = vector.shape_cast %99 : vector<1x48x48xbf16> to vector<48x48xbf16>
    %cst_79 = arith.constant dense<0.000000e+00> : vector<256x48xf32>
    %101 = tpu.matmul %98, %100, %cst_79 {dimension_numbers = #tpu.dot_dimension_numbers<[1], [0], [0], [1], [0, 0, 1, 1], [], []>} : vector<256x48xbf16>, vector<48x48xbf16>, vector<256x48xf32> -> vector<256x48xf32>
    %102 = arith.addf %97, %101 : vector<256x48xf32>
    %103 = vector.extract_strided_slice %92 {offsets = [32, 0], sizes = [256, 48], strides = [1, 1]} : vector<288x48xbf16> to vector<256x48xbf16>
    %c7_80 = arith.constant 7 : index
    %c0_81 = arith.constant 0 : index
    %c0_82 = arith.constant 0 : index
    %104 = vector.load %arg7[%c7_80, %c0_81, %c0_82] : memref<9x48x48xbf16, #tpu.memory_space<vmem>>, vector<1x48x48xbf16>
    %105 = vector.shape_cast %104 : vector<1x48x48xbf16> to vector<48x48xbf16>
    %cst_83 = arith.constant dense<0.000000e+00> : vector<256x48xf32>
    %106 = tpu.matmul %103, %105, %cst_83 {dimension_numbers = #tpu.dot_dimension_numbers<[1], [0], [0], [1], [0, 0, 1, 1], [], []>} : vector<256x48xbf16>, vector<48x48xbf16>, vector<256x48xf32> -> vector<256x48xf32>
    %107 = arith.addf %102, %106 : vector<256x48xf32>
    %c0_84 = arith.constant 0 : index
    %c2_85 = arith.constant 2 : index
    %c0_86 = arith.constant 0 : index
    %108 = vector.load %arg26[%c0_84, %c2_85, %c0_86] : memref<18x18x48xf32, #tpu.memory_space<vmem>>, vector<18x16x48xf32>
    %109 = vector.shape_cast %108 : vector<18x16x48xf32> to vector<288x48xf32>
    %110 = arith.truncf %109 : vector<288x48xf32> to vector<288x48xbf16>
    %111 = vector.extract_strided_slice %110 {offsets = [0, 0], sizes = [256, 48], strides = [1, 1]} : vector<288x48xbf16> to vector<256x48xbf16>
    %c2_87 = arith.constant 2 : index
    %c0_88 = arith.constant 0 : index
    %c0_89 = arith.constant 0 : index
    %112 = vector.load %arg7[%c2_87, %c0_88, %c0_89] : memref<9x48x48xbf16, #tpu.memory_space<vmem>>, vector<1x48x48xbf16>
    %113 = vector.shape_cast %112 : vector<1x48x48xbf16> to vector<48x48xbf16>
    %cst_90 = arith.constant dense<0.000000e+00> : vector<256x48xf32>
    %114 = tpu.matmul %111, %113, %cst_90 {dimension_numbers = #tpu.dot_dimension_numbers<[1], [0], [0], [1], [0, 0, 1, 1], [], []>} : vector<256x48xbf16>, vector<48x48xbf16>, vector<256x48xf32> -> vector<256x48xf32>
    %115 = arith.addf %107, %114 : vector<256x48xf32>
    %116 = vector.extract_strided_slice %110 {offsets = [16, 0], sizes = [256, 48], strides = [1, 1]} : vector<288x48xbf16> to vector<256x48xbf16>
    %c5_91 = arith.constant 5 : index
    %c0_92 = arith.constant 0 : index
    %c0_93 = arith.constant 0 : index
    %117 = vector.load %arg7[%c5_91, %c0_92, %c0_93] : memref<9x48x48xbf16, #tpu.memory_space<vmem>>, vector<1x48x48xbf16>
    %118 = vector.shape_cast %117 : vector<1x48x48xbf16> to vector<48x48xbf16>
    %cst_94 = arith.constant dense<0.000000e+00> : vector<256x48xf32>
    %119 = tpu.matmul %116, %118, %cst_94 {dimension_numbers = #tpu.dot_dimension_numbers<[1], [0], [0], [1], [0, 0, 1, 1], [], []>} : vector<256x48xbf16>, vector<48x48xbf16>, vector<256x48xf32> -> vector<256x48xf32>
    %120 = arith.addf %115, %119 : vector<256x48xf32>
    %121 = vector.extract_strided_slice %110 {offsets = [32, 0], sizes = [256, 48], strides = [1, 1]} : vector<288x48xbf16> to vector<256x48xbf16>
    %c8_95 = arith.constant 8 : index
    %c0_96 = arith.constant 0 : index
    %c0_97 = arith.constant 0 : index
    %122 = vector.load %arg7[%c8_95, %c0_96, %c0_97] : memref<9x48x48xbf16, #tpu.memory_space<vmem>>, vector<1x48x48xbf16>
    %123 = vector.shape_cast %122 : vector<1x48x48xbf16> to vector<48x48xbf16>
    %cst_98 = arith.constant dense<0.000000e+00> : vector<256x48xf32>
    %124 = tpu.matmul %121, %123, %cst_98 {dimension_numbers = #tpu.dot_dimension_numbers<[1], [0], [0], [1], [0, 0, 1, 1], [], []>} : vector<256x48xbf16>, vector<48x48xbf16>, vector<256x48xf32> -> vector<256x48xf32>
    %125 = arith.addf %120, %124 : vector<256x48xf32>
    %c0_99 = arith.constant 0 : index
    %c0_100 = arith.constant 0 : index
    %126 = vector.load %arg8[%c0_99, %c0_100] : memref<1x48xf32, #tpu.memory_space<vmem>>, vector<1x48xf32>
    %127 = vector.broadcast %126 : vector<1x48xf32> to vector<256x48xf32>
    %128 = arith.addf %125, %127 : vector<256x48xf32>
    %129 = arith.negf %128 : vector<256x48xf32>
    %130 = math.exp %129 : vector<256x48xf32>
    %cst_101 = arith.constant 1.000000e+00 : f32
    %131 = vector.broadcast %cst_101 : f32 to vector<256x48xf32>
    %132 = arith.addf %131, %130 : vector<256x48xf32>
    %133 = arith.divf %131, %132 : vector<256x48xf32>
    %134 = arith.mulf %128, %133 : vector<256x48xf32>
    %135 = vector.shape_cast %134 : vector<256x48xf32> to vector<16x16x48xf32>
    %c1_102 = arith.constant 1 : index
    %c1_103 = arith.constant 1 : index
    %c0_104 = arith.constant 0 : index
    %136 = vector.load %arg26[%c1_102, %c1_103, %c0_104] : memref<18x18x48xf32, #tpu.memory_space<vmem>>, vector<16x16x48xf32>
    tpu.vector_store %arg26[%c1_102, %c1_103, %c0_104], %135 {strides = array<i32>} : memref<18x18x48xf32, #tpu.memory_space<vmem>>, vector<16x16x48xf32>,
    %cst_105 = arith.constant 0.000000e+00 : f32
    %137 = vector.broadcast %cst_105 : f32 to vector<256x32xf32>
    %c0_106 = arith.constant 0 : index
    %c0_107 = arith.constant 0 : index
    %c0_108 = arith.constant 0 : index
    %138 = vector.load %arg26[%c0_106, %c0_107, %c0_108] : memref<18x18x48xf32, #tpu.memory_space<vmem>>, vector<18x16x48xf32>
    %139 = vector.shape_cast %138 : vector<18x16x48xf32> to vector<288x48xf32>
    %140 = arith.truncf %139 : vector<288x48xf32> to vector<288x48xbf16>
    %141 = vector.extract_strided_slice %140 {offsets = [0, 0], sizes = [256, 48], strides = [1, 1]} : vector<288x48xbf16> to vector<256x48xbf16>
    %c0_109 = arith.constant 0 : index
    %c0_110 = arith.constant 0 : index
    %c0_111 = arith.constant 0 : index
    %142 = vector.load %arg9[%c0_109, %c0_110, %c0_111] : memref<9x48x32xbf16, #tpu.memory_space<vmem>>, vector<1x48x32xbf16>
    %143 = vector.shape_cast %142 : vector<1x48x32xbf16> to vector<48x32xbf16>
    %cst_112 = arith.constant dense<0.000000e+00> : vector<256x32xf32>
    %144 = tpu.matmul %141, %143, %cst_112 {dimension_numbers = #tpu.dot_dimension_numbers<[1], [0], [0], [1], [0, 0, 1, 1], [], []>} : vector<256x48xbf16>, vector<48x32xbf16>, vector<256x32xf32> -> vector<256x32xf32>
    %145 = arith.addf %137, %144 : vector<256x32xf32>
    %146 = vector.extract_strided_slice %140 {offsets = [16, 0], sizes = [256, 48], strides = [1, 1]} : vector<288x48xbf16> to vector<256x48xbf16>
    %c3_113 = arith.constant 3 : index
    %c0_114 = arith.constant 0 : index
    %c0_115 = arith.constant 0 : index
    %147 = vector.load %arg9[%c3_113, %c0_114, %c0_115] : memref<9x48x32xbf16, #tpu.memory_space<vmem>>, vector<1x48x32xbf16>
    %148 = vector.shape_cast %147 : vector<1x48x32xbf16> to vector<48x32xbf16>
    %cst_116 = arith.constant dense<0.000000e+00> : vector<256x32xf32>
    %149 = tpu.matmul %146, %148, %cst_116 {dimension_numbers = #tpu.dot_dimension_numbers<[1], [0], [0], [1], [0, 0, 1, 1], [], []>} : vector<256x48xbf16>, vector<48x32xbf16>, vector<256x32xf32> -> vector<256x32xf32>
    %150 = arith.addf %145, %149 : vector<256x32xf32>
    %151 = vector.extract_strided_slice %140 {offsets = [32, 0], sizes = [256, 48], strides = [1, 1]} : vector<288x48xbf16> to vector<256x48xbf16>
    %c6_117 = arith.constant 6 : index
    %c0_118 = arith.constant 0 : index
    %c0_119 = arith.constant 0 : index
    %152 = vector.load %arg9[%c6_117, %c0_118, %c0_119] : memref<9x48x32xbf16, #tpu.memory_space<vmem>>, vector<1x48x32xbf16>
    %153 = vector.shape_cast %152 : vector<1x48x32xbf16> to vector<48x32xbf16>
    %cst_120 = arith.constant dense<0.000000e+00> : vector<256x32xf32>
    %154 = tpu.matmul %151, %153, %cst_120 {dimension_numbers = #tpu.dot_dimension_numbers<[1], [0], [0], [1], [0, 0, 1, 1], [], []>} : vector<256x48xbf16>, vector<48x32xbf16>, vector<256x32xf32> -> vector<256x32xf32>
    %155 = arith.addf %150, %154 : vector<256x32xf32>
    %c0_121 = arith.constant 0 : index
    %c1_122 = arith.constant 1 : index
    %c0_123 = arith.constant 0 : index
    %156 = vector.load %arg26[%c0_121, %c1_122, %c0_123] : memref<18x18x48xf32, #tpu.memory_space<vmem>>, vector<18x16x48xf32>
    %157 = vector.shape_cast %156 : vector<18x16x48xf32> to vector<288x48xf32>
    %158 = arith.truncf %157 : vector<288x48xf32> to vector<288x48xbf16>
    %159 = vector.extract_strided_slice %158 {offsets = [0, 0], sizes = [256, 48], strides = [1, 1]} : vector<288x48xbf16> to vector<256x48xbf16>
    %c1_124 = arith.constant 1 : index
    %c0_125 = arith.constant 0 : index
    %c0_126 = arith.constant 0 : index
    %160 = vector.load %arg9[%c1_124, %c0_125, %c0_126] : memref<9x48x32xbf16, #tpu.memory_space<vmem>>, vector<1x48x32xbf16>
    %161 = vector.shape_cast %160 : vector<1x48x32xbf16> to vector<48x32xbf16>
    %cst_127 = arith.constant dense<0.000000e+00> : vector<256x32xf32>
    %162 = tpu.matmul %159, %161, %cst_127 {dimension_numbers = #tpu.dot_dimension_numbers<[1], [0], [0], [1], [0, 0, 1, 1], [], []>} : vector<256x48xbf16>, vector<48x32xbf16>, vector<256x32xf32> -> vector<256x32xf32>
    %163 = arith.addf %155, %162 : vector<256x32xf32>
    %164 = vector.extract_strided_slice %158 {offsets = [16, 0], sizes = [256, 48], strides = [1, 1]} : vector<288x48xbf16> to vector<256x48xbf16>
    %c4_128 = arith.constant 4 : index
    %c0_129 = arith.constant 0 : index
    %c0_130 = arith.constant 0 : index
    %165 = vector.load %arg9[%c4_128, %c0_129, %c0_130] : memref<9x48x32xbf16, #tpu.memory_space<vmem>>, vector<1x48x32xbf16>
    %166 = vector.shape_cast %165 : vector<1x48x32xbf16> to vector<48x32xbf16>
    %cst_131 = arith.constant dense<0.000000e+00> : vector<256x32xf32>
    %167 = tpu.matmul %164, %166, %cst_131 {dimension_numbers = #tpu.dot_dimension_numbers<[1], [0], [0], [1], [0, 0, 1, 1], [], []>} : vector<256x48xbf16>, vector<48x32xbf16>, vector<256x32xf32> -> vector<256x32xf32>
    %168 = arith.addf %163, %167 : vector<256x32xf32>
    %169 = vector.extract_strided_slice %158 {offsets = [32, 0], sizes = [256, 48], strides = [1, 1]} : vector<288x48xbf16> to vector<256x48xbf16>
    %c7_132 = arith.constant 7 : index
    %c0_133 = arith.constant 0 : index
    %c0_134 = arith.constant 0 : index
    %170 = vector.load %arg9[%c7_132, %c0_133, %c0_134] : memref<9x48x32xbf16, #tpu.memory_space<vmem>>, vector<1x48x32xbf16>
    %171 = vector.shape_cast %170 : vector<1x48x32xbf16> to vector<48x32xbf16>
    %cst_135 = arith.constant dense<0.000000e+00> : vector<256x32xf32>
    %172 = tpu.matmul %169, %171, %cst_135 {dimension_numbers = #tpu.dot_dimension_numbers<[1], [0], [0], [1], [0, 0, 1, 1], [], []>} : vector<256x48xbf16>, vector<48x32xbf16>, vector<256x32xf32> -> vector<256x32xf32>
    %173 = arith.addf %168, %172 : vector<256x32xf32>
    %c0_136 = arith.constant 0 : index
    %c2_137 = arith.constant 2 : index
    %c0_138 = arith.constant 0 : index
    %174 = vector.load %arg26[%c0_136, %c2_137, %c0_138] : memref<18x18x48xf32, #tpu.memory_space<vmem>>, vector<18x16x48xf32>
    %175 = vector.shape_cast %174 : vector<18x16x48xf32> to vector<288x48xf32>
    %176 = arith.truncf %175 : vector<288x48xf32> to vector<288x48xbf16>
    %177 = vector.extract_strided_slice %176 {offsets = [0, 0], sizes = [256, 48], strides = [1, 1]} : vector<288x48xbf16> to vector<256x48xbf16>
    %c2_139 = arith.constant 2 : index
    %c0_140 = arith.constant 0 : index
    %c0_141 = arith.constant 0 : index
    %178 = vector.load %arg9[%c2_139, %c0_140, %c0_141] : memref<9x48x32xbf16, #tpu.memory_space<vmem>>, vector<1x48x32xbf16>
    %179 = vector.shape_cast %178 : vector<1x48x32xbf16> to vector<48x32xbf16>
    %cst_142 = arith.constant dense<0.000000e+00> : vector<256x32xf32>
    %180 = tpu.matmul %177, %179, %cst_142 {dimension_numbers = #tpu.dot_dimension_numbers<[1], [0], [0], [1], [0, 0, 1, 1], [], []>} : vector<256x48xbf16>, vector<48x32xbf16>, vector<256x32xf32> -> vector<256x32xf32>
    %181 = arith.addf %173, %180 : vector<256x32xf32>
    %182 = vector.extract_strided_slice %176 {offsets = [16, 0], sizes = [256, 48], strides = [1, 1]} : vector<288x48xbf16> to vector<256x48xbf16>
    %c5_143 = arith.constant 5 : index
    %c0_144 = arith.constant 0 : index
    %c0_145 = arith.constant 0 : index
    %183 = vector.load %arg9[%c5_143, %c0_144, %c0_145] : memref<9x48x32xbf16, #tpu.memory_space<vmem>>, vector<1x48x32xbf16>
    %184 = vector.shape_cast %183 : vector<1x48x32xbf16> to vector<48x32xbf16>
    %cst_146 = arith.constant dense<0.000000e+00> : vector<256x32xf32>
    %185 = tpu.matmul %182, %184, %cst_146 {dimension_numbers = #tpu.dot_dimension_numbers<[1], [0], [0], [1], [0, 0, 1, 1], [], []>} : vector<256x48xbf16>, vector<48x32xbf16>, vector<256x32xf32> -> vector<256x32xf32>
    %186 = arith.addf %181, %185 : vector<256x32xf32>
    %187 = vector.extract_strided_slice %176 {offsets = [32, 0], sizes = [256, 48], strides = [1, 1]} : vector<288x48xbf16> to vector<256x48xbf16>
    %c8_147 = arith.constant 8 : index
    %c0_148 = arith.constant 0 : index
    %c0_149 = arith.constant 0 : index
    %188 = vector.load %arg9[%c8_147, %c0_148, %c0_149] : memref<9x48x32xbf16, #tpu.memory_space<vmem>>, vector<1x48x32xbf16>
    %189 = vector.shape_cast %188 : vector<1x48x32xbf16> to vector<48x32xbf16>
    %cst_150 = arith.constant dense<0.000000e+00> : vector<256x32xf32>
    %190 = tpu.matmul %187, %189, %cst_150 {dimension_numbers = #tpu.dot_dimension_numbers<[1], [0], [0], [1], [0, 0, 1, 1], [], []>} : vector<256x48xbf16>, vector<48x32xbf16>, vector<256x32xf32> -> vector<256x32xf32>
    %191 = arith.addf %186, %190 : vector<256x32xf32>
    %c0_151 = arith.constant 0 : index
    %c0_152 = arith.constant 0 : index
    %192 = vector.load %arg10[%c0_151, %c0_152] : memref<1x32xf32, #tpu.memory_space<vmem>>, vector<1x32xf32>
    %193 = vector.broadcast %192 : vector<1x32xf32> to vector<256x32xf32>
    %194 = arith.addf %191, %193 : vector<256x32xf32>
    %c0_153 = arith.constant 0 : index
    %c0_154 = arith.constant 0 : index
    %c0_155 = arith.constant 0 : index
    %195 = vector.load %arg4[%c0_153, %c0_154, %c0_155] : memref<1x1x32xf32, #tpu.memory_space<vmem>>, vector<1x1x32xf32>
    %196 = vector.shape_cast %195 : vector<1x1x32xf32> to vector<1x32xf32>
    %197 = arith.truncf %196 : vector<1x32xf32> to vector<1x32xbf16>
    %c0_156 = arith.constant 0 : index
    %c0_157 = arith.constant 0 : index
    %198 = vector.load %arg11[%c0_156, %c0_157] : memref<32x32xbf16, #tpu.memory_space<vmem>>, vector<32x32xbf16>
    %cst_158 = arith.constant dense<0.000000e+00> : vector<1x32xf32>
    %199 = tpu.matmul %197, %198, %cst_158 {dimension_numbers = #tpu.dot_dimension_numbers<[1], [0], [0], [1], [0, 0, 1, 1], [], []>} : vector<1x32xbf16>, vector<32x32xbf16>, vector<1x32xf32> -> vector<1x32xf32>
    %c0_159 = arith.constant 0 : index
    %c0_160 = arith.constant 0 : index
    %200 = vector.load %arg12[%c0_159, %c0_160] : memref<1x32xf32, #tpu.memory_space<vmem>>, vector<1x32xf32>
    %201 = arith.addf %199, %200 : vector<1x32xf32>
    %202 = arith.negf %201 : vector<1x32xf32>
    %203 = math.exp %202 : vector<1x32xf32>
    %cst_161 = arith.constant 1.000000e+00 : f32
    %204 = vector.broadcast %cst_161 : f32 to vector<1x32xf32>
    %205 = arith.addf %204, %203 : vector<1x32xf32>
    %206 = arith.divf %204, %205 : vector<1x32xf32>
    %207 = arith.mulf %201, %206 : vector<1x32xf32>
    %208 = arith.truncf %207 : vector<1x32xf32> to vector<1x32xbf16>
    %c0_162 = arith.constant 0 : index
    %c0_163 = arith.constant 0 : index
    %209 = vector.load %arg13[%c0_162, %c0_163] : memref<32x32xbf16, #tpu.memory_space<vmem>>, vector<32x32xbf16>
    %cst_164 = arith.constant dense<0.000000e+00> : vector<1x32xf32>
    %210 = tpu.matmul %208, %209, %cst_164 {dimension_numbers = #tpu.dot_dimension_numbers<[1], [0], [0], [1], [0, 0, 1, 1], [], []>} : vector<1x32xbf16>, vector<32x32xbf16>, vector<1x32xf32> -> vector<1x32xf32>
    %c0_165 = arith.constant 0 : index
    %c0_166 = arith.constant 0 : index
    %211 = vector.load %arg14[%c0_165, %c0_166] : memref<1x32xf32, #tpu.memory_space<vmem>>, vector<1x32xf32>
    %212 = arith.addf %210, %211 : vector<1x32xf32>
    %c0_167 = arith.constant 0 : index
    %c0_168 = arith.constant 0 : index
    %c0_169 = arith.constant 0 : index
    %c0_170 = arith.constant 0 : index
    %213 = vector.load %arg2[%c0_167, %c0_168, %c0_169, %c0_170] : memref<1x16x16x4xf32, #tpu.memory_space<vmem>>, vector<1x16x16x4xf32>
    %214 = vector.shape_cast %213 : vector<1x16x16x4xf32> to vector<16x16x4xf32>
    %c1_171 = arith.constant 1 : index
    %c1_172 = arith.constant 1 : index
    %c0_173 = arith.constant 0 : index
    %215 = vector.load %arg26[%c1_171, %c1_172, %c0_173] : memref<18x18x48xf32, #tpu.memory_space<vmem>>, vector<16x16x4xf32>
    tpu.vector_store %arg26[%c1_171, %c1_172, %c0_173], %214 {strides = array<i32>} : memref<18x18x48xf32, #tpu.memory_space<vmem>>, vector<16x16x4xf32>,
    %cst_174 = arith.constant 0.000000e+00 : f32
    %216 = vector.broadcast %cst_174 : f32 to vector<256x32xf32>
    %c0_175 = arith.constant 0 : index
    %c0_176 = arith.constant 0 : index
    %c0_177 = arith.constant 0 : index
    %217 = vector.load %arg26[%c0_175, %c0_176, %c0_177] : memref<18x18x48xf32, #tpu.memory_space<vmem>>, vector<18x16x4xf32>
    %218 = vector.shape_cast %217 : vector<18x16x4xf32> to vector<288x4xf32>
    %219 = arith.truncf %218 : vector<288x4xf32> to vector<288x4xbf16>
    %220 = vector.extract_strided_slice %219 {offsets = [0, 0], sizes = [256, 4], strides = [1, 1]} : vector<288x4xbf16> to vector<256x4xbf16>
    %c0_178 = arith.constant 0 : index
    %c0_179 = arith.constant 0 : index
    %c0_180 = arith.constant 0 : index
    %221 = vector.load %arg15[%c0_178, %c0_179, %c0_180] : memref<9x4x32xbf16, #tpu.memory_space<vmem>>, vector<1x4x32xbf16>
    %222 = vector.shape_cast %221 : vector<1x4x32xbf16> to vector<4x32xbf16>
    %cst_181 = arith.constant dense<0.000000e+00> : vector<256x32xf32>
    %223 = tpu.matmul %220, %222, %cst_181 {dimension_numbers = #tpu.dot_dimension_numbers<[1], [0], [0], [1], [0, 0, 1, 1], [], []>} : vector<256x4xbf16>, vector<4x32xbf16>, vector<256x32xf32> -> vector<256x32xf32>
    %224 = arith.addf %216, %223 : vector<256x32xf32>
    %225 = vector.extract_strided_slice %219 {offsets = [16, 0], sizes = [256, 4], strides = [1, 1]} : vector<288x4xbf16> to vector<256x4xbf16>
    %c3_182 = arith.constant 3 : index
    %c0_183 = arith.constant 0 : index
    %c0_184 = arith.constant 0 : index
    %226 = vector.load %arg15[%c3_182, %c0_183, %c0_184] : memref<9x4x32xbf16, #tpu.memory_space<vmem>>, vector<1x4x32xbf16>
    %227 = vector.shape_cast %226 : vector<1x4x32xbf16> to vector<4x32xbf16>
    %cst_185 = arith.constant dense<0.000000e+00> : vector<256x32xf32>
    %228 = tpu.matmul %225, %227, %cst_185 {dimension_numbers = #tpu.dot_dimension_numbers<[1], [0], [0], [1], [0, 0, 1, 1], [], []>} : vector<256x4xbf16>, vector<4x32xbf16>, vector<256x32xf32> -> vector<256x32xf32>
    %229 = arith.addf %224, %228 : vector<256x32xf32>
    %230 = vector.extract_strided_slice %219 {offsets = [32, 0], sizes = [256, 4], strides = [1, 1]} : vector<288x4xbf16> to vector<256x4xbf16>
    %c6_186 = arith.constant 6 : index
    %c0_187 = arith.constant 0 : index
    %c0_188 = arith.constant 0 : index
    %231 = vector.load %arg15[%c6_186, %c0_187, %c0_188] : memref<9x4x32xbf16, #tpu.memory_space<vmem>>, vector<1x4x32xbf16>
    %232 = vector.shape_cast %231 : vector<1x4x32xbf16> to vector<4x32xbf16>
    %cst_189 = arith.constant dense<0.000000e+00> : vector<256x32xf32>
    %233 = tpu.matmul %230, %232, %cst_189 {dimension_numbers = #tpu.dot_dimension_numbers<[1], [0], [0], [1], [0, 0, 1, 1], [], []>} : vector<256x4xbf16>, vector<4x32xbf16>, vector<256x32xf32> -> vector<256x32xf32>
    %234 = arith.addf %229, %233 : vector<256x32xf32>
    %c0_190 = arith.constant 0 : index
    %c1_191 = arith.constant 1 : index
    %c0_192 = arith.constant 0 : index
    %235 = vector.load %arg26[%c0_190, %c1_191, %c0_192] : memref<18x18x48xf32, #tpu.memory_space<vmem>>, vector<18x16x4xf32>
    %236 = vector.shape_cast %235 : vector<18x16x4xf32> to vector<288x4xf32>
    %237 = arith.truncf %236 : vector<288x4xf32> to vector<288x4xbf16>
    %238 = vector.extract_strided_slice %237 {offsets = [0, 0], sizes = [256, 4], strides = [1, 1]} : vector<288x4xbf16> to vector<256x4xbf16>
    %c1_193 = arith.constant 1 : index
    %c0_194 = arith.constant 0 : index
    %c0_195 = arith.constant 0 : index
    %239 = vector.load %arg15[%c1_193, %c0_194, %c0_195] : memref<9x4x32xbf16, #tpu.memory_space<vmem>>, vector<1x4x32xbf16>
    %240 = vector.shape_cast %239 : vector<1x4x32xbf16> to vector<4x32xbf16>
    %cst_196 = arith.constant dense<0.000000e+00> : vector<256x32xf32>
    %241 = tpu.matmul %238, %240, %cst_196 {dimension_numbers = #tpu.dot_dimension_numbers<[1], [0], [0], [1], [0, 0, 1, 1], [], []>} : vector<256x4xbf16>, vector<4x32xbf16>, vector<256x32xf32> -> vector<256x32xf32>
    %242 = arith.addf %234, %241 : vector<256x32xf32>
    %243 = vector.extract_strided_slice %237 {offsets = [16, 0], sizes = [256, 4], strides = [1, 1]} : vector<288x4xbf16> to vector<256x4xbf16>
    %c4_197 = arith.constant 4 : index
    %c0_198 = arith.constant 0 : index
    %c0_199 = arith.constant 0 : index
    %244 = vector.load %arg15[%c4_197, %c0_198, %c0_199] : memref<9x4x32xbf16, #tpu.memory_space<vmem>>, vector<1x4x32xbf16>
    %245 = vector.shape_cast %244 : vector<1x4x32xbf16> to vector<4x32xbf16>
    %cst_200 = arith.constant dense<0.000000e+00> : vector<256x32xf32>
    %246 = tpu.matmul %243, %245, %cst_200 {dimension_numbers = #tpu.dot_dimension_numbers<[1], [0], [0], [1], [0, 0, 1, 1], [], []>} : vector<256x4xbf16>, vector<4x32xbf16>, vector<256x32xf32> -> vector<256x32xf32>
    %247 = arith.addf %242, %246 : vector<256x32xf32>
    %248 = vector.extract_strided_slice %237 {offsets = [32, 0], sizes = [256, 4], strides = [1, 1]} : vector<288x4xbf16> to vector<256x4xbf16>
    %c7_201 = arith.constant 7 : index
    %c0_202 = arith.constant 0 : index
    %c0_203 = arith.constant 0 : index
    %249 = vector.load %arg15[%c7_201, %c0_202, %c0_203] : memref<9x4x32xbf16, #tpu.memory_space<vmem>>, vector<1x4x32xbf16>
    %250 = vector.shape_cast %249 : vector<1x4x32xbf16> to vector<4x32xbf16>
    %cst_204 = arith.constant dense<0.000000e+00> : vector<256x32xf32>
    %251 = tpu.matmul %248, %250, %cst_204 {dimension_numbers = #tpu.dot_dimension_numbers<[1], [0], [0], [1], [0, 0, 1, 1], [], []>} : vector<256x4xbf16>, vector<4x32xbf16>, vector<256x32xf32> -> vector<256x32xf32>
    %252 = arith.addf %247, %251 : vector<256x32xf32>
    %c0_205 = arith.constant 0 : index
    %c2_206 = arith.constant 2 : index
    %c0_207 = arith.constant 0 : index
    %253 = vector.load %arg26[%c0_205, %c2_206, %c0_207] : memref<18x18x48xf32, #tpu.memory_space<vmem>>, vector<18x16x4xf32>
    %254 = vector.shape_cast %253 : vector<18x16x4xf32> to vector<288x4xf32>
    %255 = arith.truncf %254 : vector<288x4xf32> to vector<288x4xbf16>
    %256 = vector.extract_strided_slice %255 {offsets = [0, 0], sizes = [256, 4], strides = [1, 1]} : vector<288x4xbf16> to vector<256x4xbf16>
    %c2_208 = arith.constant 2 : index
    %c0_209 = arith.constant 0 : index
    %c0_210 = arith.constant 0 : index
    %257 = vector.load %arg15[%c2_208, %c0_209, %c0_210] : memref<9x4x32xbf16, #tpu.memory_space<vmem>>, vector<1x4x32xbf16>
    %258 = vector.shape_cast %257 : vector<1x4x32xbf16> to vector<4x32xbf16>
    %cst_211 = arith.constant dense<0.000000e+00> : vector<256x32xf32>
    %259 = tpu.matmul %256, %258, %cst_211 {dimension_numbers = #tpu.dot_dimension_numbers<[1], [0], [0], [1], [0, 0, 1, 1], [], []>} : vector<256x4xbf16>, vector<4x32xbf16>, vector<256x32xf32> -> vector<256x32xf32>
    %260 = arith.addf %252, %259 : vector<256x32xf32>
    %261 = vector.extract_strided_slice %255 {offsets = [16, 0], sizes = [256, 4], strides = [1, 1]} : vector<288x4xbf16> to vector<256x4xbf16>
    %c5_212 = arith.constant 5 : index
    %c0_213 = arith.constant 0 : index
    %c0_214 = arith.constant 0 : index
    %262 = vector.load %arg15[%c5_212, %c0_213, %c0_214] : memref<9x4x32xbf16, #tpu.memory_space<vmem>>, vector<1x4x32xbf16>
    %263 = vector.shape_cast %262 : vector<1x4x32xbf16> to vector<4x32xbf16>
    %cst_215 = arith.constant dense<0.000000e+00> : vector<256x32xf32>
    %264 = tpu.matmul %261, %263, %cst_215 {dimension_numbers = #tpu.dot_dimension_numbers<[1], [0], [0], [1], [0, 0, 1, 1], [], []>} : vector<256x4xbf16>, vector<4x32xbf16>, vector<256x32xf32> -> vector<256x32xf32>
    %265 = arith.addf %260, %264 : vector<256x32xf32>
    %266 = vector.extract_strided_slice %255 {offsets = [32, 0], sizes = [256, 4], strides = [1, 1]} : vector<288x4xbf16> to vector<256x4xbf16>
    %c8_216 = arith.constant 8 : index
    %c0_217 = arith.constant 0 : index
    %c0_218 = arith.constant 0 : index
    %267 = vector.load %arg15[%c8_216, %c0_217, %c0_218] : memref<9x4x32xbf16, #tpu.memory_space<vmem>>, vector<1x4x32xbf16>
    %268 = vector.shape_cast %267 : vector<1x4x32xbf16> to vector<4x32xbf16>
    %cst_219 = arith.constant dense<0.000000e+00> : vector<256x32xf32>
    %269 = tpu.matmul %266, %268, %cst_219 {dimension_numbers = #tpu.dot_dimension_numbers<[1], [0], [0], [1], [0, 0, 1, 1], [], []>} : vector<256x4xbf16>, vector<4x32xbf16>, vector<256x32xf32> -> vector<256x32xf32>
    %270 = arith.addf %265, %269 : vector<256x32xf32>
    %c0_220 = arith.constant 0 : index
    %c0_221 = arith.constant 0 : index
    %271 = vector.load %arg16[%c0_220, %c0_221] : memref<1x32xf32, #tpu.memory_space<vmem>>, vector<1x32xf32>
    %272 = vector.broadcast %271 : vector<1x32xf32> to vector<256x32xf32>
    %273 = arith.addf %270, %272 : vector<256x32xf32>
    %274 = arith.addf %273, %194 : vector<256x32xf32>
    %275 = vector.broadcast %212 : vector<1x32xf32> to vector<256x32xf32>
    %276 = arith.addf %274, %275 : vector<256x32xf32>
    %c0_222 = arith.constant 0 : index
    %c0_223 = arith.constant 0 : index
    %c0_224 = arith.constant 0 : index
    %277 = vector.load %arg3[%c0_222, %c0_223, %c0_224] : memref<1x8x32xf32, #tpu.memory_space<vmem>>, vector<1x8x32xf32>
    %278 = vector.shape_cast %277 : vector<1x8x32xf32> to vector<8x32xf32>
    %279 = arith.truncf %276 : vector<256x32xf32> to vector<256x32xbf16>
    %c0_225 = arith.constant 0 : index
    %c0_226 = arith.constant 0 : index
    %280 = vector.load %arg17[%c0_225, %c0_226] : memref<32x32xbf16, #tpu.memory_space<vmem>>, vector<32x32xbf16>
    %cst_227 = arith.constant dense<0.000000e+00> : vector<256x32xf32>
    %281 = tpu.matmul %279, %280, %cst_227 {dimension_numbers = #tpu.dot_dimension_numbers<[1], [0], [0], [1], [0, 0, 1, 1], [], []>} : vector<256x32xbf16>, vector<32x32xbf16>, vector<256x32xf32> -> vector<256x32xf32>
    %c0_228 = arith.constant 0 : index
    %c0_229 = arith.constant 0 : index
    %282 = vector.load %arg18[%c0_228, %c0_229] : memref<1x32xf32, #tpu.memory_space<vmem>>, vector<1x32xf32>
    %283 = vector.broadcast %282 : vector<1x32xf32> to vector<256x32xf32>
    %284 = arith.addf %281, %283 : vector<256x32xf32>
    %285 = arith.truncf %278 : vector<8x32xf32> to vector<8x32xbf16>
    %c0_230 = arith.constant 0 : index
    %c0_231 = arith.constant 0 : index
    %286 = vector.load %arg19[%c0_230, %c0_231] : memref<32x64xbf16, #tpu.memory_space<vmem>>, vector<32x64xbf16>
    %cst_232 = arith.constant dense<0.000000e+00> : vector<8x64xf32>
    %287 = tpu.matmul %285, %286, %cst_232 {dimension_numbers = #tpu.dot_dimension_numbers<[1], [0], [0], [1], [0, 0, 1, 1], [], []>} : vector<8x32xbf16>, vector<32x64xbf16>, vector<8x64xf32> -> vector<8x64xf32>
    %c0_233 = arith.constant 0 : index
    %c0_234 = arith.constant 0 : index
    %288 = vector.load %arg20[%c0_233, %c0_234] : memref<1x64xf32, #tpu.memory_space<vmem>>, vector<1x64xf32>
    %289 = vector.broadcast %288 : vector<1x64xf32> to vector<8x64xf32>
    %290 = arith.addf %287, %289 : vector<8x64xf32>
    %291 = vector.extract_strided_slice %290 {offsets = [0, 0], sizes = [8, 32], strides = [1, 1]} : vector<8x64xf32> to vector<8x32xf32>
    %292 = vector.extract_strided_slice %290 {offsets = [0, 32], sizes = [8, 32], strides = [1, 1]} : vector<8x64xf32> to vector<8x32xf32>
    %293 = arith.truncf %284 : vector<256x32xf32> to vector<256x32xbf16>
    %294 = arith.truncf %291 : vector<8x32xf32> to vector<8x32xbf16>
    %cst_235 = arith.constant dense<0.000000e+00> : vector<256x8xf32>
    %295 = tpu.matmul %293, %294, %cst_235 {dimension_numbers = #tpu.dot_dimension_numbers<[1], [1], [0], [0], [0, 0, 1, 0], [], []>} : vector<256x32xbf16>, vector<8x32xbf16>, vector<256x8xf32> -> vector<256x8xf32>
    %cst_236 = arith.constant dense<0xFF800000> : vector<256xf32>
    %296 = vector.multi_reduction <maximumf>, %295, %cst_236 [1] : vector<256x8xf32> to vector<256xf32>
    %297 = vector.shape_cast %296 : vector<256xf32> to vector<256x1xf32>
    %298 = vector.broadcast %297 : vector<256x1xf32> to vector<256x8xf32>
    %299 = arith.subf %295, %298 : vector<256x8xf32>
    %300 = math.exp %299 : vector<256x8xf32>
    %cst_237 = arith.constant dense<0.000000e+00> : vector<256xf32>
    %301 = vector.multi_reduction <add>, %300, %cst_237 [1] : vector<256x8xf32> to vector<256xf32>
    %302 = vector.shape_cast %301 : vector<256xf32> to vector<256x1xf32>
    %303 = tpu.reciprocal %302 {approx = true} : vector<256x1xf32> -> vector<256x1xf32>
    %304 = vector.broadcast %303 : vector<256x1xf32> to vector<256x8xf32>
    %305 = arith.mulf %300, %304 : vector<256x8xf32>
    %306 = arith.truncf %305 : vector<256x8xf32> to vector<256x8xbf16>
    %307 = arith.truncf %292 : vector<8x32xf32> to vector<8x32xbf16>
    %cst_238 = arith.constant dense<0.000000e+00> : vector<256x32xf32>
    %308 = tpu.matmul %306, %307, %cst_238 {dimension_numbers = #tpu.dot_dimension_numbers<[1], [0], [0], [1], [0, 0, 1, 1], [], []>} : vector<256x8xbf16>, vector<8x32xbf16>, vector<256x32xf32> -> vector<256x32xf32>
    %309 = arith.truncf %308 : vector<256x32xf32> to vector<256x32xbf16>
    %c0_239 = arith.constant 0 : index
    %c0_240 = arith.constant 0 : index
    %310 = vector.load %arg21[%c0_239, %c0_240] : memref<32x32xbf16, #tpu.memory_space<vmem>>, vector<32x32xbf16>
    %cst_241 = arith.constant dense<0.000000e+00> : vector<256x32xf32>
    %311 = tpu.matmul %309, %310, %cst_241 {dimension_numbers = #tpu.dot_dimension_numbers<[1], [0], [0], [1], [0, 0, 1, 1], [], []>} : vector<256x32xbf16>, vector<32x32xbf16>, vector<256x32xf32> -> vector<256x32xf32>
    %c0_242 = arith.constant 0 : index
    %c0_243 = arith.constant 0 : index
    %312 = vector.load %arg22[%c0_242, %c0_243] : memref<1x32xf32, #tpu.memory_space<vmem>>, vector<1x32xf32>
    %313 = vector.broadcast %312 : vector<1x32xf32> to vector<256x32xf32>
    %314 = arith.addf %311, %313 : vector<256x32xf32>
    %315 = arith.addf %276, %314 : vector<256x32xf32>
    %316 = arith.negf %315 : vector<256x32xf32>
    %317 = math.exp %316 : vector<256x32xf32>
    %cst_244 = arith.constant 1.000000e+00 : f32
    %318 = vector.broadcast %cst_244 : f32 to vector<256x32xf32>
    %319 = arith.addf %318, %317 : vector<256x32xf32>
    %320 = arith.divf %318, %319 : vector<256x32xf32>
    %321 = arith.mulf %315, %320 : vector<256x32xf32>
    %322 = vector.shape_cast %321 : vector<256x32xf32> to vector<16x16x32xf32>
    %c1_245 = arith.constant 1 : index
    %c1_246 = arith.constant 1 : index
    %c0_247 = arith.constant 0 : index
    %323 = vector.load %arg26[%c1_245, %c1_246, %c0_247] : memref<18x18x48xf32, #tpu.memory_space<vmem>>, vector<16x16x32xf32>
    tpu.vector_store %arg26[%c1_245, %c1_246, %c0_247], %322 {strides = array<i32>} : memref<18x18x48xf32, #tpu.memory_space<vmem>>, vector<16x16x32xf32>,
    %cst_248 = arith.constant 0.000000e+00 : f32
    %324 = vector.broadcast %cst_248 : f32 to vector<256x4xf32>
    %c0_249 = arith.constant 0 : index
    %c0_250 = arith.constant 0 : index
    %c0_251 = arith.constant 0 : index
    %325 = vector.load %arg26[%c0_249, %c0_250, %c0_251] : memref<18x18x48xf32, #tpu.memory_space<vmem>>, vector<18x16x32xf32>
    %326 = vector.shape_cast %325 : vector<18x16x32xf32> to vector<288x32xf32>
    %327 = arith.truncf %326 : vector<288x32xf32> to vector<288x32xbf16>
    %328 = vector.extract_strided_slice %327 {offsets = [0, 0], sizes = [256, 32], strides = [1, 1]} : vector<288x32xbf16> to vector<256x32xbf16>
    %c0_252 = arith.constant 0 : index
    %c0_253 = arith.constant 0 : index
    %c0_254 = arith.constant 0 : index
    %329 = vector.load %arg23[%c0_252, %c0_253, %c0_254] : memref<9x32x4xbf16, #tpu.memory_space<vmem>>, vector<1x32x4xbf16>
    %330 = vector.shape_cast %329 : vector<1x32x4xbf16> to vector<32x4xbf16>
    %cst_255 = arith.constant dense<0.000000e+00> : vector<256x4xf32>
    %331 = tpu.matmul %328, %330, %cst_255 {dimension_numbers = #tpu.dot_dimension_numbers<[1], [0], [0], [1], [0, 0, 1, 1], [], []>} : vector<256x32xbf16>, vector<32x4xbf16>, vector<256x4xf32> -> vector<256x4xf32>
    %332 = arith.addf %324, %331 : vector<256x4xf32>
    %333 = vector.extract_strided_slice %327 {offsets = [16, 0], sizes = [256, 32], strides = [1, 1]} : vector<288x32xbf16> to vector<256x32xbf16>
    %c3_256 = arith.constant 3 : index
    %c0_257 = arith.constant 0 : index
    %c0_258 = arith.constant 0 : index
    %334 = vector.load %arg23[%c3_256, %c0_257, %c0_258] : memref<9x32x4xbf16, #tpu.memory_space<vmem>>, vector<1x32x4xbf16>
    %335 = vector.shape_cast %334 : vector<1x32x4xbf16> to vector<32x4xbf16>
    %cst_259 = arith.constant dense<0.000000e+00> : vector<256x4xf32>
    %336 = tpu.matmul %333, %335, %cst_259 {dimension_numbers = #tpu.dot_dimension_numbers<[1], [0], [0], [1], [0, 0, 1, 1], [], []>} : vector<256x32xbf16>, vector<32x4xbf16>, vector<256x4xf32> -> vector<256x4xf32>
    %337 = arith.addf %332, %336 : vector<256x4xf32>
    %338 = vector.extract_strided_slice %327 {offsets = [32, 0], sizes = [256, 32], strides = [1, 1]} : vector<288x32xbf16> to vector<256x32xbf16>
    %c6_260 = arith.constant 6 : index
    %c0_261 = arith.constant 0 : index
    %c0_262 = arith.constant 0 : index
    %339 = vector.load %arg23[%c6_260, %c0_261, %c0_262] : memref<9x32x4xbf16, #tpu.memory_space<vmem>>, vector<1x32x4xbf16>
    %340 = vector.shape_cast %339 : vector<1x32x4xbf16> to vector<32x4xbf16>
    %cst_263 = arith.constant dense<0.000000e+00> : vector<256x4xf32>
    %341 = tpu.matmul %338, %340, %cst_263 {dimension_numbers = #tpu.dot_dimension_numbers<[1], [0], [0], [1], [0, 0, 1, 1], [], []>} : vector<256x32xbf16>, vector<32x4xbf16>, vector<256x4xf32> -> vector<256x4xf32>
    %342 = arith.addf %337, %341 : vector<256x4xf32>
    %c0_264 = arith.constant 0 : index
    %c1_265 = arith.constant 1 : index
    %c0_266 = arith.constant 0 : index
    %343 = vector.load %arg26[%c0_264, %c1_265, %c0_266] : memref<18x18x48xf32, #tpu.memory_space<vmem>>, vector<18x16x32xf32>
    %344 = vector.shape_cast %343 : vector<18x16x32xf32> to vector<288x32xf32>
    %345 = arith.truncf %344 : vector<288x32xf32> to vector<288x32xbf16>
    %346 = vector.extract_strided_slice %345 {offsets = [0, 0], sizes = [256, 32], strides = [1, 1]} : vector<288x32xbf16> to vector<256x32xbf16>
    %c1_267 = arith.constant 1 : index
    %c0_268 = arith.constant 0 : index
    %c0_269 = arith.constant 0 : index
    %347 = vector.load %arg23[%c1_267, %c0_268, %c0_269] : memref<9x32x4xbf16, #tpu.memory_space<vmem>>, vector<1x32x4xbf16>
    %348 = vector.shape_cast %347 : vector<1x32x4xbf16> to vector<32x4xbf16>
    %cst_270 = arith.constant dense<0.000000e+00> : vector<256x4xf32>
    %349 = tpu.matmul %346, %348, %cst_270 {dimension_numbers = #tpu.dot_dimension_numbers<[1], [0], [0], [1], [0, 0, 1, 1], [], []>} : vector<256x32xbf16>, vector<32x4xbf16>, vector<256x4xf32> -> vector<256x4xf32>
    %350 = arith.addf %342, %349 : vector<256x4xf32>
    %351 = vector.extract_strided_slice %345 {offsets = [16, 0], sizes = [256, 32], strides = [1, 1]} : vector<288x32xbf16> to vector<256x32xbf16>
    %c4_271 = arith.constant 4 : index
    %c0_272 = arith.constant 0 : index
    %c0_273 = arith.constant 0 : index
    %352 = vector.load %arg23[%c4_271, %c0_272, %c0_273] : memref<9x32x4xbf16, #tpu.memory_space<vmem>>, vector<1x32x4xbf16>
    %353 = vector.shape_cast %352 : vector<1x32x4xbf16> to vector<32x4xbf16>
    %cst_274 = arith.constant dense<0.000000e+00> : vector<256x4xf32>
    %354 = tpu.matmul %351, %353, %cst_274 {dimension_numbers = #tpu.dot_dimension_numbers<[1], [0], [0], [1], [0, 0, 1, 1], [], []>} : vector<256x32xbf16>, vector<32x4xbf16>, vector<256x4xf32> -> vector<256x4xf32>
    %355 = arith.addf %350, %354 : vector<256x4xf32>
    %356 = vector.extract_strided_slice %345 {offsets = [32, 0], sizes = [256, 32], strides = [1, 1]} : vector<288x32xbf16> to vector<256x32xbf16>
    %c7_275 = arith.constant 7 : index
    %c0_276 = arith.constant 0 : index
    %c0_277 = arith.constant 0 : index
    %357 = vector.load %arg23[%c7_275, %c0_276, %c0_277] : memref<9x32x4xbf16, #tpu.memory_space<vmem>>, vector<1x32x4xbf16>
    %358 = vector.shape_cast %357 : vector<1x32x4xbf16> to vector<32x4xbf16>
    %cst_278 = arith.constant dense<0.000000e+00> : vector<256x4xf32>
    %359 = tpu.matmul %356, %358, %cst_278 {dimension_numbers = #tpu.dot_dimension_numbers<[1], [0], [0], [1], [0, 0, 1, 1], [], []>} : vector<256x32xbf16>, vector<32x4xbf16>, vector<256x4xf32> -> vector<256x4xf32>
    %360 = arith.addf %355, %359 : vector<256x4xf32>
    %c0_279 = arith.constant 0 : index
    %c2_280 = arith.constant 2 : index
    %c0_281 = arith.constant 0 : index
    %361 = vector.load %arg26[%c0_279, %c2_280, %c0_281] : memref<18x18x48xf32, #tpu.memory_space<vmem>>, vector<18x16x32xf32>
    %362 = vector.shape_cast %361 : vector<18x16x32xf32> to vector<288x32xf32>
    %363 = arith.truncf %362 : vector<288x32xf32> to vector<288x32xbf16>
    %364 = vector.extract_strided_slice %363 {offsets = [0, 0], sizes = [256, 32], strides = [1, 1]} : vector<288x32xbf16> to vector<256x32xbf16>
    %c2_282 = arith.constant 2 : index
    %c0_283 = arith.constant 0 : index
    %c0_284 = arith.constant 0 : index
    %365 = vector.load %arg23[%c2_282, %c0_283, %c0_284] : memref<9x32x4xbf16, #tpu.memory_space<vmem>>, vector<1x32x4xbf16>
    %366 = vector.shape_cast %365 : vector<1x32x4xbf16> to vector<32x4xbf16>
    %cst_285 = arith.constant dense<0.000000e+00> : vector<256x4xf32>
    %367 = tpu.matmul %364, %366, %cst_285 {dimension_numbers = #tpu.dot_dimension_numbers<[1], [0], [0], [1], [0, 0, 1, 1], [], []>} : vector<256x32xbf16>, vector<32x4xbf16>, vector<256x4xf32> -> vector<256x4xf32>
    %368 = arith.addf %360, %367 : vector<256x4xf32>
    %369 = vector.extract_strided_slice %363 {offsets = [16, 0], sizes = [256, 32], strides = [1, 1]} : vector<288x32xbf16> to vector<256x32xbf16>
    %c5_286 = arith.constant 5 : index
    %c0_287 = arith.constant 0 : index
    %c0_288 = arith.constant 0 : index
    %370 = vector.load %arg23[%c5_286, %c0_287, %c0_288] : memref<9x32x4xbf16, #tpu.memory_space<vmem>>, vector<1x32x4xbf16>
    %371 = vector.shape_cast %370 : vector<1x32x4xbf16> to vector<32x4xbf16>
    %cst_289 = arith.constant dense<0.000000e+00> : vector<256x4xf32>
    %372 = tpu.matmul %369, %371, %cst_289 {dimension_numbers = #tpu.dot_dimension_numbers<[1], [0], [0], [1], [0, 0, 1, 1], [], []>} : vector<256x32xbf16>, vector<32x4xbf16>, vector<256x4xf32> -> vector<256x4xf32>
    %373 = arith.addf %368, %372 : vector<256x4xf32>
    %374 = vector.extract_strided_slice %363 {offsets = [32, 0], sizes = [256, 32], strides = [1, 1]} : vector<288x32xbf16> to vector<256x32xbf16>
    %c8_290 = arith.constant 8 : index
    %c0_291 = arith.constant 0 : index
    %c0_292 = arith.constant 0 : index
    %375 = vector.load %arg23[%c8_290, %c0_291, %c0_292] : memref<9x32x4xbf16, #tpu.memory_space<vmem>>, vector<1x32x4xbf16>
    %376 = vector.shape_cast %375 : vector<1x32x4xbf16> to vector<32x4xbf16>
    %cst_293 = arith.constant dense<0.000000e+00> : vector<256x4xf32>
    %377 = tpu.matmul %374, %376, %cst_293 {dimension_numbers = #tpu.dot_dimension_numbers<[1], [0], [0], [1], [0, 0, 1, 1], [], []>} : vector<256x32xbf16>, vector<32x4xbf16>, vector<256x4xf32> -> vector<256x4xf32>
    %378 = arith.addf %373, %377 : vector<256x4xf32>
    %c0_294 = arith.constant 0 : index
    %c0_295 = arith.constant 0 : index
    %379 = vector.load %arg24[%c0_294, %c0_295] : memref<1x4xf32, #tpu.memory_space<vmem>>, vector<1x4xf32>
    %380 = vector.broadcast %379 : vector<1x4xf32> to vector<256x4xf32>
    %381 = arith.addf %378, %380 : vector<256x4xf32>
    %c0_296 = arith.constant 0 : index
    %c0_297 = arith.constant 0 : index
    %c0_298 = arith.constant 0 : index
    %382 = vector.load %arg25[%c0_296, %c0_297, %c0_298] : memref<1x256x4xf32, #tpu.memory_space<vmem>>, vector<1x256x4xf32>
    %383 = vector.shape_cast %382 : vector<1x256x4xf32> to vector<256x4xf32>
    %384 = vector.shape_cast %381 : vector<256x4xf32> to vector<1x256x4xf32>
    tpu.vector_store %arg25[%c0_296, %c0_297, %c0_298], %384 {strides = array<i32>} : memref<1x256x4xf32, #tpu.memory_space<vmem>>, vector<1x256x4xf32>,
    return
  }
  func.func @transform_0(%arg0: i32) -> (i32, i32, i32, i32) {
    %c0_i32 = arith.constant 0 : i32
    %c0_i32_0 = arith.constant 0 : i32
    %c0_i32_1 = arith.constant 0 : i32
    %c0_i32_2 = arith.constant 0 : i32
    return %arg0, %c0_i32, %c0_i32_0, %c0_i32_1 : i32, i32, i32, i32
  }
  func.func @transform_1(%arg0: i32) -> (i32, i32, i32, i32) {
    %c0_i32 = arith.constant 0 : i32
    %c0_i32_0 = arith.constant 0 : i32
    %c0_i32_1 = arith.constant 0 : i32
    %c0_i32_2 = arith.constant 0 : i32
    return %arg0, %c0_i32, %c0_i32_0, %c0_i32_1 : i32, i32, i32, i32
  }
  func.func @transform_2(%arg0: i32) -> (i32, i32, i32) {
    %c0_i32 = arith.constant 0 : i32
    %c0_i32_0 = arith.constant 0 : i32
    %c0_i32_1 = arith.constant 0 : i32
    return %arg0, %c0_i32, %c0_i32_0 : i32, i32, i32
  }
  func.func @transform_3(%arg0: i32) -> (i32, i32, i32) {
    %c0_i32 = arith.constant 0 : i32
    %c0_i32_0 = arith.constant 0 : i32
    %c0_i32_1 = arith.constant 0 : i32
    return %arg0, %c0_i32, %c0_i32_0 : i32, i32, i32
  }
  func.func @transform_4(%arg0: i32) -> (i32, i32, i32) {
    %c0_i32 = arith.constant 0 : i32
    %c0_i32_0 = arith.constant 0 : i32
    %c0_i32_1 = arith.constant 0 : i32
    %c0_i32_2 = arith.constant 0 : i32
    return %c0_i32, %c0_i32_0, %c0_i32_1 : i32, i32, i32
  }
  func.func @transform_5(%arg0: i32) -> (i32, i32) {
    %c0_i32 = arith.constant 0 : i32
    %c0_i32_0 = arith.constant 0 : i32
    %c0_i32_1 = arith.constant 0 : i32
    return %c0_i32, %c0_i32_0 : i32, i32
  }
  func.func @transform_6(%arg0: i32) -> (i32, i32, i32) {
    %c0_i32 = arith.constant 0 : i32
    %c0_i32_0 = arith.constant 0 : i32
    %c0_i32_1 = arith.constant 0 : i32
    %c0_i32_2 = arith.constant 0 : i32
    return %c0_i32, %c0_i32_0, %c0_i32_1 : i32, i32, i32
  }
  func.func @transform_7(%arg0: i32) -> (i32, i32) {
    %c0_i32 = arith.constant 0 : i32
    %c0_i32_0 = arith.constant 0 : i32
    %c0_i32_1 = arith.constant 0 : i32
    return %c0_i32, %c0_i32_0 : i32, i32
  }
  func.func @transform_8(%arg0: i32) -> (i32, i32, i32) {
    %c0_i32 = arith.constant 0 : i32
    %c0_i32_0 = arith.constant 0 : i32
    %c0_i32_1 = arith.constant 0 : i32
    %c0_i32_2 = arith.constant 0 : i32
    return %c0_i32, %c0_i32_0, %c0_i32_1 : i32, i32, i32
  }
  func.func @transform_9(%arg0: i32) -> (i32, i32) {
    %c0_i32 = arith.constant 0 : i32
    %c0_i32_0 = arith.constant 0 : i32
    %c0_i32_1 = arith.constant 0 : i32
    return %c0_i32, %c0_i32_0 : i32, i32
  }
  func.func @transform_10(%arg0: i32) -> (i32, i32) {
    %c0_i32 = arith.constant 0 : i32
    %c0_i32_0 = arith.constant 0 : i32
    %c0_i32_1 = arith.constant 0 : i32
    return %c0_i32, %c0_i32_0 : i32, i32
  }
  func.func @transform_11(%arg0: i32) -> (i32, i32) {
    %c0_i32 = arith.constant 0 : i32
    %c0_i32_0 = arith.constant 0 : i32
    %c0_i32_1 = arith.constant 0 : i32
    return %c0_i32, %c0_i32_0 : i32, i32
  }
  func.func @transform_12(%arg0: i32) -> (i32, i32) {
    %c0_i32 = arith.constant 0 : i32
    %c0_i32_0 = arith.constant 0 : i32
    %c0_i32_1 = arith.constant 0 : i32
    return %c0_i32, %c0_i32_0 : i32, i32
  }
  func.func @transform_13(%arg0: i32) -> (i32, i32) {
    %c0_i32 = arith.constant 0 : i32
    %c0_i32_0 = arith.constant 0 : i32
    %c0_i32_1 = arith.constant 0 : i32
    return %c0_i32, %c0_i32_0 : i32, i32
  }
  func.func @transform_14(%arg0: i32) -> (i32, i32, i32) {
    %c0_i32 = arith.constant 0 : i32
    %c0_i32_0 = arith.constant 0 : i32
    %c0_i32_1 = arith.constant 0 : i32
    %c0_i32_2 = arith.constant 0 : i32
    return %c0_i32, %c0_i32_0, %c0_i32_1 : i32, i32, i32
  }
  func.func @transform_15(%arg0: i32) -> (i32, i32) {
    %c0_i32 = arith.constant 0 : i32
    %c0_i32_0 = arith.constant 0 : i32
    %c0_i32_1 = arith.constant 0 : i32
    return %c0_i32, %c0_i32_0 : i32, i32
  }
  func.func @transform_16(%arg0: i32) -> (i32, i32) {
    %c0_i32 = arith.constant 0 : i32
    %c0_i32_0 = arith.constant 0 : i32
    %c0_i32_1 = arith.constant 0 : i32
    return %c0_i32, %c0_i32_0 : i32, i32
  }
  func.func @transform_17(%arg0: i32) -> (i32, i32) {
    %c0_i32 = arith.constant 0 : i32
    %c0_i32_0 = arith.constant 0 : i32
    %c0_i32_1 = arith.constant 0 : i32
    return %c0_i32, %c0_i32_0 : i32, i32
  }
  func.func @transform_18(%arg0: i32) -> (i32, i32) {
    %c0_i32 = arith.constant 0 : i32
    %c0_i32_0 = arith.constant 0 : i32
    %c0_i32_1 = arith.constant 0 : i32
    return %c0_i32, %c0_i32_0 : i32, i32
  }
  func.func @transform_19(%arg0: i32) -> (i32, i32) {
    %c0_i32 = arith.constant 0 : i32
    %c0_i32_0 = arith.constant 0 : i32
    %c0_i32_1 = arith.constant 0 : i32
    return %c0_i32, %c0_i32_0 : i32, i32
  }
  func.func @transform_20(%arg0: i32) -> (i32, i32) {
    %c0_i32 = arith.constant 0 : i32
    %c0_i32_0 = arith.constant 0 : i32
    %c0_i32_1 = arith.constant 0 : i32
    return %c0_i32, %c0_i32_0 : i32, i32
  }
  func.func @transform_21(%arg0: i32) -> (i32, i32) {
    %c0_i32 = arith.constant 0 : i32
    %c0_i32_0 = arith.constant 0 : i32
    %c0_i32_1 = arith.constant 0 : i32
    return %c0_i32, %c0_i32_0 : i32, i32
  }
  func.func @transform_22(%arg0: i32) -> (i32, i32, i32) {
    %c0_i32 = arith.constant 0 : i32
    %c0_i32_0 = arith.constant 0 : i32
    %c0_i32_1 = arith.constant 0 : i32
    %c0_i32_2 = arith.constant 0 : i32
    return %c0_i32, %c0_i32_0, %c0_i32_1 : i32, i32, i32
  }
  func.func @transform_23(%arg0: i32) -> (i32, i32) {
    %c0_i32 = arith.constant 0 : i32
    %c0_i32_0 = arith.constant 0 : i32
    %c0_i32_1 = arith.constant 0 : i32
    return %c0_i32, %c0_i32_0 : i32, i32
  }
  func.func @transform_24(%arg0: i32) -> (i32, i32, i32) {
    %c0_i32 = arith.constant 0 : i32
    %c0_i32_0 = arith.constant 0 : i32
    %c0_i32_1 = arith.constant 0 : i32
    return %arg0, %c0_i32, %c0_i32_0 : i32, i32, i32
  }
}

</mosaic_0001>

<bundles_post_ra>
// kernel: champ_flame_forward.1
= control target key start
LH: loop header
LB: loop body
LE: loop exit
PB: predicated region body
PF: predicated region fallthrough
CT: control target
= control target key end

     0   :  { %s24055_s0 = inlined_call_operand.vmem [shape: f32[2,16,16,7], index: 0, kind: input, shape index: {}]   ;;  %s24056_s1 = inlined_call_operand.vmem [shape: f32[2,16,16,4], index: 1, kind: input, shape index: {}]   ;;  %s24057_s2 = inlined_call_operand.vmem [shape: f32[2,8,32], index: 2, kind: input, shape index: {}]   ;;  %s24058_s3 = inlined_call_operand.vmem [shape: f32[2,1,32], index: 3, kind: input, shape index: {}]   ;;  %s24059_s4 = inlined_call_operand.vmem [shape: bf16[9,7,48], index: 4, kind: input, shape index: {}]   ;;  %s24060_s5 = inlined_call_operand.vmem [shape: f32[1,48], index: 5, kind: input, shape index: {}]   ;;  %s24061_s6 = inlined_call_operand.vmem [shape: bf16[9,48,48], index: 6, kind: input, shape index: {}]   ;;  %s24062_s7 = inlined_call_operand.vmem [shape: f32[1,48], index: 7, kind: input, shape index: {}]   ;;  %s24063_s8 = inlined_call_operand.vmem [shape: bf16[9,48,32], index: 8, kind: input, shape index: {}]   ;;  %s24064_s9 = inlined_call_operand.vmem [shape: f32[1,32], index: 9, kind: input, shape index: {}]   ;;  %s24065_s10 = inlined_call_operand.vmem [shape: bf16[32,32], index: 10, kind: input, shape index: {}]   ;;  %s24066_s11 = inlined_call_operand.vmem [shape: f32[1,32], index: 11, kind: input, shape index: {}]   ;;  %s24067_s12 = inlined_call_operand.vmem [shape: bf16[32,32], index: 12, kind: input, shape index: {}]   ;;  %s24068_s13 = inlined_call_operand.vmem [shape: f32[1,32], index: 13, kind: input, shape index: {}]   ;;  %s24069_s14 = inlined_call_operand.vmem [shape: bf16[9,4,32], index: 14, kind: input, shape index: {}]   ;;  %s24070_s15 = inlined_call_operand.vmem [shape: f32[1,32], index: 15, kind: input, shape index: {}]   ;;  %s24071_s16 = inlined_call_operand.vmem [shape: bf16[32,32], index: 16, kind: input, shape index: {}]   ;;  %s24072_s17 = inlined_call_operand.vmem [shape: f32[1,32], index: 17, kind: input, shape index: {}]   ;;  %s24073_s18 = inlined_call_operand.vmem [shape: bf16[32,64], index: 18, kind: input, shape index: {}]   ;;  %s24074_s19 = inlined_call_operand.vmem [shape: f32[1,64], index: 19, kind: input, shape index: {}]   ;;  %s24075_s20 = inlined_call_operand.vmem [shape: bf16[32,32], index: 20, kind: input, shape index: {}]   ;;  %s24076_s21 = inlined_call_operand.vmem [shape: f32[1,32], index: 21, kind: input, shape index: {}]   ;;  %s24077_s22 = inlined_call_operand.vmem [shape: bf16[9,32,4], index: 22, kind: input, shape index: {}]   ;;  %s24078_s23 = inlined_call_operand.vmem [shape: f32[1,4], index: 23, kind: input, shape index: {}]   ;;  %s24079_s24 = inlined_call_operand.vmem [shape: f32[2,256,4], index: 24, kind: output, shape index: {}]  }
   0x1   :  { %24101 = sst [smem:[#allocation21_spill]] %s24055_s0 }
   0x2   :  { %24102 = sst [smem:[#allocation22_spill]] %s24056_s1 }
   0x3   :  { %24103 = sst [smem:[#allocation23_spill]] %s24057_s2 }
   0x4   :  { %24104 = sst [smem:[#allocation24_spill]] %s24058_s3 }
   0x5   :  { %24105 = sst [smem:[#allocation25_spill]] %s24059_s4 }
   0x6   :  { %24106 = sst [smem:[#allocation26_spill]] %s24060_s5  ;;  %s20290_s5 = smov 0  }
   0x7   :  { %24107 = sst [smem:[#allocation27_spill]] %s24061_s6 }
   0x8   :  { %24108 = sst [smem:[#allocation28_spill]] %s24062_s7 }
   0x9   :  { %24109 = sst [smem:[#allocation29_spill]] %s24063_s8 }
   0xa LB: > { %s14346_s26 = sadd.s32 4294967295, %s20159_s5   ;;  %p14350_p0 = scmp.ge.s32.totalorder %s20159_s5, 1  ;;  %s20159_s5 = sphi %s20290_s5, %s34_s5  }
   0xb   : > { %p689_p1 = scmp.lt.s32.totalorder %s20159_s5, 3 }
   0xd   : > { %p690_p2 = pnand %p14350_p0, %p689_p1 }
   0xf   : > { %693 = sbr.rel (%p690_p2) target bundleno = 4896 (0x1320), region = 116 }
  0x16   : > { %vm1017_vm0 = vcmask 1042432   ;;  %vm1018_vm1 = vcmask 1043456   ;;  %s24110_s6 = sld [smem:[#allocation25_spill]]  ;;  %p767_p3 = scmp.lt.s32.totalorder %s14346_s26, 1  ;;  %v20161_v1 = vmov 65535   ;;  %vm790_vm2 = vcmask 392192  }
  0x17   : > { %v1019_v2 = vsel %vm1017_vm0, 4294967295, %v20161_v1  ;;  %vm793_vm3 = vcmask 386048   ;;  %v20162_v5 = vmov 0.0   ;;  %vm879_vm4 = vcmask 56320   ;;  %s24111_s3 = sld [smem:[#allocation21_spill]]  ;;  %s24112_s2 = sld [smem:[#allocation27_spill]] }
  0x18   : > { %v20307_v4 = vsel %vm1018_vm1, %v1019_v2, 0  ;;  %s24161_s26 = smov (!%p767_p3, %s14346_s26), 1  ;;  %798 = vst.msk [vmem:[#allocation2 + $0x30] sm:$0xff] %vm790_vm2, %v20162_v5  ;;  %799 = vst.msk [vmem:[#allocation2 + $0x38] sm:$0xff] %vm790_vm2, %v20162_v5  ;;  %s24113_s27 = sld [smem:[#allocation26_spill]]  ;;  %vm8191_vm5 = vcmask 31744  }
  0x19   : > { %800 = vst.msk [vmem:[#allocation2 + $0x40] sm:$0x3] %vm793_vm3, %v20162_v5  ;;  %794 = vst.msk [vmem:[#allocation2 + $0x10] sm:$0x3] %vm793_vm3, %v20162_v5  ;;  %s20427_s0 = sshll.u32 %s24161_s26, 8  ;;  %s24114_s1 = sld [smem:[#allocation29_spill]] }
  0x1a   : > { %791 = vst.msk [vmem:[#allocation2] sm:$0xff] %vm790_vm2, %v20162_v5  ;;  %792 = vst.msk [vmem:[#allocation2 + $0x8] sm:$0xff] %vm790_vm2, %v20162_v5  ;;  %s24115_s4 = sld [smem:[#allocation28_spill]]  ;;  %vm8329_vm6 = vcmask 1041408   ;;  %s24117_s28 = sld [smem:[#allocation24_spill]]  ;;  %vm20163_vm7 = vmmov 0  }
  0x1b   : > { %795 = vst.msk [vmem:[#allocation2 + $0x18] sm:$0xff] %vm790_vm2, %v20162_v5  ;;  %796 = vst.msk [vmem:[#allocation2 + $0x20] sm:$0xff] %vm790_vm2, %v20162_v5  ;;  %vm8047_vm8 = vcmask 261120   ;;  %vm10918_vm9 = vcmask 64512  }
  0x1c   : > { %v20301_v0 = vld [vmem:[%s24110_s6 + $0x18] sm:$0xf]  ;;  %v14408_v3 = vld [vmem:[%s24110_s6 + $0x4] sm:$0xf]  ;;  %797 = vst.msk [vmem:[#allocation2 + $0x28] sm:$0x3] %vm793_vm3, %v20162_v5 }
  0x1d   : > { %801 = vst.msk [vmem:[#allocation2 + $0x48] sm:$0xff] %vm790_vm2, %v20162_v5  ;;  %802 = vst.msk [vmem:[#allocation2 + $0x50] sm:$0xff] %vm790_vm2, %v20162_v5  ;;  %v20421_v6 = vand.u32 %v20301_v0, %v20307_v4  ;;  %v20424_v7 = vand.u32 %v14408_v3, %v20307_v4  ;;  %s20434_s25 = scalar_lea.vmem %s24111_s3, %s20427_s0  ;;  %v14425_v26 = vld [vmem:[%s24110_s6 + $0x10] sm:$0xf]  ;;  %s20164_s3 = smov 96  }
  0x1e   : > { %803 = vst.msk [vmem:[#allocation2 + $0x58] sm:$0x3] %vm793_vm3, %v20162_v5  ;;  %806 = vst.msk [vmem:[#allocation2 + $0x70] sm:$0x3] %vm793_vm3, %v20162_v5  ;;  %v848_v8 = vld [vmem:[%s20434_s25 + $0x10] sm:$0xff]  ;;  %v849_v9 = vld [vmem:[%s20434_s25 + $0x18] sm:$0xff]  ;;  %v20496_v42 = vand.u32 %v14425_v26, %v20307_v4 }
  0x1f   : > { %804 = vst.msk [vmem:[#allocation2 + $0x60] sm:$0xff] %vm790_vm2, %v20162_v5  ;;  %805 = vst.msk [vmem:[#allocation2 + $0x68] sm:$0xff] %vm790_vm2, %v20162_v5  ;;  %16438 = vmatprep.subr.bf16.mxu0 %v20421_v6  ;;  %v850_v10 = vld [vmem:[%s20434_s25 + $0x20] sm:$0xff]  ;;  %v851_v11 = vld [vmem:[%s20434_s25 + $0x28] sm:$0xff] }
  0x20   : > { %807 = vst.msk [vmem:[#allocation2 + $0x78] sm:$0xff] %vm790_vm2, %v20162_v5  ;;  %808 = vst.msk [vmem:[#allocation2 + $0x80] sm:$0xff] %vm790_vm2, %v20162_v5  ;;  %16439 = vmatpush3.bf16.msra.mxu0 %v20421_v6  ;;  %v852_v12 = vld [vmem:[%s20434_s25 + $0x30] sm:$0xff]  ;;  %v853_v13 = vld [vmem:[%s20434_s25 + $0x38] sm:$0xff]  ;;  %s783_s29 = scalar_lea.vmem %s24117_s28, %s24161_s26 }
  0x21   : > { %809 = vst.msk [vmem:[#allocation2 + $0x88] sm:$0x3] %vm793_vm3, %v20162_v5  ;;  %812 = vst.msk [vmem:[#allocation2 + $0xa0] sm:$0x3] %vm793_vm3, %v20162_v5  ;;  %16472 = vmatprep.subr.bf16.mxu0 %v20424_v7  ;;  %v854_v14 = vld [vmem:[%s20434_s25 + $0x40] sm:$0xff]  ;;  %v855_v15 = vld [vmem:[%s20434_s25 + $0x48] sm:$0xff] }
  0x22   : > { %810 = vst.msk [vmem:[#allocation2 + $0x90] sm:$0xff] %vm790_vm2, %v20162_v5  ;;  %811 = vst.msk [vmem:[#allocation2 + $0x98] sm:$0xff] %vm790_vm2, %v20162_v5  ;;  %v856_v16 = vld [vmem:[%s20434_s25 + $0x50] sm:$0xff]  ;;  %v857_v17 = vld [vmem:[%s20434_s25 + $0x58] sm:$0xff] }
  0x23   : > { %813 = vst.msk [vmem:[#allocation2 + $0xa8] sm:$0xff] %vm790_vm2, %v20162_v5  ;;  %814 = vst.msk [vmem:[#allocation2 + $0xb0] sm:$0xff] %vm790_vm2, %v20162_v5  ;;  %v858_v18 = vld [vmem:[%s20434_s25 + $0x60] sm:$0xff]  ;;  %v859_v19 = vld [vmem:[%s20434_s25 + $0x68] sm:$0xff] }
  0x24   : > { %815 = vst.msk [vmem:[#allocation2 + $0xb8] sm:$0x3] %vm793_vm3, %v20162_v5  ;;  %818 = vst.msk [vmem:[#allocation2 + $0xd0] sm:$0x3] %vm793_vm3, %v20162_v5  ;;  %v860_v20 = vld [vmem:[%s20434_s25 + $0x70] sm:$0xff]  ;;  %v861_v21 = vld [vmem:[%s20434_s25 + $0x78] sm:$0xff] }
  0x25   : > { %816 = vst.msk [vmem:[#allocation2 + $0xc0] sm:$0xff] %vm790_vm2, %v20162_v5  ;;  %817 = vst.msk [vmem:[#allocation2 + $0xc8] sm:$0xff] %vm790_vm2, %v20162_v5  ;;  %v862_v22 = vld [vmem:[%s20434_s25 + $0x80] sm:$0xff]  ;;  %v863_v23 = vld [vmem:[%s20434_s25 + $0x88] sm:$0xff] }
  0x26   : > { %819 = vst.msk [vmem:[#allocation2 + $0xd8] sm:$0xff] %vm790_vm2, %v20162_v5  ;;  %820 = vst.msk [vmem:[#allocation2 + $0xe0] sm:$0xff] %vm790_vm2, %v20162_v5  ;;  %v864_v24 = vld [vmem:[%s20434_s25 + $0x90] sm:$0xff]  ;;  %v865_v25 = vld [vmem:[%s20434_s25 + $0x98] sm:$0xff] }
  0x27   : > { %821 = vst.msk [vmem:[#allocation2 + $0xe8] sm:$0x3] %vm793_vm3, %v20162_v5  ;;  %824 = vst.msk [vmem:[#allocation2 + $0x100] sm:$0x3] %vm793_vm3, %v20162_v5  ;;  %v866_v27 = vld [vmem:[%s20434_s25 + $0xa0] sm:$0xff]  ;;  %v867_v28 = vld [vmem:[%s20434_s25 + $0xa8] sm:$0xff] }
  0x28   : > { %822 = vst.msk [vmem:[#allocation2 + $0xf0] sm:$0xff] %vm790_vm2, %v20162_v5  ;;  %823 = vst.msk [vmem:[#allocation2 + $0xf8] sm:$0xff] %vm790_vm2, %v20162_v5  ;;  %v868_v29 = vld [vmem:[%s20434_s25 + $0xb0] sm:$0xff]  ;;  %v869_v30 = vld [vmem:[%s20434_s25 + $0xb8] sm:$0xff] }
  0x29   : > { %825 = vst.msk [vmem:[#allocation2 + $0x108] sm:$0xff] %vm790_vm2, %v20162_v5  ;;  %826 = vst.msk [vmem:[#allocation2 + $0x110] sm:$0xff] %vm790_vm2, %v20162_v5  ;;  %v870_v31 = vld [vmem:[%s20434_s25 + $0xc0] sm:$0xff]  ;;  %v871_v32 = vld [vmem:[%s20434_s25 + $0xc8] sm:$0xff] }
  0x2a   : > { %827 = vst.msk [vmem:[#allocation2 + $0x118] sm:$0x3] %vm793_vm3, %v20162_v5  ;;  %830 = vst.msk [vmem:[#allocation2 + $0x130] sm:$0x3] %vm793_vm3, %v20162_v5  ;;  %v846_v48 = vld [vmem:[%s20434_s25] sm:$0xff]  ;;  %v847_v50 = vld [vmem:[%s20434_s25 + $0x8] sm:$0xff] }
  0x2b   : > { %828 = vst.msk [vmem:[#allocation2 + $0x120] sm:$0xff] %vm790_vm2, %v20162_v5  ;;  %829 = vst.msk [vmem:[#allocation2 + $0x128] sm:$0xff] %vm790_vm2, %v20162_v5  ;;  %v872_v57 = vld [vmem:[%s20434_s25 + $0xd0] sm:$0xff]  ;;  %v873_v58 = vld [vmem:[%s20434_s25 + $0xd8] sm:$0xff] }
  0x2c   : > { %831 = vst.msk [vmem:[#allocation2 + $0x138] sm:$0xff] %vm790_vm2, %v20162_v5  ;;  %832 = vst.msk [vmem:[#allocation2 + $0x140] sm:$0xff] %vm790_vm2, %v20162_v5  ;;  %v874_v59 = vld [vmem:[%s20434_s25 + $0xe0] sm:$0xff]  ;;  %v875_v62 = vld [vmem:[%s20434_s25 + $0xe8] sm:$0xff] }
  0x2d   : > { %833 = vst.msk [vmem:[#allocation2 + $0x148] sm:$0x3] %vm793_vm3, %v20162_v5  ;;  %836 = vst.msk [vmem:[#allocation2 + $0x160] sm:$0x3] %vm793_vm3, %v20162_v5 }
  0x2e   : > { %834 = vst.msk [vmem:[#allocation2 + $0x150] sm:$0xff] %vm790_vm2, %v20162_v5  ;;  %835 = vst.msk [vmem:[#allocation2 + $0x158] sm:$0xff] %vm790_vm2, %v20162_v5 }
  0x2f   : > { %837 = vst.msk [vmem:[#allocation2 + $0x168] sm:$0xff] %vm790_vm2, %v20162_v5  ;;  %838 = vst.msk [vmem:[#allocation2 + $0x170] sm:$0xff] %vm790_vm2, %v20162_v5 }
  0x30   : > { %839 = vst.msk [vmem:[#allocation2 + $0x178] sm:$0x3] %vm793_vm3, %v20162_v5  ;;  %842 = vst.msk [vmem:[#allocation2 + $0x190] sm:$0x3] %vm793_vm3, %v20162_v5 }
  0x31   : > { %840 = vst.msk [vmem:[#allocation2 + $0x180] sm:$0xff] %vm790_vm2, %v20162_v5  ;;  %841 = vst.msk [vmem:[#allocation2 + $0x188] sm:$0xff] %vm790_vm2, %v20162_v5 }
  0x32   : > { %843 = vst.msk [vmem:[#allocation2 + $0x198] sm:$0xff] %vm790_vm2, %v20162_v5  ;;  %844 = vst.msk [vmem:[#allocation2 + $0x1a0] sm:$0xff] %vm790_vm2, %v20162_v5 }
  0x33   : > { %845 = vst.msk [vmem:[#allocation2 + $0x1a8] sm:$0x3] %vm793_vm3, %v20162_v5 }
  0x34   : > { %882 = vst.msk [vmem:[#allocation2 + $0x31] sm:$0xff] %vm879_vm4, %v848_v8  ;;  %883 = vst.msk [vmem:[#allocation2 + $0x39] sm:$0xff] %vm879_vm4, %v849_v9 }
  0x35   : > { %884 = vst.msk [vmem:[#allocation2 + $0x49] sm:$0xff] %vm879_vm4, %v850_v10  ;;  %885 = vst.msk [vmem:[#allocation2 + $0x51] sm:$0xff] %vm879_vm4, %v851_v11 }
  0x36   : > { %886 = vst.msk [vmem:[#allocation2 + $0x61] sm:$0xff] %vm879_vm4, %v852_v12  ;;  %887 = vst.msk [vmem:[#allocation2 + $0x69] sm:$0xff] %vm879_vm4, %v853_v13  ;;  %v876_v12 = vld [vmem:[%s20434_s25 + $0xf0] sm:$0xff]  ;;  %v877_v13 = vld [vmem:[%s20434_s25 + $0xf8] sm:$0xff]  ;;  %s14355_s25 = sshll.u32 %s24161_s26, 3 }
  0x37   : > { %888 = vst.msk [vmem:[#allocation2 + $0x79] sm:$0xff] %vm879_vm4, %v854_v14  ;;  %889 = vst.msk [vmem:[#allocation2 + $0x81] sm:$0xff] %vm879_vm4, %v855_v15 }
  0x38   : > { %890 = vst.msk [vmem:[#allocation2 + $0x91] sm:$0xff] %vm879_vm4, %v856_v16  ;;  %891 = vst.msk [vmem:[#allocation2 + $0x99] sm:$0xff] %vm879_vm4, %v857_v17  ;;  %v1553_v16 = vld [vmem:[#allocation2 + $0x1] sm:$0xff]  ;;  %v1554_v17 = vld [vmem:[#allocation2 + $0x9] sm:$0xff] }
  0x39   : > { %892 = vst.msk [vmem:[#allocation2 + $0xa9] sm:$0xff] %vm879_vm4, %v858_v18  ;;  %893 = vst.msk [vmem:[#allocation2 + $0xb1] sm:$0xff] %vm879_vm4, %v859_v19  ;;  %v1589_v19 = vpack.c.bf16 %v1554_v17, %v1553_v16 }
  0x3a   : > { %894 = vst.msk [vmem:[#allocation2 + $0xc1] sm:$0xff] %vm879_vm4, %v860_v20  ;;  %895 = vst.msk [vmem:[#allocation2 + $0xc9] sm:$0xff] %vm879_vm4, %v861_v21 }
  0x3b   : > { %896 = vst.msk [vmem:[#allocation2 + $0xd9] sm:$0xff] %vm879_vm4, %v862_v22  ;;  %897 = vst.msk [vmem:[#allocation2 + $0xe1] sm:$0xff] %vm879_vm4, %v863_v23  ;;  %v916_v33 = vld [vmem:[#allocation2 + $0x30] sm:$0xff]  ;;  %v917_v34 = vld [vmem:[#allocation2 + $0x38] sm:$0xff] }
  0x3c   : > { %898 = vst.msk [vmem:[#allocation2 + $0xf1] sm:$0xff] %vm879_vm4, %v864_v24  ;;  %899 = vst.msk [vmem:[#allocation2 + $0xf9] sm:$0xff] %vm879_vm4, %v865_v25  ;;  %v918_v35 = vld [vmem:[#allocation2 + $0x48] sm:$0xff]  ;;  %v20489_v36 = vpack.c.bf16 %v917_v34, %v916_v33  ;;  %v919_v37 = vld [vmem:[#allocation2 + $0x50] sm:$0xff] }
  0x3d   : > { %900 = vst.msk [vmem:[#allocation2 + $0x109] sm:$0xff] %vm879_vm4, %v866_v27  ;;  %901 = vst.msk [vmem:[#allocation2 + $0x111] sm:$0xff] %vm879_vm4, %v867_v28  ;;  %v920_v38 = vld [vmem:[#allocation2 + $0x60] sm:$0xff]  ;;  %v921_v39 = vld [vmem:[#allocation2 + $0x68] sm:$0xff]  ;;  %v20491_v40 = vpack.c.bf16 %v919_v37, %v918_v35 }
  0x3e   : > { %902 = vst.msk [vmem:[#allocation2 + $0x121] sm:$0xff] %vm879_vm4, %v868_v29  ;;  %903 = vst.msk [vmem:[#allocation2 + $0x129] sm:$0xff] %vm879_vm4, %v869_v30  ;;  %v20493_v41 = vpack.c.bf16 %v921_v39, %v920_v38  ;;  %16440 = vmatprep.mubr.msk.bf16.mxu0 %vm879_vm4, %v20489_v36  ;;  %v922_v43 = vld [vmem:[#allocation2 + $0x78] sm:$0xff]  ;;  %v923_v44 = vld [vmem:[#allocation2 + $0x80] sm:$0xff] }
  0x3f   : > { %904 = vst.msk [vmem:[#allocation2 + $0x139] sm:$0xff] %vm879_vm4, %v870_v31  ;;  %905 = vst.msk [vmem:[#allocation2 + $0x141] sm:$0xff] %vm879_vm4, %v871_v32  ;;  %16441 = vmatmul.mubr.msk.bf16.vlgmr.msra.gmra.mrb[0].mxu0 %vm879_vm4, %v20491_v40  ;;  %v924_v45 = vld [vmem:[#allocation2 + $0x90] sm:$0xff]  ;;  %v925_v46 = vld [vmem:[#allocation2 + $0x98] sm:$0xff]  ;;  %v20506_v47 = vpack.c.bf16 %v923_v44, %v922_v43 }
  0x40   : > { %16444 = vmatprep.mubr.msk.bf16.mxu0 %vm879_vm4, %v20493_v41  ;;  %16473 = vmatpush3.bf16.msra.mxu0 %v20424_v7  ;;  %v20509_v49 = vpack.c.bf16 %v925_v46, %v924_v45  ;;  %880 = vst.msk [vmem:[#allocation2 + $0x19] sm:$0xff] %vm879_vm4, %v846_v48  ;;  %881 = vst.msk [vmem:[#allocation2 + $0x21] sm:$0xff] %vm879_vm4, %v847_v50  ;;  %v926_v51 = vld [vmem:[#allocation2 + $0xa8] sm:$0xff]  ;;  %v927_v52 = vld [vmem:[#allocation2 + $0xb0] sm:$0xff] }
  0x41   : > { %16506 = vmatprep.subr.bf16.mxu0 %v20496_v42  ;;  %v928_v53 = vld [vmem:[#allocation2 + $0xc0] sm:$0xff]  ;;  %v929_v54 = vld [vmem:[#allocation2 + $0xc8] sm:$0xff]  ;;  %v20518_v55 = vpack.c.bf16 %v927_v52, %v926_v51  ;;  %906 = vst.msk [vmem:[#allocation2 + $0x151] sm:$0xff] %vm879_vm4, %v872_v57  ;;  %907 = vst.msk [vmem:[#allocation2 + $0x159] sm:$0xff] %vm879_vm4, %v873_v58 }
  0x42   : > { %v20520_v56 = vpack.c.bf16 %v929_v54, %v928_v53  ;;  %v930_v60 = vld [vmem:[#allocation2 + $0xd8] sm:$0xff]  ;;  %v931_v61 = vld [vmem:[#allocation2 + $0xe0] sm:$0xff]  ;;  %908 = vst.msk [vmem:[#allocation2 + $0x169] sm:$0xff] %vm879_vm4, %v874_v59  ;;  %909 = vst.msk [vmem:[#allocation2 + $0x171] sm:$0xff] %vm879_vm4, %v875_v62 }
  0x43   : > { %v932_v63 = vld [vmem:[#allocation2 + $0xf0] sm:$0xff]  ;;  %v933_v0 = vld [vmem:[#allocation2 + $0xf8] sm:$0xff]  ;;  %v20534_v1 = vpack.c.bf16 %v931_v61, %v930_v60  ;;  %910 = vst.msk [vmem:[#allocation2 + $0x181] sm:$0xff] %vm879_vm4, %v876_v12  ;;  %911 = vst.msk [vmem:[#allocation2 + $0x189] sm:$0xff] %vm879_vm4, %v877_v13 }
  0x44   : > { %v20536_v2 = vpack.c.bf16 %v933_v0, %v932_v63  ;;  %v934_v3 = vld [vmem:[#allocation2 + $0x108] sm:$0xff]  ;;  %v935_v7 = vld [vmem:[#allocation2 + $0x110] sm:$0xff]  ;;  %v1558_v23 = vld [vmem:[#allocation2 + $0x39] sm:$0xff] }
  0x45   : > { %v936_v8 = vld [vmem:[#allocation2 + $0x120] sm:$0xff]  ;;  %v937_v9 = vld [vmem:[#allocation2 + $0x128] sm:$0xff]  ;;  %v20542_v10 = vpack.c.bf16 %v935_v7, %v934_v3  ;;  %v1557_v22 = vld [vmem:[#allocation2 + $0x31] sm:$0xff] }
  0x46   : > { %v20544_v11 = vpack.c.bf16 %v937_v9, %v936_v8  ;;  %v938_v14 = vld [vmem:[#allocation2 + $0x138] sm:$0xff]  ;;  %v939_v15 = vld [vmem:[#allocation2 + $0x140] sm:$0xff]  ;;  %v20564_v26 = vpack.c.bf16 %v1558_v23, %v1557_v22  ;;  %v1559_v28 = vld [vmem:[#allocation2 + $0x49] sm:$0xff] }
  0x47   : > { %16445 = vmatmul.mubr.msk.bf16.gmra.mrb[4].mxu0 %vm879_vm4, %v20506_v47  ;;  %v20554_v18 = vpack.c.bf16 %v939_v15, %v938_v14  ;;  %v1555_v20 = vld [vmem:[#allocation2 + $0x19] sm:$0xff]  ;;  %v1556_v21 = vld [vmem:[#allocation2 + $0x21] sm:$0xff]  ;;  %v1560_v29 = vld [vmem:[#allocation2 + $0x51] sm:$0xff] }
  0x48   : > { %16448 = vmatprep.mubr.msk.bf16.mxu0 %vm879_vm4, %v20509_v49  ;;  %v14442_v24 = vld [vmem:[%s24110_s6 + $0x1c] sm:$0xf]  ;;  %v20562_v25 = vpack.c.bf16 %v1556_v21, %v1555_v20  ;;  %v1561_v30 = vld [vmem:[#allocation2 + $0x61] sm:$0xff]  ;;  %v1562_v31 = vld [vmem:[#allocation2 + $0x69] sm:$0xff]  ;;  %v20575_v32 = vpack.c.bf16 %v1560_v29, %v1559_v28 }
  0x49   : > { %v20567_v27 = vand.u32 %v14442_v24, %v20307_v4  ;;  %v20577_v33 = vpack.c.bf16 %v1562_v31, %v1561_v30  ;;  %v1563_v34 = vld [vmem:[#allocation2 + $0x79] sm:$0xff]  ;;  %v1564_v35 = vld [vmem:[#allocation2 + $0x81] sm:$0xff]  ;;  %v1565_v37 = vld [vmem:[#allocation2 + $0x91] sm:$0xff] }
  0x4a   : > { %v1566_v38 = vld [vmem:[#allocation2 + $0x99] sm:$0xff]  ;;  %v20583_v39 = vpack.c.bf16 %v1564_v35, %v1563_v34  ;;  %v1568_v44 = vld [vmem:[#allocation2 + $0xb1] sm:$0xff]  ;;  %v1569_v45 = vld [vmem:[#allocation2 + $0xc1] sm:$0xff] }
  0x4b   : > { %v20585_v43 = vpack.c.bf16 %v1566_v38, %v1565_v37  ;;  %v1570_v46 = vld [vmem:[#allocation2 + $0xc9] sm:$0xff]  ;;  %v914_v53 = vld [vmem:[#allocation2 + $0x18] sm:$0xff]  ;;  %v915_v54 = vld [vmem:[#allocation2 + $0x20] sm:$0xff] }
  0x4c   : > { %v20593_v50 = vpack.c.bf16 %v1570_v46, %v1569_v45  ;;  %v14358_v51 = vld [vmem:[%s24110_s6 + $0xc] sm:$0xf]  ;;  %v1571_v57 = vld [vmem:[#allocation2 + $0xd9] sm:$0xff]  ;;  %v1572_v58 = vld [vmem:[#allocation2 + $0xe1] sm:$0xff]  ;;  %v20603_v59 = vpack.c.bf16 %v915_v54, %v914_v53 }
  0x4d   : > { %v1022_v52 = vand.u32 %v14358_v51, %v20307_v4  ;;  %v1573_v60 = vld [vmem:[#allocation2 + $0xf1] sm:$0xff]  ;;  %v1574_v61 = vld [vmem:[#allocation2 + $0xf9] sm:$0xff]  ;;  %v20607_v62 = vpack.c.bf16 %v1572_v58, %v1571_v57  ;;  %v1575_v0 = vld [vmem:[#allocation2 + $0x109] sm:$0xff] }
  0x4e   : > { %16372 = vmatprep.mubr.msk.bf16.mxu1 %vm879_vm4, %v20603_v59  ;;  %v20609_v63 = vpack.c.bf16 %v1574_v61, %v1573_v60  ;;  %v1576_v3 = vld [vmem:[#allocation2 + $0x111] sm:$0xff]  ;;  %v1577_v7 = vld [vmem:[#allocation2 + $0x121] sm:$0xff]  ;;  %v1578_v8 = vld [vmem:[#allocation2 + $0x129] sm:$0xff] }
  0x4f   : > { %16449 = vmatmul.mubr.msk.bf16.gmra.mrb[8].mxu0 %vm879_vm4, %v20518_v55  ;;  %16370 = vmatprep.subr.bf16.mxu1 %v1022_v52  ;;  %v20619_v9 = vpack.c.bf16 %v1576_v3, %v1575_v0  ;;  %v20621_v12 = vpack.c.bf16 %v1578_v8, %v1577_v7  ;;  %v1579_v13 = vld [vmem:[#allocation2 + $0x139] sm:$0xff]  ;;  %v1580_v14 = vld [vmem:[#allocation2 + $0x141] sm:$0xff]  ;;  %v1581_v15 = vld [vmem:[#allocation2 + $0x151] sm:$0xff] }
  0x50   : > { %16452 = vmatprep.mubr.msk.bf16.mxu0 %vm879_vm4, %v20520_v56  ;;  %16371 = vmatpush3.bf16.msra.mxu1 %v1022_v52  ;;  %v1582_v16 = vld [vmem:[#allocation2 + $0x159] sm:$0xff]  ;;  %v20631_v17 = vpack.c.bf16 %v1580_v14, %v1579_v13  ;;  %v1583_v20 = vld [vmem:[#allocation2 + $0x169] sm:$0xff]  ;;  %v1584_v21 = vld [vmem:[#allocation2 + $0x171] sm:$0xff] }
  0x51   : > { %v20643_v22 = vpack.c.bf16 %v1584_v21, %v1583_v20  ;;  %v14459_v23 = vld [vmem:[%s24110_s6 + $0x8] sm:$0xf]  ;;  %v941_v28 = vld [vmem:[#allocation2 + $0x158] sm:$0xff]  ;;  %v943_v30 = vld [vmem:[#allocation2 + $0x170] sm:$0xff] }
  0x52   : > { %v2360_v24 = vand.u32 %v14459_v23, %v20307_v4  ;;  %v944_v31 = vld [vmem:[#allocation2 + $0x180] sm:$0xff]  ;;  %v945_v35 = vld [vmem:[#allocation2 + $0x188] sm:$0xff]  ;;  %v2262_v54 = vld [vmem:[#allocation2 + $0x52] sm:$0xff] }
  0x53   : > { %16373 = vmatmul.mubr.msk.bf16.vlgmr.msra.gmra.mrb[0].mxu1 %vm879_vm4, %v20489_v36  ;;  %v964_v37 = vpack.c.bf16 %v945_v35, %v944_v31  ;;  %v966_v38 = vld [vmem:[%s24110_s6] sm:$0xf]  ;;  %v913_v45 = vld [vmem:[#allocation2 + $0x8] sm:$0xff]  ;;  %v2270_v8 = vld [vmem:[#allocation2 + $0xb2] sm:$0xff] }
  0x54   : > { %16376 = vmatprep.mubr.msk.bf16.mxu1 %vm879_vm4, %v20491_v40  ;;  %v2261_v53 = vld [vmem:[#allocation2 + $0x4a] sm:$0xff]  ;;  %v2263_v57 = vld [vmem:[#allocation2 + $0x62] sm:$0xff]  ;;  %v2278_v23 = vld [vmem:[#allocation2 + $0x112] sm:$0xff] }
  0x55   : > { %v2264_v58 = vld [vmem:[#allocation2 + $0x6a] sm:$0xff]  ;;  %v2266_v61 = vld [vmem:[#allocation2 + $0x82] sm:$0xff]  ;;  %v2283_v31 = vld [vmem:[#allocation2 + $0x152] sm:$0xff] }
  0x56   : > { %v20786_v60 = vpack.c.bf16 %v2264_v58, %v2263_v57  ;;  %v2269_v7 = vld [vmem:[#allocation2 + $0xaa] sm:$0xff] }
  0x57   : > { %16453 = vmatmul.mubr.msk.bf16.gmra.mrb[12].mxu0 %vm879_vm4, %v20534_v1  ;;  %v20800_v13 = vpack.c.bf16 %v2270_v8, %v2269_v7 }
  0x58   : > { %16456 = vmatprep.mubr.msk.bf16.mxu0 %vm879_vm4, %v20536_v2 }
  0x5b   : > { %16377 = vmatmul.mubr.msk.bf16.gmra.mrb[4].mxu1 %vm879_vm4, %v20493_v41 }
  0x5c   : > { %16380 = vmatprep.mubr.msk.bf16.mxu1 %vm879_vm4, %v20506_v47 }
  0x5f   : > { %16457 = vmatmul.mubr.msk.bf16.gmra.mrb[16].mxu0 %vm879_vm4, %v20542_v10 }
  0x60   : > { %16460 = vmatprep.mubr.msk.bf16.mxu0 %vm879_vm4, %v20544_v11 }
  0x63   : > { %16381 = vmatmul.mubr.msk.bf16.gmra.mrb[8].mxu1 %vm879_vm4, %v20509_v49 }
  0x64   : > { %16384 = vmatprep.mubr.msk.bf16.mxu1 %vm879_vm4, %v20518_v55 }
  0x67   : > { %16461 = vmatmul.mubr.msk.bf16.gmra.mrb[20].mxu0 %vm879_vm4, %v20554_v18 }
  0x68   : > { %16474 = vmatprep.mubr.msk.bf16.mxu0 %vm879_vm4, %v1589_v19  ;;  %v20633_v19 = vpack.c.bf16 %v1582_v16, %v1581_v15  ;;  %v2273_v15 = vld [vmem:[#allocation2 + $0xda] sm:$0xff]  ;;  %v2274_v16 = vld [vmem:[#allocation2 + $0xe2] sm:$0xff] }
  0x69   : > { %v20808_v20 = vpack.c.bf16 %v2274_v16, %v2273_v15  ;;  %v20967_v15 = vld [vmem:[%s24112_s2] sm:$0xff]  }
  0x6b   : > { %16385 = vmatmul.mubr.msk.bf16.gmra.mrb[12].mxu1 %vm879_vm4, %v20520_v56 }
  0x6c   : > { %16388 = vmatprep.mubr.msk.bf16.mxu1 %vm879_vm4, %v20534_v1 }
  0x6f   : > { %16475 = vmatmul.mubr.msk.bf16.vlgmr.msra.gmra.mrb[0].mxu0 %vm879_vm4, %v20562_v25 }
  0x70   : > { %16478 = vmatprep.mubr.msk.bf16.mxu0 %vm879_vm4, %v20564_v26  ;;  %16507 = vmatpush3.bf16.msra.mxu0 %v20496_v42  ;;  %v1567_v42 = vld [vmem:[#allocation2 + $0xa9] sm:$0xff] }
  0x71   : > { %16540 = vmatprep.subr.bf16.mxu0 %v20567_v27  ;;  %v20591_v48 = vpack.c.bf16 %v1568_v44, %v1567_v42  ;;  %v1189_v42 = vand.u32 %v20307_v4, %v966_v38  ;;  %v912_v44 = vld [vmem:[#allocation2] sm:$0xff]  ;;  %v2285_v38 = vld [vmem:[#allocation2 + $0x16a] sm:$0xff] }
  0x72   : > { %v948_v46 = vpack.c.bf16 %v913_v45, %v912_v44 }
  0x73   : > { %16389 = vmatmul.mubr.msk.bf16.gmra.mrb[16].mxu1 %vm879_vm4, %v20536_v2  ;;  %16404 = vmatprep.subr.bf16.mxu1 %v1189_v42 }
  0x74   : > { %16392 = vmatprep.mubr.msk.bf16.mxu1 %vm879_vm4, %v20542_v10  ;;  %16405 = vmatpush3.bf16.msra.mxu1 %v1189_v42  ;;  %v2286_v42 = vld [vmem:[#allocation2 + $0x172] sm:$0xff] }
  0x75   : > { %18154 = vmatprep.subr.bf16.mxu1 %v20421_v6  ;;  %v2306_v44 = vpack.c.bf16 %v2286_v42, %v2285_v38 }
  0x77   : > { %16479 = vmatmul.mubr.msk.bf16.gmra.mrb[4].mxu0 %vm879_vm4, %v20575_v32 }
  0x78   : > { %16482 = vmatprep.mubr.msk.bf16.mxu0 %vm879_vm4, %v20577_v33 }
  0x7b   : > { %16393 = vmatmul.mubr.msk.bf16.gmra.mrb[20].mxu1 %vm879_vm4, %v20544_v11 }
  0x7c   : > { %16396 = vmatprep.mubr.msk.bf16.mxu1 %vm879_vm4, %v20554_v18 }
  0x7f   : > { %16483 = vmatmul.mubr.msk.bf16.gmra.mrb[8].mxu0 %vm879_vm4, %v20583_v39 }
  0x80   : > { %16486 = vmatprep.mubr.msk.bf16.mxu0 %vm879_vm4, %v20585_v43 }
  0x87   : > { %16487 = vmatmul.mubr.msk.bf16.gmra.mrb[12].mxu0 %vm879_vm4, %v20591_v48 }
  0x88   : > { %16490 = vmatprep.mubr.msk.bf16.mxu0 %vm879_vm4, %v20593_v50 }
  0x8f   : > { %16491 = vmatmul.mubr.msk.bf16.gmra.mrb[16].mxu0 %vm879_vm4, %v20607_v62 }
  0x90   : > { %16494 = vmatprep.mubr.msk.bf16.mxu0 %vm879_vm4, %v20609_v63 }
  0x97   : > { %16495 = vmatmul.mubr.msk.bf16.gmra.mrb[20].mxu0 %vm879_vm4, %v20619_v9 }
  0x98   : > { %16498 = vmatprep.mubr.msk.bf16.mxu0 %vm879_vm4, %v20621_v12 }
  0x9f   : > { %16499 = vmatmul.mubr.msk.bf16.gmra.mrb[24].mxu0 %vm879_vm4, %v20631_v17 }
  0xa0   : > { %16502 = vmatprep.mubr.msk.bf16.mxu0 %vm879_vm4, %v20633_v19 }
  0xa7   : > { %16503 = vmatmul.mubr.msk.bf16.gmra.mrb[28].mxu0 %vm879_vm4, %v20643_v22 }
  0xa8   : > { %16508 = vmatprep.mubr.msk.bf16.mxu0 %vm879_vm4, %v20562_v25  ;;  %v940_v25 = vld [vmem:[#allocation2 + $0x150] sm:$0xff] }
  0xa9   : > { %v962_v29 = vpack.c.bf16 %v941_v28, %v940_v25  ;;  %v2280_v25 = vld [vmem:[#allocation2 + $0x12a] sm:$0xff] }
  0xab   : > { %16397 = vmatmul.mubr.msk.bf16.gmra.mrb[24].mxu1 %vm879_vm4, %v962_v29 }
  0xaf   : > { %16509 = vmatmul.mubr.msk.bf16.vlgmr.msra.gmra.mrb[0].mxu0 %vm879_vm4, %v20564_v26 }
  0xb0   : > { %16512 = vmatprep.mubr.msk.bf16.mxu0 %vm879_vm4, %v20575_v32  ;;  %16541 = vmatpush3.bf16.msra.mxu0 %v20567_v27  ;;  %v942_v27 = vld [vmem:[#allocation2 + $0x168] sm:$0xff] }
  0xb1   : > { %16574 = vmatprep.subr.bf16.mxu0 %v2360_v24  ;;  %v963_v34 = vpack.c.bf16 %v943_v30, %v942_v27  ;;  %v2281_v27 = vld [vmem:[#allocation2 + $0x13a] sm:$0xff]  ;;  %v2282_v30 = vld [vmem:[#allocation2 + $0x142] sm:$0xff] }
  0xb2   : > { %v20824_v35 = vpack.c.bf16 %v2282_v30, %v2281_v27 }
  0xb3   : > { %16400 = vmatprep.mubr.msk.bf16.mxu1 %vm879_vm4, %v963_v34 }
  0xb4   : > { %16401 = vmatmul.mubr.msk.bf16.gmra.mrb[28].mxu1 %vm879_vm4, %v964_v37 }
  0xb5   : > { %16406 = vmatprep.mubr.msk.bf16.mxu1 %vm879_vm4, %v948_v46  ;;  %v2287_v46 = vld [vmem:[#allocation2 + $0x182] sm:$0xff] }
  0xb7   : > { %16513 = vmatmul.mubr.msk.bf16.gmra.mrb[4].mxu0 %vm879_vm4, %v20577_v33 }
  0xb8   : > { %16516 = vmatprep.mubr.msk.bf16.mxu0 %vm879_vm4, %v20583_v39 }
  0xbc   : > { %16407 = vmatmul.mubr.msk.bf16.vlgmr.msra.gmra.mrb[0].mxu1 %vm879_vm4, %v20603_v59  ;;  %v20784_v59 = vpack.c.bf16 %v2262_v54, %v2261_v53 }
  0xbd   : > { %16410 = vmatprep.mubr.msk.bf16.mxu1 %vm879_vm4, %v20489_v36  ;;  %18155 = vmatpush3.bf16.msra.mxu1 %v20421_v6  ;;  %v1585_v6 = vld [vmem:[#allocation2 + $0x181] sm:$0xff]  ;;  %v1586_v36 = vld [vmem:[#allocation2 + $0x189] sm:$0xff] }
  0xbf   : > { %16517 = vmatmul.mubr.msk.bf16.gmra.mrb[8].mxu0 %vm879_vm4, %v20585_v43 }
  0xc0   : > { %16520 = vmatprep.mubr.msk.bf16.mxu0 %vm879_vm4, %v20591_v48 }
  0xc4   : > { %16411 = vmatmul.mubr.msk.bf16.gmra.mrb[4].mxu1 %vm879_vm4, %v20491_v40  ;;  %v1605_v40 = vpack.c.bf16 %v1586_v36, %v1585_v6  ;;  %v2288_v6 = vld [vmem:[#allocation2 + $0x18a] sm:$0xff] }
  0xc5   : > { %16414 = vmatprep.mubr.msk.bf16.mxu1 %vm879_vm4, %v20493_v41  ;;  %v14476_v41 = vld [vmem:[%s24110_s6 + $0x14] sm:$0xf] }
  0xc7   : > { %16521 = vmatmul.mubr.msk.bf16.gmra.mrb[12].mxu0 %vm879_vm4, %v20593_v50 }
  0xc8   : > { %16524 = vmatprep.mubr.msk.bf16.mxu0 %vm879_vm4, %v20607_v62 }
  0xcc   : > { %16415 = vmatmul.mubr.msk.bf16.gmra.mrb[8].mxu1 %vm879_vm4, %v20506_v47  ;;  %v2561_v47 = vand.u32 %v14476_v41, %v20307_v4 }
  0xcd   : > { %16418 = vmatprep.mubr.msk.bf16.mxu1 %vm879_vm4, %v20509_v49  ;;  %v946_v49 = vld [vmem:[#allocation2 + $0x198] sm:$0xff] }
  0xcf   : > { %16525 = vmatmul.mubr.msk.bf16.gmra.mrb[16].mxu0 %vm879_vm4, %v20609_v63 }
  0xd0   : > { %16528 = vmatprep.mubr.msk.bf16.mxu0 %vm879_vm4, %v20619_v9 }
  0xd4   : > { %16419 = vmatmul.mubr.msk.bf16.gmra.mrb[12].mxu1 %vm879_vm4, %v20518_v55  ;;  %v947_v55 = vld [vmem:[#allocation2 + $0x1a0] sm:$0xff] }
  0xd5   : > { %16422 = vmatprep.mubr.msk.bf16.mxu1 %vm879_vm4, %v20520_v56  ;;  %v20762_v56 = vpack.c.bf16 %v947_v55, %v946_v49 }
  0xd7   : > { %16529 = vmatmul.mubr.msk.bf16.gmra.mrb[20].mxu0 %vm879_vm4, %v20621_v12 }
  0xd8   : > { %16532 = vmatprep.mubr.msk.bf16.mxu0 %vm879_vm4, %v20631_v17 }
  0xdc   : > { %16423 = vmatmul.mubr.msk.bf16.gmra.mrb[16].mxu1 %vm879_vm4, %v20534_v1  ;;  %v1587_v1 = vld [vmem:[#allocation2 + $0x199] sm:$0xff] }
  0xdd   : > { %16426 = vmatprep.mubr.msk.bf16.mxu1 %vm879_vm4, %v20536_v2  ;;  %v1588_v2 = vld [vmem:[#allocation2 + $0x1a1] sm:$0xff] }
  0xdf   : > { %16533 = vmatmul.mubr.msk.bf16.gmra.mrb[24].mxu0 %vm879_vm4, %v20633_v19 }
  0xe0   : > { %16536 = vmatprep.mubr.msk.bf16.mxu0 %vm879_vm4, %v20643_v22 }
  0xe4   : > { %16427 = vmatmul.mubr.msk.bf16.gmra.mrb[20].mxu1 %vm879_vm4, %v20542_v10  ;;  %v2255_v10 = vld [vmem:[#allocation2 + $0x2] sm:$0xff] }
  0xe5   : > { %16430 = vmatprep.mubr.msk.bf16.mxu1 %vm879_vm4, %v20544_v11  ;;  %v2256_v11 = vld [vmem:[#allocation2 + $0xa] sm:$0xff] }
  0xe7   : > { %16537 = vmatmul.mubr.msk.bf16.gmra.mrb[28].mxu0 %vm879_vm4, %v1605_v40 }
  0xe8   : > { %16542 = vmatprep.mubr.msk.bf16.mxu0 %vm879_vm4, %v20564_v26  ;;  %v2291_v26 = vpack.c.bf16 %v2256_v11, %v2255_v10 }
  0xec   : > { %16431 = vmatmul.mubr.msk.bf16.gmra.mrb[24].mxu1 %vm879_vm4, %v20554_v18  ;;  %v1606_v18 = vpack.c.bf16 %v1588_v2, %v1587_v1 }
  0xed   : > { %16434 = vmatprep.mubr.msk.bf16.mxu1 %vm879_vm4, %v962_v29 }
  0xef   : > { %16543 = vmatmul.mubr.msk.bf16.vlgmr.msra.gmra.mrb[0].mxu0 %vm879_vm4, %v20575_v32  ;;  %v2257_v32 = vld [vmem:[#allocation2 + $0x1a] sm:$0xff] }
  0xf0   : > { %16546 = vmatprep.mubr.msk.bf16.mxu0 %vm879_vm4, %v20577_v33  ;;  %16575 = vmatpush3.bf16.msra.mxu0 %v2360_v24  ;;  %v2258_v33 = vld [vmem:[#allocation2 + $0x22] sm:$0xff] }
  0xf1   : > { %16608 = vmatprep.subr.bf16.mxu0 %v2561_v47  ;;  %v2279_v24 = vld [vmem:[#allocation2 + $0x122] sm:$0xff] }
  0xf4   : > { %16435 = vmatmul.mubr.msk.bf16.gmra.mrb[28].mxu1 %vm879_vm4, %v963_v34 }
  0xf5   : > { %16464 = vmatprep.mubr.msk.bf16.mxu1 %vm879_vm4, %v962_v29  ;;  %v20818_v29 = vpack.c.bf16 %v2280_v25, %v2279_v24 }
  0xf7   : > { %16547 = vmatmul.mubr.msk.bf16.gmra.mrb[4].mxu0 %vm879_vm4, %v20583_v39  ;;  %v2259_v39 = vld [vmem:[#allocation2 + $0x32] sm:$0xff] }
  0xf8   : > { %16550 = vmatprep.mubr.msk.bf16.mxu0 %vm879_vm4, %v20585_v43  ;;  %v2260_v43 = vld [vmem:[#allocation2 + $0x3a] sm:$0xff] }
  0xf9   : > { %v20778_v51 = vpack.c.bf16 %v2260_v43, %v2259_v39 }
  0xfc   : > { %16465 = vmatmul.mubr.msk.bf16.vlgmr.msra.gmra.mrb[24].mxu1 %vm879_vm4, %v963_v34  ;;  %v2284_v34 = vld [vmem:[#allocation2 + $0x15a] sm:$0xff] }
  0xfd   : > { %16468 = vmatprep.mubr.msk.bf16.mxu1 %vm879_vm4, %v964_v37  ;;  %v20826_v37 = vpack.c.bf16 %v2284_v34, %v2283_v31 }
  0xff   : > { %16551 = vmatmul.mubr.msk.bf16.gmra.mrb[8].mxu0 %vm879_vm4, %v20591_v48  ;;  %v14493_v48 = vld [vmem:[%s24110_s6 + $0x20] sm:$0xf] }
 0x100   : > { %16554 = vmatprep.mubr.msk.bf16.mxu0 %vm879_vm4, %v20593_v50  ;;  %v2292_v50 = vpack.c.bf16 %v2258_v33, %v2257_v32  ;;  %v2762_v52 = vand.u32 %v14493_v48, %v20307_v4  ;;  %v2265_v4 = vld [vmem:[#allocation2 + $0x7a] sm:$0xff] }
 0x101   : > { %v20792_v0 = vpack.c.bf16 %v2266_v61, %v2265_v4  ;;  %v2290_v4 = vld [vmem:[#allocation2 + $0x1a2] sm:$0xff] }
 0x104   : > { %16469 = vmatmul.mubr.msk.bf16.gmra.mrb[28].mxu1 %vm879_vm4, %v20762_v56 }
 0x107   : > { %16555 = vmatmul.mubr.msk.bf16.gmra.mrb[12].mxu0 %vm879_vm4, %v20607_v62  ;;  %v2267_v62 = vld [vmem:[#allocation2 + $0x92] sm:$0xff] }
 0x108   : > { %16558 = vmatprep.mubr.msk.bf16.mxu0 %vm879_vm4, %v20609_v63  ;;  %v2268_v63 = vld [vmem:[#allocation2 + $0x9a] sm:$0xff] }
 0x109   : > { %v20794_v3 = vpack.c.bf16 %v2268_v63, %v2267_v62 }
 0x10f   : > { %16559 = vmatmul.mubr.msk.bf16.gmra.mrb[16].mxu0 %vm879_vm4, %v20619_v9  ;;  %v2271_v9 = vld [vmem:[#allocation2 + $0xc2] sm:$0xff] }
 0x110   : > { %16562 = vmatprep.mubr.msk.bf16.mxu0 %vm879_vm4, %v20621_v12  ;;  %v2272_v12 = vld [vmem:[#allocation2 + $0xca] sm:$0xff] }
 0x111   : > { %v20802_v14 = vpack.c.bf16 %v2272_v12, %v2271_v9  ;;  %v19555_v12 = vld [vmem:[%s24112_s2 + $0x48] sm:$0xff]  }
 0x112   : > { %16676 = vmatprep.subr.bf16.mxu1 %v19555_v12 }
 0x113   : > { %16677 = vmatpush3.bf16.msra.mxu1 %v19555_v12 }
 0x117   : > { %16563 = vmatmul.mubr.msk.bf16.gmra.mrb[20].mxu0 %vm879_vm4, %v20631_v17  ;;  %v2275_v17 = vld [vmem:[#allocation2 + $0xf2] sm:$0xff] }
 0x118   : > { %16566 = vmatprep.mubr.msk.bf16.mxu0 %vm879_vm4, %v20633_v19  ;;  %v2276_v19 = vld [vmem:[#allocation2 + $0xfa] sm:$0xff] }
 0x119   : > { %v20810_v21 = vpack.c.bf16 %v2276_v19, %v2275_v17  ;;  %v20973_v17 = vld [vmem:[%s24113_s27] ss:$0 sm:$0xff] }
 0x11f   : > { %16567 = vmatmul.mubr.msk.bf16.gmra.mrb[24].mxu0 %vm879_vm4, %v20643_v22  ;;  %v2277_v22 = vld [vmem:[#allocation2 + $0x10a] sm:$0xff] }
 0x120   : > { %16570 = vmatprep.mubr.msk.bf16.mxu0 %vm879_vm4, %v1605_v40  ;;  %v20816_v28 = vpack.c.bf16 %v2278_v23, %v2277_v22 }
 0x127   : > { %16571 = vmatmul.mubr.msk.bf16.gmra.mrb[28].mxu0 %vm879_vm4, %v1606_v18 }
 0x128   : > { %16576 = vmatprep.mubr.msk.bf16.mxu0 %vm879_vm4, %v2291_v26 }
 0x12f   : > { %16577 = vmatmul.mubr.msk.bf16.vlgmr.msra.gmra.mrb[0].mxu0 %vm879_vm4, %v2292_v50 }
 0x130   : > { %16580 = vmatprep.mubr.msk.bf16.mxu0 %vm879_vm4, %v20778_v51  ;;  %16609 = vmatpush3.bf16.msra.mxu0 %v2561_v47  ;;  %v2307_v47 = vpack.c.bf16 %v2288_v6, %v2287_v46 }
 0x131   : > { %16642 = vmatprep.subr.bf16.mxu0 %v2762_v52 }
 0x137   : > { %16581 = vmatmul.mubr.msk.bf16.gmra.mrb[4].mxu0 %vm879_vm4, %v20784_v59 }
 0x138   : > { %16584 = vmatprep.mubr.msk.bf16.mxu0 %vm879_vm4, %v20786_v60 }
 0x13f   : > { %16585 = vmatmul.mubr.msk.bf16.gmra.mrb[8].mxu0 %vm879_vm4, %v20792_v0 }
 0x140   : > { %16588 = vmatprep.mubr.msk.bf16.mxu0 %vm879_vm4, %v20794_v3 }
 0x147   : > { %16589 = vmatmul.mubr.msk.bf16.gmra.mrb[12].mxu0 %vm879_vm4, %v20800_v13 }
 0x148   : > { %16592 = vmatprep.mubr.msk.bf16.mxu0 %vm879_vm4, %v20802_v14 }
 0x14f   : > { %16593 = vmatmul.mubr.msk.bf16.gmra.mrb[16].mxu0 %vm879_vm4, %v20808_v20 }
 0x150   : > { %16596 = vmatprep.mubr.msk.bf16.mxu0 %vm879_vm4, %v20810_v21 }
 0x157   : > { %16597 = vmatmul.mubr.msk.bf16.gmra.mrb[20].mxu0 %vm879_vm4, %v20816_v28 }
 0x158   : > { %16600 = vmatprep.mubr.msk.bf16.mxu0 %vm879_vm4, %v20818_v29 }
 0x15f   : > { %16601 = vmatmul.mubr.msk.bf16.gmra.mrb[24].mxu0 %vm879_vm4, %v20824_v35 }
 0x160   : > { %16604 = vmatprep.mubr.msk.bf16.mxu0 %vm879_vm4, %v20826_v37 }
 0x167   : > { %16605 = vmatmul.mubr.msk.bf16.gmra.mrb[28].mxu0 %vm879_vm4, %v2306_v44 }
 0x168   : > { %16610 = vmatprep.mubr.msk.bf16.mxu0 %vm879_vm4, %v2292_v50 }
 0x16f   : > { %16611 = vmatmul.mubr.msk.bf16.vlgmr.msra.gmra.mrb[0].mxu0 %vm879_vm4, %v20778_v51 }
 0x170   : > { %16614 = vmatprep.mubr.msk.bf16.mxu0 %vm879_vm4, %v20784_v59  ;;  %16643 = vmatpush3.bf16.msra.mxu0 %v2762_v52 }
 0x177   : > { %16615 = vmatmul.mubr.msk.bf16.gmra.mrb[4].mxu0 %vm879_vm4, %v20786_v60 }
 0x178   : > { %16618 = vmatprep.mubr.msk.bf16.mxu0 %vm879_vm4, %v20792_v0 }
 0x17f   : > { %16619 = vmatmul.mubr.msk.bf16.gmra.mrb[8].mxu0 %vm879_vm4, %v20794_v3 }
 0x180   : > { %16622 = vmatprep.mubr.msk.bf16.mxu0 %vm879_vm4, %v20800_v13 }
 0x187   : > { %16623 = vmatmul.mubr.msk.bf16.gmra.mrb[12].mxu0 %vm879_vm4, %v20802_v14 }
 0x188   : > { %16626 = vmatprep.mubr.msk.bf16.mxu0 %vm879_vm4, %v20808_v20 }
 0x18f   : > { %16627 = vmatmul.mubr.msk.bf16.gmra.mrb[16].mxu0 %vm879_vm4, %v20810_v21  ;;  %v20860_v45 = vpop.f32.mrb[0].mxu1 }
 0x190   : > { %16630 = vmatprep.mubr.msk.bf16.mxu0 %vm879_vm4, %v20816_v28  ;;  %v20863_v36 = vpop.f32.mrb[1].mxu1 }
 0x191   : > { %v20865_v40 = vpop.f32.mrb[2].mxu1 }
 0x192   : > { %v20867_v41 = vpop.f32.mrb[3].mxu1 }
 0x197   : > { %16631 = vmatmul.mubr.msk.bf16.gmra.mrb[20].mxu0 %vm879_vm4, %v20818_v29  ;;  %v20870_v49 = vpop.f32.mrb[4].mxu1 }
 0x198   : > { %16634 = vmatprep.mubr.msk.bf16.mxu0 %vm879_vm4, %v20824_v35  ;;  %v20874_v55 = vpop.f32.mrb[5].mxu1 }
 0x199   : > { %v20876_v1 = vpop.f32.mrb[6].mxu1 }
 0x19a   : > { %v20878_v2 = vpop.f32.mrb[7].mxu1 }
 0x19f   : > { %16635 = vmatmul.mubr.msk.bf16.gmra.mrb[24].mxu0 %vm879_vm4, %v20826_v37  ;;  %v20882_v10 = vpop.f32.mrb[8].mxu1 }
 0x1a0   : > { %16638 = vmatprep.mubr.msk.bf16.mxu0 %vm879_vm4, %v2306_v44  ;;  %v20886_v11 = vpop.f32.mrb[9].mxu1 }
 0x1a1   : > { %v20888_v18 = vpop.f32.mrb[10].mxu1 }
 0x1a2   : > { %v20890_v26 = vpop.f32.mrb[11].mxu1 }
 0x1a7   : > { %16639 = vmatmul.mubr.msk.bf16.gmra.mrb[28].mxu0 %vm879_vm4, %v2307_v47  ;;  %v20894_v32 = vpop.f32.mrb[12].mxu1 }
 0x1a8   : > { %16644 = vmatprep.mubr.msk.bf16.mxu0 %vm879_vm4, %v20778_v51  ;;  %v20898_v33 = vpop.f32.mrb[13].mxu1 }
 0x1a9   : > { %v20900_v39 = vpop.f32.mrb[14].mxu1 }
 0x1aa   : > { %v20902_v43 = vpop.f32.mrb[15].mxu1 }
 0x1af   : > { %16645 = vmatmul.mubr.msk.bf16.vlgmr.msra.gmra.mrb[0].mxu0 %vm879_vm4, %v20784_v59  ;;  %v20906_v48 = vpop.f32.mrb[16].mxu1 }
 0x1b0   : > { %16648 = vmatprep.mubr.msk.bf16.mxu0 %vm879_vm4, %v20786_v60  ;;  %v20910_v50 = vpop.f32.mrb[17].mxu1  ;;  %v2289_v60 = vld [vmem:[#allocation2 + $0x19a] sm:$0xff] }
 0x1b1   : > { %v20912_v51 = vpop.f32.mrb[18].mxu1 }
 0x1b2   : > { %v20914_v52 = vpop.f32.mrb[19].mxu1 }
 0x1b7   : > { %16649 = vmatmul.mubr.msk.bf16.gmra.mrb[4].mxu0 %vm879_vm4, %v20792_v0  ;;  %v20918_v53 = vpop.f32.mrb[20].mxu1  ;;  %v2308_v0 = vpack.c.bf16 %v2290_v4, %v2289_v60 }
 0x1b8   : > { %16652 = vmatprep.mubr.msk.bf16.mxu0 %vm879_vm4, %v20794_v3  ;;  %v20922_v54 = vpop.f32.mrb[21].mxu1 }
 0x1b9   : > { %v20924_v57 = vpop.f32.mrb[22].mxu1 }
 0x1ba   : > { %v20926_v58 = vpop.f32.mrb[23].mxu1 }
 0x1bf   : > { %16653 = vmatmul.mubr.msk.bf16.gmra.mrb[8].mxu0 %vm879_vm4, %v20800_v13  ;;  %v19556_v13 = vld [vmem:[%s24112_s2 + $0x50] sm:$0xff]  }
 0x1c0   : > { %16656 = vmatprep.mubr.msk.bf16.mxu0 %vm879_vm4, %v20802_v14  ;;  %16678 = vmatprep.subr.bf16.mxu1 %v19556_v13  ;;  %v19557_v14 = vld [vmem:[%s24112_s2 + $0x58] sm:$0xff]  }
 0x1c1   : > { %16679 = vmatpush3.bf16.msra.mxu1 %v19556_v13 }
 0x1c2   : > { %16680 = vmatprep.subr.bf16.mxu1 %v19557_v14 }
 0x1c5   : > { %16681 = vmatpush3.bf16.msra.mxu1 %v19557_v14 }
 0x1c6   : > { %16714 = vmatprep.subr.bf16.mxu1 %v20967_v15 }
 0x1c7   : > { %16657 = vmatmul.mubr.msk.bf16.gmra.mrb[12].mxu0 %vm879_vm4, %v20808_v20 }
 0x1c8   : > { %16660 = vmatprep.mubr.msk.bf16.mxu0 %vm879_vm4, %v20810_v21 }
 0x1cf   : > { %16661 = vmatmul.mubr.msk.bf16.gmra.mrb[16].mxu0 %vm879_vm4, %v20816_v28  ;;  %v20937_v59 = vpop.f32.mrb[24].mxu1 }
 0x1d0   : > { %16664 = vmatprep.mubr.msk.bf16.mxu0 %vm879_vm4, %v20818_v29  ;;  %v20940_v61 = vpop.f32.mrb[25].mxu1 }
 0x1d1   : > { %v20942_v62 = vpop.f32.mrb[26].mxu1 }
 0x1d2   : > { %v20944_v63 = vpop.f32.mrb[27].mxu1 }
 0x1d7   : > { %16665 = vmatmul.mubr.msk.bf16.gmra.mrb[20].mxu0 %vm879_vm4, %v20824_v35  ;;  %v20947_v3 = vpop.f32.mrb[28].mxu1 }
 0x1d8   : > { %16668 = vmatprep.mubr.msk.bf16.mxu0 %vm879_vm4, %v20826_v37  ;;  %v20949_v7 = vpop.f32.mrb[29].mxu1 }
 0x1d9   : > { %v20951_v8 = vpop.f32.mrb[30].mxu1 }
 0x1da   : > { %v20953_v9 = vpop.f32.mrb[31].mxu1 }
 0x1df   : > { %16669 = vmatmul.mubr.msk.bf16.gmra.mrb[24].mxu0 %vm879_vm4, %v2306_v44 }
 0x1e0   : > { %16672 = vmatprep.mubr.msk.bf16.mxu0 %vm879_vm4, %v2307_v47 }
 0x1e7   : > { %16673 = vmatmul.mubr.msk.bf16.gmra.mrb[28].mxu0 %vm879_vm4, %v2308_v0 }
 0x282   : > { %v16646_v16 = vpop.f32.mrb[0].mxu0 }
 0x283   : > { %v18156_v19 = vadd.f32 %v16646_v16, %v20860_v45  ;;  %v2798_v20 = vpop.f32.mrb[1].mxu0 }
 0x284   : > { %v18157_v21 = vadd.f32 %v2798_v20, %v20863_v36  ;;  %v16647_v22 = vpop.f32.mrb[2].mxu0 }
 0x285   : > { %v20978_v23 = vadd.f32 %v18156_v19, %v20973_v17  ;;  %v18158_v24 = vadd.f32 %v16647_v22, %v20865_v40  ;;  %v2801_v25 = vpop.f32.mrb[3].mxu0 }
 0x286   : > { %v20982_v28 = vadd.f32 %v18157_v21, %v20973_v17  ;;  %v18159_v29 = vadd.f32 %v2801_v25, %v20867_v41 }
 0x287   : > { %v14513_v27 = vmul.f32 -1.442695, %v20978_v23  ;;  %v20987_v30 = vadd.f32 %v18158_v24, %v20973_v17 }
 0x288   : > { %v14511_v31 = vmul.f32 -1.442695, %v20982_v28  ;;  %v20991_v34 = vadd.f32 %v18159_v29, %v20973_v17 }
 0x289   : > { %19637 = vpow2.f32 %v14513_v27  ;;  %v14514_v35 = vmul.f32 -1.442695, %v20987_v30 }
 0x28a   : > { %19639 = vpow2.f32 %v14511_v31  ;;  %v14512_v37 = vmul.f32 -1.442695, %v20991_v34  ;;  %v16650_v38 = vpop.f32.mrb[4].mxu0 }
 0x28b   : > { %19641 = vpow2.f32 %v14514_v35  ;;  %v18160_v42 = vadd.f32 %v16650_v38, %v20870_v49  ;;  %v2814_v44 = vpop.f32.mrb[5].mxu0 }
 0x28c   : > { %19643 = vpow2.f32 %v14512_v37  ;;  %v18161_v45 = vadd.f32 %v2814_v44, %v20874_v55  ;;  %v16651_v46 = vpop.f32.mrb[6].mxu0 }
 0x28d   : > { %v20998_v6 = vadd.f32 %v18160_v42, %v20973_v17  ;;  %v18162_v36 = vadd.f32 %v16651_v46, %v20876_v1  ;;  %v2817_v40 = vpop.f32.mrb[7].mxu0 }
 0x28e   : > { %v21002_v41 = vadd.f32 %v18161_v45, %v20973_v17  ;;  %v18163_v47 = vadd.f32 %v2817_v40, %v20878_v2 }
 0x28f   : > { %v14517_v60 = vmul.f32 -1.442695, %v20998_v6  ;;  %v21007_v49 = vadd.f32 %v18162_v36, %v20973_v17 }
 0x290   : > { %v14515_v4 = vmul.f32 -1.442695, %v21002_v41  ;;  %v21011_v55 = vadd.f32 %v18163_v47, %v20973_v17 }
 0x291   : > { %19645 = vpow2.f32 %v14517_v60  ;;  %v14518_v0 = vmul.f32 -1.442695, %v21007_v49 }
 0x292   : > { %19647 = vpow2.f32 %v14515_v4  ;;  %v14516_v1 = vmul.f32 -1.442695, %v21011_v55  ;;  %v16654_v12 = vpop.f32.mrb[8].mxu0 }
 0x293   : > { %v19638_v13 = vpop.eup %19637  ;;  %19649 = vpow2.f32 %v14518_v0  ;;  %v18164_v2 = vadd.f32 %v16654_v12, %v20882_v10  ;;  %v2830_v14 = vpop.f32.mrb[9].mxu0 }
 0x294   : > { %v19640_v16 = vpop.eup %19639  ;;  %v3094_v19 = vadd.f32 1.0, %v19638_v13  ;;  %19651 = vpow2.f32 %v14516_v1  ;;  %v18165_v20 = vadd.f32 %v2830_v14, %v20886_v11  ;;  %v16655_v21 = vpop.f32.mrb[10].mxu0 }
 0x295   : > { %v19642_v22 = vpop.eup %19641  ;;  %v3092_v24 = vadd.f32 1.0, %v19640_v16  ;;  %v21018_v25 = vadd.f32 %v18164_v2, %v20973_v17  ;;  %v18166_v29 = vadd.f32 %v16655_v21, %v20888_v18  ;;  %v2833_v27 = vpop.f32.mrb[11].mxu0 }
 0x296   : > { %v19644_v31 = vpop.eup %19643  ;;  %19653 = vrcp.f32 %v3094_v19  ;;  %v3095_v35 = vadd.f32 1.0, %v19642_v22  ;;  %v21022_v10 = vadd.f32 %v18165_v20, %v20973_v17  ;;  %v18167_v37 = vadd.f32 %v2833_v27, %v20890_v26 }
 0x297   : > { %19655 = vrcp.f32 %v3092_v24  ;;  %v3093_v38 = vadd.f32 1.0, %v19644_v31  ;;  %v14521_v11 = vmul.f32 -1.442695, %v21018_v25  ;;  %v21027_v42 = vadd.f32 %v18166_v29, %v20973_v17 }
 0x298   : > { %19657 = vrcp.f32 %v3095_v35  ;;  %v14519_v44 = vmul.f32 -1.442695, %v21022_v10  ;;  %v21031_v18 = vadd.f32 %v18167_v37, %v20973_v17 }
 0x299   : > { %19659 = vrcp.f32 %v3093_v38  ;;  %v14522_v45 = vmul.f32 -1.442695, %v21027_v42 }
 0x29a   : > { %19661 = vpow2.f32 %v14521_v11  ;;  %v14520_v46 = vmul.f32 -1.442695, %v21031_v18  ;;  %v16658_v26 = vpop.f32.mrb[12].mxu0 }
 0x29b   : > { %v19646_v36 = vpop.eup %19645  ;;  %19663 = vpow2.f32 %v14519_v44  ;;  %v18168_v40 = vadd.f32 %v16658_v26, %v20894_v32  ;;  %v2846_v47 = vpop.f32.mrb[13].mxu0 }
 0x29c   : > { %v19648_v60 = vpop.eup %19647  ;;  %v3098_v4 = vadd.f32 1.0, %v19646_v36  ;;  %19665 = vpow2.f32 %v14522_v45  ;;  %v18169_v0 = vadd.f32 %v2846_v47, %v20898_v33  ;;  %v16659_v1 = vpop.f32.mrb[14].mxu0 }
 0x29d   : > { %v19650_v12 = vpop.eup %19649  ;;  %v3096_v13 = vadd.f32 1.0, %v19648_v60  ;;  %19667 = vpow2.f32 %v14520_v46  ;;  %v21038_v2 = vadd.f32 %v18168_v40, %v20973_v17  ;;  %v18170_v14 = vadd.f32 %v16659_v1, %v20900_v39  ;;  %v2849_v16 = vpop.f32.mrb[15].mxu0 }
 0x29e   : > { %v19652_v19 = vpop.eup %19651  ;;  %19669 = vrcp.f32 %v3098_v4  ;;  %v3099_v20 = vadd.f32 1.0, %v19650_v12  ;;  %v21042_v32 = vadd.f32 %v18169_v0, %v20973_v17  ;;  %v18171_v21 = vadd.f32 %v2849_v16, %v20902_v43 }
 0x29f   : > { %19671 = vrcp.f32 %v3096_v13  ;;  %v3097_v33 = vadd.f32 1.0, %v19652_v19  ;;  %v14525_v22 = vmul.f32 -1.442695, %v21038_v2  ;;  %v21047_v24 = vadd.f32 %v18170_v14, %v20973_v17 }
 0x2a0   : > { %v19654_v29 = vpop.eup %19653  ;;  %19673 = vrcp.f32 %v3099_v20  ;;  %v14523_v39 = vmul.f32 -1.442695, %v21042_v32  ;;  %v21051_v27 = vadd.f32 %v18171_v21, %v20973_v17 }
 0x2a1   : > { %v19656_v31 = vpop.eup %19655  ;;  %v3190_v35 = vmul.f32 %v19654_v29, %v20978_v23  ;;  %19675 = vrcp.f32 %v3097_v33  ;;  %v14526_v43 = vmul.f32 -1.442695, %v21047_v24 }
 0x2a2   : > { %v19658_v37 = vpop.eup %19657  ;;  %v3188_v38 = vmul.f32 %v19656_v31, %v20982_v28  ;;  %19677 = vpow2.f32 %v14525_v22  ;;  %v14524_v11 = vmul.f32 -1.442695, %v21051_v27  ;;  %v16662_v44 = vpop.f32.mrb[16].mxu0 }
 0x2a3   : > { %v19660_v45 = vpop.eup %19659  ;;  %3222 = vst.msk [vmem:[#allocation2 + $0x31] sm:$0xff] %vm790_vm2, %v3190_v35  ;;  %v3191_v46 = vmul.f32 %v19658_v37, %v20987_v30  ;;  %19679 = vpow2.f32 %v14523_v39  ;;  %v18172_v26 = vadd.f32 %v16662_v44, %v20906_v48  ;;  %v2862_v36 = vpop.f32.mrb[17].mxu0 }
 0x2a4   : > { %v19662_v23 = vpop.eup %19661  ;;  %3220 = vst.msk [vmem:[#allocation2 + $0x19] sm:$0xff] %vm790_vm2, %v3188_v38  ;;  %v3189_v40 = vmul.f32 %v19660_v45, %v20991_v34  ;;  %19681 = vpow2.f32 %v14526_v43  ;;  %v18173_v28 = vadd.f32 %v2862_v36, %v20910_v50  ;;  %v16663_v47 = vpop.f32.mrb[18].mxu0 }
 0x2a5   : > { %v19664_v60 = vpop.eup %19663  ;;  %3223 = vst.msk [vmem:[#allocation2 + $0x39] sm:$0xff] %vm790_vm2, %v3191_v46  ;;  %v3102_v4 = vadd.f32 1.0, %v19662_v23  ;;  %19683 = vpow2.f32 %v14524_v11  ;;  %v21065_v30 = vadd.f32 %v18172_v26, %v20973_v17  ;;  %v18174_v48 = vadd.f32 %v16663_v47, %v20912_v51  ;;  %v2865_v0 = vpop.f32.mrb[19].mxu0 }
 0x2a6   : > { %v19666_v1 = vpop.eup %19665  ;;  %3221 = vst.msk [vmem:[#allocation2 + $0x21] sm:$0xff] %vm790_vm2, %v3189_v40  ;;  %v3100_v12 = vadd.f32 1.0, %v19664_v60  ;;  %v21070_v34 = vadd.f32 %v18173_v28, %v20973_v17  ;;  %v18175_v50 = vadd.f32 %v2865_v0, %v20914_v52 }
 0x2a7   : > { %v19668_v13 = vpop.eup %19667  ;;  %19685 = vrcp.f32 %v3102_v4  ;;  %v3103_v14 = vadd.f32 1.0, %v19666_v1  ;;  %v14529_v16 = vmul.f32 -1.442695, %v21065_v30  ;;  %v21075_v19 = vadd.f32 %v18174_v48, %v20973_v17 }
 0x2a8   : > { %v19670_v20 = vpop.eup %19669  ;;  %19687 = vrcp.f32 %v3100_v12  ;;  %v3101_v51 = vadd.f32 1.0, %v19668_v13  ;;  %v14527_v21 = vmul.f32 -1.442695, %v21070_v34  ;;  %v21079_v33 = vadd.f32 %v18175_v50, %v20973_v17 }
 0x2a9   : > { %v19672_v22 = vpop.eup %19671  ;;  %v3194_v29 = vmul.f32 %v19670_v20, %v20998_v6  ;;  %19689 = vrcp.f32 %v3103_v14  ;;  %v14530_v52 = vmul.f32 -1.442695, %v21075_v19 }
 0x2aa   : > { %v19674_v39 = vpop.eup %19673  ;;  %v3192_v31 = vmul.f32 %v19672_v22, %v21002_v41  ;;  %19691 = vrcp.f32 %v3101_v51  ;;  %v14528_v35 = vmul.f32 -1.442695, %v21079_v33  ;;  %v16666_v43 = vpop.f32.mrb[20].mxu0  ;;  %v3256_v20 = vld [vmem:[#allocation2 + $0x30] sm:$0xff] }
 0x2ab   : > { %v19676_v37 = vpop.eup %19675  ;;  %3226 = vst.msk [vmem:[#allocation2 + $0x61] sm:$0xff] %vm790_vm2, %v3194_v29  ;;  %v3195_v38 = vmul.f32 %v19674_v39, %v21007_v49  ;;  %19693 = vpow2.f32 %v14529_v16  ;;  %v18176_v11 = vadd.f32 %v16666_v43, %v20918_v53  ;;  %v2878_v44 = vpop.f32.mrb[21].mxu0  ;;  %v3254_v13 = vld [vmem:[#allocation2 + $0x18] sm:$0xff]  ;;  %v19559_v39 = vld [vmem:[%s24112_s2 + $0x8] sm:$0xff]  }
 0x2ac   : > { %v19678_v6 = vpop.eup %19677  ;;  %3224 = vst.msk [vmem:[#allocation2 + $0x49] sm:$0xff] %vm790_vm2, %v3192_v31  ;;  %v3193_v45 = vmul.f32 %v19676_v37, %v21011_v55  ;;  %19695 = vpow2.f32 %v14527_v21  ;;  %v18177_v41 = vadd.f32 %v2878_v44, %v20922_v54  ;;  %v16667_v46 = vpop.f32.mrb[22].mxu0 }
 0x2ad   : > { %v19680_v26 = vpop.eup %19679  ;;  %3227 = vst.msk [vmem:[#allocation2 + $0x69] sm:$0xff] %vm790_vm2, %v3195_v38  ;;  %v3106_v36 = vadd.f32 1.0, %v19678_v6  ;;  %19697 = vpow2.f32 %v14530_v52  ;;  %v21093_v49 = vadd.f32 %v18176_v11, %v20973_v17  ;;  %v18178_v53 = vadd.f32 %v16667_v46, %v20924_v57  ;;  %v2881_v23 = vpop.f32.mrb[23].mxu0  ;;  %v3255_v47 = vld [vmem:[#allocation2 + $0x20] sm:$0xff]  ;;  %v3257_v57 = vld [vmem:[#allocation2 + $0x38] sm:$0xff] }
 0x2ae   : > { %v19682_v40 = vpop.eup %19681  ;;  %3225 = vst.msk [vmem:[#allocation2 + $0x51] sm:$0xff] %vm790_vm2, %v3193_v45  ;;  %v3104_v28 = vadd.f32 1.0, %v19680_v26  ;;  %19699 = vpow2.f32 %v14528_v35  ;;  %v21098_v55 = vadd.f32 %v18177_v41, %v20973_v17  ;;  %v18179_v54 = vadd.f32 %v2881_v23, %v20926_v58 }
 0x2af   : > { %v19684_v60 = vpop.eup %19683  ;;  %19701 = vrcp.f32 %v3106_v36  ;;  %v3107_v4 = vadd.f32 1.0, %v19682_v40  ;;  %v14533_v48 = vmul.f32 -1.442695, %v21093_v49  ;;  %v21103_v0 = vadd.f32 %v18178_v53, %v20973_v17 }
 0x2b0   : > { %19703 = vrcp.f32 %v3104_v28  ;;  %v3105_v1 = vadd.f32 1.0, %v19684_v60  ;;  %v14531_v12 = vmul.f32 -1.442695, %v21098_v55  ;;  %v21107_v50 = vadd.f32 %v18179_v54, %v20973_v17 }
 0x2b1   : > { %v19686_v14 = vpop.eup %19685  ;;  %19705 = vrcp.f32 %v3107_v4  ;;  %v14534_v58 = vmul.f32 -1.442695, %v21103_v0  ;;  %v21110_v16 = vpack.c.bf16 %v3255_v47, %v3254_v13  ;;  %v21114_v29 = vpack.c.bf16 %v3257_v57, %v3256_v20 }
 0x2b2   : > { %v19688_v51 = vpop.eup %19687  ;;  %v3198_v21 = vmul.f32 %v19686_v14, %v21018_v25  ;;  %19707 = vrcp.f32 %v3105_v1  ;;  %v14532_v22 = vmul.f32 -1.442695, %v21107_v50  ;;  %v16670_v52 = vpop.f32.mrb[24].mxu0  ;;  %v3260_v1 = vld [vmem:[#allocation2 + $0x60] sm:$0xff] }
 0x2b3   : > { %v19690_v31 = vpop.eup %19689  ;;  %v3196_v35 = vmul.f32 %v19688_v51, %v21022_v10  ;;  %19709 = vpow2.f32 %v14533_v48  ;;  %16682 = vmatprep.mubr.msk.bf16.mxu1 %vm790_vm2, %v21110_v16  ;;  %v18180_v43 = vadd.f32 %v16670_v52, %v20937_v59  ;;  %v2894_v25 = vpop.f32.mrb[25].mxu0  ;;  %v3258_v36 = vld [vmem:[#allocation2 + $0x48] sm:$0xff]  ;;  %v21163_v51 = vld [vmem:[%s24112_s2 + $0x90] sm:$0xff]  }
 0x2b4   : > { %v19692_v37 = vpop.eup %19691  ;;  %3230 = vst.msk [vmem:[#allocation2 + $0x91] sm:$0xff] %vm790_vm2, %v3198_v21  ;;  %v3199_v38 = vmul.f32 %v19690_v31, %v21027_v42  ;;  %19711 = vpow2.f32 %v14531_v12  ;;  %16683 = vmatmul.mubr.msk.bf16.vlgmr.msra.gmra.mrb[32].mxu1 %vm790_vm2, %v21114_v29  ;;  %v18181_v11 = vadd.f32 %v2894_v25, %v20940_v61  ;;  %v16671_v44 = vpop.f32.mrb[26].mxu0  ;;  %v3261_v28 = vld [vmem:[#allocation2 + $0x68] sm:$0xff] }
 0x2b5   : > { %v19694_v10 = vpop.eup %19693  ;;  %3228 = vst.msk [vmem:[#allocation2 + $0x79] sm:$0xff] %vm790_vm2, %v3196_v35  ;;  %v3197_v6 = vmul.f32 %v19692_v37, %v21031_v18  ;;  %19713 = vpow2.f32 %v14534_v58  ;;  %v21131_v59 = vadd.f32 %v18180_v43, %v20973_v17  ;;  %v18182_v45 = vadd.f32 %v16671_v44, %v20942_v62  ;;  %v2897_v41 = vpop.f32.mrb[27].mxu0  ;;  %v3259_v42 = vld [vmem:[#allocation2 + $0x50] sm:$0xff]  ;;  %16715 = vmatpush3.bf16.msra.mxu1 %v20967_v15 }
 0x2b6   : > { %v19696_v46 = vpop.eup %19695  ;;  %3231 = vst.msk [vmem:[#allocation2 + $0x99] sm:$0xff] %vm790_vm2, %v3199_v38  ;;  %v3110_v61 = vadd.f32 1.0, %v19694_v10  ;;  %19715 = vpow2.f32 %v14532_v22  ;;  %v21137_v26 = vadd.f32 %v18181_v11, %v20973_v17  ;;  %v18183_v18 = vadd.f32 %v2897_v41, %v20944_v63  ;;  %16716 = vmatprep.subr.bf16.mxu1 %v19559_v39  ;;  %v19560_v62 = vld [vmem:[%s24112_s2 + $0x10] sm:$0xff]  }
 0x2b7   : > { %v19698_v53 = vpop.eup %19697  ;;  %3229 = vst.msk [vmem:[#allocation2 + $0x81] sm:$0xff] %vm790_vm2, %v3197_v6  ;;  %v3108_v15 = vadd.f32 1.0, %v19696_v46  ;;  %v21145_v23 = vadd.f32 %v18182_v45, %v20973_v17  ;;  %v21147_v40 = vpack.c.bf16 %v3259_v42, %v3258_v36  ;;  %v14537_v63 = vmul.f32 -1.442695, %v21131_v59 }
 0x2b8   : > { %v19700_v54 = vpop.eup %19699  ;;  %19717 = vrcp.f32 %v3110_v61  ;;  %v3111_v47 = vadd.f32 1.0, %v19698_v53  ;;  %v21151_v60 = vadd.f32 %v18183_v18, %v20973_v17  ;;  %v14535_v57 = vmul.f32 -1.442695, %v21137_v26 }
 0x2b9   : > { %v19702_v4 = vpop.eup %19701  ;;  %19719 = vrcp.f32 %v3108_v15  ;;  %v3109_v48 = vadd.f32 1.0, %v19700_v54  ;;  %16686 = vmatprep.mubr.msk.bf16.mxu1 %vm790_vm2, %v21147_v40  ;;  %16717 = vmatpush3.bf16.msra.mxu1 %v19559_v39  ;;  %v14538_v14 = vmul.f32 -1.442695, %v21145_v23  ;;  %v21158_v58 = vpack.c.bf16 %v3261_v28, %v3260_v1 }
 0x2ba   : > { %v19704_v12 = vpop.eup %19703  ;;  %v3202_v13 = vmul.f32 %v19702_v4, %v21038_v2  ;;  %19721 = vrcp.f32 %v3111_v47  ;;  %v16674_v20 = vpop.f32.mrb[28].mxu0  ;;  %16718 = vmatprep.subr.bf16.mxu1 %v19560_v62  ;;  %v14536_v52 = vmul.f32 -1.442695, %v21151_v60 }
 0x2bb   : > { %v19706_v21 = vpop.eup %19705  ;;  %v3200_v22 = vmul.f32 %v19704_v12, %v21042_v32  ;;  %19723 = vrcp.f32 %v3109_v48  ;;  %v18184_v2 = vadd.f32 %v16674_v20, %v20947_v3  ;;  %v2910_v39 = vpop.f32.mrb[29].mxu0  ;;  %v3264_v15 = vld [vmem:[#allocation2 + $0x90] sm:$0xff] }
 0x2bc   : > { %v19708_v31 = vpop.eup %19707  ;;  %3234 = vst.msk [vmem:[#allocation2 + $0xc1] sm:$0xff] %vm790_vm2, %v3202_v13  ;;  %v3203_v35 = vmul.f32 %v19706_v21, %v21047_v24  ;;  %19725 = vpow2.f32 %v14537_v63  ;;  %16687 = vmatmul.mubr.msk.bf16.gmra.mrb[36].mxu1 %vm790_vm2, %v21158_v58  ;;  %v18185_v43 = vadd.f32 %v2910_v39, %v20949_v7  ;;  %v16675_v25 = vpop.f32.mrb[30].mxu0 }
 0x2bd   : > { %v19710_v37 = vpop.eup %19709  ;;  %3232 = vst.msk [vmem:[#allocation2 + $0xa9] sm:$0xff] %vm790_vm2, %v3200_v22  ;;  %v3201_v32 = vmul.f32 %v19708_v31, %v21051_v27  ;;  %19727 = vpow2.f32 %v14535_v57  ;;  %v21176_v3 = vadd.f32 %v18184_v2, %v20973_v17  ;;  %v18186_v38 = vadd.f32 %v16675_v25, %v20951_v8  ;;  %v2913_v11 = vpop.f32.mrb[31].mxu0  ;;  %16719 = vmatpush3.bf16.msra.mxu1 %v19560_v62  ;;  %v3265_v41 = vld [vmem:[#allocation2 + $0x98] sm:$0xff] }
 0x2be   : > { %v19712_v24 = vpop.eup %19711  ;;  %3235 = vst.msk [vmem:[#allocation2 + $0xc9] sm:$0xff] %vm790_vm2, %v3203_v35  ;;  %v3114_v44 = vadd.f32 1.0, %v19710_v37  ;;  %19729 = vpow2.f32 %v14538_v14  ;;  %v21181_v7 = vadd.f32 %v18185_v43, %v20973_v17  ;;  %v18187_v10 = vadd.f32 %v2913_v11, %v20953_v9  ;;  %v3263_v6 = vld [vmem:[#allocation2 + $0x80] sm:$0xff]  ;;  %16752 = vmatprep.subr.bf16.mxu1 %v21163_v51  ;;  %v3262_v9 = vld [vmem:[#allocation2 + $0x78] sm:$0xff] }
 0x2bf   : > { %v19714_v27 = vpop.eup %19713  ;;  %3233 = vst.msk [vmem:[#allocation2 + $0xb1] sm:$0xff] %vm790_vm2, %v3201_v32  ;;  %v3112_v45 = vadd.f32 1.0, %v19712_v24  ;;  %19731 = vpow2.f32 %v14536_v52  ;;  %v21187_v8 = vadd.f32 %v18186_v38, %v20973_v17  ;;  %v14541_v61 = vmul.f32 -1.442695, %v21176_v3 }
 0x2c0   : > { %v19716_v42 = vpop.eup %19715  ;;  %19733 = vrcp.f32 %v3114_v44  ;;  %v3115_v46 = vadd.f32 1.0, %v19714_v27  ;;  %v21191_v18 = vadd.f32 %v18187_v10, %v20973_v17  ;;  %v14539_v62 = vmul.f32 -1.442695, %v21181_v7 }
 0x2c1   : > { %19735 = vrcp.f32 %v3112_v45  ;;  %v3113_v36 = vadd.f32 1.0, %v19716_v42  ;;  %v21194_v53 = vpack.c.bf16 %v3263_v6, %v3262_v9  ;;  %v14542_v54 = vmul.f32 -1.442695, %v21187_v8 }
 0x2c2   : > { %v19718_v28 = vpop.eup %19717  ;;  %19737 = vrcp.f32 %v3115_v46  ;;  %v21197_v47 = vpack.c.bf16 %v3265_v41, %v3264_v15  ;;  %v14540_v17 = vmul.f32 -1.442695, %v21191_v18 }
 0x2c3   : > { %v19720_v63 = vpop.eup %19719  ;;  %v3206_v4 = vmul.f32 %v19718_v28, %v21065_v30  ;;  %19739 = vrcp.f32 %v3113_v36  ;;  %16690 = vmatprep.mubr.msk.bf16.mxu1 %vm790_vm2, %v21194_v53 }
 0x2c4   : > { %v19722_v48 = vpop.eup %19721  ;;  %v3204_v57 = vmul.f32 %v19720_v63, %v21070_v34  ;;  %19741 = vpow2.f32 %v14541_v61  ;;  %16691 = vmatmul.mubr.msk.bf16.gmra.mrb[40].mxu1 %vm790_vm2, %v21197_v47  ;;  %v3266_v14 = vld [vmem:[#allocation2 + $0xa8] sm:$0xff] }
 0x2c5   : > { %v19724_v1 = vpop.eup %19723  ;;  %3238 = vst.msk [vmem:[#allocation2 + $0xf1] sm:$0xff] %vm790_vm2, %v3206_v4  ;;  %v3207_v12 = vmul.f32 %v19722_v48, %v21075_v19  ;;  %19743 = vpow2.f32 %v14539_v62  ;;  %v3269_v52 = vld [vmem:[#allocation2 + $0xc8] sm:$0xff] }
 0x2c6   : > { %v19726_v30 = vpop.eup %19725  ;;  %3236 = vst.msk [vmem:[#allocation2 + $0xd9] sm:$0xff] %vm790_vm2, %v3204_v57  ;;  %v3205_v13 = vmul.f32 %v19724_v1, %v21079_v33  ;;  %19745 = vpow2.f32 %v14542_v54  ;;  %v3267_v20 = vld [vmem:[#allocation2 + $0xb0] sm:$0xff]  ;;  %v3268_v33 = vld [vmem:[#allocation2 + $0xc0] sm:$0xff] }
 0x2c7   : > { %v19728_v21 = vpop.eup %19727  ;;  %3239 = vst.msk [vmem:[#allocation2 + $0xf9] sm:$0xff] %vm790_vm2, %v3207_v12  ;;  %v3118_v34 = vadd.f32 1.0, %v19726_v30  ;;  %19747 = vpow2.f32 %v14540_v17  ;;  %v21211_v22 = vpack.c.bf16 %v3267_v20, %v3266_v14  ;;  %v21216_v25 = vpack.c.bf16 %v3269_v52, %v3268_v33 }
 0x2c8   : > { %v19730_v2 = vpop.eup %19729  ;;  %3237 = vst.msk [vmem:[#allocation2 + $0xe1] sm:$0xff] %vm790_vm2, %v3205_v13  ;;  %v3116_v19 = vadd.f32 1.0, %v19728_v21 }
 0x2c9   : > { %v19732_v39 = vpop.eup %19731  ;;  %19749 = vrcp.f32 %v3118_v34  ;;  %v3119_v31 = vadd.f32 1.0, %v19730_v2  ;;  %16694 = vmatprep.mubr.msk.bf16.mxu1 %vm790_vm2, %v21211_v22 }
 0x2ca   : > { %v19734_v35 = vpop.eup %19733  ;;  %19751 = vrcp.f32 %v3116_v19  ;;  %v3117_v43 = vadd.f32 1.0, %v19732_v39 }
 0x2cb   : > { %v19736_v37 = vpop.eup %19735  ;;  %v3210_v32 = vmul.f32 %v19734_v35, %v21093_v49  ;;  %19753 = vrcp.f32 %v3119_v31 }
 0x2cc   : > { %v19738_v38 = vpop.eup %19737  ;;  %v3208_v11 = vmul.f32 %v19736_v37, %v21098_v55  ;;  %19755 = vrcp.f32 %v3117_v43  ;;  %16695 = vmatmul.mubr.msk.bf16.gmra.mrb[44].mxu1 %vm790_vm2, %v21216_v25  ;;  %v3272_v36 = vld [vmem:[#allocation2 + $0xf0] sm:$0xff] }
 0x2cd   : > { %v19740_v24 = vpop.eup %19739  ;;  %3242 = vst.msk [vmem:[#allocation2 + $0x121] sm:$0xff] %vm790_vm2, %v3210_v32  ;;  %v3211_v44 = vmul.f32 %v19738_v38, %v21103_v0  ;;  %v3270_v45 = vld [vmem:[#allocation2 + $0xd8] sm:$0xff] }
 0x2ce   : > { %v19742_v10 = vpop.eup %19741  ;;  %3240 = vst.msk [vmem:[#allocation2 + $0x109] sm:$0xff] %vm790_vm2, %v3208_v11  ;;  %v3209_v6 = vmul.f32 %v19740_v24, %v21107_v50  ;;  %v3273_v41 = vld [vmem:[#allocation2 + $0xf8] sm:$0xff] }
 0x2cf   : > { %v19744_v27 = vpop.eup %19743  ;;  %3243 = vst.msk [vmem:[#allocation2 + $0x129] sm:$0xff] %vm790_vm2, %v3211_v44  ;;  %v3122_v49 = vadd.f32 1.0, %v19742_v10  ;;  %v3271_v55 = vld [vmem:[#allocation2 + $0xe0] sm:$0xff]  ;;  %v21232_v50 = vpack.c.bf16 %v3273_v41, %v3272_v36  ;;  %v19562_v44 = vld [vmem:[%s24112_s2 + $0x98] sm:$0xff]  }
 0x2d0   : > { %v19746_v42 = vpop.eup %19745  ;;  %3241 = vst.msk [vmem:[#allocation2 + $0x111] sm:$0xff] %vm790_vm2, %v3209_v6  ;;  %v3120_v46 = vadd.f32 1.0, %v19744_v27  ;;  %v21228_v61 = vpack.c.bf16 %v3271_v55, %v3270_v45  ;;  %v19563_v10 = vld [vmem:[%s24112_s2 + $0xa0] sm:$0xff]   ;;  %v19564_v6 = vld [vmem:[%s24112_s2 + $0x18] sm:$0xff]   ;;  %v19568_v45 = vld [vmem:[%s24112_s2 + $0x68] sm:$0xff]  }
 0x2d1   : > { %v19748_v9 = vpop.eup %19747  ;;  %19757 = vrcp.f32 %v3122_v49  ;;  %v3123_v0 = vadd.f32 1.0, %v19746_v42  ;;  %v3953_v49 = vld [vmem:[#allocation2 + $0x31] sm:$0xff]  ;;  %v3958_v42 = vld [vmem:[#allocation2 + $0x69] sm:$0xff] }
 0x2d2   : > { %19759 = vrcp.f32 %v3120_v46  ;;  %v3121_v62 = vadd.f32 1.0, %v19748_v9  ;;  %16698 = vmatprep.mubr.msk.bf16.mxu1 %vm790_vm2, %v21228_v61  ;;  %v3956_v41 = vld [vmem:[#allocation2 + $0x51] sm:$0xff]  ;;  %v3955_v46 = vld [vmem:[#allocation2 + $0x49] sm:$0xff]  ;;  %v3957_v9 = vld [vmem:[#allocation2 + $0x61] sm:$0xff] }
 0x2d3   : > { %v19750_v15 = vpop.eup %19749  ;;  %19761 = vrcp.f32 %v3123_v0  ;;  %v19570_v0 = vld [vmem:[%s24112_s2 + $0xa8] sm:$0xff]   ;;  %v21359_v36 = vpack.c.bf16 %v3958_v42, %v3957_v9  ;;  %v4718_v42 = vld [vmem:[#allocation2 + $0x52] sm:$0xff] }
 0x2d4   : > { %v19752_v28 = vpop.eup %19751  ;;  %v3214_v54 = vmul.f32 %v19750_v15, %v21131_v59  ;;  %19763 = vrcp.f32 %v3121_v62  ;;  %16699 = vmatmul.mubr.msk.bf16.gmra.mrb[48].mxu1 %vm790_vm2, %v21232_v50  ;;  %v3276_v13 = vld [vmem:[#allocation2 + $0x120] sm:$0xff] }
 0x2d5   : > { %v19754_v63 = vpop.eup %19753  ;;  %v3212_v4 = vmul.f32 %v19752_v28, %v21137_v26  ;;  %v3274_v1 = vld [vmem:[#allocation2 + $0x108] sm:$0xff]  ;;  %v3959_v15 = vld [vmem:[#allocation2 + $0x79] sm:$0xff] }
 0x2d6   : > { %v19756_v17 = vpop.eup %19755  ;;  %3246 = vst.msk [vmem:[#allocation2 + $0x151] sm:$0xff] %vm790_vm2, %v3214_v54  ;;  %v3215_v48 = vmul.f32 %v19754_v63, %v21145_v23  ;;  %v3277_v30 = vld [vmem:[#allocation2 + $0x128] sm:$0xff]  ;;  %v3961_v54 = vld [vmem:[#allocation2 + $0x91] sm:$0xff] }
 0x2d7   : > { %3244 = vst.msk [vmem:[#allocation2 + $0x139] sm:$0xff] %vm790_vm2, %v3212_v4  ;;  %v3213_v57 = vmul.f32 %v19756_v17, %v21151_v60  ;;  %v3275_v12 = vld [vmem:[#allocation2 + $0x110] sm:$0xff]  ;;  %v21248_v26 = vpack.c.bf16 %v3277_v30, %v3276_v13  ;;  %v3960_v62 = vld [vmem:[#allocation2 + $0x81] sm:$0xff]  ;;  %v3967_v13 = vld [vmem:[#allocation2 + $0xd9] sm:$0xff] }
 0x2d8   : > { %3247 = vst.msk [vmem:[#allocation2 + $0x159] sm:$0xff] %vm790_vm2, %v3215_v48  ;;  %v21243_v59 = vpack.c.bf16 %v3275_v12, %v3274_v1  ;;  %v21365_v28 = vpack.c.bf16 %v3960_v62, %v3959_v15  ;;  %v3964_v4 = vld [vmem:[#allocation2 + $0xb1] sm:$0xff]  ;;  %v3966_v17 = vld [vmem:[#allocation2 + $0xc9] sm:$0xff]  ;;  %v3965_v1 = vld [vmem:[#allocation2 + $0xc1] sm:$0xff] }
 0x2d9   : > { %3245 = vst.msk [vmem:[#allocation2 + $0x141] sm:$0xff] %vm790_vm2, %v3213_v57  ;;  %v3963_v48 = vld [vmem:[#allocation2 + $0xa9] sm:$0xff]  ;;  %v21375_v12 = vpack.c.bf16 %v3966_v17, %v3965_v1  ;;  %v3968_v30 = vld [vmem:[#allocation2 + $0xe1] sm:$0xff]  ;;  %v4723_v15 = vld [vmem:[#allocation2 + $0x92] sm:$0xff] }
 0x2da   : > { %16702 = vmatprep.mubr.msk.bf16.mxu1 %vm790_vm2, %v21243_v59  ;;  %v21373_v57 = vpack.c.bf16 %v3964_v4, %v3963_v48  ;;  %v4721_v62 = vld [vmem:[#allocation2 + $0x7a] sm:$0xff]  ;;  %v4725_v4 = vld [vmem:[#allocation2 + $0xaa] sm:$0xff]  ;;  %v4726_v17 = vld [vmem:[#allocation2 + $0xb2] sm:$0xff] }
 0x2db   : > { %v19758_v23 = vpop.eup %19757  ;;  %v4727_v48 = vld [vmem:[#allocation2 + $0xc2] sm:$0xff]  ;;  %v21502_v1 = vpack.c.bf16 %v4726_v17, %v4725_v4 }
 0x2dc   : > { %v19760_v14 = vpop.eup %19759  ;;  %v3218_v20 = vmul.f32 %v19758_v23, %v21176_v3  ;;  %16703 = vmatmul.mubr.msk.bf16.gmra.mrb[52].mxu1 %vm790_vm2, %v21248_v26  ;;  %v3969_v23 = vld [vmem:[#allocation2 + $0xf1] sm:$0xff] }
 0x2dd   : > { %v19762_v60 = vpop.eup %19761  ;;  %v3216_v21 = vmul.f32 %v19760_v14, %v21181_v7  ;;  %v3280_v33 = vld [vmem:[#allocation2 + $0x150] sm:$0xff]  ;;  %v3252_v7 = vld [vmem:[#allocation2] sm:$0xff] }
 0x2de   : > { %v19764_v34 = vpop.eup %19763  ;;  %3250 = vst.msk [vmem:[#allocation2 + $0x181] sm:$0xff] %vm790_vm2, %v3218_v20  ;;  %v3219_v52 = vmul.f32 %v19762_v60, %v21187_v8  ;;  %v3278_v39 = vld [vmem:[#allocation2 + $0x138] sm:$0xff]  ;;  %v3253_v8 = vld [vmem:[#allocation2 + $0x8] sm:$0xff] }
 0x2df   : > { %3248 = vst.msk [vmem:[#allocation2 + $0x169] sm:$0xff] %vm790_vm2, %v3216_v21  ;;  %v3217_v2 = vmul.f32 %v19764_v34, %v21191_v18  ;;  %v3281_v19 = vld [vmem:[#allocation2 + $0x158] sm:$0xff]  ;;  %v3288_v11 = vpack.c.bf16 %v3253_v8, %v3252_v7  ;;  %v3974_v60 = vld [vmem:[#allocation2 + $0x129] sm:$0xff] }
 0x2e0   : > { %3251 = vst.msk [vmem:[#allocation2 + $0x189] sm:$0xff] %vm790_vm2, %v3219_v52  ;;  %v3279_v3 = vld [vmem:[#allocation2 + $0x140] sm:$0xff]  ;;  %v3302_v35 = vpack.c.bf16 %v3281_v19, %v3280_v33  ;;  %v3972_v20 = vld [vmem:[#allocation2 + $0x111] sm:$0xff]  ;;  %v3971_v21 = vld [vmem:[#allocation2 + $0x109] sm:$0xff] }
 0x2e1   : > { %3249 = vst.msk [vmem:[#allocation2 + $0x171] sm:$0xff] %vm790_vm2, %v3217_v2  ;;  %v3301_v31 = vpack.c.bf16 %v3279_v3, %v3278_v39  ;;  %v21389_v34 = vpack.c.bf16 %v3972_v20, %v3971_v21  ;;  %v3973_v52 = vld [vmem:[#allocation2 + $0x121] sm:$0xff]  ;;  %v3978_v39 = vld [vmem:[#allocation2 + $0x159] sm:$0xff]  ;;  %v3977_v33 = vld [vmem:[#allocation2 + $0x151] sm:$0xff] }
 0x2e2   : > { %v3997_v2 = vpack.c.bf16 %v3974_v60, %v3973_v52  ;;  %v3976_v19 = vld [vmem:[#allocation2 + $0x141] sm:$0xff]  ;;  %v3975_v3 = vld [vmem:[#allocation2 + $0x139] sm:$0xff]  ;;  %v4733_v20 = vld [vmem:[#allocation2 + $0x10a] sm:$0xff] }
 0x2e3   : > { %16706 = vmatprep.mubr.msk.bf16.mxu1 %vm790_vm2, %v3301_v31  ;;  %v4734_v60 = vld [vmem:[#allocation2 + $0x112] sm:$0xff]  ;;  %v4735_v21 = vld [vmem:[#allocation2 + $0x122] sm:$0xff] }
 0x2e4   : > { %16707 = vmatmul.mubr.msk.bf16.gmra.mrb[56].mxu1 %vm790_vm2, %v3302_v35  ;;  %v4758_v52 = vpack.c.bf16 %v4734_v60, %v4733_v20 }
 0x2e5   : > { %v3284_v38 = vld [vmem:[#allocation2 + $0x180] sm:$0xff] }
 0x2e6   : > { %v3282_v37 = vld [vmem:[#allocation2 + $0x168] sm:$0xff] }
 0x2e7   : > { %v3285_v43 = vld [vmem:[#allocation2 + $0x188] sm:$0xff] }
 0x2e8   : > { %v3283_v32 = vld [vmem:[#allocation2 + $0x170] sm:$0xff]  ;;  %v3304_v24 = vpack.c.bf16 %v3285_v43, %v3284_v38 }
 0x2e9   : > { %v3303_v18 = vpack.c.bf16 %v3283_v32, %v3282_v37  ;;  %v3980_v7 = vld [vmem:[#allocation2 + $0x171] sm:$0xff]  ;;  %v3979_v8 = vld [vmem:[#allocation2 + $0x169] sm:$0xff] }
 0x2ea   : > { %v4000_v43 = vpack.c.bf16 %v3980_v7, %v3979_v8  ;;  %v19571_v37 = vld [vmem:[%s24112_s2 + $0xb0] sm:$0xff]   ;;  %v19572_v32 = vld [vmem:[%s24112_s2 + $0xb8] sm:$0xff]  }
 0x2eb   : > { %16710 = vmatprep.mubr.msk.bf16.mxu1 %vm790_vm2, %v3303_v18  ;;  %v3982_v38 = vld [vmem:[#allocation2 + $0x189] sm:$0xff]  ;;  %v4742_v8 = vld [vmem:[#allocation2 + $0x172] sm:$0xff] }
 0x2ec   : > { %16711 = vmatmul.mubr.msk.bf16.gmra.mrb[60].mxu1 %vm790_vm2, %v3304_v24  ;;  %v4741_v7 = vld [vmem:[#allocation2 + $0x16a] sm:$0xff] }
 0x2ed   : > { %16720 = vmatprep.mubr.msk.bf16.mxu1 %vm790_vm2, %v3288_v11  ;;  %v3981_v11 = vld [vmem:[#allocation2 + $0x181] sm:$0xff] }
 0x2f4   : > { %16721 = vmatmul.mubr.msk.bf16.vlgmr.msra.gmra.mrb[32].mxu1 %vm790_vm2, %v21110_v16  ;;  %v19565_v16 = vld [vmem:[%s24112_s2 + $0x20] sm:$0xff]  }
 0x2f5   : > { %16724 = vmatprep.mubr.msk.bf16.mxu1 %vm790_vm2, %v21114_v29  ;;  %16753 = vmatpush3.bf16.msra.mxu1 %v21163_v51  ;;  %v19566_v51 = vld [vmem:[%s24112_s2 + $0x28] sm:$0xff]  }
 0x2f6   : > { %16754 = vmatprep.subr.bf16.mxu1 %v19562_v44 }
 0x2f9   : > { %16755 = vmatpush3.bf16.msra.mxu1 %v19562_v44  ;;  %v19574_v44 = vld [vmem:[%s24112_s2 + $0x38] sm:$0xff]  }
 0x2fa   : > { %16756 = vmatprep.subr.bf16.mxu1 %v19563_v10 }
 0x2fc   : > { %16725 = vmatmul.mubr.msk.bf16.gmra.mrb[36].mxu1 %vm790_vm2, %v21147_v40 }
 0x2fd   : > { %16728 = vmatprep.mubr.msk.bf16.mxu1 %vm790_vm2, %v21158_v58  ;;  %16757 = vmatpush3.bf16.msra.mxu1 %v19563_v10  ;;  %v19575_v10 = vld [vmem:[%s24112_s2 + $0x40] sm:$0xff]  }
 0x2fe   : > { %16790 = vmatprep.subr.bf16.mxu1 %v19564_v6 }
 0x304   : > { %16729 = vmatmul.mubr.msk.bf16.gmra.mrb[40].mxu1 %vm790_vm2, %v21194_v53 }
 0x305   : > { %16732 = vmatprep.mubr.msk.bf16.mxu1 %vm790_vm2, %v21197_v47 }
 0x30c   : > { %16733 = vmatmul.mubr.msk.bf16.gmra.mrb[44].mxu1 %vm790_vm2, %v21211_v22 }
 0x30d   : > { %16736 = vmatprep.mubr.msk.bf16.mxu1 %vm790_vm2, %v21216_v25 }
 0x314   : > { %16737 = vmatmul.mubr.msk.bf16.gmra.mrb[48].mxu1 %vm790_vm2, %v21228_v61 }
 0x315   : > { %16740 = vmatprep.mubr.msk.bf16.mxu1 %vm790_vm2, %v21232_v50 }
 0x31c   : > { %16741 = vmatmul.mubr.msk.bf16.gmra.mrb[52].mxu1 %vm790_vm2, %v21243_v59 }
 0x31d   : > { %16744 = vmatprep.mubr.msk.bf16.mxu1 %vm790_vm2, %v21248_v26 }
 0x324   : > { %16745 = vmatmul.mubr.msk.bf16.gmra.mrb[56].mxu1 %vm790_vm2, %v3301_v31 }
 0x325   : > { %16748 = vmatprep.mubr.msk.bf16.mxu1 %vm790_vm2, %v3302_v35 }
 0x32c   : > { %16749 = vmatmul.mubr.msk.bf16.gmra.mrb[60].mxu1 %vm790_vm2, %v3303_v18 }
 0x32d   : > { %16758 = vmatprep.mubr.msk.bf16.mxu1 %vm790_vm2, %v21114_v29  ;;  %v19567_v29 = vld [vmem:[%s24112_s2 + $0x60] sm:$0xff]  }
 0x334   : > { %16759 = vmatmul.mubr.msk.bf16.vlgmr.msra.gmra.mrb[32].mxu1 %vm790_vm2, %v21147_v40  ;;  %v3949_v40 = vld [vmem:[#allocation2 + $0x1] sm:$0xff] }
 0x335   : > { %16762 = vmatprep.mubr.msk.bf16.mxu1 %vm790_vm2, %v21158_v58  ;;  %16791 = vmatpush3.bf16.msra.mxu1 %v19564_v6  ;;  %v3950_v58 = vld [vmem:[#allocation2 + $0x9] sm:$0xff]  ;;  %v19576_v6 = vld [vmem:[%s24112_s2 + $0x78] sm:$0xff]  }
 0x336   : > { %16792 = vmatprep.subr.bf16.mxu1 %v19565_v16 }
 0x339   : > { %16793 = vmatpush3.bf16.msra.mxu1 %v19565_v16  ;;  %v3983_v16 = vld [vmem:[#allocation2 + $0x199] sm:$0xff] }
 0x33a   : > { %16794 = vmatprep.subr.bf16.mxu1 %v19566_v51 }
 0x33c   : > { %16763 = vmatmul.mubr.msk.bf16.gmra.mrb[36].mxu1 %vm790_vm2, %v21194_v53  ;;  %v3985_v53 = vpack.c.bf16 %v3950_v58, %v3949_v40  ;;  %v4712_v40 = vld [vmem:[#allocation2 + $0xa] sm:$0xff] }
 0x33d   : > { %16766 = vmatprep.mubr.msk.bf16.mxu1 %vm790_vm2, %v21197_v47  ;;  %16795 = vmatpush3.bf16.msra.mxu1 %v19566_v51  ;;  %v3952_v47 = vld [vmem:[#allocation2 + $0x21] sm:$0xff] }
 0x33e   : > { %16828 = vmatprep.subr.bf16.mxu1 %v19567_v29  ;;  %v3984_v51 = vld [vmem:[#allocation2 + $0x1a1] sm:$0xff] }
 0x33f   : > { %v4002_v58 = vpack.c.bf16 %v3984_v51, %v3983_v16  ;;  %v19583_v16 = vld [vmem:[%s24114_s1 + $0x50] sm:$0xff]   ;;  %v19584_v51 = vld [vmem:[%s24114_s1 + $0x58] sm:$0xff]  }
 0x344   : > { %16767 = vmatmul.mubr.msk.bf16.gmra.mrb[40].mxu1 %vm790_vm2, %v21211_v22  ;;  %v3954_v22 = vld [vmem:[#allocation2 + $0x39] sm:$0xff] }
 0x345   : > { %16770 = vmatprep.mubr.msk.bf16.mxu1 %vm790_vm2, %v21216_v25  ;;  %v3951_v25 = vld [vmem:[#allocation2 + $0x19] sm:$0xff]  ;;  %v21345_v55 = vpack.c.bf16 %v3954_v22, %v3953_v49  ;;  %v4714_v22 = vld [vmem:[#allocation2 + $0x22] sm:$0xff] }
 0x346   : > { %v21340_v27 = vpack.c.bf16 %v3952_v47, %v3951_v25  ;;  %v4713_v47 = vld [vmem:[#allocation2 + $0x1a] sm:$0xff]  ;;  %v4715_v25 = vld [vmem:[#allocation2 + $0x32] sm:$0xff] }
 0x347   : > { %v21469_v49 = vpack.c.bf16 %v4714_v22, %v4713_v47 }
 0x34c   : > { %16771 = vmatmul.mubr.msk.bf16.gmra.mrb[44].mxu1 %vm790_vm2, %v21228_v61  ;;  %v21354_v61 = vpack.c.bf16 %v3956_v41, %v3955_v46  ;;  %v4717_v41 = vld [vmem:[#allocation2 + $0x4a] sm:$0xff]  ;;  %v4719_v46 = vld [vmem:[#allocation2 + $0x62] sm:$0xff] }
 0x34d   : > { %16774 = vmatprep.mubr.msk.bf16.mxu1 %vm790_vm2, %v21232_v50  ;;  %v3962_v50 = vld [vmem:[#allocation2 + $0x99] sm:$0xff]  ;;  %v21483_v9 = vpack.c.bf16 %v4718_v42, %v4717_v41 }
 0x34e   : > { %v21367_v63 = vpack.c.bf16 %v3962_v50, %v3961_v54  ;;  %v4722_v50 = vld [vmem:[#allocation2 + $0x82] sm:$0xff] }
 0x34f   : > { %v21494_v54 = vpack.c.bf16 %v4722_v50, %v4721_v62 }
 0x354   : > { %16775 = vmatmul.mubr.msk.bf16.gmra.mrb[48].mxu1 %vm790_vm2, %v21243_v59  ;;  %v3970_v59 = vld [vmem:[#allocation2 + $0xf9] sm:$0xff] }
 0x355   : > { %16778 = vmatprep.mubr.msk.bf16.mxu1 %vm790_vm2, %v21248_v26  ;;  %v21381_v26 = vpack.c.bf16 %v3968_v30, %v3967_v13  ;;  %v21383_v14 = vpack.c.bf16 %v3970_v59, %v3969_v23  ;;  %v4729_v30 = vld [vmem:[#allocation2 + $0xda] sm:$0xff]  ;;  %v4730_v59 = vld [vmem:[#allocation2 + $0xe2] sm:$0xff]  ;;  %v4731_v13 = vld [vmem:[#allocation2 + $0xf2] sm:$0xff] }
 0x356   : > { %v4756_v23 = vpack.c.bf16 %v4730_v59, %v4729_v30 }
 0x35c   : > { %16779 = vmatmul.mubr.msk.bf16.gmra.mrb[52].mxu1 %vm790_vm2, %v3301_v31  ;;  %v3998_v31 = vpack.c.bf16 %v3976_v19, %v3975_v3  ;;  %v4737_v19 = vld [vmem:[#allocation2 + $0x13a] sm:$0xff]  ;;  %v4739_v3 = vld [vmem:[#allocation2 + $0x152] sm:$0xff] }
 0x35d   : > { %16782 = vmatprep.mubr.msk.bf16.mxu1 %vm790_vm2, %v3302_v35  ;;  %v3999_v35 = vpack.c.bf16 %v3978_v39, %v3977_v33  ;;  %v4738_v39 = vld [vmem:[#allocation2 + $0x142] sm:$0xff] }
 0x35e   : > { %v4760_v33 = vpack.c.bf16 %v4738_v39, %v4737_v19 }
 0x364   : > { %16783 = vmatmul.mubr.msk.bf16.gmra.mrb[56].mxu1 %vm790_vm2, %v3303_v18  ;;  %v19573_v18 = vld [vmem:[%s24112_s2 + $0x30] sm:$0xff]  }
 0x365   : > { %16786 = vmatprep.mubr.msk.bf16.mxu1 %vm790_vm2, %v3304_v24  ;;  %v4001_v24 = vpack.c.bf16 %v3982_v38, %v3981_v11  ;;  %v4744_v38 = vld [vmem:[#allocation2 + $0x18a] sm:$0xff] }
 0x36c   : > { %16787 = vmatmul.mubr.msk.bf16.gmra.mrb[60].mxu1 %vm790_vm2, %v20762_v56  ;;  %v19569_v56 = vld [vmem:[%s24112_s2 + $0x70] sm:$0xff]  }
 0x36d   : > { %16796 = vmatprep.mubr.msk.bf16.mxu1 %vm790_vm2, %v3985_v53 }
 0x374   : > { %16797 = vmatmul.mubr.msk.bf16.vlgmr.msra.gmra.mrb[32].mxu1 %vm790_vm2, %v21340_v27 }
 0x375   : > { %16800 = vmatprep.mubr.msk.bf16.mxu1 %vm790_vm2, %v21345_v55  ;;  %16829 = vmatpush3.bf16.msra.mxu1 %v19567_v29  ;;  %v4711_v29 = vld [vmem:[#allocation2 + $0x2] sm:$0xff] }
 0x376   : > { %16830 = vmatprep.subr.bf16.mxu1 %v19568_v45  ;;  %v4747_v53 = vpack.c.bf16 %v4712_v40, %v4711_v29  ;;  %v21583_v29 = vld [vmem:[%s24114_s1] sm:$0xff]  }
 0x377   : > { %v21589_v40 = vld [vmem:[%s24115_s4] ss:$0 sm:$0xff]  ;;  %s24116_s4 = sld [smem:[#allocation22_spill]] }
 0x379   : > { %16831 = vmatpush3.bf16.msra.mxu1 %v19568_v45  ;;  %v19577_v45 = vld [vmem:[%s24112_s2 + $0x80] sm:$0xff]  }
 0x37a   : > { %16832 = vmatprep.subr.bf16.mxu1 %v19569_v56 }
 0x37c   : > { %16801 = vmatmul.mubr.msk.bf16.gmra.mrb[36].mxu1 %vm790_vm2, %v21354_v61 }
 0x37d   : > { %16804 = vmatprep.mubr.msk.bf16.mxu1 %vm790_vm2, %v21359_v36  ;;  %16833 = vmatpush3.bf16.msra.mxu1 %v19569_v56  ;;  %v19578_v56 = vld [vmem:[%s24112_s2 + $0x88] sm:$0xff]   ;;  %s22139_s27 = scalar_lea.vmem %s24116_s4, %s20427_s0 }
 0x37e   : > { %16866 = vmatprep.subr.bf16.mxu1 %v19570_v0 }
 0x384   : > { %16805 = vmatmul.mubr.msk.bf16.gmra.mrb[40].mxu1 %vm790_vm2, %v21365_v28 }
 0x385   : > { %16808 = vmatprep.mubr.msk.bf16.mxu1 %vm790_vm2, %v21367_v63 }
 0x38c   : > { %16809 = vmatmul.mubr.msk.bf16.gmra.mrb[44].mxu1 %vm790_vm2, %v21373_v57 }
 0x38d   : > { %16812 = vmatprep.mubr.msk.bf16.mxu1 %vm790_vm2, %v21375_v12 }
 0x394   : > { %16813 = vmatmul.mubr.msk.bf16.gmra.mrb[48].mxu1 %vm790_vm2, %v21381_v26 }
 0x395   : > { %16816 = vmatprep.mubr.msk.bf16.mxu1 %vm790_vm2, %v21383_v14 }
 0x39c   : > { %16817 = vmatmul.mubr.msk.bf16.gmra.mrb[52].mxu1 %vm790_vm2, %v21389_v34 }
 0x39d   : > { %16820 = vmatprep.mubr.msk.bf16.mxu1 %vm790_vm2, %v3997_v2 }
 0x3a4   : > { %16821 = vmatmul.mubr.msk.bf16.gmra.mrb[56].mxu1 %vm790_vm2, %v3998_v31 }
 0x3a5   : > { %16824 = vmatprep.mubr.msk.bf16.mxu1 %vm790_vm2, %v3999_v35 }
 0x3ac   : > { %16825 = vmatmul.mubr.msk.bf16.gmra.mrb[60].mxu1 %vm790_vm2, %v4000_v43 }
 0x3ad   : > { %16834 = vmatprep.mubr.msk.bf16.mxu1 %vm790_vm2, %v21340_v27  ;;  %v4716_v27 = vld [vmem:[#allocation2 + $0x3a] sm:$0xff] }
 0x3b4   : > { %16835 = vmatmul.mubr.msk.bf16.vlgmr.msra.gmra.mrb[32].mxu1 %vm790_vm2, %v21345_v55 }
 0x3b5   : > { %16838 = vmatprep.mubr.msk.bf16.mxu1 %vm790_vm2, %v21354_v61  ;;  %16867 = vmatpush3.bf16.msra.mxu1 %v19570_v0  ;;  %v19579_v0 = vld [vmem:[%s24112_s2 + $0xc0] sm:$0xff]  }
 0x3b6   : > { %16868 = vmatprep.subr.bf16.mxu1 %v19571_v37 }
 0x3b9   : > { %16869 = vmatpush3.bf16.msra.mxu1 %v19571_v37  ;;  %v19580_v37 = vld [vmem:[%s24112_s2 + $0xc8] sm:$0xff]  }
 0x3ba   : > { %16870 = vmatprep.subr.bf16.mxu1 %v19572_v32 }
 0x3bc   : > { %16839 = vmatmul.mubr.msk.bf16.gmra.mrb[36].mxu1 %vm790_vm2, %v21359_v36 }
 0x3bd   : > { %16842 = vmatprep.mubr.msk.bf16.mxu1 %vm790_vm2, %v21365_v28  ;;  %16871 = vmatpush3.bf16.msra.mxu1 %v19572_v32  ;;  %v19581_v32 = vld [vmem:[%s24112_s2 + $0xd0] sm:$0xff]  }
 0x3be   : > { %16904 = vmatprep.subr.bf16.mxu1 %v19573_v18 }
 0x3c4   : > { %16843 = vmatmul.mubr.msk.bf16.gmra.mrb[40].mxu1 %vm790_vm2, %v21367_v63 }
 0x3c5   : > { %16846 = vmatprep.mubr.msk.bf16.mxu1 %vm790_vm2, %v21373_v57 }
 0x3cc   : > { %16847 = vmatmul.mubr.msk.bf16.gmra.mrb[44].mxu1 %vm790_vm2, %v21375_v12 }
 0x3cd   : > { %16850 = vmatprep.mubr.msk.bf16.mxu1 %vm790_vm2, %v21381_v26 }
 0x3d4   : > { %16851 = vmatmul.mubr.msk.bf16.gmra.mrb[48].mxu1 %vm790_vm2, %v21383_v14 }
 0x3d5   : > { %16854 = vmatprep.mubr.msk.bf16.mxu1 %vm790_vm2, %v21389_v34 }
 0x3dc   : > { %16855 = vmatmul.mubr.msk.bf16.gmra.mrb[52].mxu1 %vm790_vm2, %v3997_v2 }
 0x3dd   : > { %16858 = vmatprep.mubr.msk.bf16.mxu1 %vm790_vm2, %v3998_v31 }
 0x3e4   : > { %16859 = vmatmul.mubr.msk.bf16.gmra.mrb[56].mxu1 %vm790_vm2, %v3999_v35 }
 0x3e5   : > { %16862 = vmatprep.mubr.msk.bf16.mxu1 %vm790_vm2, %v4000_v43 }
 0x3ec   : > { %16863 = vmatmul.mubr.msk.bf16.gmra.mrb[60].mxu1 %vm790_vm2, %v4001_v24 }
 0x3ed   : > { %16872 = vmatprep.mubr.msk.bf16.mxu1 %vm790_vm2, %v21345_v55  ;;  %v21474_v55 = vpack.c.bf16 %v4716_v27, %v4715_v25 }
 0x3f4   : > { %16873 = vmatmul.mubr.msk.bf16.vlgmr.msra.gmra.mrb[32].mxu1 %vm790_vm2, %v21354_v61  ;;  %v4720_v61 = vld [vmem:[#allocation2 + $0x6a] sm:$0xff] }
 0x3f5   : > { %16876 = vmatprep.mubr.msk.bf16.mxu1 %vm790_vm2, %v21359_v36  ;;  %16905 = vmatpush3.bf16.msra.mxu1 %v19573_v18  ;;  %v21488_v36 = vpack.c.bf16 %v4720_v61, %v4719_v46  ;;  %v4743_v18 = vld [vmem:[#allocation2 + $0x182] sm:$0xff] }
 0x3f6   : > { %16906 = vmatprep.subr.bf16.mxu1 %v19574_v44  ;;  %v4763_v11 = vpack.c.bf16 %v4744_v38, %v4743_v18 }
 0x3f9   : > { %16907 = vmatpush3.bf16.msra.mxu1 %v19574_v44  ;;  %v4746_v44 = vld [vmem:[#allocation2 + $0x1a2] sm:$0xff] }
 0x3fa   : > { %16908 = vmatprep.subr.bf16.mxu1 %v19575_v10 }
 0x3fc   : > { %16877 = vmatmul.mubr.msk.bf16.gmra.mrb[36].mxu1 %vm790_vm2, %v21365_v28  ;;  %v4724_v28 = vld [vmem:[#allocation2 + $0x9a] sm:$0xff] }
 0x3fd   : > { %16880 = vmatprep.mubr.msk.bf16.mxu1 %vm790_vm2, %v21367_v63  ;;  %16909 = vmatpush3.bf16.msra.mxu1 %v19575_v10  ;;  %v21496_v63 = vpack.c.bf16 %v4724_v28, %v4723_v15 }
 0x3fe   : > { %16942 = vmatprep.subr.bf16.mxu1 %v19576_v6 }
 0x404   : > { %16881 = vmatmul.mubr.msk.bf16.gmra.mrb[40].mxu1 %vm790_vm2, %v21373_v57  ;;  %v4728_v57 = vld [vmem:[#allocation2 + $0xca] sm:$0xff] }
 0x405   : > { %16884 = vmatprep.mubr.msk.bf16.mxu1 %vm790_vm2, %v21375_v12  ;;  %v21504_v12 = vpack.c.bf16 %v4728_v57, %v4727_v48 }
 0x40c   : > { %16885 = vmatmul.mubr.msk.bf16.gmra.mrb[44].mxu1 %vm790_vm2, %v21381_v26  ;;  %v4732_v26 = vld [vmem:[#allocation2 + $0xfa] sm:$0xff] }
 0x40d   : > { %16888 = vmatprep.mubr.msk.bf16.mxu1 %vm790_vm2, %v21383_v14  ;;  %v4757_v14 = vpack.c.bf16 %v4732_v26, %v4731_v13 }
 0x414   : > { %16889 = vmatmul.mubr.msk.bf16.gmra.mrb[48].mxu1 %vm790_vm2, %v21389_v34  ;;  %v4736_v34 = vld [vmem:[#allocation2 + $0x12a] sm:$0xff] }
 0x415   : > { %16892 = vmatprep.mubr.msk.bf16.mxu1 %vm790_vm2, %v3997_v2  ;;  %v4759_v2 = vpack.c.bf16 %v4736_v34, %v4735_v21 }
 0x41c   : > { %16893 = vmatmul.mubr.msk.bf16.gmra.mrb[52].mxu1 %vm790_vm2, %v3998_v31  ;;  %v4740_v31 = vld [vmem:[#allocation2 + $0x15a] sm:$0xff] }
 0x41d   : > { %16896 = vmatprep.mubr.msk.bf16.mxu1 %vm790_vm2, %v3999_v35  ;;  %v4761_v35 = vpack.c.bf16 %v4740_v31, %v4739_v3 }
 0x424   : > { %16897 = vmatmul.mubr.msk.bf16.gmra.mrb[56].mxu1 %vm790_vm2, %v4000_v43  ;;  %v4762_v43 = vpack.c.bf16 %v4742_v8, %v4741_v7 }
 0x425   : > { %16900 = vmatprep.mubr.msk.bf16.mxu1 %vm790_vm2, %v4001_v24  ;;  %v4745_v24 = vld [vmem:[#allocation2 + $0x19a] sm:$0xff] }
 0x426   : > { %v4764_v10 = vpack.c.bf16 %v4746_v44, %v4745_v24 }
 0x42c   : > { %16901 = vmatmul.mubr.msk.bf16.gmra.mrb[60].mxu1 %vm790_vm2, %v4002_v58 }
 0x42d   : > { %16910 = vmatprep.mubr.msk.bf16.mxu1 %vm790_vm2, %v4747_v53 }
 0x434   : > { %16911 = vmatmul.mubr.msk.bf16.vlgmr.msra.gmra.mrb[32].mxu1 %vm790_vm2, %v21469_v49 }
 0x435   : > { %16914 = vmatprep.mubr.msk.bf16.mxu1 %vm790_vm2, %v21474_v55  ;;  %16943 = vmatpush3.bf16.msra.mxu1 %v19576_v6  ;;  %v19582_v6 = vld [vmem:[%s24114_s1 + $0x48] sm:$0xff]  }
 0x436   : > { %16944 = vmatprep.subr.bf16.mxu1 %v19577_v45  ;;  %17018 = vmatprep.subr.bf16.mxu0 %v19582_v6 }
 0x437   : > { %17019 = vmatpush3.bf16.msra.mxu0 %v19582_v6 }
 0x438   : > { %17020 = vmatprep.subr.bf16.mxu0 %v19583_v16 }
 0x439   : > { %16945 = vmatpush3.bf16.msra.mxu1 %v19577_v45 }
 0x43a   : > { %16946 = vmatprep.subr.bf16.mxu1 %v19578_v56 }
 0x43b   : > { %17021 = vmatpush3.bf16.msra.mxu0 %v19583_v16 }
 0x43c   : > { %16915 = vmatmul.mubr.msk.bf16.gmra.mrb[36].mxu1 %vm790_vm2, %v21483_v9  ;;  %17022 = vmatprep.subr.bf16.mxu0 %v19584_v51 }
 0x43d   : > { %16918 = vmatprep.mubr.msk.bf16.mxu1 %vm790_vm2, %v21488_v36  ;;  %16947 = vmatpush3.bf16.msra.mxu1 %v19578_v56 }
 0x43e   : > { %16980 = vmatprep.subr.bf16.mxu1 %v19579_v0 }
 0x43f   : > { %17023 = vmatpush3.bf16.msra.mxu0 %v19584_v51 }
 0x440   : > { %17056 = vmatprep.subr.bf16.mxu0 %v21583_v29 }
 0x444   : > { %16919 = vmatmul.mubr.msk.bf16.gmra.mrb[40].mxu1 %vm790_vm2, %v21494_v54 }
 0x445   : > { %16922 = vmatprep.mubr.msk.bf16.mxu1 %vm790_vm2, %v21496_v63 }
 0x44c   : > { %16923 = vmatmul.mubr.msk.bf16.gmra.mrb[44].mxu1 %vm790_vm2, %v21502_v1 }
 0x44d   : > { %16926 = vmatprep.mubr.msk.bf16.mxu1 %vm790_vm2, %v21504_v12 }
 0x454   : > { %16927 = vmatmul.mubr.msk.bf16.gmra.mrb[48].mxu1 %vm790_vm2, %v4756_v23 }
 0x455   : > { %16930 = vmatprep.mubr.msk.bf16.mxu1 %vm790_vm2, %v4757_v14 }
 0x45c   : > { %16931 = vmatmul.mubr.msk.bf16.gmra.mrb[52].mxu1 %vm790_vm2, %v4758_v52 }
 0x45d   : > { %16934 = vmatprep.mubr.msk.bf16.mxu1 %vm790_vm2, %v4759_v2 }
 0x464   : > { %16935 = vmatmul.mubr.msk.bf16.gmra.mrb[56].mxu1 %vm790_vm2, %v4760_v33 }
 0x465   : > { %16938 = vmatprep.mubr.msk.bf16.mxu1 %vm790_vm2, %v4761_v35 }
 0x46c   : > { %16939 = vmatmul.mubr.msk.bf16.gmra.mrb[60].mxu1 %vm790_vm2, %v4762_v43 }
 0x46d   : > { %16948 = vmatprep.mubr.msk.bf16.mxu1 %vm790_vm2, %v21469_v49 }
 0x474   : > { %16949 = vmatmul.mubr.msk.bf16.vlgmr.msra.gmra.mrb[32].mxu1 %vm790_vm2, %v21474_v55 }
 0x475   : > { %16952 = vmatprep.mubr.msk.bf16.mxu1 %vm790_vm2, %v21483_v9  ;;  %16981 = vmatpush3.bf16.msra.mxu1 %v19579_v0 }
 0x476   : > { %16982 = vmatprep.subr.bf16.mxu1 %v19580_v37 }
 0x479   : > { %16983 = vmatpush3.bf16.msra.mxu1 %v19580_v37 }
 0x47a   : > { %16984 = vmatprep.subr.bf16.mxu1 %v19581_v32 }
 0x47c   : > { %16953 = vmatmul.mubr.msk.bf16.gmra.mrb[36].mxu1 %vm790_vm2, %v21488_v36 }
 0x47d   : > { %16956 = vmatprep.mubr.msk.bf16.mxu1 %vm790_vm2, %v21494_v54  ;;  %16985 = vmatpush3.bf16.msra.mxu1 %v19581_v32 }
 0x47e   : > { %17360 = vmatprep.subr.bf16.mxu1 %v20162_v5 }
 0x484   : > { %16957 = vmatmul.mubr.msk.bf16.gmra.mrb[40].mxu1 %vm790_vm2, %v21496_v63 }
 0x485   : > { %16960 = vmatprep.mubr.msk.bf16.mxu1 %vm790_vm2, %v21502_v1 }
 0x48c   : > { %16961 = vmatmul.mubr.msk.bf16.gmra.mrb[44].mxu1 %vm790_vm2, %v21504_v12 }
 0x48d   : > { %16964 = vmatprep.mubr.msk.bf16.mxu1 %vm790_vm2, %v4756_v23 }
 0x494   : > { %16965 = vmatmul.mubr.msk.bf16.gmra.mrb[48].mxu1 %vm790_vm2, %v4757_v14 }
 0x495   : > { %16968 = vmatprep.mubr.msk.bf16.mxu1 %vm790_vm2, %v4758_v52 }
 0x49c   : > { %16969 = vmatmul.mubr.msk.bf16.gmra.mrb[52].mxu1 %vm790_vm2, %v4759_v2 }
 0x49d   : > { %16972 = vmatprep.mubr.msk.bf16.mxu1 %vm790_vm2, %v4760_v33 }
 0x4a4   : > { %16973 = vmatmul.mubr.msk.bf16.gmra.mrb[56].mxu1 %vm790_vm2, %v4761_v35 }
 0x4a5   : > { %16976 = vmatprep.mubr.msk.bf16.mxu1 %vm790_vm2, %v4762_v43 }
 0x4ac   : > { %16977 = vmatmul.mubr.msk.bf16.gmra.mrb[60].mxu1 %vm790_vm2, %v4763_v11 }
 0x4ad   : > { %16986 = vmatprep.mubr.msk.bf16.mxu1 %vm790_vm2, %v21474_v55 }
 0x4b4   : > { %16987 = vmatmul.mubr.msk.bf16.vlgmr.msra.gmra.mrb[32].mxu1 %vm790_vm2, %v21483_v9 }
 0x4b5   : > { %16990 = vmatprep.mubr.msk.bf16.mxu1 %vm790_vm2, %v21488_v36 }
 0x4bc   : > { %16991 = vmatmul.mubr.msk.bf16.gmra.mrb[36].mxu1 %vm790_vm2, %v21494_v54 }
 0x4bd   : > { %16994 = vmatprep.mubr.msk.bf16.mxu1 %vm790_vm2, %v21496_v63 }
 0x4c4   : > { %16995 = vmatmul.mubr.msk.bf16.gmra.mrb[40].mxu1 %vm790_vm2, %v21502_v1 }
 0x4c5   : > { %16998 = vmatprep.mubr.msk.bf16.mxu1 %vm790_vm2, %v21504_v12 }
 0x4cc   : > { %16999 = vmatmul.mubr.msk.bf16.gmra.mrb[44].mxu1 %vm790_vm2, %v4756_v23 }
 0x4cd   : > { %17002 = vmatprep.mubr.msk.bf16.mxu1 %vm790_vm2, %v4757_v14 }
 0x4d4   : > { %17003 = vmatmul.mubr.msk.bf16.gmra.mrb[48].mxu1 %vm790_vm2, %v4758_v52 }
 0x4d5   : > { %17006 = vmatprep.mubr.msk.bf16.mxu1 %vm790_vm2, %v4759_v2 }
 0x4dc   : > { %17007 = vmatmul.mubr.msk.bf16.gmra.mrb[52].mxu1 %vm790_vm2, %v4760_v33 }
 0x4dd   : > { %17010 = vmatprep.mubr.msk.bf16.mxu1 %vm790_vm2, %v4761_v35 }
 0x4e4   : > { %17011 = vmatmul.mubr.msk.bf16.gmra.mrb[56].mxu1 %vm790_vm2, %v4762_v43 }
 0x4e5   : > { %17014 = vmatprep.mubr.msk.bf16.mxu1 %vm790_vm2, %v4763_v11 }
 0x4ec   : > { %17015 = vmatmul.mubr.msk.bf16.gmra.mrb[60].mxu1 %vm790_vm2, %v4764_v10 }
 0x4ed   : > { %17364 = vmatprep.mubr.msk.bf16.mxu1 %vm20163_vm7, %v20162_v5 }
 0x587   : > { %v16988_v58 = vpop.f32.mrb[32].mxu1 }
 0x588   : > { %v21592_v53 = vadd.f32 %v16988_v58, %v21589_v40  ;;  %v5314_v47 = vpop.f32.mrb[33].mxu1 }
 0x589   : > { %v21595_v22 = vadd.f32 %v21589_v40, %v5314_v47  ;;  %v16989_v25 = vpop.f32.mrb[34].mxu1 }
 0x58a   : > { %v14765_v27 = vmul.f32 -1.442695, %v21592_v53  ;;  %v21599_v49 = vadd.f32 %v16989_v25, %v21589_v40  ;;  %v5317_v45 = vpop.f32.mrb[35].mxu1 }
 0x58b   : > { %v14763_v55 = vmul.f32 -1.442695, %v21595_v22  ;;  %v21603_v56 = vadd.f32 %v21589_v40, %v5317_v45 }
 0x58c   : > { %19765 = vpow2.f32 %v14765_v27  ;;  %v14766_v41 = vmul.f32 -1.442695, %v21599_v49 }
 0x58d   : > { %19767 = vpow2.f32 %v14763_v55  ;;  %v14764_v42 = vmul.f32 -1.442695, %v21603_v56 }
 0x58e   : > { %19769 = vpow2.f32 %v14766_v41 }
 0x58f   : > { %19771 = vpow2.f32 %v14764_v42  ;;  %v16992_v46 = vpop.f32.mrb[36].mxu1 }
 0x590   : > { %v21608_v61 = vadd.f32 %v16992_v46, %v21589_v40  ;;  %v5330_v9 = vpop.f32.mrb[37].mxu1 }
 0x591   : > { %v21611_v0 = vadd.f32 %v21589_v40, %v5330_v9  ;;  %v16993_v36 = vpop.f32.mrb[38].mxu1 }
 0x592   : > { %v14769_v62 = vmul.f32 -1.442695, %v21608_v61  ;;  %v21615_v50 = vadd.f32 %v16993_v36, %v21589_v40  ;;  %v5333_v15 = vpop.f32.mrb[39].mxu1 }
 0x593   : > { %v14767_v28 = vmul.f32 -1.442695, %v21611_v0  ;;  %v21619_v54 = vadd.f32 %v21589_v40, %v5333_v15 }
 0x594   : > { %19773 = vpow2.f32 %v14769_v62  ;;  %v14770_v63 = vmul.f32 -1.442695, %v21615_v50 }
 0x595   : > { %19775 = vpow2.f32 %v14767_v28  ;;  %v14768_v4 = vmul.f32 -1.442695, %v21619_v54 }
 0x596   : > { %v19766_v17 = vpop.eup %19765  ;;  %19777 = vpow2.f32 %v14770_v63 }
 0x597   : > { %v19768_v48 = vpop.eup %19767  ;;  %v5610_v57 = vadd.f32 1.0, %v19766_v17  ;;  %19779 = vpow2.f32 %v14768_v4  ;;  %v16996_v1 = vpop.f32.mrb[40].mxu1 }
 0x598   : > { %v19770_v12 = vpop.eup %19769  ;;  %v5608_v30 = vadd.f32 1.0, %v19768_v48  ;;  %v21624_v59 = vadd.f32 %v16996_v1, %v21589_v40  ;;  %v5346_v13 = vpop.f32.mrb[41].mxu1 }
 0x599   : > { %v19772_v26 = vpop.eup %19771  ;;  %19781 = vrcp.f32 %v5610_v57  ;;  %v5611_v23 = vadd.f32 1.0, %v19770_v12  ;;  %v21627_v14 = vadd.f32 %v21589_v40, %v5346_v13  ;;  %v16997_v20 = vpop.f32.mrb[42].mxu1 }
 0x59a   : > { %19783 = vrcp.f32 %v5608_v30  ;;  %v5609_v60 = vadd.f32 1.0, %v19772_v26  ;;  %v14773_v21 = vmul.f32 -1.442695, %v21624_v59  ;;  %v21631_v34 = vadd.f32 %v16997_v20, %v21589_v40  ;;  %v5349_v52 = vpop.f32.mrb[43].mxu1 }
 0x59b   : > { %19785 = vrcp.f32 %v5611_v23  ;;  %v14771_v2 = vmul.f32 -1.442695, %v21627_v14  ;;  %v21635_v19 = vadd.f32 %v21589_v40, %v5349_v52 }
 0x59c   : > { %19787 = vrcp.f32 %v5609_v60  ;;  %v14774_v39 = vmul.f32 -1.442695, %v21631_v34 }
 0x59d   : > { %19789 = vpow2.f32 %v14773_v21  ;;  %v14772_v3 = vmul.f32 -1.442695, %v21635_v19 }
 0x59e   : > { %v19774_v31 = vpop.eup %19773  ;;  %19791 = vpow2.f32 %v14771_v2 }
 0x59f   : > { %v19776_v33 = vpop.eup %19775  ;;  %v5614_v35 = vadd.f32 1.0, %v19774_v31  ;;  %19793 = vpow2.f32 %v14774_v39  ;;  %v17000_v7 = vpop.f32.mrb[44].mxu1 }
 0x5a0   : > { %v19778_v8 = vpop.eup %19777  ;;  %v5612_v43 = vadd.f32 1.0, %v19776_v33  ;;  %19795 = vpow2.f32 %v14772_v3  ;;  %v21640_v37 = vadd.f32 %v17000_v7, %v21589_v40  ;;  %v5362_v32 = vpop.f32.mrb[45].mxu1 }
 0x5a1   : > { %v19780_v18 = vpop.eup %19779  ;;  %19797 = vrcp.f32 %v5614_v35  ;;  %v5615_v38 = vadd.f32 1.0, %v19778_v8  ;;  %v21643_v11 = vadd.f32 %v21589_v40, %v5362_v32  ;;  %v17001_v24 = vpop.f32.mrb[46].mxu1 }
 0x5a2   : > { %19799 = vrcp.f32 %v5612_v43  ;;  %v5613_v44 = vadd.f32 1.0, %v19780_v18  ;;  %v14777_v10 = vmul.f32 -1.442695, %v21640_v37  ;;  %v21647_v6 = vadd.f32 %v17001_v24, %v21589_v40  ;;  %v5365_v16 = vpop.f32.mrb[47].mxu1 }
 0x5a3   : > { %v19782_v51 = vpop.eup %19781  ;;  %19801 = vrcp.f32 %v5615_v38  ;;  %v14775_v58 = vmul.f32 -1.442695, %v21643_v11  ;;  %v21651_v47 = vadd.f32 %v21589_v40, %v5365_v16 }
 0x5a4   : > { %v19784_v25 = vpop.eup %19783  ;;  %v5706_v27 = vmul.f32 %v19782_v51, %v21592_v53  ;;  %19803 = vrcp.f32 %v5613_v44  ;;  %v14778_v45 = vmul.f32 -1.442695, %v21647_v6 }
 0x5a5   : > { %v19786_v55 = vpop.eup %19785  ;;  %v5704_v41 = vmul.f32 %v19784_v25, %v21595_v22  ;;  %19805 = vpow2.f32 %v14777_v10  ;;  %v14776_v42 = vmul.f32 -1.442695, %v21651_v47 }
 0x5a6   : > { %v19788_v46 = vpop.eup %19787  ;;  %5738 = vst.msk [vmem:[#allocation2 + $0x31] sm:$0xff] %vm790_vm2, %v5706_v27  ;;  %v5707_v9 = vmul.f32 %v19786_v55, %v21599_v49  ;;  %19807 = vpow2.f32 %v14775_v58 }
 0x5a7   : > { %v19790_v36 = vpop.eup %19789  ;;  %5736 = vst.msk [vmem:[#allocation2 + $0x19] sm:$0xff] %vm790_vm2, %v5704_v41  ;;  %v5705_v53 = vmul.f32 %v19788_v46, %v21603_v56  ;;  %19809 = vpow2.f32 %v14778_v45  ;;  %v17004_v62 = vpop.f32.mrb[48].mxu1 }
 0x5a8   : > { %v19792_v15 = vpop.eup %19791  ;;  %5739 = vst.msk [vmem:[#allocation2 + $0x39] sm:$0xff] %vm790_vm2, %v5707_v9  ;;  %v5618_v22 = vadd.f32 1.0, %v19790_v36  ;;  %19811 = vpow2.f32 %v14776_v42  ;;  %v21663_v28 = vadd.f32 %v17004_v62, %v21589_v40  ;;  %v5378_v63 = vpop.f32.mrb[49].mxu1  ;;  %v19586_v42 = vld [vmem:[%s24114_s1 + $0x8] sm:$0xff]  }
 0x5a9   : > { %v19794_v4 = vpop.eup %19793  ;;  %5737 = vst.msk [vmem:[#allocation2 + $0x21] sm:$0xff] %vm790_vm2, %v5705_v53  ;;  %v5616_v49 = vadd.f32 1.0, %v19792_v15  ;;  %v21667_v17 = vadd.f32 %v21589_v40, %v5378_v63  ;;  %v17005_v48 = vpop.f32.mrb[50].mxu1 }
 0x5aa   : > { %v19796_v56 = vpop.eup %19795  ;;  %19813 = vrcp.f32 %v5618_v22  ;;  %v5619_v57 = vadd.f32 1.0, %v19794_v4  ;;  %v14781_v1 = vmul.f32 -1.442695, %v21663_v28  ;;  %v21671_v12 = vadd.f32 %v17005_v48, %v21589_v40  ;;  %v5381_v30 = vpop.f32.mrb[51].mxu1  ;;  %v19587_v48 = vld [vmem:[%s24114_s1 + $0x10] sm:$0xff]  }
 0x5ab   : > { %v19798_v13 = vpop.eup %19797  ;;  %19815 = vrcp.f32 %v5616_v49  ;;  %v5617_v26 = vadd.f32 1.0, %v19796_v56  ;;  %v14779_v23 = vmul.f32 -1.442695, %v21667_v17  ;;  %v21675_v20 = vadd.f32 %v21589_v40, %v5381_v30 }
 0x5ac   : > { %v19800_v60 = vpop.eup %19799  ;;  %v5710_v21 = vmul.f32 %v19798_v13, %v21608_v61  ;;  %19817 = vrcp.f32 %v5619_v57  ;;  %v14782_v52 = vmul.f32 -1.442695, %v21671_v12 }
 0x5ad   : > { %v19802_v2 = vpop.eup %19801  ;;  %v5708_v39 = vmul.f32 %v19800_v60, %v21611_v0  ;;  %19819 = vrcp.f32 %v5617_v26  ;;  %v14780_v3 = vmul.f32 -1.442695, %v21675_v20  ;;  %v5772_v8 = vld [vmem:[#allocation2 + $0x30] sm:$0xff] }
 0x5ae   : > { %v19804_v31 = vpop.eup %19803  ;;  %5742 = vst.msk [vmem:[#allocation2 + $0x61] sm:$0xff] %vm790_vm2, %v5710_v21  ;;  %v5711_v33 = vmul.f32 %v19802_v2, %v21615_v50  ;;  %19821 = vpow2.f32 %v14781_v1  ;;  %v5770_v50 = vld [vmem:[#allocation2 + $0x18] sm:$0xff] }
 0x5af   : > { %v19806_v35 = vpop.eup %19805  ;;  %5740 = vst.msk [vmem:[#allocation2 + $0x49] sm:$0xff] %vm790_vm2, %v5708_v39  ;;  %v5709_v61 = vmul.f32 %v19804_v31, %v21619_v54  ;;  %19823 = vpow2.f32 %v14779_v23  ;;  %v17008_v7 = vpop.f32.mrb[52].mxu1  ;;  %v5773_v43 = vld [vmem:[#allocation2 + $0x38] sm:$0xff] }
 0x5b0   : > { %v19808_v32 = vpop.eup %19807  ;;  %5743 = vst.msk [vmem:[#allocation2 + $0x69] sm:$0xff] %vm790_vm2, %v5711_v33  ;;  %v5622_v0 = vadd.f32 1.0, %v19806_v35  ;;  %19825 = vpow2.f32 %v14782_v52  ;;  %v21687_v18 = vadd.f32 %v17008_v7, %v21589_v40  ;;  %v5394_v38 = vpop.f32.mrb[53].mxu1  ;;  %v5771_v24 = vld [vmem:[#allocation2 + $0x20] sm:$0xff]  ;;  %v21689_v44 = vpack.c.bf16 %v5773_v43, %v5772_v8 }
 0x5b1   : > { %v19810_v10 = vpop.eup %19809  ;;  %5741 = vst.msk [vmem:[#allocation2 + $0x51] sm:$0xff] %vm790_vm2, %v5709_v61  ;;  %v5620_v54 = vadd.f32 1.0, %v19808_v32  ;;  %19827 = vpow2.f32 %v14780_v3  ;;  %v21693_v16 = vadd.f32 %v21589_v40, %v5394_v38  ;;  %v17009_v51 = vpop.f32.mrb[54].mxu1  ;;  %v21695_v58 = vpack.c.bf16 %v5771_v24, %v5770_v50  ;;  %v21742_v61 = vld [vmem:[%s24114_s1 + $0x90] sm:$0xff]  }
 0x5b2   : > { %v19812_v25 = vpop.eup %19811  ;;  %19829 = vrcp.f32 %v5622_v0  ;;  %v5623_v27 = vadd.f32 1.0, %v19810_v10  ;;  %v14785_v45 = vmul.f32 -1.442695, %v21687_v18  ;;  %v21699_v55 = vadd.f32 %v17009_v51, %v21589_v40  ;;  %v5397_v41 = vpop.f32.mrb[55].mxu1 }
 0x5b3   : > { %19831 = vrcp.f32 %v5620_v54  ;;  %v5621_v46 = vadd.f32 1.0, %v19812_v25  ;;  %v14783_v9 = vmul.f32 -1.442695, %v21693_v16  ;;  %v21706_v36 = vadd.f32 %v21589_v40, %v5397_v41  ;;  %17024 = vmatprep.mubr.msk.bf16.mxu0 %vm790_vm2, %v21695_v58 }
 0x5b4   : > { %v19814_v53 = vpop.eup %19813  ;;  %19833 = vrcp.f32 %v5623_v27  ;;  %v14786_v62 = vmul.f32 -1.442695, %v21699_v55  ;;  %17025 = vmatmul.mubr.msk.bf16.vlgmr.msra.gmra.mrb[32].mxu0 %vm790_vm2, %v21689_v44 }
 0x5b5   : > { %v19816_v15 = vpop.eup %19815  ;;  %v5714_v22 = vmul.f32 %v19814_v53, %v21624_v59  ;;  %19835 = vrcp.f32 %v5621_v46  ;;  %v14784_v63 = vmul.f32 -1.442695, %v21706_v36  ;;  %17057 = vmatpush3.bf16.msra.mxu0 %v21583_v29  ;;  %v5776_v39 = vld [vmem:[#allocation2 + $0x60] sm:$0xff] }
 0x5b6   : > { %v19818_v4 = vpop.eup %19817  ;;  %v5712_v49 = vmul.f32 %v19816_v15, %v21627_v14  ;;  %19837 = vpow2.f32 %v14785_v45  ;;  %17058 = vmatprep.subr.bf16.mxu0 %v19586_v42  ;;  %v5774_v26 = vld [vmem:[#allocation2 + $0x48] sm:$0xff] }
 0x5b7   : > { %v19820_v56 = vpop.eup %19819  ;;  %5746 = vst.msk [vmem:[#allocation2 + $0x91] sm:$0xff] %vm790_vm2, %v5714_v22  ;;  %v5715_v57 = vmul.f32 %v19818_v4, %v21631_v34  ;;  %19839 = vpow2.f32 %v14783_v9  ;;  %v17012_v59 = vpop.f32.mrb[56].mxu1  ;;  %v5777_v1 = vld [vmem:[#allocation2 + $0x68] sm:$0xff] }
 0x5b8   : > { %v19822_v30 = vpop.eup %19821  ;;  %5744 = vst.msk [vmem:[#allocation2 + $0x79] sm:$0xff] %vm790_vm2, %v5712_v49  ;;  %v5713_v29 = vmul.f32 %v19820_v56, %v21635_v19  ;;  %19841 = vpow2.f32 %v14786_v62  ;;  %v21725_v14 = vadd.f32 %v17012_v59, %v21589_v40  ;;  %v5410_v13 = vpop.f32.mrb[57].mxu1  ;;  %v5775_v23 = vld [vmem:[#allocation2 + $0x50] sm:$0xff]  ;;  %v21737_v35 = vpack.c.bf16 %v5777_v1, %v5776_v39 }
 0x5b9   : > { %v19824_v60 = vpop.eup %19823  ;;  %5747 = vst.msk [vmem:[#allocation2 + $0x99] sm:$0xff] %vm790_vm2, %v5715_v57  ;;  %v5626_v21 = vadd.f32 1.0, %v19822_v30  ;;  %19843 = vpow2.f32 %v14784_v63  ;;  %v21729_v34 = vadd.f32 %v21589_v40, %v5410_v13  ;;  %v17013_v52 = vpop.f32.mrb[58].mxu1  ;;  %v21731_v2 = vpack.c.bf16 %v5775_v23, %v5774_v26  ;;  %17059 = vmatpush3.bf16.msra.mxu0 %v19586_v42 }
 0x5ba   : > { %v19826_v19 = vpop.eup %19825  ;;  %5745 = vst.msk [vmem:[#allocation2 + $0x81] sm:$0xff] %vm790_vm2, %v5713_v29  ;;  %v5624_v3 = vadd.f32 1.0, %v19824_v60  ;;  %v21735_v31 = vadd.f32 %v17013_v52, %v21589_v40  ;;  %v5413_v33 = vpop.f32.mrb[59].mxu1  ;;  %17060 = vmatprep.subr.bf16.mxu0 %v19587_v48  ;;  %v14789_v43 = vmul.f32 -1.442695, %v21725_v14 }
 0x5bb   : > { %v19828_v7 = vpop.eup %19827  ;;  %19845 = vrcp.f32 %v5626_v21  ;;  %v5627_v8 = vadd.f32 1.0, %v19826_v19  ;;  %v21746_v32 = vadd.f32 %v21589_v40, %v5413_v33  ;;  %17028 = vmatprep.mubr.msk.bf16.mxu0 %vm790_vm2, %v21731_v2  ;;  %v14787_v50 = vmul.f32 -1.442695, %v21729_v34 }
 0x5bc   : > { %v19830_v0 = vpop.eup %19829  ;;  %19847 = vrcp.f32 %v5624_v3  ;;  %v5625_v38 = vadd.f32 1.0, %v19828_v7  ;;  %17029 = vmatmul.mubr.msk.bf16.gmra.mrb[36].mxu0 %vm790_vm2, %v21737_v35  ;;  %v14790_v54 = vmul.f32 -1.442695, %v21735_v31 }
 0x5bd   : > { %v19832_v24 = vpop.eup %19831  ;;  %v5718_v10 = vmul.f32 %v19830_v0, %v21640_v37  ;;  %19849 = vrcp.f32 %v5627_v8  ;;  %17061 = vmatpush3.bf16.msra.mxu0 %v19587_v48  ;;  %v14788_v27 = vmul.f32 -1.442695, %v21746_v32 }
 0x5be   : > { %v19834_v51 = vpop.eup %19833  ;;  %v5716_v25 = vmul.f32 %v19832_v24, %v21643_v11  ;;  %19851 = vrcp.f32 %v5625_v38  ;;  %17094 = vmatprep.subr.bf16.mxu0 %v21742_v61  ;;  %v5780_v23 = vld [vmem:[#allocation2 + $0x90] sm:$0xff] }
 0x5bf   : > { %v19836_v45 = vpop.eup %19835  ;;  %5750 = vst.msk [vmem:[#allocation2 + $0xc1] sm:$0xff] %vm790_vm2, %v5718_v10  ;;  %v5719_v41 = vmul.f32 %v19834_v51, %v21647_v6  ;;  %19853 = vpow2.f32 %v14789_v43  ;;  %v17016_v42 = vpop.f32.mrb[60].mxu1  ;;  %v5778_v30 = vld [vmem:[#allocation2 + $0x78] sm:$0xff] }
 0x5c0   : > { %v19838_v37 = vpop.eup %19837  ;;  %5748 = vst.msk [vmem:[#allocation2 + $0xa9] sm:$0xff] %vm790_vm2, %v5716_v25  ;;  %v5717_v46 = vmul.f32 %v19836_v45, %v21651_v47  ;;  %19855 = vpow2.f32 %v14787_v50  ;;  %v21763_v11 = vadd.f32 %v17016_v42, %v21589_v40  ;;  %v5426_v9 = vpop.f32.mrb[61].mxu1  ;;  %v5781_v48 = vld [vmem:[#allocation2 + $0x98] sm:$0xff] }
 0x5c1   : > { %v19840_v53 = vpop.eup %19839  ;;  %5751 = vst.msk [vmem:[#allocation2 + $0xc9] sm:$0xff] %vm790_vm2, %v5719_v41  ;;  %v5630_v62 = vadd.f32 1.0, %v19838_v37  ;;  %19857 = vpow2.f32 %v14790_v54  ;;  %v21767_v15 = vadd.f32 %v21589_v40, %v5426_v9  ;;  %v17017_v6 = vpop.f32.mrb[62].mxu1  ;;  %v5779_v22 = vld [vmem:[#allocation2 + $0x80] sm:$0xff]  ;;  %v21781_v52 = vpack.c.bf16 %v5781_v48, %v5780_v23 }
 0x5c2   : > { %v19842_v63 = vpop.eup %19841  ;;  %5749 = vst.msk [vmem:[#allocation2 + $0xb1] sm:$0xff] %vm790_vm2, %v5717_v46  ;;  %v5628_v4 = vadd.f32 1.0, %v19840_v53  ;;  %19859 = vpow2.f32 %v14788_v27  ;;  %v21771_v47 = vadd.f32 %v17017_v6, %v21589_v40  ;;  %v5429_v49 = vpop.f32.mrb[63].mxu1  ;;  %v14793_v59 = vmul.f32 -1.442695, %v21763_v11 }
 0x5c3   : > { %v19844_v56 = vpop.eup %19843  ;;  %19861 = vrcp.f32 %v5630_v62  ;;  %v5631_v57 = vadd.f32 1.0, %v19842_v63  ;;  %v21775_v1 = vadd.f32 %v21589_v40, %v5429_v49  ;;  %v14791_v13 = vmul.f32 -1.442695, %v21767_v15 }
 0x5c4   : > { %19863 = vrcp.f32 %v5628_v4  ;;  %v5629_v29 = vadd.f32 1.0, %v19844_v56  ;;  %v21778_v26 = vpack.c.bf16 %v5779_v22, %v5778_v30  ;;  %v14794_v21 = vmul.f32 -1.442695, %v21771_v47 }
 0x5c5   : > { %v19846_v60 = vpop.eup %19845  ;;  %19865 = vrcp.f32 %v5631_v57  ;;  %v14792_v40 = vmul.f32 -1.442695, %v21775_v1 }
 0x5c6   : > { %v19848_v39 = vpop.eup %19847  ;;  %v5722_v19 = vmul.f32 %v19846_v60, %v21663_v28  ;;  %19867 = vrcp.f32 %v5629_v29  ;;  %17032 = vmatprep.mubr.msk.bf16.mxu0 %vm790_vm2, %v21778_v26 }
 0x5c7   : > { %v19850_v3 = vpop.eup %19849  ;;  %v5720_v33 = vmul.f32 %v19848_v39, %v21667_v17  ;;  %19869 = vpow2.f32 %v14793_v59  ;;  %17033 = vmatmul.mubr.msk.bf16.gmra.mrb[40].mxu0 %vm790_vm2, %v21781_v52  ;;  %v5782_v0 = vld [vmem:[#allocation2 + $0xa8] sm:$0xff] }
 0x5c8   : > { %v19852_v7 = vpop.eup %19851  ;;  %5754 = vst.msk [vmem:[#allocation2 + $0xf1] sm:$0xff] %vm790_vm2, %v5722_v19  ;;  %v5723_v8 = vmul.f32 %v19850_v3, %v21671_v12  ;;  %19871 = vpow2.f32 %v14791_v13  ;;  %v5785_v10 = vld [vmem:[#allocation2 + $0xc8] sm:$0xff] }
 0x5c9   : > { %v19854_v28 = vpop.eup %19853  ;;  %5752 = vst.msk [vmem:[#allocation2 + $0xd9] sm:$0xff] %vm790_vm2, %v5720_v33  ;;  %v5721_v43 = vmul.f32 %v19852_v7, %v21675_v20  ;;  %19873 = vpow2.f32 %v14794_v21  ;;  %v5783_v38 = vld [vmem:[#allocation2 + $0xb0] sm:$0xff]  ;;  %v5784_v20 = vld [vmem:[#allocation2 + $0xc0] sm:$0xff] }
 0x5ca   : > { %v19856_v50 = vpop.eup %19855  ;;  %5755 = vst.msk [vmem:[#allocation2 + $0xf9] sm:$0xff] %vm790_vm2, %v5723_v8  ;;  %v5634_v17 = vadd.f32 1.0, %v19854_v28  ;;  %19875 = vpow2.f32 %v14792_v40  ;;  %v21795_v24 = vpack.c.bf16 %v5783_v38, %v5782_v0  ;;  %v21800_v41 = vpack.c.bf16 %v5785_v10, %v5784_v20 }
 0x5cb   : > { %v19858_v54 = vpop.eup %19857  ;;  %5753 = vst.msk [vmem:[#allocation2 + $0xe1] sm:$0xff] %vm790_vm2, %v5721_v43  ;;  %v5632_v12 = vadd.f32 1.0, %v19856_v50 }
 0x5cc   : > { %v19860_v51 = vpop.eup %19859  ;;  %19877 = vrcp.f32 %v5634_v17  ;;  %v5635_v25 = vadd.f32 1.0, %v19858_v54  ;;  %17036 = vmatprep.mubr.msk.bf16.mxu0 %vm790_vm2, %v21795_v24 }
 0x5cd   : > { %v19862_v27 = vpop.eup %19861  ;;  %19879 = vrcp.f32 %v5632_v12  ;;  %v5633_v45 = vadd.f32 1.0, %v19860_v51 }
 0x5ce   : > { %v19864_v42 = vpop.eup %19863  ;;  %v5726_v37 = vmul.f32 %v19862_v27, %v21687_v18  ;;  %19881 = vrcp.f32 %v5635_v25 }
 0x5cf   : > { %v19866_v46 = vpop.eup %19865  ;;  %v5724_v9 = vmul.f32 %v19864_v42, %v21693_v16  ;;  %19883 = vrcp.f32 %v5633_v45  ;;  %17037 = vmatmul.mubr.msk.bf16.gmra.mrb[44].mxu0 %vm790_vm2, %v21800_v41  ;;  %v5788_v30 = vld [vmem:[#allocation2 + $0xf0] sm:$0xff] }
 0x5d0   : > { %v19868_v53 = vpop.eup %19867  ;;  %5758 = vst.msk [vmem:[#allocation2 + $0x121] sm:$0xff] %vm790_vm2, %v5726_v37  ;;  %v5727_v62 = vmul.f32 %v19866_v46, %v21699_v55  ;;  %v5786_v4 = vld [vmem:[#allocation2 + $0xd8] sm:$0xff] }
 0x5d1   : > { %v19870_v6 = vpop.eup %19869  ;;  %5756 = vst.msk [vmem:[#allocation2 + $0x109] sm:$0xff] %vm790_vm2, %v5724_v9  ;;  %v5725_v22 = vmul.f32 %v19868_v53, %v21706_v36  ;;  %v5789_v49 = vld [vmem:[#allocation2 + $0xf8] sm:$0xff] }
 0x5d2   : > { %v19872_v63 = vpop.eup %19871  ;;  %5759 = vst.msk [vmem:[#allocation2 + $0x129] sm:$0xff] %vm790_vm2, %v5727_v62  ;;  %v5638_v18 = vadd.f32 1.0, %v19870_v6  ;;  %v5787_v16 = vld [vmem:[#allocation2 + $0xe0] sm:$0xff]  ;;  %v21816_v36 = vpack.c.bf16 %v5789_v49, %v5788_v30  ;;  %v19589_v53 = vld [vmem:[%s24114_s1 + $0x98] sm:$0xff]   ;;  %v19595_v49 = vld [vmem:[%s24114_s1 + $0x68] sm:$0xff]  }
 0x5d3   : > { %v19874_v48 = vpop.eup %19873  ;;  %5757 = vst.msk [vmem:[#allocation2 + $0x111] sm:$0xff] %vm790_vm2, %v5725_v22  ;;  %v5636_v56 = vadd.f32 1.0, %v19872_v63  ;;  %v21812_v57 = vpack.c.bf16 %v5787_v16, %v5786_v4  ;;  %v19590_v62 = vld [vmem:[%s24114_s1 + $0xa0] sm:$0xff]   ;;  %v19591_v6 = vld [vmem:[%s24114_s1 + $0x18] sm:$0xff]  }
 0x5d4   : > { %v19876_v59 = vpop.eup %19875  ;;  %19885 = vrcp.f32 %v5638_v18  ;;  %v5639_v55 = vadd.f32 1.0, %v19874_v48  ;;  %v6468_v22 = vld [vmem:[#allocation2 + $0x21] sm:$0xff]  ;;  %v6470_v63 = vld [vmem:[#allocation2 + $0x39] sm:$0xff]  ;;  %v6469_v16 = vld [vmem:[#allocation2 + $0x31] sm:$0xff] }
 0x5d5   : > { %19887 = vrcp.f32 %v5636_v56  ;;  %v5637_v29 = vadd.f32 1.0, %v19876_v59  ;;  %17040 = vmatprep.mubr.msk.bf16.mxu0 %vm790_vm2, %v21812_v57  ;;  %v6467_v18 = vld [vmem:[#allocation2 + $0x19] sm:$0xff]  ;;  %v21937_v48 = vpack.c.bf16 %v6470_v63, %v6469_v16  ;;  %v19596_v56 = vld [vmem:[%s24114_s1 + $0x70] sm:$0xff]   ;;  %v7230_v16 = vld [vmem:[#allocation2 + $0x22] sm:$0xff] }
 0x5d6   : > { %v19878_v13 = vpop.eup %19877  ;;  %19889 = vrcp.f32 %v5639_v55  ;;  %v21932_v4 = vpack.c.bf16 %v6468_v22, %v6467_v18  ;;  %v6474_v59 = vld [vmem:[#allocation2 + $0x69] sm:$0xff] }
 0x5d7   : > { %v19880_v23 = vpop.eup %19879  ;;  %v5730_v60 = vmul.f32 %v19878_v13, %v21725_v14  ;;  %19891 = vrcp.f32 %v5637_v29  ;;  %17041 = vmatmul.mubr.msk.bf16.gmra.mrb[48].mxu0 %vm790_vm2, %v21816_v36  ;;  %v5792_v28 = vld [vmem:[#allocation2 + $0x120] sm:$0xff]  ;;  %v6471_v55 = vld [vmem:[#allocation2 + $0x49] sm:$0xff] }
 0x5d8   : > { %v19882_v21 = vpop.eup %19881  ;;  %v5728_v39 = vmul.f32 %v19880_v23, %v21729_v34  ;;  %v5790_v33 = vld [vmem:[#allocation2 + $0x108] sm:$0xff] }
 0x5d9   : > { %v19884_v19 = vpop.eup %19883  ;;  %5762 = vst.msk [vmem:[#allocation2 + $0x151] sm:$0xff] %vm790_vm2, %v5730_v60  ;;  %v5731_v40 = vmul.f32 %v19882_v21, %v21735_v31  ;;  %v5793_v8 = vld [vmem:[#allocation2 + $0x128] sm:$0xff]  ;;  %v6478_v60 = vld [vmem:[#allocation2 + $0x99] sm:$0xff] }
 0x5da   : > { %5760 = vst.msk [vmem:[#allocation2 + $0x139] sm:$0xff] %vm790_vm2, %v5728_v39  ;;  %v5729_v3 = vmul.f32 %v19884_v19, %v21746_v32  ;;  %v5791_v7 = vld [vmem:[#allocation2 + $0x110] sm:$0xff]  ;;  %v21832_v34 = vpack.c.bf16 %v5793_v8, %v5792_v28  ;;  %v6473_v29 = vld [vmem:[#allocation2 + $0x61] sm:$0xff]  ;;  %v6475_v21 = vld [vmem:[#allocation2 + $0x79] sm:$0xff] }
 0x5db   : > { %5763 = vst.msk [vmem:[#allocation2 + $0x159] sm:$0xff] %vm790_vm2, %v5731_v40  ;;  %v21827_v14 = vpack.c.bf16 %v5791_v7, %v5790_v33  ;;  %v21951_v13 = vpack.c.bf16 %v6474_v59, %v6473_v29  ;;  %v6476_v23 = vld [vmem:[#allocation2 + $0x81] sm:$0xff]  ;;  %v6477_v19 = vld [vmem:[#allocation2 + $0x91] sm:$0xff]  ;;  %v6482_v33 = vld [vmem:[#allocation2 + $0xc9] sm:$0xff] }
 0x5dc   : > { %5761 = vst.msk [vmem:[#allocation2 + $0x141] sm:$0xff] %vm790_vm2, %v5729_v3  ;;  %v21957_v39 = vpack.c.bf16 %v6476_v23, %v6475_v21  ;;  %v21959_v40 = vpack.c.bf16 %v6478_v60, %v6477_v19  ;;  %v6480_v3 = vld [vmem:[#allocation2 + $0xb1] sm:$0xff]  ;;  %v6479_v7 = vld [vmem:[#allocation2 + $0xa9] sm:$0xff]  ;;  %v22086_v60 = vld [vmem:[%s24114_s1 + $0xc0] sm:$0xff]  }
 0x5dd   : > { %17044 = vmatprep.mubr.msk.bf16.mxu0 %vm790_vm2, %v21827_v14  ;;  %v21965_v8 = vpack.c.bf16 %v6480_v3, %v6479_v7  ;;  %v7228_v22 = vld [vmem:[#allocation2 + $0xa] sm:$0xff]  ;;  %v7234_v29 = vld [vmem:[#allocation2 + $0x52] sm:$0xff]  ;;  %v7238_v19 = vld [vmem:[#allocation2 + $0x82] sm:$0xff] }
 0x5de   : > { %v19886_v31 = vpop.eup %19885  ;;  %v7240_v3 = vld [vmem:[#allocation2 + $0x9a] sm:$0xff] }
 0x5df   : > { %v19888_v43 = vpop.eup %19887  ;;  %v5734_v0 = vmul.f32 %v19886_v31, %v21763_v11  ;;  %17045 = vmatmul.mubr.msk.bf16.gmra.mrb[52].mxu0 %vm790_vm2, %v21832_v34  ;;  %v6486_v31 = vld [vmem:[#allocation2 + $0xf9] sm:$0xff] }
 0x5e0   : > { %v19890_v32 = vpop.eup %19889  ;;  %v5732_v38 = vmul.f32 %v19888_v43, %v21767_v15  ;;  %v5796_v25 = vld [vmem:[#allocation2 + $0x150] sm:$0xff]  ;;  %v5768_v15 = vld [vmem:[#allocation2] sm:$0xff] }
 0x5e1   : > { %v19892_v50 = vpop.eup %19891  ;;  %5766 = vst.msk [vmem:[#allocation2 + $0x181] sm:$0xff] %vm790_vm2, %v5734_v0  ;;  %v5735_v17 = vmul.f32 %v19890_v32, %v21771_v47  ;;  %v5794_v12 = vld [vmem:[#allocation2 + $0x138] sm:$0xff]  ;;  %v5769_v47 = vld [vmem:[#allocation2 + $0x8] sm:$0xff] }
 0x5e2   : > { %5764 = vst.msk [vmem:[#allocation2 + $0x169] sm:$0xff] %vm790_vm2, %v5732_v38  ;;  %v5733_v10 = vmul.f32 %v19892_v50, %v21775_v1  ;;  %v5797_v54 = vld [vmem:[#allocation2 + $0x158] sm:$0xff]  ;;  %v21846_v46 = vpack.c.bf16 %v5769_v47, %v5768_v15 }
 0x5e3   : > { %5767 = vst.msk [vmem:[#allocation2 + $0x189] sm:$0xff] %vm790_vm2, %v5735_v17  ;;  %v5795_v11 = vld [vmem:[#allocation2 + $0x140] sm:$0xff]  ;;  %v5818_v20 = vpack.c.bf16 %v5797_v54, %v5796_v25  ;;  %v6485_v32 = vld [vmem:[#allocation2 + $0xf1] sm:$0xff]  ;;  %v6490_v17 = vld [vmem:[#allocation2 + $0x129] sm:$0xff] }
 0x5e4   : > { %5765 = vst.msk [vmem:[#allocation2 + $0x171] sm:$0xff] %vm790_vm2, %v5733_v10  ;;  %v5817_v51 = vpack.c.bf16 %v5795_v11, %v5794_v12  ;;  %v6483_v43 = vld [vmem:[#allocation2 + $0xd9] sm:$0xff]  ;;  %v21975_v38 = vpack.c.bf16 %v6486_v31, %v6485_v32  ;;  %v6488_v50 = vld [vmem:[#allocation2 + $0x111] sm:$0xff]  ;;  %v6487_v10 = vld [vmem:[#allocation2 + $0x109] sm:$0xff] }
 0x5e5   : > { %v21981_v54 = vpack.c.bf16 %v6488_v50, %v6487_v10  ;;  %v6489_v12 = vld [vmem:[#allocation2 + $0x121] sm:$0xff]  ;;  %v6494_v25 = vld [vmem:[#allocation2 + $0x159] sm:$0xff]  ;;  %v6493_v47 = vld [vmem:[#allocation2 + $0x151] sm:$0xff] }
 0x5e6   : > { %17048 = vmatprep.mubr.msk.bf16.mxu0 %vm790_vm2, %v5817_v51  ;;  %v6513_v11 = vpack.c.bf16 %v6490_v17, %v6489_v12  ;;  %v7246_v32 = vld [vmem:[#allocation2 + $0xe2] sm:$0xff]  ;;  %v7248_v50 = vld [vmem:[#allocation2 + $0xfa] sm:$0xff]  ;;  %v7250_v12 = vld [vmem:[#allocation2 + $0x112] sm:$0xff] }
 0x5e7   : > { %17049 = vmatmul.mubr.msk.bf16.gmra.mrb[56].mxu0 %vm790_vm2, %v5818_v20 }
 0x5e8   : > { %v5800_v37 = vld [vmem:[#allocation2 + $0x180] sm:$0xff] }
 0x5e9   : > { %v5798_v45 = vld [vmem:[#allocation2 + $0x168] sm:$0xff] }
 0x5ea   : > { %v5801_v27 = vld [vmem:[#allocation2 + $0x188] sm:$0xff] }
 0x5eb   : > { %v5799_v42 = vld [vmem:[#allocation2 + $0x170] sm:$0xff]  ;;  %v5820_v9 = vpack.c.bf16 %v5801_v27, %v5800_v37  ;;  %v6515_v27 = vpack.c.bf16 %v6494_v25, %v6493_v47  ;;  %v7254_v47 = vld [vmem:[#allocation2 + $0x142] sm:$0xff] }
 0x5ec   : > { %v5819_v1 = vpack.c.bf16 %v5799_v42, %v5798_v45  ;;  %v6496_v45 = vld [vmem:[#allocation2 + $0x171] sm:$0xff]  ;;  %v6495_v42 = vld [vmem:[#allocation2 + $0x169] sm:$0xff] }
 0x5ed   : > { %v19598_v37 = vld [vmem:[%s24114_s1 + $0xb0] sm:$0xff]  }
 0x5ee   : > { %17052 = vmatprep.mubr.msk.bf16.mxu0 %vm790_vm2, %v5819_v1 }
 0x5ef   : > { %17053 = vmatmul.mubr.msk.bf16.gmra.mrb[60].mxu0 %vm790_vm2, %v5820_v9 }
 0x5f0   : > { %17062 = vmatprep.mubr.msk.bf16.mxu0 %vm790_vm2, %v21846_v46 }
 0x5f7   : > { %17063 = vmatmul.mubr.msk.bf16.vlgmr.msra.gmra.mrb[32].mxu0 %vm790_vm2, %v21695_v58  ;;  %v19592_v58 = vld [vmem:[%s24114_s1 + $0x20] sm:$0xff]  }
 0x5f8   : > { %17066 = vmatprep.mubr.msk.bf16.mxu0 %vm790_vm2, %v21689_v44  ;;  %17095 = vmatpush3.bf16.msra.mxu0 %v21742_v61  ;;  %v19593_v61 = vld [vmem:[%s24114_s1 + $0x28] sm:$0xff]  }
 0x5f9   : > { %17096 = vmatprep.subr.bf16.mxu0 %v19589_v53 }
 0x5fc   : > { %17097 = vmatpush3.bf16.msra.mxu0 %v19589_v53  ;;  %v19600_v53 = vld [vmem:[%s24114_s1 + $0x30] sm:$0xff]  }
 0x5fd   : > { %17098 = vmatprep.subr.bf16.mxu0 %v19590_v62 }
 0x5ff   : > { %17067 = vmatmul.mubr.msk.bf16.gmra.mrb[36].mxu0 %vm790_vm2, %v21731_v2 }
 0x600   : > { %17070 = vmatprep.mubr.msk.bf16.mxu0 %vm790_vm2, %v21737_v35  ;;  %17099 = vmatpush3.bf16.msra.mxu0 %v19590_v62  ;;  %v6498_v62 = vld [vmem:[#allocation2 + $0x189] sm:$0xff] }
 0x601   : > { %17132 = vmatprep.subr.bf16.mxu0 %v19591_v6 }
 0x607   : > { %17071 = vmatmul.mubr.msk.bf16.gmra.mrb[40].mxu0 %vm790_vm2, %v21778_v26 }
 0x608   : > { %17074 = vmatprep.mubr.msk.bf16.mxu0 %vm790_vm2, %v21781_v52 }
 0x60f   : > { %17075 = vmatmul.mubr.msk.bf16.gmra.mrb[44].mxu0 %vm790_vm2, %v21795_v24 }
 0x610   : > { %17078 = vmatprep.mubr.msk.bf16.mxu0 %vm790_vm2, %v21800_v41 }
 0x617   : > { %17079 = vmatmul.mubr.msk.bf16.gmra.mrb[48].mxu0 %vm790_vm2, %v21812_v57 }
 0x618   : > { %17082 = vmatprep.mubr.msk.bf16.mxu0 %vm790_vm2, %v21816_v36 }
 0x61f   : > { %17083 = vmatmul.mubr.msk.bf16.gmra.mrb[52].mxu0 %vm790_vm2, %v21827_v14 }
 0x620   : > { %17086 = vmatprep.mubr.msk.bf16.mxu0 %vm790_vm2, %v21832_v34 }
 0x627   : > { %17087 = vmatmul.mubr.msk.bf16.gmra.mrb[56].mxu0 %vm790_vm2, %v5817_v51 }
 0x628   : > { %17090 = vmatprep.mubr.msk.bf16.mxu0 %vm790_vm2, %v5818_v20 }
 0x62f   : > { %17091 = vmatmul.mubr.msk.bf16.gmra.mrb[60].mxu0 %vm790_vm2, %v5819_v1 }
 0x630   : > { %17100 = vmatprep.mubr.msk.bf16.mxu0 %vm790_vm2, %v21689_v44  ;;  %v19594_v44 = vld [vmem:[%s24114_s1 + $0x60] sm:$0xff]  }
 0x637   : > { %17101 = vmatmul.mubr.msk.bf16.vlgmr.msra.gmra.mrb[32].mxu0 %vm790_vm2, %v21731_v2  ;;  %v5802_v2 = vld [vmem:[#allocation2 + $0x198] sm:$0xff] }
 0x638   : > { %17104 = vmatprep.mubr.msk.bf16.mxu0 %vm790_vm2, %v21737_v35  ;;  %17133 = vmatpush3.bf16.msra.mxu0 %v19591_v6  ;;  %v5803_v35 = vld [vmem:[#allocation2 + $0x1a0] sm:$0xff] }
 0x639   : > { %17134 = vmatprep.subr.bf16.mxu0 %v19592_v58  ;;  %v6497_v6 = vld [vmem:[#allocation2 + $0x181] sm:$0xff] }
 0x63c   : > { %17135 = vmatpush3.bf16.msra.mxu0 %v19592_v58  ;;  %v6517_v58 = vpack.c.bf16 %v6498_v62, %v6497_v6  ;;  %v8159_v62 = vld [vmem:[%s22139_s27] sm:$0xff]  ;;  %v8160_v6 = vld [vmem:[%s22139_s27 + $0x8] sm:$0xff] }
 0x63d   : > { %17136 = vmatprep.subr.bf16.mxu0 %v19593_v61 }
 0x63f   : > { %17105 = vmatmul.mubr.msk.bf16.gmra.mrb[36].mxu0 %vm790_vm2, %v21778_v26  ;;  %v6465_v26 = vld [vmem:[#allocation2 + $0x1] sm:$0xff] }
 0x640   : > { %17108 = vmatprep.mubr.msk.bf16.mxu0 %vm790_vm2, %v21781_v52  ;;  %17137 = vmatpush3.bf16.msra.mxu0 %v19593_v61  ;;  %v6466_v52 = vld [vmem:[#allocation2 + $0x9] sm:$0xff]  ;;  %v19601_v61 = vld [vmem:[%s24114_s1 + $0x38] sm:$0xff]  }
 0x641   : > { %17170 = vmatprep.subr.bf16.mxu0 %v19594_v44 }
 0x647   : > { %17109 = vmatmul.mubr.msk.bf16.gmra.mrb[40].mxu0 %vm790_vm2, %v21795_v24  ;;  %v21924_v24 = vpack.c.bf16 %v5803_v35, %v5802_v2  ;;  %v19603_v2 = vld [vmem:[%s24114_s1 + $0x78] sm:$0xff]  }
 0x648   : > { %17112 = vmatprep.mubr.msk.bf16.mxu0 %vm790_vm2, %v21800_v41  ;;  %v21926_v41 = vpack.c.bf16 %v6466_v52, %v6465_v26  ;;  %v6499_v35 = vld [vmem:[#allocation2 + $0x199] sm:$0xff]  ;;  %v6500_v26 = vld [vmem:[#allocation2 + $0x1a1] sm:$0xff] }
 0x649   : > { %v7227_v52 = vld [vmem:[#allocation2 + $0x2] sm:$0xff]  ;;  %v22059_v63 = vpack.c.bf16 %v6500_v26, %v6499_v35  ;;  %v19608_v26 = vld [vmem:[%s24114_s1 + $0xd0] sm:$0xff]  }
 0x64a   : > { %v22061_v18 = vpack.c.bf16 %v7228_v22, %v7227_v52  ;;  %v8164_v35 = vld [vmem:[%s22139_s27 + $0x28] sm:$0xff]  ;;  %v8165_v52 = vld [vmem:[%s22139_s27 + $0x30] sm:$0xff]  ;;  %v8166_v22 = vld [vmem:[%s22139_s27 + $0x38] sm:$0xff] }
 0x64f   : > { %17113 = vmatmul.mubr.msk.bf16.gmra.mrb[44].mxu0 %vm790_vm2, %v21812_v57  ;;  %v6472_v57 = vld [vmem:[#allocation2 + $0x51] sm:$0xff] }
 0x650   : > { %17116 = vmatprep.mubr.msk.bf16.mxu0 %vm790_vm2, %v21816_v36  ;;  %v21946_v30 = vpack.c.bf16 %v6472_v57, %v6471_v55  ;;  %v19597_v36 = vld [vmem:[%s24114_s1 + $0xa8] sm:$0xff]   ;;  %v19604_v57 = vld [vmem:[%s24114_s1 + $0x80] sm:$0xff]  }
 0x651   : > { %v19605_v55 = vld [vmem:[%s24114_s1 + $0x88] sm:$0xff]  }
 0x657   : > { %17117 = vmatmul.mubr.msk.bf16.gmra.mrb[48].mxu0 %vm790_vm2, %v21827_v14  ;;  %v6481_v14 = vld [vmem:[#allocation2 + $0xc1] sm:$0xff] }
 0x658   : > { %17120 = vmatprep.mubr.msk.bf16.mxu0 %vm790_vm2, %v21832_v34  ;;  %v21967_v28 = vpack.c.bf16 %v6482_v33, %v6481_v14  ;;  %v6484_v34 = vld [vmem:[#allocation2 + $0xe1] sm:$0xff]  ;;  %v7242_v14 = vld [vmem:[#allocation2 + $0xb2] sm:$0xff] }
 0x659   : > { %v21973_v0 = vpack.c.bf16 %v6484_v34, %v6483_v43  ;;  %v7244_v34 = vld [vmem:[#allocation2 + $0xca] sm:$0xff] }
 0x65f   : > { %17121 = vmatmul.mubr.msk.bf16.gmra.mrb[52].mxu0 %vm790_vm2, %v5817_v51  ;;  %v6492_v51 = vld [vmem:[#allocation2 + $0x141] sm:$0xff] }
 0x660   : > { %17124 = vmatprep.mubr.msk.bf16.mxu0 %vm790_vm2, %v5818_v20  ;;  %v6491_v20 = vld [vmem:[#allocation2 + $0x139] sm:$0xff] }
 0x661   : > { %v6514_v15 = vpack.c.bf16 %v6492_v51, %v6491_v20  ;;  %v7252_v51 = vld [vmem:[#allocation2 + $0x12a] sm:$0xff] }
 0x667   : > { %17125 = vmatmul.mubr.msk.bf16.gmra.mrb[56].mxu0 %vm790_vm2, %v5819_v1  ;;  %v6516_v1 = vpack.c.bf16 %v6496_v45, %v6495_v42  ;;  %v7256_v45 = vld [vmem:[#allocation2 + $0x15a] sm:$0xff] }
 0x668   : > { %17128 = vmatprep.mubr.msk.bf16.mxu0 %vm790_vm2, %v5820_v9  ;;  %v19599_v9 = vld [vmem:[%s24114_s1 + $0xb8] sm:$0xff]  }
 0x66f   : > { %17129 = vmatmul.mubr.msk.bf16.gmra.mrb[60].mxu0 %vm790_vm2, %v21924_v24 }
 0x670   : > { %17138 = vmatprep.mubr.msk.bf16.mxu0 %vm790_vm2, %v21926_v41 }
 0x677   : > { %17139 = vmatmul.mubr.msk.bf16.vlgmr.msra.gmra.mrb[32].mxu0 %vm790_vm2, %v21932_v4 }
 0x678   : > { %17142 = vmatprep.mubr.msk.bf16.mxu0 %vm790_vm2, %v21937_v48  ;;  %17171 = vmatpush3.bf16.msra.mxu0 %v19594_v44  ;;  %v19602_v44 = vld [vmem:[%s24114_s1 + $0x40] sm:$0xff]  }
 0x679   : > { %17172 = vmatprep.subr.bf16.mxu0 %v19595_v49 }
 0x67c   : > { %17173 = vmatpush3.bf16.msra.mxu0 %v19595_v49  ;;  %v7231_v49 = vld [vmem:[#allocation2 + $0x32] sm:$0xff] }
 0x67d   : > { %17174 = vmatprep.subr.bf16.mxu0 %v19596_v56 }
 0x67f   : > { %17143 = vmatmul.mubr.msk.bf16.gmra.mrb[36].mxu0 %vm790_vm2, %v21946_v30 }
 0x680   : > { %17146 = vmatprep.mubr.msk.bf16.mxu0 %vm790_vm2, %v21951_v13  ;;  %17175 = vmatpush3.bf16.msra.mxu0 %v19596_v56 }
 0x681   : > { %17208 = vmatprep.subr.bf16.mxu0 %v19597_v36 }
 0x687   : > { %17147 = vmatmul.mubr.msk.bf16.gmra.mrb[40].mxu0 %vm790_vm2, %v21957_v39 }
 0x688   : > { %17150 = vmatprep.mubr.msk.bf16.mxu0 %vm790_vm2, %v21959_v40 }
 0x68f   : > { %17151 = vmatmul.mubr.msk.bf16.gmra.mrb[44].mxu0 %vm790_vm2, %v21965_v8 }
 0x690   : > { %17154 = vmatprep.mubr.msk.bf16.mxu0 %vm790_vm2, %v21967_v28 }
 0x697   : > { %17155 = vmatmul.mubr.msk.bf16.gmra.mrb[48].mxu0 %vm790_vm2, %v21973_v0 }
 0x698   : > { %17158 = vmatprep.mubr.msk.bf16.mxu0 %vm790_vm2, %v21975_v38 }
 0x69f   : > { %17159 = vmatmul.mubr.msk.bf16.gmra.mrb[52].mxu0 %vm790_vm2, %v21981_v54 }
 0x6a0   : > { %17162 = vmatprep.mubr.msk.bf16.mxu0 %vm790_vm2, %v6513_v11 }
 0x6a7   : > { %17163 = vmatmul.mubr.msk.bf16.gmra.mrb[56].mxu0 %vm790_vm2, %v6514_v15 }
 0x6a8   : > { %17166 = vmatprep.mubr.msk.bf16.mxu0 %vm790_vm2, %v6515_v27 }
 0x6af   : > { %17167 = vmatmul.mubr.msk.bf16.gmra.mrb[60].mxu0 %vm790_vm2, %v6516_v1 }
 0x6b0   : > { %17176 = vmatprep.mubr.msk.bf16.mxu0 %vm790_vm2, %v21932_v4  ;;  %v7229_v4 = vld [vmem:[#allocation2 + $0x1a] sm:$0xff] }
 0x6b1   : > { %v22067_v56 = vpack.c.bf16 %v7230_v16, %v7229_v4  ;;  %8192 = vst.msk [vmem:[#allocation2 + $0x19] sm:$0xff] %vm8191_vm5, %v8159_v62  ;;  %8193 = vst.msk [vmem:[#allocation2 + $0x21] sm:$0xff] %vm8191_vm5, %v8160_v6  ;;  %v22177_v4 = vld [vmem:[%s24069_s14 + $0x6] sm:$0x3] }
 0x6b2   : > { %v8167_v16 = vld [vmem:[%s22139_s27 + $0x40] sm:$0xff] }
 0x6b7   : > { %17177 = vmatmul.mubr.msk.bf16.vlgmr.msra.gmra.mrb[32].mxu0 %vm790_vm2, %v21937_v48 }
 0x6b8   : > { %17180 = vmatprep.mubr.msk.bf16.mxu0 %vm790_vm2, %v21946_v30  ;;  %17209 = vmatpush3.bf16.msra.mxu0 %v19597_v36  ;;  %v7235_v36 = vld [vmem:[#allocation2 + $0x62] sm:$0xff] }
 0x6b9   : > { %17210 = vmatprep.subr.bf16.mxu0 %v19598_v37  ;;  %8198 = vst.msk [vmem:[#allocation2 + $0x61] sm:$0xff] %vm8191_vm5, %v8165_v52 }
 0x6bc   : > { %17211 = vmatpush3.bf16.msra.mxu0 %v19598_v37  ;;  %v7257_v37 = vld [vmem:[#allocation2 + $0x16a] sm:$0xff] }
 0x6bd   : > { %17212 = vmatprep.subr.bf16.mxu0 %v19599_v9 }
 0x6bf   : > { %17181 = vmatmul.mubr.msk.bf16.gmra.mrb[36].mxu0 %vm790_vm2, %v21951_v13 }
 0x6c0   : > { %17184 = vmatprep.mubr.msk.bf16.mxu0 %vm790_vm2, %v21957_v39  ;;  %17213 = vmatpush3.bf16.msra.mxu0 %v19599_v9  ;;  %v7258_v9 = vld [vmem:[#allocation2 + $0x172] sm:$0xff] }
 0x6c1   : > { %17246 = vmatprep.subr.bf16.mxu0 %v19600_v53 }
 0x6c7   : > { %17185 = vmatmul.mubr.msk.bf16.gmra.mrb[40].mxu0 %vm790_vm2, %v21959_v40 }
 0x6c8   : > { %17188 = vmatprep.mubr.msk.bf16.mxu0 %vm790_vm2, %v21965_v8 }
 0x6cf   : > { %17189 = vmatmul.mubr.msk.bf16.gmra.mrb[44].mxu0 %vm790_vm2, %v21967_v28 }
 0x6d0   : > { %17192 = vmatprep.mubr.msk.bf16.mxu0 %vm790_vm2, %v21973_v0 }
 0x6d7   : > { %17193 = vmatmul.mubr.msk.bf16.gmra.mrb[48].mxu0 %vm790_vm2, %v21975_v38 }
 0x6d8   : > { %17196 = vmatprep.mubr.msk.bf16.mxu0 %vm790_vm2, %v21981_v54 }
 0x6df   : > { %17197 = vmatmul.mubr.msk.bf16.gmra.mrb[52].mxu0 %vm790_vm2, %v6513_v11 }
 0x6e0   : > { %17200 = vmatprep.mubr.msk.bf16.mxu0 %vm790_vm2, %v6514_v15 }
 0x6e7   : > { %17201 = vmatmul.mubr.msk.bf16.gmra.mrb[56].mxu0 %vm790_vm2, %v6515_v27 }
 0x6e8   : > { %17204 = vmatprep.mubr.msk.bf16.mxu0 %vm790_vm2, %v6516_v1 }
 0x6ef   : > { %17205 = vmatmul.mubr.msk.bf16.gmra.mrb[60].mxu0 %vm790_vm2, %v6517_v58 }
 0x6f0   : > { %17214 = vmatprep.mubr.msk.bf16.mxu0 %vm790_vm2, %v21937_v48  ;;  %v7232_v48 = vld [vmem:[#allocation2 + $0x3a] sm:$0xff] }
 0x6f1   : > { %v22072_v59 = vpack.c.bf16 %v7232_v48, %v7231_v49  ;;  %v8168_v49 = vld [vmem:[%s22139_s27 + $0x48] sm:$0xff]  ;;  %v8169_v48 = vld [vmem:[%s22139_s27 + $0x50] sm:$0xff] }
 0x6f7   : > { %17215 = vmatmul.mubr.msk.bf16.vlgmr.msra.gmra.mrb[32].mxu0 %vm790_vm2, %v21946_v30  ;;  %v7233_v30 = vld [vmem:[#allocation2 + $0x4a] sm:$0xff] }
 0x6f8   : > { %17218 = vmatprep.mubr.msk.bf16.mxu0 %vm790_vm2, %v21951_v13  ;;  %17247 = vmatpush3.bf16.msra.mxu0 %v19600_v53  ;;  %v7236_v13 = vld [vmem:[#allocation2 + $0x6a] sm:$0xff]  ;;  %v22081_v23 = vpack.c.bf16 %v7234_v29, %v7233_v30  ;;  %v22141_v53 = vpack.c.bf16 %v7258_v9, %v7257_v37  ;;  %8197 = vst.msk [vmem:[#allocation2 + $0x51] sm:$0xff] %vm8191_vm5, %v8164_v35  ;;  %v8174_v29 = vld [vmem:[%s22139_s27 + $0x78] sm:$0xff] }
 0x6f9   : > { %17248 = vmatprep.subr.bf16.mxu0 %v19601_v61  ;;  %v22088_v21 = vpack.c.bf16 %v7236_v13, %v7235_v36  ;;  %8199 = vst.msk [vmem:[#allocation2 + $0x69] sm:$0xff] %vm8191_vm5, %v8166_v22  ;;  %v8173_v30 = vld [vmem:[%s22139_s27 + $0x70] sm:$0xff]  ;;  %v8175_v36 = vld [vmem:[%s22139_s27 + $0x80] sm:$0xff]  ;;  %v8176_v13 = vld [vmem:[%s22139_s27 + $0x88] sm:$0xff] }
 0x6fc   : > { %17249 = vmatpush3.bf16.msra.mxu0 %v19601_v61  ;;  %v8162_v61 = vld [vmem:[%s22139_s27 + $0x18] sm:$0xff] }
 0x6fd   : > { %17250 = vmatprep.subr.bf16.mxu0 %v19602_v44  ;;  %8195 = vst.msk [vmem:[#allocation2 + $0x39] sm:$0xff] %vm8191_vm5, %v8162_v61 }
 0x6ff   : > { %17219 = vmatmul.mubr.msk.bf16.gmra.mrb[36].mxu0 %vm790_vm2, %v21957_v39  ;;  %v7237_v39 = vld [vmem:[#allocation2 + $0x7a] sm:$0xff] }
 0x700   : > { %17222 = vmatprep.mubr.msk.bf16.mxu0 %vm790_vm2, %v21959_v40  ;;  %17251 = vmatpush3.bf16.msra.mxu0 %v19602_v44  ;;  %v7239_v40 = vld [vmem:[#allocation2 + $0x92] sm:$0xff]  ;;  %v22095_v33 = vpack.c.bf16 %v7238_v19, %v7237_v39  ;;  %v19607_v44 = vld [vmem:[%s24114_s1 + $0xc8] sm:$0xff]   ;;  %8200 = vst.msk [vmem:[#allocation2 + $0x79] sm:$0xff] %vm8191_vm5, %v8167_v16  ;;  %8201 = vst.msk [vmem:[#allocation2 + $0x81] sm:$0xff] %vm8191_vm5, %v8168_v49 }
 0x701   : > { %17284 = vmatprep.subr.bf16.mxu0 %v19603_v2  ;;  %v22097_v7 = vpack.c.bf16 %v7240_v3, %v7239_v40  ;;  %8202 = vst.msk [vmem:[#allocation2 + $0x91] sm:$0xff] %vm8191_vm5, %v8169_v48  ;;  %v8178_v39 = vld [vmem:[%s22139_s27 + $0x98] sm:$0xff]  ;;  %v8179_v19 = vld [vmem:[%s22139_s27 + $0xa0] sm:$0xff]  ;;  %v8180_v40 = vld [vmem:[%s22139_s27 + $0xa8] sm:$0xff] }
 0x702   : > { %v8181_v3 = vld [vmem:[%s22139_s27 + $0xb0] sm:$0xff]  ;;  %v8233_v37 = vld [vmem:[#allocation2 + $0x68] sm:$0xff] }
 0x707   : > { %17223 = vmatmul.mubr.msk.bf16.gmra.mrb[40].mxu0 %vm790_vm2, %v21965_v8  ;;  %v7241_v8 = vld [vmem:[#allocation2 + $0xaa] sm:$0xff]  ;;  %v8234_v9 = vld [vmem:[#allocation2 + $0x78] sm:$0xff] }
 0x708   : > { %17226 = vmatprep.mubr.msk.bf16.mxu0 %vm790_vm2, %v21967_v28  ;;  %v7243_v28 = vld [vmem:[#allocation2 + $0xc2] sm:$0xff]  ;;  %v22103_v31 = vpack.c.bf16 %v7242_v14, %v7241_v8  ;;  %v8182_v8 = vld [vmem:[%s22139_s27 + $0xb8] sm:$0xff] }
 0x709   : > { %v22105_v43 = vpack.c.bf16 %v7244_v34, %v7243_v28  ;;  %8206 = vst.msk [vmem:[#allocation2 + $0xc1] sm:$0xff] %vm8191_vm5, %v8173_v30  ;;  %8207 = vst.msk [vmem:[#allocation2 + $0xc9] sm:$0xff] %vm8191_vm5, %v8174_v29  ;;  %v8183_v14 = vld [vmem:[%s22139_s27 + $0xc0] sm:$0xff]  ;;  %v8184_v28 = vld [vmem:[%s22139_s27 + $0xc8] sm:$0xff] }
 0x70a   : > { %v8185_v34 = vld [vmem:[%s22139_s27 + $0xd0] sm:$0xff] }
 0x70f   : > { %17227 = vmatmul.mubr.msk.bf16.gmra.mrb[44].mxu0 %vm790_vm2, %v21973_v0  ;;  %v7245_v0 = vld [vmem:[#allocation2 + $0xda] sm:$0xff] }
 0x710   : > { %17230 = vmatprep.mubr.msk.bf16.mxu0 %vm790_vm2, %v21975_v38  ;;  %v7247_v38 = vld [vmem:[#allocation2 + $0xf2] sm:$0xff]  ;;  %v22111_v17 = vpack.c.bf16 %v7246_v32, %v7245_v0  ;;  %8208 = vst.msk [vmem:[#allocation2 + $0xd9] sm:$0xff] %vm8191_vm5, %v8175_v36  ;;  %8209 = vst.msk [vmem:[#allocation2 + $0xe1] sm:$0xff] %vm8191_vm5, %v8176_v13  ;;  %v8187_v32 = vld [vmem:[%s22139_s27 + $0xe0] sm:$0xff] }
 0x711   : > { %v22113_v10 = vpack.c.bf16 %v7248_v50, %v7247_v38  ;;  %8211 = vst.msk [vmem:[#allocation2 + $0xf9] sm:$0xff] %vm8191_vm5, %v8178_v39  ;;  %v8186_v0 = vld [vmem:[%s22139_s27 + $0xd8] sm:$0xff]  ;;  %v8188_v38 = vld [vmem:[%s22139_s27 + $0xe8] sm:$0xff]  ;;  %8220 = vst.msk [vmem:[#allocation2 + $0x169] sm:$0xff] %vm8191_vm5, %v8187_v32 }
 0x712   : > { %v7259_v50 = vld [vmem:[#allocation2 + $0x182] sm:$0xff]  ;;  %8221 = vst.msk [vmem:[#allocation2 + $0x171] sm:$0xff] %vm8191_vm5, %v8188_v38 }
 0x713   : > { %v8240_v52 = vld [vmem:[#allocation2 + $0xc0] sm:$0xff]  ;;  %v8241_v22 = vld [vmem:[#allocation2 + $0xc8] sm:$0xff] }
 0x714   : > { %v22326_v49 = vpack.c.bf16 %v8241_v22, %v8240_v52 }
 0x717   : > { %17231 = vmatmul.mubr.msk.bf16.gmra.mrb[48].mxu0 %vm790_vm2, %v21981_v54  ;;  %v7249_v54 = vld [vmem:[#allocation2 + $0x10a] sm:$0xff]  ;;  %v8243_v16 = vld [vmem:[#allocation2 + $0xe0] sm:$0xff] }
 0x718   : > { %17234 = vmatprep.mubr.msk.bf16.mxu0 %vm790_vm2, %v6513_v11  ;;  %v7251_v11 = vld [vmem:[#allocation2 + $0x122] sm:$0xff]  ;;  %v22119_v25 = vpack.c.bf16 %v7250_v12, %v7249_v54  ;;  %8212 = vst.msk [vmem:[#allocation2 + $0x109] sm:$0xff] %vm8191_vm5, %v8179_v19  ;;  %8213 = vst.msk [vmem:[#allocation2 + $0x111] sm:$0xff] %vm8191_vm5, %v8180_v40  ;;  %v8189_v54 = vld [vmem:[%s22139_s27 + $0xf0] sm:$0xff] }
 0x719   : > { %v22121_v20 = vpack.c.bf16 %v7252_v51, %v7251_v11  ;;  %8214 = vst.msk [vmem:[#allocation2 + $0x121] sm:$0xff] %vm8191_vm5, %v8181_v3  ;;  %8215 = vst.msk [vmem:[#allocation2 + $0x129] sm:$0xff] %vm8191_vm5, %v8182_v8  ;;  %v7260_v12 = vld [vmem:[#allocation2 + $0x18a] sm:$0xff]  ;;  %v8190_v11 = vld [vmem:[%s22139_s27 + $0xf8] sm:$0xff] }
 0x71a   : > { %8222 = vst.msk [vmem:[#allocation2 + $0x181] sm:$0xff] %vm8191_vm5, %v8189_v54  ;;  %8223 = vst.msk [vmem:[#allocation2 + $0x189] sm:$0xff] %vm8191_vm5, %v8190_v11  ;;  %v7279_v51 = vpack.c.bf16 %v7260_v12, %v7259_v50  ;;  %v15072_v11 = vld [vmem:[%s24069_s14 + $0x2] sm:$0x3]  ;;  %v8880_v22 = vld [vmem:[#allocation2 + $0xd9] sm:$0xff] }
 0x71f   : > { %17235 = vmatmul.mubr.msk.bf16.gmra.mrb[52].mxu0 %vm790_vm2, %v6514_v15  ;;  %v7253_v15 = vld [vmem:[#allocation2 + $0x13a] sm:$0xff]  ;;  %v8247_v30 = vld [vmem:[#allocation2 + $0x110] sm:$0xff] }
 0x720   : > { %17238 = vmatprep.mubr.msk.bf16.mxu0 %vm790_vm2, %v6515_v27  ;;  %v7255_v27 = vld [vmem:[#allocation2 + $0x152] sm:$0xff]  ;;  %v22127_v42 = vpack.c.bf16 %v7254_v47, %v7253_v15  ;;  %8216 = vst.msk [vmem:[#allocation2 + $0x139] sm:$0xff] %vm8191_vm5, %v8183_v14  ;;  %8217 = vst.msk [vmem:[#allocation2 + $0x141] sm:$0xff] %vm8191_vm5, %v8184_v28  ;;  %v8331_v15 = vsel %vm8329_vm6, %v22177_v4, 0  ;;  %v8278_v47 = vld [vmem:[%s24069_s14] sm:$0x3] }
 0x721   : > { %8218 = vst.msk [vmem:[#allocation2 + $0x151] sm:$0xff] %vm8191_vm5, %v8185_v34  ;;  %8219 = vst.msk [vmem:[#allocation2 + $0x159] sm:$0xff] %vm8191_vm5, %v8186_v0  ;;  %v8248_v13 = vld [vmem:[#allocation2 + $0x120] sm:$0xff]  ;;  %v8254_v28 = vld [vmem:[#allocation2 + $0x168] sm:$0xff] }
 0x722   : > { %v8255_v34 = vld [vmem:[#allocation2 + $0x170] sm:$0xff]  ;;  %v8256_v38 = vld [vmem:[#allocation2 + $0x180] sm:$0xff]  ;;  %v8257_v50 = vld [vmem:[#allocation2 + $0x188] sm:$0xff] }
 0x723   : > { %v8275_v32 = vpack.c.bf16 %v8255_v34, %v8254_v28  ;;  %v8276_v54 = vpack.c.bf16 %v8257_v50, %v8256_v38  ;;  %v8893_v28 = vld [vmem:[#allocation2 + $0x171] sm:$0xff]  ;;  %v8894_v38 = vld [vmem:[#allocation2 + $0x181] sm:$0xff]  ;;  %v8895_v50 = vld [vmem:[#allocation2 + $0x189] sm:$0xff] }
 0x727   : > { %17239 = vmatmul.mubr.msk.bf16.gmra.mrb[56].mxu0 %vm790_vm2, %v6516_v1  ;;  %v22129_v1 = vpack.c.bf16 %v7256_v45, %v7255_v27  ;;  %v8498_v45 = vsel %vm8329_vm6, %v8278_v47, 0  ;;  %v8250_v39 = vld [vmem:[#allocation2 + $0x138] sm:$0xff]  ;;  %v8251_v19 = vld [vmem:[#allocation2 + $0x140] sm:$0xff] }
 0x728   : > { %17242 = vmatprep.mubr.msk.bf16.mxu0 %vm790_vm2, %v6517_v58  ;;  %v8161_v58 = vld [vmem:[%s22139_s27 + $0x10] sm:$0xff]  ;;  %v22344_v3 = vpack.c.bf16 %v8251_v19, %v8250_v39  ;;  %v8253_v14 = vld [vmem:[#allocation2 + $0x158] sm:$0xff]  ;;  %v8889_v39 = vld [vmem:[#allocation2 + $0x141] sm:$0xff] }
 0x729   : > { %8194 = vst.msk [vmem:[#allocation2 + $0x31] sm:$0xff] %vm8191_vm5, %v8161_v58  ;;  %v8236_v58 = vld [vmem:[#allocation2 + $0x90] sm:$0xff] }
 0x72a   : > { %v8252_v8 = vld [vmem:[#allocation2 + $0x150] sm:$0xff] }
 0x72b   : > { %v8274_v0 = vpack.c.bf16 %v8253_v14, %v8252_v8  ;;  %v8890_v19 = vld [vmem:[#allocation2 + $0x151] sm:$0xff]  ;;  %v8892_v14 = vld [vmem:[#allocation2 + $0x169] sm:$0xff] }
 0x72c   : > { %v8913_v34 = vpack.c.bf16 %v8893_v28, %v8892_v14  ;;  %v9590_v14 = vld [vmem:[#allocation2 + $0x13a] sm:$0xff]  ;;  %v9591_v28 = vld [vmem:[#allocation2 + $0x142] sm:$0xff] }
 0x72f   : > { %17243 = vmatmul.mubr.msk.bf16.gmra.mrb[60].mxu0 %vm790_vm2, %v22059_v63 }
 0x730   : > { %17252 = vmatprep.mubr.msk.bf16.mxu0 %vm790_vm2, %v22061_v18 }
 0x737   : > { %17253 = vmatmul.mubr.msk.bf16.vlgmr.msra.gmra.mrb[32].mxu0 %vm790_vm2, %v22067_v56 }
 0x738   : > { %17256 = vmatprep.mubr.msk.bf16.mxu0 %vm790_vm2, %v22072_v59  ;;  %17285 = vmatpush3.bf16.msra.mxu0 %v19603_v2  ;;  %v8163_v2 = vld [vmem:[%s22139_s27 + $0x20] sm:$0xff] }
 0x739   : > { %17286 = vmatprep.subr.bf16.mxu0 %v19604_v57  ;;  %8196 = vst.msk [vmem:[#allocation2 + $0x49] sm:$0xff] %vm8191_vm5, %v8163_v2 }
 0x73c   : > { %17287 = vmatpush3.bf16.msra.mxu0 %v19604_v57  ;;  %v8171_v57 = vld [vmem:[%s22139_s27 + $0x60] sm:$0xff] }
 0x73d   : > { %17288 = vmatprep.subr.bf16.mxu0 %v19605_v55  ;;  %8204 = vst.msk [vmem:[#allocation2 + $0xa9] sm:$0xff] %vm8191_vm5, %v8171_v57 }
 0x73f   : > { %17257 = vmatmul.mubr.msk.bf16.gmra.mrb[36].mxu0 %vm790_vm2, %v22081_v23 }
 0x740   : > { %17260 = vmatprep.mubr.msk.bf16.mxu0 %vm790_vm2, %v22088_v21  ;;  %17289 = vmatpush3.bf16.msra.mxu0 %v19605_v55  ;;  %v8172_v55 = vld [vmem:[%s22139_s27 + $0x68] sm:$0xff] }
 0x741   : > { %17322 = vmatprep.subr.bf16.mxu0 %v22086_v60  ;;  %8205 = vst.msk [vmem:[#allocation2 + $0xb1] sm:$0xff] %vm8191_vm5, %v8172_v55  ;;  %v8246_v55 = vld [vmem:[#allocation2 + $0x108] sm:$0xff] }
 0x742   : > { %v22336_v36 = vpack.c.bf16 %v8247_v30, %v8246_v55  ;;  %v8885_v55 = vld [vmem:[#allocation2 + $0x111] sm:$0xff]  ;;  %v8886_v30 = vld [vmem:[#allocation2 + $0x121] sm:$0xff] }
 0x747   : > { %17261 = vmatmul.mubr.msk.bf16.gmra.mrb[40].mxu0 %vm790_vm2, %v22095_v33 }
 0x748   : > { %17264 = vmatprep.mubr.msk.bf16.mxu0 %vm790_vm2, %v22097_v7  ;;  %v8239_v2 = vld [vmem:[#allocation2 + $0xb0] sm:$0xff] }
 0x74f   : > { %17265 = vmatmul.mubr.msk.bf16.gmra.mrb[44].mxu0 %vm790_vm2, %v22103_v31 }
 0x750   : > { %17268 = vmatprep.mubr.msk.bf16.mxu0 %vm790_vm2, %v22105_v43 }
 0x757   : > { %17269 = vmatmul.mubr.msk.bf16.gmra.mrb[48].mxu0 %vm790_vm2, %v22111_v17 }
 0x758   : > { %17272 = vmatprep.mubr.msk.bf16.mxu0 %vm790_vm2, %v22113_v10 }
 0x75f   : > { %17273 = vmatmul.mubr.msk.bf16.gmra.mrb[52].mxu0 %vm790_vm2, %v22119_v25 }
 0x760   : > { %17276 = vmatprep.mubr.msk.bf16.mxu0 %vm790_vm2, %v22121_v20 }
 0x767   : > { %17277 = vmatmul.mubr.msk.bf16.gmra.mrb[56].mxu0 %vm790_vm2, %v22127_v42 }
 0x768   : > { %17280 = vmatprep.mubr.msk.bf16.mxu0 %vm790_vm2, %v22129_v1 }
 0x76f   : > { %17281 = vmatmul.mubr.msk.bf16.gmra.mrb[60].mxu0 %vm790_vm2, %v22141_v53 }
 0x770   : > { %17290 = vmatprep.mubr.msk.bf16.mxu0 %vm790_vm2, %v22067_v56  ;;  %v8170_v56 = vld [vmem:[%s22139_s27 + $0x58] sm:$0xff] }
 0x771   : > { %8203 = vst.msk [vmem:[#allocation2 + $0x99] sm:$0xff] %vm8191_vm5, %v8170_v56 }
 0x777   : > { %17291 = vmatmul.mubr.msk.bf16.vlgmr.msra.gmra.mrb[32].mxu0 %vm790_vm2, %v22072_v59 }
 0x778   : > { %17294 = vmatprep.mubr.msk.bf16.mxu0 %vm790_vm2, %v22081_v23  ;;  %17323 = vmatpush3.bf16.msra.mxu0 %v22086_v60  ;;  %v8177_v60 = vld [vmem:[%s22139_s27 + $0x90] sm:$0xff]  ;;  %v8237_v61 = vld [vmem:[#allocation2 + $0x98] sm:$0xff]  ;;  %s24136_s27 = sld [smem:[#allocation23_spill]] }
 0x779   : > { %17324 = vmatprep.subr.bf16.mxu0 %v19607_v44  ;;  %8210 = vst.msk [vmem:[#allocation2 + $0xf1] sm:$0xff] %vm8191_vm5, %v8177_v60  ;;  %v22318_v35 = vpack.c.bf16 %v8237_v61, %v8236_v58  ;;  %v8249_v60 = vld [vmem:[#allocation2 + $0x128] sm:$0xff] }
 0x77a   : > { %v22342_v40 = vpack.c.bf16 %v8249_v60, %v8248_v13  ;;  %v8876_v61 = vld [vmem:[#allocation2 + $0xa9] sm:$0xff]  ;;  %v8888_v60 = vld [vmem:[#allocation2 + $0x139] sm:$0xff] }
 0x77c   : > { %17325 = vmatpush3.bf16.msra.mxu0 %v19607_v44  ;;  %v8238_v44 = vld [vmem:[#allocation2 + $0xa8] sm:$0xff] }
 0x77d   : > { %17326 = vmatprep.subr.bf16.mxu0 %v19608_v26 }
 0x77e   : > { %s780_s28 = scalar_lea.vmem %s24136_s27, %s14355_s25 }
 0x77f   : > { %17295 = vmatmul.mubr.msk.bf16.gmra.mrb[36].mxu0 %vm790_vm2, %v22088_v21 }
 0x780   : > { %17298 = vmatprep.mubr.msk.bf16.mxu0 %vm790_vm2, %v22095_v33  ;;  %17327 = vmatpush3.bf16.msra.mxu0 %v19608_v26  ;;  %v22320_v26 = vpack.c.bf16 %v8239_v2, %v8238_v44  ;;  %v8244_v56 = vld [vmem:[#allocation2 + $0xf0] sm:$0xff]  ;;  %v8245_v57 = vld [vmem:[#allocation2 + $0xf8] sm:$0xff]  ;;  %v8878_v2 = vld [vmem:[#allocation2 + $0xc1] sm:$0xff] }
 0x781   : > { %19532 = vmatprep.subr.msk.bf16.mxu0 %vm8329_vm6, %v22177_v4  ;;  %v8242_v4 = vld [vmem:[#allocation2 + $0xd8] sm:$0xff]  ;;  %v22334_v29 = vpack.c.bf16 %v8245_v57, %v8244_v56  ;;  %v8884_v57 = vld [vmem:[#allocation2 + $0x109] sm:$0xff] }
 0x782   : > { %v22328_v48 = vpack.c.bf16 %v8243_v16, %v8242_v4  ;;  %v8877_v44 = vld [vmem:[#allocation2 + $0xb1] sm:$0xff]  ;;  %v8881_v4 = vld [vmem:[#allocation2 + $0xe1] sm:$0xff] }
 0x783   : > { %v8882_v16 = vld [vmem:[#allocation2 + $0xf1] sm:$0xff] }
 0x787   : > { %17299 = vmatmul.mubr.msk.bf16.gmra.mrb[40].mxu0 %vm790_vm2, %v22097_v7 }
 0x788   : > { %17302 = vmatprep.mubr.msk.bf16.mxu0 %vm790_vm2, %v22103_v31 }
 0x78f   : > { %17303 = vmatmul.mubr.msk.bf16.gmra.mrb[44].mxu0 %vm790_vm2, %v22105_v43 }
 0x790   : > { %17306 = vmatprep.mubr.msk.bf16.mxu0 %vm790_vm2, %v22111_v17 }
 0x797   : > { %17307 = vmatmul.mubr.msk.bf16.gmra.mrb[48].mxu0 %vm790_vm2, %v22113_v10 }
 0x798   : > { %17310 = vmatprep.mubr.msk.bf16.mxu0 %vm790_vm2, %v22119_v25 }
 0x79f   : > { %17311 = vmatmul.mubr.msk.bf16.gmra.mrb[52].mxu0 %vm790_vm2, %v22121_v20 }
 0x7a0   : > { %17314 = vmatprep.mubr.msk.bf16.mxu0 %vm790_vm2, %v22127_v42 }
 0x7a7   : > { %17315 = vmatmul.mubr.msk.bf16.gmra.mrb[56].mxu0 %vm790_vm2, %v22129_v1 }
 0x7a8   : > { %17318 = vmatprep.mubr.msk.bf16.mxu0 %vm790_vm2, %v22141_v53 }
 0x7af   : > { %17319 = vmatmul.mubr.msk.bf16.gmra.mrb[60].mxu0 %vm790_vm2, %v7279_v51 }
 0x7b0   : > { %17328 = vmatprep.mubr.msk.bf16.mxu0 %vm790_vm2, %v22072_v59  ;;  %v7261_v59 = vld [vmem:[#allocation2 + $0x19a] sm:$0xff] }
 0x7b7   : > { %17329 = vmatmul.mubr.msk.bf16.vlgmr.msra.gmra.mrb[32].mxu0 %vm790_vm2, %v22081_v23  ;;  %v7262_v23 = vld [vmem:[#allocation2 + $0x1a2] sm:$0xff] }
 0x7b8   : > { %17332 = vmatprep.mubr.msk.bf16.mxu0 %vm790_vm2, %v22088_v21  ;;  %17377 = vmatpush3.bf16.msra.mxu0 %v8331_v15  ;;  %v8226_v21 = vld [vmem:[#allocation2 + $0x18] sm:$0xff]  ;;  %v8028_v15 = vld [vmem:[%s783_s29] sm:$0x1]  ;;  %s23954_s29 = scalar_lea.vmem %s24079_s24, %s20427_s0 }
 0x7b9   : > { %19533 = vmatprep.subr.msk.bf16.mxu0 %vm8329_vm6, %v8278_v47  ;;  %v8029_v47 = vpack.c.bf16 %v8028_v15, %v8028_v15 }
 0x7bf   : > { %17333 = vmatmul.mubr.msk.bf16.gmra.mrb[36].mxu0 %vm790_vm2, %v22095_v33  ;;  %v8227_v33 = vld [vmem:[#allocation2 + $0x20] sm:$0xff] }
 0x7c0   : > { %17336 = vmatprep.mubr.msk.bf16.mxu0 %vm790_vm2, %v22097_v7  ;;  %v22289_v7 = vpack.c.bf16 %v7262_v23, %v7261_v59  ;;  %v8967_v59 = vsel %vm8329_vm6, %v15072_v11, 0  ;;  %v15089_v23 = vld [vmem:[%s24069_s14 + $0x8] sm:$0x3] }
 0x7c7   : > { %17337 = vmatmul.mubr.msk.bf16.gmra.mrb[40].mxu0 %vm790_vm2, %v22103_v31  ;;  %v22291_v31 = vpack.c.bf16 %v8227_v33, %v8226_v21  ;;  %v8864_v21 = vld [vmem:[#allocation2 + $0x19] sm:$0xff]  ;;  %v8865_v33 = vld [vmem:[#allocation2 + $0x21] sm:$0xff] }
 0x7c8   : > { %17340 = vmatprep.mubr.msk.bf16.mxu0 %vm790_vm2, %v22105_v43  ;;  %v8228_v43 = vld [vmem:[#allocation2 + $0x30] sm:$0xff] }
 0x7cf   : > { %17341 = vmatmul.mubr.msk.bf16.gmra.mrb[44].mxu0 %vm790_vm2, %v22111_v17  ;;  %v8229_v17 = vld [vmem:[#allocation2 + $0x38] sm:$0xff] }
 0x7d0   : > { %17344 = vmatprep.mubr.msk.bf16.mxu0 %vm790_vm2, %v22113_v10  ;;  %v8230_v10 = vld [vmem:[#allocation2 + $0x48] sm:$0xff] }
 0x7d7   : > { %17345 = vmatmul.mubr.msk.bf16.gmra.mrb[48].mxu0 %vm790_vm2, %v22119_v25  ;;  %v8231_v25 = vld [vmem:[#allocation2 + $0x50] sm:$0xff] }
 0x7d8   : > { %17348 = vmatprep.mubr.msk.bf16.mxu0 %vm790_vm2, %v22121_v20  ;;  %v22297_v20 = vpack.c.bf16 %v8229_v17, %v8228_v43  ;;  %v22299_v27 = vpack.c.bf16 %v8231_v25, %v8230_v10  ;;  %v8867_v43 = vld [vmem:[#allocation2 + $0x39] sm:$0xff]  ;;  %v8899_v17 = vpack.c.bf16 %v8865_v33, %v8864_v21  ;;  %v9168_v25 = vsel %vm8329_vm6, %v15089_v23, 0 }
 0x7df   : > { %17349 = vmatmul.mubr.msk.bf16.gmra.mrb[52].mxu0 %vm790_vm2, %v22127_v42  ;;  %v15055_v42 = vld [vmem:[%s24069_s14 + $0xc] sm:$0x3] }
 0x7e0   : > { %17352 = vmatprep.mubr.msk.bf16.mxu0 %vm790_vm2, %v22129_v1  ;;  %v8232_v1 = vld [vmem:[#allocation2 + $0x60] sm:$0xff]  ;;  %v8667_v12 = vsel %vm8329_vm6, %v15055_v42, 0 }
 0x7e1   : > { %v22310_v62 = vpack.c.bf16 %v8233_v37, %v8232_v1  ;;  %v8872_v37 = vld [vmem:[#allocation2 + $0x79] sm:$0xff] }
 0x7e7   : > { %17353 = vmatmul.mubr.msk.bf16.gmra.mrb[56].mxu0 %vm790_vm2, %v22141_v53  ;;  %v8235_v53 = vld [vmem:[#allocation2 + $0x80] sm:$0xff] }
 0x7e8   : > { %17356 = vmatprep.mubr.msk.bf16.mxu0 %vm790_vm2, %v7279_v51  ;;  %v22312_v6 = vpack.c.bf16 %v8235_v53, %v8234_v9  ;;  %v19610_v51 = vld [vmem:[%s24065_s10 + $0x8] sm:$0xff]   ;;  %v8874_v53 = vld [vmem:[#allocation2 + $0x91] sm:$0xff] }
 0x7e9   : > { %v8873_v9 = vld [vmem:[#allocation2 + $0x81] sm:$0xff] }
 0x7ef   : > { %17357 = vmatmul.mubr.msk.bf16.gmra.mrb[60].mxu0 %vm790_vm2, %v22289_v7 }
 0x7f0   : > { %17378 = vmatprep.mubr.msk.bf16.mxu0 %vm8191_vm5, %v22291_v31 }
 0x7f7   : > { %17379 = vmatmul.mubr.msk.bf16.vlgmr.msra.gmra.mrb[32].mxu0 %vm8191_vm5, %v22297_v20 }
 0x7f8   : > { %17382 = vmatprep.mubr.msk.bf16.mxu0 %vm8191_vm5, %v22299_v27  ;;  %17411 = vmatpush3.bf16.msra.mxu0 %v8498_v45  ;;  %v8871_v45 = vld [vmem:[#allocation2 + $0x69] sm:$0xff] }
 0x7f9   : > { %19534 = vmatprep.subr.msk.bf16.mxu0 %vm8329_vm6, %v15055_v42 }
 0x7ff   : > { %17383 = vmatmul.mubr.msk.bf16.gmra.mrb[36].mxu0 %vm8191_vm5, %v22310_v62 }
 0x800   : > { %17386 = vmatprep.mubr.msk.bf16.mxu0 %vm8191_vm5, %v22312_v6 }
 0x807   : > { %17387 = vmatmul.mubr.msk.bf16.gmra.mrb[40].mxu0 %vm8191_vm5, %v22318_v35 }
 0x808   : > { %17390 = vmatprep.mubr.msk.bf16.mxu0 %vm8191_vm5, %v22320_v26 }
 0x80f   : > { %17391 = vmatmul.mubr.msk.bf16.gmra.mrb[44].mxu0 %vm8191_vm5, %v22326_v49 }
 0x810   : > { %17394 = vmatprep.mubr.msk.bf16.mxu0 %vm8191_vm5, %v22328_v48 }
 0x817   : > { %17395 = vmatmul.mubr.msk.bf16.gmra.mrb[48].mxu0 %vm8191_vm5, %v22334_v29 }
 0x818   : > { %17398 = vmatprep.mubr.msk.bf16.mxu0 %vm8191_vm5, %v22336_v36 }
 0x81f   : > { %17399 = vmatmul.mubr.msk.bf16.gmra.mrb[52].mxu0 %vm8191_vm5, %v22342_v40 }
 0x820   : > { %17402 = vmatprep.mubr.msk.bf16.mxu0 %vm8191_vm5, %v22344_v3 }
 0x827   : > { %17403 = vmatmul.mubr.msk.bf16.gmra.mrb[56].mxu0 %vm8191_vm5, %v8274_v0 }
 0x828   : > { %17406 = vmatprep.mubr.msk.bf16.mxu0 %vm8191_vm5, %v8275_v32 }
 0x82f   : > { %17407 = vmatmul.mubr.msk.bf16.gmra.mrb[60].mxu0 %vm8191_vm5, %v8276_v54 }
 0x830   : > { %17412 = vmatprep.mubr.msk.bf16.mxu0 %vm8191_vm5, %v21846_v46  ;;  %v19609_v46 = vld [vmem:[%s24065_s10] sm:$0xff]  }
 0x831   : > { %17361 = vmatpush3.bf16.msra.mxu1 %v19609_v46  ;;  %v8034_v46 = vld [vmem:[%s24066_s11] sm:$0x1] }
 0x832   : > { %17362 = vmatprep.subr.bf16.mxu1 %v20162_v5 }
 0x835   : > { %17363 = vmatpush3.bf16.msra.mxu1 %v19610_v51 }
 0x836   : > { %17368 = vmatprep.subr.bf16.mxu1 %v20162_v5 }
 0x837   : > { %17413 = vmatmul.mubr.msk.bf16.vlgmr.msra.gmra.mrb[32].mxu0 %vm8191_vm5, %v22291_v31  ;;  %v8866_v31 = vld [vmem:[#allocation2 + $0x31] sm:$0xff] }
 0x838   : > { %17416 = vmatprep.mubr.msk.bf16.mxu0 %vm8191_vm5, %v22297_v20  ;;  %17445 = vmatpush3.bf16.msra.mxu0 %v8667_v12  ;;  %v22441_v10 = vpack.c.bf16 %v8867_v43, %v8866_v31  ;;  %v19611_v43 = vld [vmem:[%s24067_s12] sm:$0xff]  }
 0x839   : > { %19535 = vmatprep.subr.msk.bf16.mxu0 %vm8329_vm6, %v15072_v11  ;;  %17365 = vmatmul.mubr.msk.bf16.vlgmr.msra.gmra.mrb[64].mxu1 %vm8047_vm8, %v8029_v47  ;;  %v15140_v11 = vld [vmem:[%s24069_s14 + $0xa] sm:$0x3] }
 0x83a   : > { %17372 = vmatprep.mubr.msk.bf16.mxu1 %vm20163_vm7, %v20162_v5  ;;  %17369 = vmatpush3.bf16.msra.mxu1 %v19611_v43  ;;  %v10337_v43 = vlaneseq }
 0x83b   : > { %17370 = vmatprep.subr.bf16.mxu1 %v20162_v5 }
 0x83f   : > { %17417 = vmatmul.mubr.msk.bf16.gmra.mrb[36].mxu0 %vm8191_vm5, %v22299_v27 }
 0x840   : > { %17420 = vmatprep.mubr.msk.bf16.mxu0 %vm8191_vm5, %v22310_v62 }
 0x847   : > { %17421 = vmatmul.mubr.msk.bf16.gmra.mrb[40].mxu0 %vm8191_vm5, %v22312_v6 }
 0x848   : > { %17424 = vmatprep.mubr.msk.bf16.mxu0 %vm8191_vm5, %v22318_v35 }
 0x84f   : > { %17425 = vmatmul.mubr.msk.bf16.gmra.mrb[44].mxu0 %vm8191_vm5, %v22320_v26 }
 0x850   : > { %17428 = vmatprep.mubr.msk.bf16.mxu0 %vm8191_vm5, %v22326_v49 }
 0x857   : > { %17429 = vmatmul.mubr.msk.bf16.gmra.mrb[48].mxu0 %vm8191_vm5, %v22328_v48 }
 0x858   : > { %17432 = vmatprep.mubr.msk.bf16.mxu0 %vm8191_vm5, %v22334_v29 }
 0x85f   : > { %17433 = vmatmul.mubr.msk.bf16.gmra.mrb[52].mxu0 %vm8191_vm5, %v22336_v36 }
 0x860   : > { %17436 = vmatprep.mubr.msk.bf16.mxu0 %vm8191_vm5, %v22342_v40 }
 0x867   : > { %17437 = vmatmul.mubr.msk.bf16.gmra.mrb[56].mxu0 %vm8191_vm5, %v22344_v3 }
 0x868   : > { %17440 = vmatprep.mubr.msk.bf16.mxu0 %vm8191_vm5, %v8274_v0 }
 0x86f   : > { %17441 = vmatmul.mubr.msk.bf16.gmra.mrb[60].mxu0 %vm8191_vm5, %v8275_v32 }
 0x870   : > { %17446 = vmatprep.mubr.msk.bf16.mxu0 %vm8191_vm5, %v22297_v20  ;;  %v15106_v20 = vld [vmem:[%s24069_s14 + $0xe] sm:$0x3] }
 0x877   : > { %17447 = vmatmul.mubr.msk.bf16.vlgmr.msra.gmra.mrb[32].mxu0 %vm8191_vm5, %v22299_v27  ;;  %v8870_v27 = vld [vmem:[#allocation2 + $0x61] sm:$0xff] }
 0x878   : > { %17450 = vmatprep.mubr.msk.bf16.mxu0 %vm8191_vm5, %v22310_v62  ;;  %17479 = vmatpush3.bf16.msra.mxu0 %v8967_v59  ;;  %v22453_v1 = vpack.c.bf16 %v8871_v45, %v8870_v27  ;;  %v8875_v62 = vld [vmem:[#allocation2 + $0x99] sm:$0xff] }
 0x879   : > { %19536 = vmatprep.subr.msk.bf16.mxu0 %vm8329_vm6, %v15089_v23  ;;  %v22461_v58 = vpack.c.bf16 %v8875_v62, %v8874_v53  ;;  %v9568_v27 = vld [vmem:[#allocation2 + $0x32] sm:$0xff]  ;;  %v9569_v45 = vld [vmem:[#allocation2 + $0x3a] sm:$0xff]  ;;  %v9572_v53 = vld [vmem:[#allocation2 + $0x62] sm:$0xff] }
 0x87a   : > { %v9573_v62 = vld [vmem:[#allocation2 + $0x6a] sm:$0xff] }
 0x87f   : > { %17451 = vmatmul.mubr.msk.bf16.gmra.mrb[36].mxu0 %vm8191_vm5, %v22312_v6  ;;  %v22459_v6 = vpack.c.bf16 %v8873_v9, %v8872_v37  ;;  %v9870_v37 = vsel %vm8329_vm6, %v15140_v11, 0  ;;  %v15157_v9 = vld [vmem:[%s24069_s14 + $0x10] sm:$0x3] }
 0x880   : > { %17454 = vmatprep.mubr.msk.bf16.mxu0 %vm8191_vm5, %v22318_v35  ;;  %v8879_v35 = vld [vmem:[#allocation2 + $0xc9] sm:$0xff] }
 0x881   : > { %v22469_v52 = vpack.c.bf16 %v8879_v35, %v8878_v2  ;;  %v9576_v2 = vld [vmem:[#allocation2 + $0x92] sm:$0xff]  ;;  %v9577_v35 = vld [vmem:[#allocation2 + $0x9a] sm:$0xff] }
 0x887   : > { %17455 = vmatmul.mubr.msk.bf16.gmra.mrb[40].mxu0 %vm8191_vm5, %v22320_v26  ;;  %v22467_v26 = vpack.c.bf16 %v8877_v44, %v8876_v61  ;;  %v9574_v61 = vld [vmem:[#allocation2 + $0x7a] sm:$0xff]  ;;  %v9575_v44 = vld [vmem:[#allocation2 + $0x82] sm:$0xff] }
 0x888   : > { %17458 = vmatprep.mubr.msk.bf16.mxu0 %vm8191_vm5, %v22326_v49  ;;  %v8883_v49 = vld [vmem:[#allocation2 + $0xf9] sm:$0xff] }
 0x889   : > { %v22477_v56 = vpack.c.bf16 %v8883_v49, %v8882_v16  ;;  %v9580_v16 = vld [vmem:[#allocation2 + $0xc2] sm:$0xff]  ;;  %v9581_v49 = vld [vmem:[#allocation2 + $0xca] sm:$0xff] }
 0x88f   : > { %17459 = vmatmul.mubr.msk.bf16.gmra.mrb[44].mxu0 %vm8191_vm5, %v22328_v48  ;;  %v22475_v48 = vpack.c.bf16 %v8881_v4, %v8880_v22  ;;  %v9578_v22 = vld [vmem:[#allocation2 + $0xaa] sm:$0xff]  ;;  %v9579_v4 = vld [vmem:[#allocation2 + $0xb2] sm:$0xff] }
 0x890   : > { %17462 = vmatprep.mubr.msk.bf16.mxu0 %vm8191_vm5, %v22334_v29  ;;  %v8887_v29 = vld [vmem:[#allocation2 + $0x129] sm:$0xff] }
 0x891   : > { %v22485_v13 = vpack.c.bf16 %v8887_v29, %v8886_v30  ;;  %v9584_v30 = vld [vmem:[#allocation2 + $0xf2] sm:$0xff]  ;;  %v9585_v29 = vld [vmem:[#allocation2 + $0xfa] sm:$0xff] }
 0x897   : > { %17463 = vmatmul.mubr.msk.bf16.gmra.mrb[48].mxu0 %vm8191_vm5, %v22336_v36  ;;  %v22483_v36 = vpack.c.bf16 %v8885_v55, %v8884_v57  ;;  %v9582_v57 = vld [vmem:[#allocation2 + $0xda] sm:$0xff]  ;;  %v9583_v55 = vld [vmem:[#allocation2 + $0xe2] sm:$0xff] }
 0x898   : > { %17466 = vmatprep.mubr.msk.bf16.mxu0 %vm8191_vm5, %v22342_v40  ;;  %v8891_v40 = vld [vmem:[#allocation2 + $0x159] sm:$0xff] }
 0x899   : > { %v22493_v8 = vpack.c.bf16 %v8891_v40, %v8890_v19  ;;  %v9588_v19 = vld [vmem:[#allocation2 + $0x122] sm:$0xff]  ;;  %v9589_v40 = vld [vmem:[#allocation2 + $0x12a] sm:$0xff] }
 0x89f   : > { %17467 = vmatmul.mubr.msk.bf16.gmra.mrb[52].mxu0 %vm8191_vm5, %v22344_v3  ;;  %v22491_v3 = vpack.c.bf16 %v8889_v39, %v8888_v60  ;;  %v9586_v60 = vld [vmem:[#allocation2 + $0x10a] sm:$0xff]  ;;  %v9587_v39 = vld [vmem:[#allocation2 + $0x112] sm:$0xff] }
 0x8a0   : > { %17470 = vmatprep.mubr.msk.bf16.mxu0 %vm8191_vm5, %v8274_v0  ;;  %v9369_v0 = vsel %vm8329_vm6, %v15106_v20, 0 }
 0x8a7   : > { %17471 = vmatmul.mubr.msk.bf16.gmra.mrb[56].mxu0 %vm8191_vm5, %v8275_v32  ;;  %v15123_v32 = vld [vmem:[%s24069_s14 + $0x4] sm:$0x3] }
 0x8a8   : > { %17474 = vmatprep.mubr.msk.bf16.mxu0 %vm8191_vm5, %v8276_v54  ;;  %v8914_v54 = vpack.c.bf16 %v8895_v50, %v8894_v38  ;;  %v9669_v12 = vsel %vm8329_vm6, %v15123_v32, 0  ;;  %v9594_v50 = vld [vmem:[#allocation2 + $0x16a] sm:$0xff] }
 0x8af   : > { %17475 = vmatmul.mubr.msk.bf16.gmra.mrb[60].mxu0 %vm8191_vm5, %v21924_v24  ;;  %v8868_v24 = vld [vmem:[#allocation2 + $0x49] sm:$0xff] }
 0x8b0   : > { %17480 = vmatprep.mubr.msk.bf16.mxu0 %vm8191_vm5, %v21926_v41  ;;  %v8869_v41 = vld [vmem:[#allocation2 + $0x51] sm:$0xff] }
 0x8b1   : > { %v22451_v42 = vpack.c.bf16 %v8869_v41, %v8868_v24  ;;  %v9566_v24 = vld [vmem:[#allocation2 + $0x1a] sm:$0xff]  ;;  %v9567_v41 = vld [vmem:[#allocation2 + $0x22] sm:$0xff] }
 0x8b7   : > { %17481 = vmatmul.mubr.msk.bf16.vlgmr.msra.gmra.mrb[32].mxu0 %vm8191_vm5, %v8899_v17 }
 0x8b8   : > { %17484 = vmatprep.mubr.msk.bf16.mxu0 %vm8191_vm5, %v22441_v10  ;;  %17513 = vmatpush3.bf16.msra.mxu0 %v9168_v25 }
 0x8b9   : > { %19537 = vmatprep.subr.msk.bf16.mxu0 %vm8329_vm6, %v15106_v20 }
 0x8bf   : > { %17485 = vmatmul.mubr.msk.bf16.gmra.mrb[36].mxu0 %vm8191_vm5, %v22451_v42 }
 0x8c0   : > { %17488 = vmatprep.mubr.msk.bf16.mxu0 %vm8191_vm5, %v22453_v1 }
 0x8c7   : > { %17489 = vmatmul.mubr.msk.bf16.gmra.mrb[40].mxu0 %vm8191_vm5, %v22459_v6 }
 0x8c8   : > { %17492 = vmatprep.mubr.msk.bf16.mxu0 %vm8191_vm5, %v22461_v58 }
 0x8cf   : > { %17493 = vmatmul.mubr.msk.bf16.gmra.mrb[44].mxu0 %vm8191_vm5, %v22467_v26 }
 0x8d0   : > { %17496 = vmatprep.mubr.msk.bf16.mxu0 %vm8191_vm5, %v22469_v52 }
 0x8d7   : > { %17497 = vmatmul.mubr.msk.bf16.gmra.mrb[48].mxu0 %vm8191_vm5, %v22475_v48 }
 0x8d8   : > { %17500 = vmatprep.mubr.msk.bf16.mxu0 %vm8191_vm5, %v22477_v56 }
 0x8df   : > { %17501 = vmatmul.mubr.msk.bf16.gmra.mrb[52].mxu0 %vm8191_vm5, %v22483_v36 }
 0x8e0   : > { %17504 = vmatprep.mubr.msk.bf16.mxu0 %vm8191_vm5, %v22485_v13 }
 0x8e7   : > { %17505 = vmatmul.mubr.msk.bf16.gmra.mrb[56].mxu0 %vm8191_vm5, %v22491_v3 }
 0x8e8   : > { %17508 = vmatprep.mubr.msk.bf16.mxu0 %vm8191_vm5, %v22493_v8 }
 0x8ef   : > { %17509 = vmatmul.mubr.msk.bf16.gmra.mrb[60].mxu0 %vm8191_vm5, %v8913_v34 }
 0x8f0   : > { %17514 = vmatprep.mubr.msk.bf16.mxu0 %vm8191_vm5, %v8899_v17  ;;  %v19612_v17 = vld [vmem:[%s24067_s12 + $0x8] sm:$0xff]  }
 0x8f1   : > { %17371 = vmatpush3.bf16.msra.mxu1 %v19612_v17  ;;  %v8103_v17 = vld [vmem:[%s24068_s13] sm:$0x1] }
 0x8f7   : > { %17515 = vmatmul.mubr.msk.bf16.vlgmr.msra.gmra.mrb[32].mxu0 %vm8191_vm5, %v22441_v10 }
 0x8f8   : > { %17518 = vmatprep.mubr.msk.bf16.mxu0 %vm8191_vm5, %v22451_v42  ;;  %17547 = vmatpush3.bf16.msra.mxu0 %v9369_v0  ;;  %v9593_v0 = vld [vmem:[#allocation2 + $0x15a] sm:$0xff] }
 0x8f9   : > { %19538 = vmatprep.subr.msk.bf16.mxu0 %vm8329_vm6, %v15123_v32  ;;  %v9613_v32 = vpack.c.bf16 %v9591_v28, %v9590_v14 }
 0x8ff   : > { %17519 = vmatmul.mubr.msk.bf16.gmra.mrb[36].mxu0 %vm8191_vm5, %v22453_v1 }
 0x900   : > { %17522 = vmatprep.mubr.msk.bf16.mxu0 %vm8191_vm5, %v22459_v6 }
 0x907   : > { %17523 = vmatmul.mubr.msk.bf16.gmra.mrb[40].mxu0 %vm8191_vm5, %v22461_v58 }
 0x908   : > { %17526 = vmatprep.mubr.msk.bf16.mxu0 %vm8191_vm5, %v22467_v26 }
 0x90c   : > { %v8085_v51 = vpop.f32.mrb[64].mxu1 }
 0x90d   : > { %v8086_v15 = vadd.f32 %v8085_v51, %v8034_v46  ;;  %v17366_v47 = vpop.f32.mrb[65].mxu1  ;;  %v9596_v46 = vld [vmem:[#allocation2 + $0x182] sm:$0xff]  ;;  %v9597_v51 = vld [vmem:[#allocation2 + $0x18a] sm:$0xff] }
 0x90e   : > { %v8088_v59 = vpop.f32.mrb[66].mxu1 }
 0x90f   : > { %17527 = vmatmul.mubr.msk.bf16.gmra.mrb[44].mxu0 %vm8191_vm5, %v22469_v52  ;;  %v15018_v23 = vmul.f32 -1.442695, %v8086_v15  ;;  %v17367_v21 = vpop.f32.mrb[67].mxu1 }
 0x910   : > { %17530 = vmatprep.mubr.msk.bf16.mxu0 %vm8191_vm5, %v22475_v48 }
 0x911   : > { %19893 = vpow2.f32 %v15018_v23 }
 0x917   : > { %17531 = vmatmul.mubr.msk.bf16.gmra.mrb[48].mxu0 %vm8191_vm5, %v22477_v56 }
 0x918   : > { %17534 = vmatprep.mubr.msk.bf16.mxu0 %vm8191_vm5, %v22483_v36 }
 0x91b   : > { %v19894_v33 = vpop.eup %19893 }
 0x91c   : > { %v8094_v31 = vadd.f32 1.0, %v19894_v33  ;;  %v19613_v33 = vld [vmem:[%s24071_s16] sm:$0xff]  }
 0x91d   : > { %17682 = vmatprep.subr.bf16.mxu1 %v19613_v33 }
 0x91e   : > { %19895 = vrcp.f32 %v8094_v31  ;;  %v19614_v31 = vld [vmem:[%s24071_s16 + $0x8] sm:$0xff]  }
 0x91f   : > { %17535 = vmatmul.mubr.msk.bf16.gmra.mrb[52].mxu0 %vm8191_vm5, %v22485_v13 }
 0x920   : > { %17538 = vmatprep.mubr.msk.bf16.mxu0 %vm8191_vm5, %v22491_v3 }
 0x927   : > { %17539 = vmatmul.mubr.msk.bf16.gmra.mrb[56].mxu0 %vm8191_vm5, %v22493_v8 }
 0x928   : > { %17542 = vmatprep.mubr.msk.bf16.mxu0 %vm8191_vm5, %v8913_v34 }
 0x92f   : > { %17543 = vmatmul.mubr.msk.bf16.gmra.mrb[60].mxu0 %vm8191_vm5, %v8914_v54 }
 0x930   : > { %17548 = vmatprep.mubr.msk.bf16.mxu0 %vm8191_vm5, %v22441_v10  ;;  %v19896_v10 = vpop.eup %19895 }
 0x931   : > { %v8097_v25 = vmul.f32 %v19896_v10, %v8086_v15  ;;  %v9616_v15 = vpack.c.bf16 %v9597_v51, %v9596_v46  ;;  %v22674_v10 = vld [vmem:[%s24064_s9] ss:$0 sm:$0xff] }
 0x933   : > { %v8098_v20 = vpack.c.bf16 %v8097_v25, %v8097_v25 }
 0x935   : > { %17373 = vmatmul.mubr.msk.bf16.vlgmr.msra.gmra.mrb[68].mxu1 %vm8047_vm8, %v8098_v20 }
 0x936   : > { %17683 = vmatpush3.bf16.msra.mxu1 %v19613_v33 }
 0x937   : > { %17549 = vmatmul.mubr.msk.bf16.vlgmr.msra.gmra.mrb[32].mxu0 %vm8191_vm5, %v22451_v42  ;;  %v9601_v42 = vpack.c.bf16 %v9567_v41, %v9566_v24  ;;  %17684 = vmatprep.subr.bf16.mxu1 %v19614_v31  ;;  %v22679_v41 = vld [vmem:[%s24070_s15] ss:$0 sm:$0xff] }
 0x938   : > { %17552 = vmatprep.mubr.msk.bf16.mxu0 %vm8191_vm5, %v22453_v1  ;;  %17581 = vmatpush3.bf16.msra.mxu0 %v9669_v12  ;;  %v22582_v1 = vpack.c.bf16 %v9569_v45, %v9568_v27 }
 0x939   : > { %19539 = vmatprep.subr.msk.bf16.mxu0 %vm8329_vm6, %v15140_v11  ;;  %v10071_v11 = vsel %vm8329_vm6, %v15157_v9, 0 }
 0x93a   : > { %17685 = vmatpush3.bf16.msra.mxu1 %v19614_v31 }
 0x93b   : > { %17718 = vmatprep.subr.bf16.mxu1 %v20162_v5 }
 0x93f   : > { %17553 = vmatmul.mubr.msk.bf16.gmra.mrb[36].mxu0 %vm8191_vm5, %v22459_v6 }
 0x940   : > { %17556 = vmatprep.mubr.msk.bf16.mxu0 %vm8191_vm5, %v22461_v58  ;;  %v22594_v58 = vpack.c.bf16 %v9573_v62, %v9572_v53 }
 0x947   : > { %17557 = vmatmul.mubr.msk.bf16.gmra.mrb[40].mxu0 %vm8191_vm5, %v22467_v26  ;;  %v22600_v26 = vpack.c.bf16 %v9575_v44, %v9574_v61 }
 0x948   : > { %17560 = vmatprep.mubr.msk.bf16.mxu0 %vm8191_vm5, %v22469_v52  ;;  %v22602_v52 = vpack.c.bf16 %v9577_v35, %v9576_v2 }
 0x94f   : > { %17561 = vmatmul.mubr.msk.bf16.gmra.mrb[44].mxu0 %vm8191_vm5, %v22475_v48  ;;  %v9607_v48 = vpack.c.bf16 %v9579_v4, %v9578_v22 }
 0x950   : > { %17564 = vmatprep.mubr.msk.bf16.mxu0 %vm8191_vm5, %v22477_v56  ;;  %v9608_v56 = vpack.c.bf16 %v9581_v49, %v9580_v16 }
 0x957   : > { %17565 = vmatmul.mubr.msk.bf16.gmra.mrb[48].mxu0 %vm8191_vm5, %v22483_v36  ;;  %v9609_v36 = vpack.c.bf16 %v9583_v55, %v9582_v57 }
 0x958   : > { %17568 = vmatprep.mubr.msk.bf16.mxu0 %vm8191_vm5, %v22485_v13  ;;  %v9610_v13 = vpack.c.bf16 %v9585_v29, %v9584_v30 }
 0x95f   : > { %17569 = vmatmul.mubr.msk.bf16.gmra.mrb[52].mxu0 %vm8191_vm5, %v22491_v3  ;;  %v9611_v3 = vpack.c.bf16 %v9587_v39, %v9586_v60 }
 0x960   : > { %17572 = vmatprep.mubr.msk.bf16.mxu0 %vm8191_vm5, %v22493_v8  ;;  %v9612_v8 = vpack.c.bf16 %v9589_v40, %v9588_v19  ;;  %v19616_v40 = vld [vmem:[%s24073_s18 + $0x8] sm:$0xff]  }
 0x967   : > { %17573 = vmatmul.mubr.msk.bf16.gmra.mrb[56].mxu0 %vm8191_vm5, %v8913_v34  ;;  %v9592_v34 = vld [vmem:[#allocation2 + $0x152] sm:$0xff] }
 0x968   : > { %17576 = vmatprep.mubr.msk.bf16.mxu0 %vm8191_vm5, %v8914_v54  ;;  %v9614_v38 = vpack.c.bf16 %v9593_v0, %v9592_v34  ;;  %v9595_v54 = vld [vmem:[#allocation2 + $0x172] sm:$0xff] }
 0x969   : > { %v9615_v12 = vpack.c.bf16 %v9595_v54, %v9594_v50 }
 0x96f   : > { %17577 = vmatmul.mubr.msk.bf16.gmra.mrb[60].mxu0 %vm8191_vm5, %v22059_v63  ;;  %v9570_v63 = vld [vmem:[#allocation2 + $0x4a] sm:$0xff] }
 0x970   : > { %17582 = vmatprep.mubr.msk.bf16.mxu0 %vm8191_vm5, %v22061_v18  ;;  %v9571_v18 = vld [vmem:[#allocation2 + $0x52] sm:$0xff] }
 0x971   : > { %v22592_v6 = vpack.c.bf16 %v9571_v18, %v9570_v63 }
 0x977   : > { %17583 = vmatmul.mubr.msk.bf16.vlgmr.msra.gmra.mrb[32].mxu0 %vm8191_vm5, %v9601_v42 }
 0x978   : > { %17586 = vmatprep.mubr.msk.bf16.mxu0 %vm8191_vm5, %v22582_v1  ;;  %17615 = vmatpush3.bf16.msra.mxu0 %v9870_v37 }
 0x979   : > { %19540 = vmatprep.subr.msk.bf16.mxu0 %vm8329_vm6, %v15157_v9 }
 0x97f   : > { %17587 = vmatmul.mubr.msk.bf16.gmra.mrb[36].mxu0 %vm8191_vm5, %v22592_v6 }
 0x980   : > { %17590 = vmatprep.mubr.msk.bf16.mxu0 %vm8191_vm5, %v22594_v58 }
 0x987   : > { %17591 = vmatmul.mubr.msk.bf16.gmra.mrb[40].mxu0 %vm8191_vm5, %v22600_v26 }
 0x988   : > { %17594 = vmatprep.mubr.msk.bf16.mxu0 %vm8191_vm5, %v22602_v52 }
 0x98f   : > { %17595 = vmatmul.mubr.msk.bf16.gmra.mrb[44].mxu0 %vm8191_vm5, %v9607_v48 }
 0x990   : > { %17598 = vmatprep.mubr.msk.bf16.mxu0 %vm8191_vm5, %v9608_v56 }
 0x997   : > { %17599 = vmatmul.mubr.msk.bf16.gmra.mrb[48].mxu0 %vm8191_vm5, %v9609_v36 }
 0x998   : > { %17602 = vmatprep.mubr.msk.bf16.mxu0 %vm8191_vm5, %v9610_v13 }
 0x99f   : > { %17603 = vmatmul.mubr.msk.bf16.gmra.mrb[52].mxu0 %vm8191_vm5, %v9611_v3 }
 0x9a0   : > { %17606 = vmatprep.mubr.msk.bf16.mxu0 %vm8191_vm5, %v9612_v8 }
 0x9a7   : > { %17607 = vmatmul.mubr.msk.bf16.gmra.mrb[56].mxu0 %vm8191_vm5, %v9613_v32 }
 0x9a8   : > { %17610 = vmatprep.mubr.msk.bf16.mxu0 %vm8191_vm5, %v9614_v38 }
 0x9af   : > { %17611 = vmatmul.mubr.msk.bf16.gmra.mrb[60].mxu0 %vm8191_vm5, %v9615_v12 }
 0x9b0   : > { %17616 = vmatprep.mubr.msk.bf16.mxu0 %vm8191_vm5, %v9601_v42 }
 0x9b7   : > { %17617 = vmatmul.mubr.msk.bf16.vlgmr.msra.gmra.mrb[32].mxu0 %vm8191_vm5, %v22582_v1 }
 0x9b8   : > { %17620 = vmatprep.mubr.msk.bf16.mxu0 %vm8191_vm5, %v22592_v6  ;;  %17649 = vmatpush3.bf16.msra.mxu0 %v10071_v11 }
 0x9bf   : > { %17621 = vmatmul.mubr.msk.bf16.gmra.mrb[36].mxu0 %vm8191_vm5, %v22594_v58 }
 0x9c0   : > { %17624 = vmatprep.mubr.msk.bf16.mxu0 %vm8191_vm5, %v22600_v26 }
 0x9c7   : > { %17625 = vmatmul.mubr.msk.bf16.gmra.mrb[40].mxu0 %vm8191_vm5, %v22602_v52 }
 0x9c8   : > { %17628 = vmatprep.mubr.msk.bf16.mxu0 %vm8191_vm5, %v9607_v48 }
 0x9cf   : > { %17629 = vmatmul.mubr.msk.bf16.gmra.mrb[44].mxu0 %vm8191_vm5, %v9608_v56 }
 0x9d0   : > { %17632 = vmatprep.mubr.msk.bf16.mxu0 %vm8191_vm5, %v9609_v36 }
 0x9d7   : > { %17633 = vmatmul.mubr.msk.bf16.gmra.mrb[48].mxu0 %vm8191_vm5, %v9610_v13 }
 0x9d8   : > { %17636 = vmatprep.mubr.msk.bf16.mxu0 %vm8191_vm5, %v9611_v3 }
 0x9df   : > { %17637 = vmatmul.mubr.msk.bf16.gmra.mrb[52].mxu0 %vm8191_vm5, %v9612_v8 }
 0x9e0   : > { %17640 = vmatprep.mubr.msk.bf16.mxu0 %vm8191_vm5, %v9613_v32 }
 0x9e7   : > { %17641 = vmatmul.mubr.msk.bf16.gmra.mrb[56].mxu0 %vm8191_vm5, %v9614_v38 }
 0x9e8   : > { %17644 = vmatprep.mubr.msk.bf16.mxu0 %vm8191_vm5, %v9615_v12 }
 0x9ef   : > { %17645 = vmatmul.mubr.msk.bf16.gmra.mrb[60].mxu0 %vm8191_vm5, %v9616_v15 }
 0x9f0   : > { %17650 = vmatprep.mubr.msk.bf16.mxu0 %vm8191_vm5, %v22582_v1 }
 0x9f7   : > { %17651 = vmatmul.mubr.msk.bf16.vlgmr.msra.gmra.mrb[32].mxu0 %vm8191_vm5, %v22592_v6 }
 0x9f8   : > { %17654 = vmatprep.mubr.msk.bf16.mxu0 %vm8191_vm5, %v22594_v58 }
 0x9ff   : > { %17655 = vmatmul.mubr.msk.bf16.gmra.mrb[36].mxu0 %vm8191_vm5, %v22600_v26 }
 0xa00   : > { %17658 = vmatprep.mubr.msk.bf16.mxu0 %vm8191_vm5, %v22602_v52 }
 0xa07   : > { %17659 = vmatmul.mubr.msk.bf16.gmra.mrb[40].mxu0 %vm8191_vm5, %v9607_v48  ;;  %v19615_v48 = vld [vmem:[%s24073_s18] sm:$0xff]  }
 0xa08   : > { %17662 = vmatprep.mubr.msk.bf16.mxu0 %vm8191_vm5, %v9608_v56  ;;  %v8153_v47 = vpop.f32.mrb[68].mxu1 }
 0xa09   : > { %v17374_v59 = vpop.f32.mrb[69].mxu1  ;;  %v8154_v25 = vadd.f32 %v8153_v47, %v8103_v17 }
 0xa0a   : > { %v8156_v23 = vpop.f32.mrb[70].mxu1 }
 0xa0b   : > { %v17375_v21 = vpop.f32.mrb[71].mxu1 }
 0xa0f   : > { %17663 = vmatmul.mubr.msk.bf16.gmra.mrb[44].mxu0 %vm8191_vm5, %v9609_v36 }
 0xa10   : > { %17666 = vmatprep.mubr.msk.bf16.mxu0 %vm8191_vm5, %v9610_v13 }
 0xa17   : > { %17667 = vmatmul.mubr.msk.bf16.gmra.mrb[48].mxu0 %vm8191_vm5, %v9611_v3 }
 0xa18   : > { %17670 = vmatprep.mubr.msk.bf16.mxu0 %vm8191_vm5, %v9612_v8 }
 0xa1f   : > { %17671 = vmatmul.mubr.msk.bf16.gmra.mrb[52].mxu0 %vm8191_vm5, %v9613_v32 }
 0xa20   : > { %17674 = vmatprep.mubr.msk.bf16.mxu0 %vm8191_vm5, %v9614_v38 }
 0xa27   : > { %17675 = vmatmul.mubr.msk.bf16.gmra.mrb[56].mxu0 %vm8191_vm5, %v9615_v12 }
 0xa28   : > { %17678 = vmatprep.mubr.msk.bf16.mxu0 %vm8191_vm5, %v9616_v15 }
 0xa2f   : > { %17679 = vmatmul.mubr.msk.bf16.gmra.mrb[60].mxu0 %vm8191_vm5, %v22289_v7  ;;  %v10338_v7 = vshrl.u32 %v10337_v43, 7 }
 0xa31   : > { %v10339_v20 = vsub.s32 0, %v10338_v7 }
 0xa33   : > { %v22683_v37 = vrot.slane %v8154_v25, %v10339_v20 }
 0xaca   : > { %v17652_v24 = vpop.f32.mrb[32].mxu0 }
 0xacb   : > { %v18188_v27 = vadd.f32 %v17652_v24, %v22674_v10  ;;  %v10107_v45 = vpop.f32.mrb[33].mxu0 }
 0xacc   : > { %v18190_v42 = vadd.f32 %v22674_v10, %v10107_v45  ;;  %v17653_v1 = vpop.f32.mrb[34].mxu0 }
 0xacd   : > { %v18189_v9 = vadd.f32 %v18188_v27, %v22679_v41  ;;  %v18192_v63 = vadd.f32 %v17653_v1, %v22674_v10  ;;  %v10110_v18 = vpop.f32.mrb[35].mxu0 }
 0xace   : > { %v18191_v53 = vadd.f32 %v18190_v42, %v22679_v41  ;;  %v18194_v62 = vadd.f32 %v22674_v10, %v10110_v18 }
 0xacf   : > { %v22690_v6 = vadd.f32 %v18189_v9, %v22683_v37  ;;  %v18193_v58 = vadd.f32 %v18192_v63, %v22679_v41 }
 0xad0   : > { %v22694_v61 = vadd.f32 %v18191_v53, %v22683_v37  ;;  %v18195_v44 = vadd.f32 %v18194_v62, %v22679_v41 }
 0xad1   : > { %v22698_v2 = vadd.f32 %v18193_v58, %v22683_v37 }
 0xad2   : > { %v22701_v35 = vadd.f32 %v18195_v44, %v22683_v37  ;;  %v17656_v26 = vpop.f32.mrb[36].mxu0 }
 0xad3   : > { %v18196_v52 = vadd.f32 %v17656_v26, %v22674_v10  ;;  %v10123_v22 = vpop.f32.mrb[37].mxu0  ;;  %v10375_v56 = vpack.c.bf16 %v22698_v2, %v22690_v6 }
 0xad4   : > { %v10374_v4 = vpack.c.bf16 %v22701_v35, %v22694_v61  ;;  %v18198_v16 = vadd.f32 %v22674_v10, %v10123_v22  ;;  %v17657_v49 = vpop.f32.mrb[38].mxu0 }
 0xad5   : > { %v18197_v57 = vadd.f32 %v18196_v52, %v22679_v41  ;;  %v18200_v55 = vadd.f32 %v17657_v49, %v22674_v10  ;;  %v10126_v30 = vpop.f32.mrb[39].mxu0 }
 0xad6   : > { %v18199_v29 = vadd.f32 %v18198_v16, %v22679_v41  ;;  %v18202_v36 = vadd.f32 %v22674_v10, %v10126_v30  ;;  %17686 = vmatprep.mubr.msk.bf16.mxu1 %vm8047_vm8, %v10374_v4 }
 0xad7   : > { %v22718_v13 = vadd.f32 %v18197_v57, %v22683_v37  ;;  %v18201_v60 = vadd.f32 %v18200_v55, %v22679_v41  ;;  %17687 = vmatmul.mubr.msk.bf16.vlgmr.msra.gmra.mrb[72].mxu1 %vm8047_vm8, %v10375_v56 }
 0xad8   : > { %v22723_v39 = vadd.f32 %v18199_v29, %v22683_v37  ;;  %v18203_v19 = vadd.f32 %v18202_v36, %v22679_v41  ;;  %17719 = vmatpush3.bf16.msra.mxu1 %v19615_v48 }
 0xad9   : > { %v22730_v3 = vadd.f32 %v18201_v60, %v22683_v37  ;;  %17720 = vmatprep.subr.bf16.mxu1 %v20162_v5 }
 0xada   : > { %v22734_v8 = vadd.f32 %v18203_v19, %v22683_v37  ;;  %v17660_v14 = vpop.f32.mrb[40].mxu0 }
 0xadb   : > { %v18204_v28 = vadd.f32 %v17660_v14, %v22674_v10  ;;  %v10139_v34 = vpop.f32.mrb[41].mxu0  ;;  %v10377_v50 = vpack.c.bf16 %v22730_v3, %v22718_v13 }
 0xadc   : > { %v10376_v0 = vpack.c.bf16 %v22734_v8, %v22723_v39  ;;  %v18206_v32 = vadd.f32 %v22674_v10, %v10139_v34  ;;  %v17661_v38 = vpop.f32.mrb[42].mxu0  ;;  %17721 = vmatpush3.bf16.msra.mxu1 %v19616_v40 }
 0xadd   : > { %v18205_v54 = vadd.f32 %v18204_v28, %v22679_v41  ;;  %v18208_v12 = vadd.f32 %v17661_v38, %v22674_v10  ;;  %v10142_v11 = vpop.f32.mrb[43].mxu0 }
 0xade   : > { %v18207_v46 = vadd.f32 %v18206_v32, %v22679_v41  ;;  %v18210_v51 = vadd.f32 %v22674_v10, %v10142_v11  ;;  %17690 = vmatprep.mubr.msk.bf16.mxu1 %vm8047_vm8, %v10376_v0 }
 0xadf   : > { %v22748_v15 = vadd.f32 %v18205_v54, %v22683_v37  ;;  %v18209_v47 = vadd.f32 %v18208_v12, %v22679_v41  ;;  %17691 = vmatmul.mubr.msk.bf16.gmra.mrb[76].mxu1 %vm8047_vm8, %v10377_v50 }
 0xae0   : > { %v22753_v59 = vadd.f32 %v18207_v46, %v22683_v37  ;;  %v18211_v23 = vadd.f32 %v18210_v51, %v22679_v41 }
 0xae1   : > { %v22757_v21 = vadd.f32 %v18209_v47, %v22683_v37 }
 0xae2   : > { %v22760_v33 = vadd.f32 %v18211_v23, %v22683_v37  ;;  %v17664_v31 = vpop.f32.mrb[44].mxu0 }
 0xae3   : > { %v18212_v43 = vadd.f32 %v17664_v31, %v22674_v10  ;;  %v10155_v7 = vpop.f32.mrb[45].mxu0  ;;  %v10379_v24 = vpack.c.bf16 %v22757_v21, %v22748_v15 }
 0xae4   : > { %v10378_v17 = vpack.c.bf16 %v22760_v33, %v22753_v59  ;;  %v18214_v25 = vadd.f32 %v22674_v10, %v10155_v7  ;;  %v17665_v20 = vpop.f32.mrb[46].mxu0 }
 0xae5   : > { %v18213_v27 = vadd.f32 %v18212_v43, %v22679_v41  ;;  %v18216_v45 = vadd.f32 %v17665_v20, %v22674_v10  ;;  %v10158_v42 = vpop.f32.mrb[47].mxu0 }
 0xae6   : > { %v18215_v1 = vadd.f32 %v18214_v25, %v22679_v41  ;;  %v18218_v9 = vadd.f32 %v22674_v10, %v10158_v42  ;;  %17694 = vmatprep.mubr.msk.bf16.mxu1 %vm8047_vm8, %v10378_v17 }
 0xae7   : > { %v22774_v63 = vadd.f32 %v18213_v27, %v22683_v37  ;;  %v18217_v18 = vadd.f32 %v18216_v45, %v22679_v41  ;;  %17695 = vmatmul.mubr.msk.bf16.gmra.mrb[80].mxu1 %vm8047_vm8, %v10379_v24 }
 0xae8   : > { %v22779_v53 = vadd.f32 %v18215_v1, %v22683_v37  ;;  %v18219_v62 = vadd.f32 %v18218_v9, %v22679_v41 }
 0xae9   : > { %v22783_v58 = vadd.f32 %v18217_v18, %v22683_v37 }
 0xaea   : > { %v22786_v44 = vadd.f32 %v18219_v62, %v22683_v37  ;;  %v17668_v26 = vpop.f32.mrb[48].mxu0 }
 0xaeb   : > { %24118 = vst [vmem:[#allocation3_spill] sm:$0xff] %v22783_v58  ;;  %v18220_v52 = vadd.f32 %v17668_v26, %v22674_v10  ;;  %v10171_v22 = vpop.f32.mrb[49].mxu0  ;;  %v10381_v48 = vpack.c.bf16 %v22783_v58, %v22774_v63 }
 0xaec   : > { %24119 = vst [vmem:[#allocation4_spill] sm:$0xff] %v22786_v44  ;;  %v10380_v4 = vpack.c.bf16 %v22786_v44, %v22779_v53  ;;  %v18222_v16 = vadd.f32 %v22674_v10, %v10171_v22  ;;  %v17669_v49 = vpop.f32.mrb[50].mxu0 }
 0xaed   : > { %v18221_v56 = vadd.f32 %v18220_v52, %v22679_v41  ;;  %v18224_v57 = vadd.f32 %v17669_v49, %v22674_v10  ;;  %v10174_v55 = vpop.f32.mrb[51].mxu0 }
 0xaee   : > { %v18223_v30 = vadd.f32 %v18222_v16, %v22679_v41  ;;  %v18226_v29 = vadd.f32 %v22674_v10, %v10174_v55  ;;  %17698 = vmatprep.mubr.msk.bf16.mxu1 %vm8047_vm8, %v10380_v4 }
 0xaef   : > { %v22800_v36 = vadd.f32 %v18221_v56, %v22683_v37  ;;  %v18225_v60 = vadd.f32 %v18224_v57, %v22679_v41  ;;  %17699 = vmatmul.mubr.msk.bf16.gmra.mrb[84].mxu1 %vm8047_vm8, %v10381_v48 }
 0xaf0   : > { %v22805_v19 = vadd.f32 %v18223_v30, %v22683_v37  ;;  %v18227_v40 = vadd.f32 %v18226_v29, %v22679_v41 }
 0xaf1   : > { %24120 = vst [vmem:[#allocation5_spill] sm:$0xff] %v22800_v36  ;;  %v22809_v14 = vadd.f32 %v18225_v60, %v22683_v37 }
 0xaf2   : > { %24121 = vst [vmem:[#allocation6_spill] sm:$0xff] %v22805_v19  ;;  %v22812_v28 = vadd.f32 %v18227_v40, %v22683_v37  ;;  %v17672_v34 = vpop.f32.mrb[52].mxu0 }
 0xaf3   : > { %24122 = vst [vmem:[#allocation7_spill] sm:$0xff] %v22809_v14  ;;  %v18228_v0 = vadd.f32 %v17672_v34, %v22674_v10  ;;  %v10187_v32 = vpop.f32.mrb[53].mxu0  ;;  %v10383_v12 = vpack.c.bf16 %v22809_v14, %v22800_v36 }
 0xaf4   : > { %24123 = vst [vmem:[#allocation8_spill] sm:$0xff] %v22812_v28  ;;  %v10382_v38 = vpack.c.bf16 %v22812_v28, %v22805_v19  ;;  %v18230_v50 = vadd.f32 %v22674_v10, %v10187_v32  ;;  %v17673_v54 = vpop.f32.mrb[54].mxu0 }
 0xaf5   : > { %v18229_v11 = vadd.f32 %v18228_v0, %v22679_v41  ;;  %v18232_v46 = vadd.f32 %v17673_v54, %v22674_v10  ;;  %v10190_v51 = vpop.f32.mrb[55].mxu0 }
 0xaf6   : > { %v18231_v47 = vadd.f32 %v18230_v50, %v22679_v41  ;;  %v18234_v23 = vadd.f32 %v22674_v10, %v10190_v51  ;;  %17702 = vmatprep.mubr.msk.bf16.mxu1 %vm8047_vm8, %v10382_v38 }
 0xaf7   : > { %v22826_v31 = vadd.f32 %v18229_v11, %v22683_v37  ;;  %v18233_v43 = vadd.f32 %v18232_v46, %v22679_v41  ;;  %17703 = vmatmul.mubr.msk.bf16.gmra.mrb[88].mxu1 %vm8047_vm8, %v10383_v12 }
 0xaf8   : > { %v22831_v7 = vadd.f32 %v18231_v47, %v22683_v37  ;;  %v18235_v17 = vadd.f32 %v18234_v23, %v22679_v41 }
 0xaf9   : > { %24124 = vst [vmem:[#allocation9_spill] sm:$0xff] %v22826_v31  ;;  %v22835_v25 = vadd.f32 %v18233_v43, %v22683_v37 }
 0xafa   : > { %24125 = vst [vmem:[#allocation10_spill] sm:$0xff] %v22831_v7  ;;  %v22838_v20 = vadd.f32 %v18235_v17, %v22683_v37  ;;  %v17676_v24 = vpop.f32.mrb[56].mxu0 }
 0xafb   : > { %24126 = vst [vmem:[#allocation11_spill] sm:$0xff] %v22835_v25  ;;  %v18236_v27 = vadd.f32 %v17676_v24, %v22674_v10  ;;  %v10203_v45 = vpop.f32.mrb[57].mxu0  ;;  %v10385_v18 = vpack.c.bf16 %v22835_v25, %v22826_v31 }
 0xafc   : > { %24127 = vst [vmem:[#allocation12_spill] sm:$0xff] %v22838_v20  ;;  %v10384_v42 = vpack.c.bf16 %v22838_v20, %v22831_v7  ;;  %v18238_v1 = vadd.f32 %v22674_v10, %v10203_v45  ;;  %v17677_v9 = vpop.f32.mrb[58].mxu0 }
 0xafd   : > { %v18237_v62 = vadd.f32 %v18236_v27, %v22679_v41  ;;  %v18240_v26 = vadd.f32 %v17677_v9, %v22674_v10  ;;  %v10206_v52 = vpop.f32.mrb[59].mxu0  ;;  %v22908_v27 = vld [vmem:[%s24072_s17] ss:$0 sm:$0xff] }
 0xafe   : > { %v18239_v22 = vadd.f32 %v18238_v1, %v22679_v41  ;;  %v18242_v4 = vadd.f32 %v22674_v10, %v10206_v52  ;;  %17706 = vmatprep.mubr.msk.bf16.mxu1 %vm8047_vm8, %v10384_v42 }
 0xaff   : > { %v22852_v16 = vadd.f32 %v18237_v62, %v22683_v37  ;;  %v18241_v49 = vadd.f32 %v18240_v26, %v22679_v41  ;;  %17707 = vmatmul.mubr.msk.bf16.gmra.mrb[92].mxu1 %vm8047_vm8, %v10385_v18 }
 0xb00   : > { %v22857_v48 = vadd.f32 %v18239_v22, %v22683_v37  ;;  %v18243_v56 = vadd.f32 %v18242_v4, %v22679_v41 }
 0xb01   : > { %24128 = vst [vmem:[#allocation13_spill] sm:$0xff] %v22852_v16  ;;  %v22861_v57 = vadd.f32 %v18241_v49, %v22683_v37 }
 0xb02   : > { %24129 = vst [vmem:[#allocation14_spill] sm:$0xff] %v22857_v48  ;;  %v22864_v55 = vadd.f32 %v18243_v56, %v22683_v37  ;;  %v17680_v30 = vpop.f32.mrb[60].mxu0 }
 0xb03   : > { %24130 = vst [vmem:[#allocation15_spill] sm:$0xff] %v22861_v57  ;;  %v18244_v29 = vadd.f32 %v17680_v30, %v22674_v10  ;;  %v10219_v60 = vpop.f32.mrb[61].mxu0  ;;  %v10387_v32 = vpack.c.bf16 %v22861_v57, %v22852_v16 }
 0xb04   : > { %24131 = vst [vmem:[#allocation16_spill] sm:$0xff] %v22864_v55  ;;  %v10386_v40 = vpack.c.bf16 %v22864_v55, %v22857_v48  ;;  %v18246_v34 = vadd.f32 %v22674_v10, %v10219_v60  ;;  %v17681_v0 = vpop.f32.mrb[62].mxu0 }
 0xb05   : > { %v18245_v38 = vadd.f32 %v18244_v29, %v22679_v41  ;;  %v18248_v50 = vadd.f32 %v17681_v0, %v22674_v10  ;;  %v10222_v54 = vpop.f32.mrb[63].mxu0 }
 0xb06   : > { %v18247_v12 = vadd.f32 %v18246_v34, %v22679_v41  ;;  %v18250_v11 = vadd.f32 %v22674_v10, %v10222_v54  ;;  %17710 = vmatprep.mubr.msk.bf16.mxu1 %vm8047_vm8, %v10386_v40 }
 0xb07   : > { %v22878_v46 = vadd.f32 %v18245_v38, %v22683_v37  ;;  %v18249_v51 = vadd.f32 %v18248_v50, %v22679_v41  ;;  %17711 = vmatmul.mubr.msk.bf16.gmra.mrb[96].mxu1 %vm8047_vm8, %v10387_v32 }
 0xb08   : > { %v22883_v47 = vadd.f32 %v18247_v12, %v22683_v37  ;;  %v18251_v23 = vadd.f32 %v18250_v11, %v22679_v41  ;;  %v10373_v41 = vld [vmem:[%s780_s28] sm:$0xff] }
 0xb09   : > { %24132 = vst [vmem:[#allocation17_spill] sm:$0xff] %v22878_v46  ;;  %v22887_v43 = vadd.f32 %v18249_v51, %v22683_v37 }
 0xb0a   : > { %24133 = vst [vmem:[#allocation18_spill] sm:$0xff] %v22883_v47  ;;  %v22890_v17 = vadd.f32 %v18251_v23, %v22683_v37  ;;  %v10622_v37 = vpack.c.bf16 %v10373_v41, %v10373_v41 }
 0xb0b   : > { %24134 = vst [vmem:[#allocation19_spill] sm:$0xff] %v22887_v43  ;;  %v10389_v24 = vpack.c.bf16 %v22887_v43, %v22878_v46 }
 0xb0c   : > { %24135 = vst [vmem:[#allocation20_spill] sm:$0xff] %v22890_v17  ;;  %v10388_v10 = vpack.c.bf16 %v22890_v17, %v22883_v47 }
 0xb0e   : > { %17714 = vmatprep.mubr.msk.bf16.mxu1 %vm8047_vm8, %v10388_v10 }
 0xb0f   : > { %17715 = vmatmul.mubr.msk.bf16.gmra.mrb[100].mxu1 %vm8047_vm8, %v10389_v24 }
 0xb10   : > { %17722 = vmatprep.mubr.msk.bf16.mxu1 %vm20163_vm7, %v20162_v5 }
 0xb17   : > { %17723 = vmatmul.mubr.msk.bf16.vlgmr.msra.gmra.mrb[104].mxu1 %vm8047_vm8, %v10622_v37 }
 0xbaa   : > { %v17688_v45 = vpop.f32.mrb[72].mxu1 }
 0xbab   : > { %v22911_v42 = vadd.f32 %v17688_v45, %v22908_v27  ;;  %v10495_v1 = vpop.f32.mrb[73].mxu1 }
 0xbac   : > { %v17689_v9 = vpop.f32.mrb[74].mxu1  ;;  %v10496_v5 = vadd.f32 %v22908_v27, %v10495_v1 }
 0xbad   : > { %v22914_v18 = vadd.f32 %v17689_v9, %v22908_v27  ;;  %v10498_v62 = vpop.f32.mrb[75].mxu1 }
 0xbae   : > { %v10499_v26 = vadd.f32 %v22908_v27, %v10498_v62 }
 0xbb0   : > { %v10689_v22 = vpack.c.bf16 %v10499_v26, %v10496_v5 }
 0xbb2   : > { %v17692_v4 = vpop.f32.mrb[76].mxu1  ;;  %17728 = vmatprep.mubr.msk.bf16.mxu1 %vm8047_vm8, %v10689_v22 }
 0xbb3   : > { %v22922_v49 = vadd.f32 %v17692_v4, %v22908_v27  ;;  %v10511_v56 = vpop.f32.mrb[77].mxu1 }
 0xbb4   : > { %v22925_v30 = vadd.f32 %v22908_v27, %v10511_v56  ;;  %v17693_v29 = vpop.f32.mrb[78].mxu1 }
 0xbb5   : > { %v22928_v60 = vadd.f32 %v17693_v29, %v22908_v27  ;;  %v10514_v40 = vpop.f32.mrb[79].mxu1 }
 0xbb6   : > { %v22931_v34 = vadd.f32 %v22908_v27, %v10514_v40 }
 0xbba   : > { %v17696_v38 = vpop.f32.mrb[80].mxu1 }
 0xbbb   : > { %v22938_v50 = vadd.f32 %v17696_v38, %v22908_v27  ;;  %v10527_v54 = vpop.f32.mrb[81].mxu1 }
 0xbbc   : > { %v22941_v12 = vadd.f32 %v22908_v27, %v10527_v54  ;;  %v17697_v11 = vpop.f32.mrb[82].mxu1 }
 0xbbd   : > { %v22944_v51 = vadd.f32 %v17697_v11, %v22908_v27  ;;  %v10530_v23 = vpop.f32.mrb[83].mxu1 }
 0xbbe   : > { %v22947_v10 = vadd.f32 %v22908_v27, %v10530_v23 }
 0xbc2   : > { %v17700_v37 = vpop.f32.mrb[84].mxu1 }
 0xbc3   : > { %v22954_v45 = vadd.f32 %v17700_v37, %v22908_v27  ;;  %v10543_v1 = vpop.f32.mrb[85].mxu1 }
 0xbc4   : > { %v22957_v9 = vadd.f32 %v22908_v27, %v10543_v1  ;;  %v17701_v62 = vpop.f32.mrb[86].mxu1 }
 0xbc5   : > { %v10555_v5 = vadd.f32 %v17701_v62, %v22908_v27  ;;  %v10546_v26 = vpop.f32.mrb[87].mxu1 }
 0xbc6   : > { %v10547_v22 = vadd.f32 %v22908_v27, %v10546_v26 }
 0xbc7   : > { %v10696_v4 = vpack.c.bf16 %v10555_v5, %v22954_v45 }
 0xbc8   : > { %v10695_v56 = vpack.c.bf16 %v10547_v22, %v22957_v9 }
 0xbca   : > { %v17704_v29 = vpop.f32.mrb[88].mxu1 }
 0xbcb   : > { %v10568_v40 = vadd.f32 %v17704_v29, %v22908_v27  ;;  %v10559_v38 = vpop.f32.mrb[89].mxu1 }
 0xbcc   : > { %v10560_v54 = vadd.f32 %v22908_v27, %v10559_v38  ;;  %v17705_v11 = vpop.f32.mrb[90].mxu1 }
 0xbcd   : > { %v10571_v23 = vadd.f32 %v17705_v11, %v22908_v27  ;;  %v10562_v37 = vpop.f32.mrb[91].mxu1 }
 0xbce   : > { %v10563_v1 = vadd.f32 %v22908_v27, %v10562_v37 }
 0xbcf   : > { %v10698_v62 = vpack.c.bf16 %v10571_v23, %v10568_v40 }
 0xbd0   : > { %v10697_v24 = vpack.c.bf16 %v10563_v1, %v10560_v54 }
 0xbd2   : > { %v17708_v41 = vpop.f32.mrb[92].mxu1 }
 0xbd3   : > { %v10584_v26 = vadd.f32 %v17708_v41, %v22908_v27  ;;  %v10575_v45 = vpop.f32.mrb[93].mxu1 }
 0xbd4   : > { %v10576_v9 = vadd.f32 %v22908_v27, %v10575_v45  ;;  %v17709_v5 = vpop.f32.mrb[94].mxu1 }
 0xbd5   : > { %v10587_v22 = vadd.f32 %v17709_v5, %v22908_v27  ;;  %v10578_v29 = vpop.f32.mrb[95].mxu1 }
 0xbd6   : > { %v10579_v38 = vadd.f32 %v22908_v27, %v10578_v29 }
 0xbd7   : > { %v10700_v0 = vpack.c.bf16 %v10587_v22, %v10584_v26 }
 0xbd8   : > { %v10699_v32 = vpack.c.bf16 %v10579_v38, %v10576_v9 }
 0xbda   : > { %v17712_v11 = vpop.f32.mrb[96].mxu1 }
 0xbdb   : > { %v10600_v52 = vadd.f32 %v17712_v11, %v22908_v27  ;;  %v10591_v37 = vpop.f32.mrb[97].mxu1 }
 0xbdc   : > { %v10592_v40 = vadd.f32 %v22908_v27, %v10591_v37  ;;  %v17713_v54 = vpop.f32.mrb[98].mxu1 }
 0xbdd   : > { %v10603_v41 = vadd.f32 %v17713_v54, %v22908_v27  ;;  %v10594_v23 = vpop.f32.mrb[99].mxu1  ;;  %v15194_v54 = vld [vmem:[%s24074_s19] ss:$0 sm:$0xff] }
 0xbde   : > { %v10595_v1 = vadd.f32 %v22908_v27, %v10594_v23 }
 0xbdf   : > { %v10702_v45 = vpack.c.bf16 %v10603_v41, %v10600_v52 }
 0xbe0   : > { %v10701_v17 = vpack.c.bf16 %v10595_v1, %v10592_v40 }
 0xbe2   : > { %v17716_v5 = vpop.f32.mrb[100].mxu1 }
 0xbe3   : > { %v10616_v43 = vadd.f32 %v17716_v5, %v22908_v27  ;;  %v10607_v29 = vpop.f32.mrb[101].mxu1 }
 0xbe4   : > { %v10608_v26 = vadd.f32 %v22908_v27, %v10607_v29  ;;  %v17717_v9 = vpop.f32.mrb[102].mxu1 }
 0xbe5   : > { %v10619_v22 = vadd.f32 %v17717_v9, %v22908_v27  ;;  %v10610_v38 = vpop.f32.mrb[103].mxu1  ;;  %v24140_v9 = vpack.c.bf16 %v22947_v10, %v22941_v12 }
 0xbe6   : > { %v10611_v11 = vadd.f32 %v22908_v27, %v10610_v38  ;;  %v24138_v27 = vpack.c.bf16 %v22931_v34, %v22925_v30 }
 0xbe7   : > { %v10704_v37 = vpack.c.bf16 %v10619_v22, %v10616_v43  ;;  %v24137_v43 = vpack.c.bf16 %v22914_v18, %v22911_v42  ;;  %v24141_v42 = vpack.c.bf16 %v22944_v51, %v22938_v50 }
 0xbe8   : > { %v10703_v47 = vpack.c.bf16 %v10611_v11, %v10608_v26  ;;  %v24139_v26 = vpack.c.bf16 %v22928_v60, %v22922_v49 }
 0xbea   : > { %v10683_v52 = vpop.f32.mrb[104].mxu1 }
 0xbeb   : > { %v10684_v40 = vadd.f32 %v15194_v54, %v10683_v52  ;;  %v17724_v41 = vpop.f32.mrb[105].mxu1 }
 0xbec   : > { %v10686_v23 = vpop.f32.mrb[106].mxu1 }
 0xbed   : > { %v22982_v1 = vpack.c.bf16 %v10684_v40, %v10684_v40  ;;  %v17725_v5 = vpop.f32.mrb[107].mxu1 }
 0xbef   : > { %19541 = vmatprep.subr.msk.bf16.mxu1 %vm8047_vm8, %v22982_v1  ;;  %v10755_v29 = vsel %vm8047_vm8, %v22982_v1, 0 }
 0xbf0   : > { %17727 = vmatpush3.bf16.xpose.msra.mxu1 %v10755_v29 }
 0xbf7   : > { %17729 = vmatmul.mubr.msk.bf16.vlgmr.msra.gmra.mrb[108].mxu1 %vm8047_vm8, %v24137_v43 }
 0xbf8   : > { %17732 = vmatprep.mubr.msk.bf16.mxu1 %vm8047_vm8, %v24138_v27 }
 0xbff   : > { %17733 = vmatmul.mubr.msk.bf16.gmra.mrb[112].mxu1 %vm8047_vm8, %v24139_v26 }
 0xc00   : > { %17736 = vmatprep.mubr.msk.bf16.mxu1 %vm8047_vm8, %v24140_v9 }
 0xc07   : > { %17737 = vmatmul.mubr.msk.bf16.gmra.mrb[116].mxu1 %vm8047_vm8, %v24141_v42 }
 0xc08   : > { %17740 = vmatprep.mubr.msk.bf16.mxu1 %vm8047_vm8, %v10695_v56 }
 0xc0f   : > { %17741 = vmatmul.mubr.msk.bf16.gmra.mrb[120].mxu1 %vm8047_vm8, %v10696_v4 }
 0xc10   : > { %17744 = vmatprep.mubr.msk.bf16.mxu1 %vm8047_vm8, %v10697_v24 }
 0xc17   : > { %17745 = vmatmul.mubr.msk.bf16.gmra.mrb[124].mxu1 %vm8047_vm8, %v10698_v62 }
 0xc18   : > { %17748 = vmatprep.mubr.msk.bf16.mxu1 %vm8047_vm8, %v10699_v32 }
 0xc1f   : > { %17749 = vmatmul.mubr.msk.bf16.gmra.mrb[128].mxu1 %vm8047_vm8, %v10700_v0 }
 0xc20   : > { %17752 = vmatprep.mubr.msk.bf16.mxu1 %vm8047_vm8, %v10701_v17 }
 0xc27   : > { %17753 = vmatmul.mubr.msk.bf16.gmra.mrb[132].mxu1 %vm8047_vm8, %v10702_v45 }
 0xc28   : > { %17756 = vmatprep.mubr.msk.bf16.mxu1 %vm8047_vm8, %v10703_v47 }
 0xc2f   : > { %17757 = vmatmul.mubr.msk.bf16.gmra.mrb[136].mxu1 %vm8047_vm8, %v10704_v37 }
 0xcca   : > { %v23018_v18 = vpop.f32.mrb[108].mxu1 }
 0xccb   : > { %v23020_v49 = vpop.f32.mrb[109].mxu1  ;;  %v10925_v30 = vsel %vm10918_vm9, %v23018_v18, -inf }
 0xccc   : > { %10926 = vmax.xlane.f32.xlu1 %v10925_v30  ;;  %v23024_v60 = vpop.f32.mrb[110].mxu1  ;;  %v10919_v17 = vsel %vm10918_vm9, %v23020_v49, -inf }
 0xccd   : > { %10920 = vmax.xlane.f32.xlu0 %v10919_v17  ;;  %v23028_v34 = vpop.f32.mrb[111].mxu1  ;;  %v10928_v47 = vsel %vm10918_vm9, %v23024_v60, -inf }
 0xcce   : > { %v10922_v0 = vsel %vm10918_vm9, %v23028_v34, -inf }
 0xcd0   : > { %10929 = vmax.xlane.f32.xlu1 %v10928_v47 }
 0xcd1   : > { %10923 = vmax.xlane.f32.xlu0 %v10922_v0 }
 0xcd2   : > { %v23034_v32 = vpop.f32.mrb[112].mxu1 }
 0xcd3   : > { %v23036_v50 = vpop.f32.mrb[113].mxu1  ;;  %v10937_v12 = vsel %vm10918_vm9, %v23034_v32, -inf }
 0xcd4   : > { %v23040_v51 = vpop.f32.mrb[114].mxu1  ;;  %v10931_v4 = vsel %vm10918_vm9, %v23036_v50, -inf }
 0xcd5   : > { %10938 = vmax.xlane.f32.xlu0 %v10937_v12  ;;  %v23042_v10 = vpop.f32.mrb[115].mxu1  ;;  %v10940_v62 = vsel %vm10918_vm9, %v23040_v51, -inf }
 0xcd6   : > { %v10934_v24 = vsel %vm10918_vm9, %v23042_v10, -inf }
 0xcd7   : > { %10935 = vmax.xlane.f32.xlu1 %v10934_v24 }
 0xcd9   : > { %10932 = vmax.xlane.f32.xlu0 %v10931_v4 }
 0xcda   : > { %v23048_v56 = vpop.f32.mrb[116].mxu1 }
 0xcdb   : > { %10941 = vmax.xlane.f32.xlu1 %v10940_v62  ;;  %v23052_v45 = vpop.f32.mrb[117].mxu1  ;;  %v10949_v22 = vsel %vm10918_vm9, %v23048_v56, -inf }
 0xcdc   : > { %v23056_v38 = vpop.f32.mrb[118].mxu1  ;;  %v10943_v54 = vsel %vm10918_vm9, %v23052_v45, -inf }
 0xcdd   : > { %10950 = vmax.xlane.f32.xlu0 %v10949_v22  ;;  %v23058_v11 = vpop.f32.mrb[119].mxu1  ;;  %v10952_v40 = vsel %vm10918_vm9, %v23056_v38, -inf }
 0xcde   : > { %v10946_v37 = vsel %vm10918_vm9, %v23058_v11, -inf }
 0xcdf   : > { %10947 = vmax.xlane.f32.xlu1 %v10946_v37 }
 0xce1   : > { %10944 = vmax.xlane.f32.xlu0 %v10943_v54 }
 0xce2   : > { %v23064_v52 = vpop.f32.mrb[120].mxu1 }
 0xce3   : > { %10953 = vmax.xlane.f32.xlu1 %v10952_v40  ;;  %v23068_v41 = vpop.f32.mrb[121].mxu1  ;;  %v10961_v23 = vsel %vm10918_vm9, %v23064_v52, -inf }
 0xce4   : > { %v23072_v5 = vpop.f32.mrb[122].mxu1  ;;  %v10955_v27 = vsel %vm10918_vm9, %v23068_v41, -inf }
 0xce5   : > { %10962 = vmax.xlane.f32.xlu0 %v10961_v23  ;;  %v23074_v29 = vpop.f32.mrb[123].mxu1  ;;  %v10964_v9 = vsel %vm10918_vm9, %v23072_v5, -inf }
 0xce6   : > { %v10958_v43 = vsel %vm10918_vm9, %v23074_v29, -inf }
 0xce7   : > { %10959 = vmax.xlane.f32.xlu1 %v10958_v43 }
 0xce9   : > { %10956 = vmax.xlane.f32.xlu0 %v10955_v27 }
 0xcea   : > { %v23080_v26 = vpop.f32.mrb[124].mxu1 }
 0xceb   : > { %10965 = vmax.xlane.f32.xlu1 %v10964_v9  ;;  %v23084_v42 = vpop.f32.mrb[125].mxu1  ;;  %v10973_v30 = vsel %vm10918_vm9, %v23080_v26, -inf }
 0xcec   : > { %v23088_v17 = vpop.f32.mrb[126].mxu1  ;;  %v10967_v12 = vsel %vm10918_vm9, %v23084_v42, -inf }
 0xced   : > { %10974 = vmax.xlane.f32.xlu0 %v10973_v30  ;;  %v23090_v47 = vpop.f32.mrb[127].mxu1  ;;  %v10976_v4 = vsel %vm10918_vm9, %v23088_v17, -inf }
 0xcee   : > { %v10970_v0 = vsel %vm10918_vm9, %v23090_v47, -inf }
 0xcef   : > { %10971 = vmax.xlane.f32.xlu1 %v10970_v0 }
 0xcf1   : > { %10968 = vmax.xlane.f32.xlu0 %v10967_v12 }
 0xcf2   : > { %v23096_v24 = vpop.f32.mrb[128].mxu1 }
 0xcf3   : > { %10977 = vmax.xlane.f32.xlu1 %v10976_v4  ;;  %v23100_v62 = vpop.f32.mrb[129].mxu1  ;;  %v10985_v22 = vsel %vm10918_vm9, %v23096_v24, -inf }
 0xcf4   : > { %v23104_v37 = vpop.f32.mrb[130].mxu1  ;;  %v10979_v23 = vsel %vm10918_vm9, %v23100_v62, -inf }
 0xcf5   : > { %10986 = vmax.xlane.f32.xlu0 %v10985_v22  ;;  %v23106_v54 = vpop.f32.mrb[131].mxu1  ;;  %v10988_v27 = vsel %vm10918_vm9, %v23104_v37, -inf }
 0xcf6   : > { %v10982_v40 = vsel %vm10918_vm9, %v23106_v54, -inf }
 0xcf7   : > { %10983 = vmax.xlane.f32.xlu1 %v10982_v40 }
 0xcf9   : > { %10980 = vmax.xlane.f32.xlu0 %v10979_v23 }
 0xcfa   : > { %v23112_v43 = vpop.f32.mrb[132].mxu1 }
 0xcfb   : > { %10989 = vmax.xlane.f32.xlu1 %v10988_v27  ;;  %v23116_v9 = vpop.f32.mrb[133].mxu1  ;;  %v10997_v30 = vsel %vm10918_vm9, %v23112_v43, -inf }
 0xcfc   : > { %v23120_v0 = vpop.f32.mrb[134].mxu1  ;;  %v10991_v22 = vsel %vm10918_vm9, %v23116_v9, -inf }
 0xcfd   : > { %10998 = vmax.xlane.f32.xlu0 %v10997_v30  ;;  %v23122_v12 = vpop.f32.mrb[135].mxu1  ;;  %v11000_v23 = vsel %vm10918_vm9, %v23120_v0, -inf }
 0xcfe   : > { %v10994_v4 = vsel %vm10918_vm9, %v23122_v12, -inf }
 0xcff   : > { %10995 = vmax.xlane.f32.xlu1 %v10994_v4 }
 0xd01   : > { %10992 = vmax.xlane.f32.xlu0 %v10991_v22 }
 0xd02   : > { %v23128_v40 = vpop.f32.mrb[136].mxu1 }
 0xd03   : > { %11001 = vmax.xlane.f32.xlu1 %v11000_v23  ;;  %v23132_v27 = vpop.f32.mrb[137].mxu1  ;;  %v11009_v30 = vsel %vm10918_vm9, %v23128_v40, -inf }
 0xd04   : > { %v23136_v46 = vpop.f32.mrb[138].mxu1  ;;  %v11003_v22 = vsel %vm10918_vm9, %v23132_v27, -inf }
 0xd05   : > { %11010 = vmax.xlane.f32.xlu0 %v11009_v30  ;;  %v23138_v55 = vpop.f32.mrb[139].mxu1  ;;  %v11012_v23 = vsel %vm10918_vm9, %v23136_v46, -inf }
 0xd06   : > { %v11006_v4 = vsel %vm10918_vm9, %v23138_v55, -inf }
 0xd07   : > { %11007 = vmax.xlane.f32.xlu1 %v11006_v4 }
 0xd09   : > { %11004 = vmax.xlane.f32.xlu0 %v11003_v22 }
 0xd0b   : > { %11013 = vmax.xlane.f32.xlu1 %v11012_v23 }
 0xd59   : > { %v10927_v57 = vpop.xlane.xlu1 %10926 }
 0xd5a   : > { %v11017_v48 = vsub.f32 %v23018_v18, %v10927_v57  ;;  %v10921_v16 = vpop.xlane.xlu0 %10920 }
 0xd5b   : > { %v11015_v30 = vsub.f32 %v23020_v49, %v10921_v16 }
 0xd5c   : > { %v11051_v20 = vmul.f32 1.442695, %v11017_v48 }
 0xd5d   : > { %v11047_v25 = vmul.f32 1.442695, %v11015_v30  ;;  %v10930_v7 = vpop.xlane.xlu1 %10929 }
 0xd5e   : > { %19897 = vpow2.f32 %v11051_v20  ;;  %v11018_v4 = vsub.f32 %v23024_v60, %v10930_v7  ;;  %v10924_v31 = vpop.xlane.xlu0 %10923 }
 0xd5f   : > { %v11016_v28 = vsub.f32 %v23028_v34, %v10924_v31  ;;  %19899 = vpow2.f32 %v11047_v25 }
 0xd60   : > { %v11053_v22 = vmul.f32 1.442695, %v11018_v4 }
 0xd61   : > { %v11049_v14 = vmul.f32 1.442695, %v11016_v28 }
 0xd62   : > { %19901 = vpow2.f32 %v11053_v22  ;;  %v10939_v23 = vpop.xlane.xlu0 %10938 }
 0xd63   : > { %v11021_v19 = vsub.f32 %v23034_v32, %v10939_v23  ;;  %19903 = vpow2.f32 %v11049_v14 }
 0xd64   : > { %v10936_v57 = vpop.xlane.xlu1 %10935 }
 0xd65   : > { %v11059_v18 = vmul.f32 1.442695, %v11021_v19  ;;  %v11020_v16 = vsub.f32 %v23042_v10, %v10936_v57 }
 0xd66   : > { %v10933_v48 = vpop.xlane.xlu0 %10932 }
 0xd67   : > { %19905 = vpow2.f32 %v11059_v18  ;;  %v11019_v20 = vsub.f32 %v23036_v50, %v10933_v48  ;;  %v11057_v14 = vmul.f32 1.442695, %v11020_v16 }
 0xd68   : > { %v23153_v7 = vpop.eup %19897  ;;  %v10942_v49 = vpop.xlane.xlu1 %10941 }
 0xd69   : > { %v11055_v31 = vmul.f32 1.442695, %v11019_v20  ;;  %v11022_v25 = vsub.f32 %v23040_v51, %v10942_v49  ;;  %v11117_v28 = vsel %vm10918_vm9, %v23153_v7, 0.0  ;;  %v23158_v60 = vpop.eup %19899 }
 0xd6a   : > { %v10951_v34 = vpop.xlane.xlu0 %10950  ;;  %11118 = vadd.xlane.f32.xlu0 %v11117_v28  ;;  %v11111_v51 = vsel %vm10918_vm9, %v23158_v60, 0.0 }
 0xd6b   : > { %19907 = vpow2.f32 %v11055_v31  ;;  %v11061_v19 = vmul.f32 1.442695, %v11022_v25  ;;  %v11025_v32 = vsub.f32 %v23048_v56, %v10951_v34 }
 0xd6c   : > { %v23161_v10 = vpop.eup %19901  ;;  %v10948_v50 = vpop.xlane.xlu1 %10947 }
 0xd6d   : > { %19909 = vpow2.f32 %v11061_v19  ;;  %v11067_v30 = vmul.f32 1.442695, %v11025_v32  ;;  %v11120_v4 = vsel %vm10918_vm9, %v23161_v10, 0.0  ;;  %v23167_v22 = vpop.eup %19903  ;;  %v11024_v23 = vsub.f32 %v23058_v11, %v10948_v50 }
 0xd6e   : > { %19911 = vpow2.f32 %v11057_v14  ;;  %v10945_v57 = vpop.xlane.xlu0 %10944  ;;  %11112 = vadd.xlane.f32.xlu0 %v11111_v51  ;;  %11121 = vadd.xlane.f32.xlu1 %v11120_v4  ;;  %v11114_v49 = vsel %vm10918_vm9, %v23167_v22, 0.0 }
 0xd6f   : > { %19913 = vpow2.f32 %v11067_v30  ;;  %v11023_v56 = vsub.f32 %v23052_v45, %v10945_v57  ;;  %v11065_v31 = vmul.f32 1.442695, %v11024_v23 }
 0xd70   : > { %v10954_v18 = vpop.xlane.xlu1 %10953 }
 0xd71   : > { %v23171_v16 = vpop.eup %19905  ;;  %v11063_v48 = vmul.f32 1.442695, %v11023_v56  ;;  %v11026_v20 = vsub.f32 %v23056_v38, %v10954_v18 }
 0xd72   : > { %v10963_v25 = vpop.xlane.xlu0 %10962  ;;  %11115 = vadd.xlane.f32.xlu1 %v11114_v49  ;;  %v11129_v11 = vsel %vm10918_vm9, %v23171_v16, 0.0 }
 0xd73   : > { %19915 = vpow2.f32 %v11063_v48  ;;  %v11069_v28 = vmul.f32 1.442695, %v11026_v20  ;;  %v11029_v14 = vsub.f32 %v23064_v52, %v10963_v25  ;;  %11130 = vadd.xlane.f32.xlu0 %v11129_v11 }
 0xd74   : > { %v10960_v45 = vpop.xlane.xlu1 %10959 }
 0xd75   : > { %v23179_v34 = vpop.eup %19907  ;;  %19917 = vpow2.f32 %v11069_v28  ;;  %v11075_v19 = vmul.f32 1.442695, %v11029_v14  ;;  %v11028_v30 = vsub.f32 %v23074_v29, %v10960_v45 }
 0xd76   : > { %19919 = vpow2.f32 %v11065_v31  ;;  %v10957_v38 = vpop.xlane.xlu0 %10956  ;;  %v11123_v32 = vsel %vm10918_vm9, %v23179_v34, 0.0 }
 0xd77   : > { %v23183_v50 = vpop.eup %19909  ;;  %19921 = vpow2.f32 %v11075_v19  ;;  %v11027_v51 = vsub.f32 %v23068_v41, %v10957_v38  ;;  %11124 = vadd.xlane.f32.xlu0 %v11123_v32  ;;  %v11073_v29 = vmul.f32 1.442695, %v11028_v30 }
 0xd78   : > { %v23187_v52 = vpop.eup %19911  ;;  %v10966_v4 = vpop.xlane.xlu1 %10965  ;;  %v11132_v23 = vsel %vm10918_vm9, %v23183_v50, 0.0 }
 0xd79   : > { %v23191_v57 = vpop.eup %19913  ;;  %v11071_v56 = vmul.f32 1.442695, %v11027_v51  ;;  %v11030_v18 = vsub.f32 %v23072_v5, %v10966_v4  ;;  %11133 = vadd.xlane.f32.xlu1 %v11132_v23  ;;  %v11126_v25 = vsel %vm10918_vm9, %v23187_v52, 0.0 }
 0xd7a   : > { %v10975_v48 = vpop.xlane.xlu0 %10974  ;;  %v11141_v20 = vsel %vm10918_vm9, %v23191_v57, 0.0 }
 0xd7b   : > { %19923 = vpow2.f32 %v11071_v56  ;;  %v11077_v41 = vmul.f32 1.442695, %v11030_v18  ;;  %v11033_v49 = vsub.f32 %v23080_v26, %v10975_v48  ;;  %11142 = vadd.xlane.f32.xlu0 %v11141_v20 }
 0xd7c   : > { %v10972_v31 = vpop.xlane.xlu1 %10971 }
 0xd7d   : > { %v23199_v11 = vpop.eup %19915  ;;  %19925 = vpow2.f32 %v11077_v41  ;;  %11127 = vadd.xlane.f32.xlu1 %v11126_v25  ;;  %v11083_v45 = vmul.f32 1.442695, %v11033_v49  ;;  %v11032_v41 = vsub.f32 %v23090_v47, %v10972_v31 }
 0xd7e   : > { %v10969_v5 = vpop.xlane.xlu0 %10968  ;;  %v11135_v28 = vsel %vm10918_vm9, %v23199_v11, 0.0  ;;  %19927 = vpow2.f32 %v11073_v29 }
 0xd7f   : > { %v23203_v14 = vpop.eup %19917  ;;  %v11031_v19 = vsub.f32 %v23084_v42, %v10969_v5  ;;  %11136 = vadd.xlane.f32.xlu0 %v11135_v28  ;;  %19929 = vpow2.f32 %v11083_v45  ;;  %v11081_v28 = vmul.f32 1.442695, %v11032_v41 }
 0xd80   : > { %v23206_v26 = vpop.eup %19919  ;;  %v10978_v38 = vpop.xlane.xlu1 %10977  ;;  %v11144_v32 = vsel %vm10918_vm9, %v23203_v14, 0.0 }
 0xd81   : > { %v23210_v30 = vpop.eup %19921  ;;  %11145 = vadd.xlane.f32.xlu1 %v11144_v32  ;;  %v11079_v23 = vmul.f32 1.442695, %v11031_v19  ;;  %v11034_v56 = vsub.f32 %v23088_v17, %v10978_v38  ;;  %v11138_v42 = vsel %vm10918_vm9, %v23206_v26, 0.0 }
 0xd82   : > { %v23212_v51 = vpop.xlane.xlu0 %10986  ;;  %v11153_v4 = vsel %vm10918_vm9, %v23210_v30, 0.0 }
 0xd83   : > { %11154 = vadd.xlane.f32.xlu0 %v11153_v4  ;;  %19931 = vpow2.f32 %v11079_v23  ;;  %v11085_v49 = vmul.f32 1.442695, %v11034_v56 }
 0xd84   : > { %v10984_v48 = vpop.xlane.xlu1 %10983 }
 0xd85   : > { %v23219_v18 = vpop.eup %19923  ;;  %11139 = vadd.xlane.f32.xlu1 %v11138_v42  ;;  %19933 = vpow2.f32 %v11085_v49 }
 0xd86   : > { %v11147_v20 = vsel %vm10918_vm9, %v23219_v18, 0.0  ;;  %v10981_v25 = vpop.xlane.xlu0 %10980  ;;  %19935 = vpow2.f32 %v11081_v28 }
 0xd87   : > { %v23223_v29 = vpop.eup %19925  ;;  %11148 = vadd.xlane.f32.xlu0 %v11147_v20  ;;  %v11035_v45 = vsub.f32 %v23100_v62, %v10981_v25  ;;  %v11036_v62 = vsub.f32 %v23106_v54, %v10984_v48 }
 0xd88   : > { %v11156_v17 = vsel %vm10918_vm9, %v23223_v29, 0.0  ;;  %v23228_v5 = vpop.eup %19927  ;;  %v10990_v19 = vpop.xlane.xlu1 %10989 }
 0xd89   : > { %11157 = vadd.xlane.f32.xlu1 %v11156_v17  ;;  %v11150_v38 = vsel %vm10918_vm9, %v23228_v5, 0.0  ;;  %v23233_v32 = vpop.eup %19929  ;;  %v11087_v47 = vmul.f32 1.442695, %v11035_v45  ;;  %v11038_v31 = vsub.f32 %v23104_v37, %v10990_v19  ;;  %v11089_v25 = vmul.f32 1.442695, %v11036_v62 }
 0xd8a   : > { %v11165_v4 = vsel %vm10918_vm9, %v23233_v32, 0.0  ;;  %v10999_v56 = vpop.xlane.xlu0 %10998 }
 0xd8b   : > { %19937 = vpow2.f32 %v11087_v47  ;;  %v11093_v42 = vmul.f32 1.442695, %v11038_v31  ;;  %v11041_v37 = vsub.f32 %v23112_v43, %v10999_v56 }
 0xd8c   : > { %v10996_v49 = vpop.xlane.xlu1 %10995 }
 0xd8d   : > { %11151 = vadd.xlane.f32.xlu1 %v11150_v38  ;;  %v23238_v23 = vpop.eup %19931  ;;  %19939 = vpow2.f32 %v11093_v42  ;;  %v11099_v54 = vmul.f32 1.442695, %v11041_v37  ;;  %v11040_v42 = vsub.f32 %v23122_v12, %v10996_v49 }
 0xd8e   : > { %v11159_v20 = vsel %vm10918_vm9, %v23238_v23, 0.0  ;;  %v10993_v17 = vpop.xlane.xlu0 %10992  ;;  %19941 = vpow2.f32 %v11089_v25 }
 0xd8f   : > { %v23243_v41 = vpop.eup %19933  ;;  %v11039_v48 = vsub.f32 %v23116_v9, %v10993_v17  ;;  %19943 = vpow2.f32 %v11099_v54  ;;  %v11097_v17 = vmul.f32 1.442695, %v11040_v42 }
 0xd90   : > { %v11168_v28 = vsel %vm10918_vm9, %v23243_v41, 0.0  ;;  %v23248_v45 = vpop.eup %19935  ;;  %v11002_v19 = vpop.xlane.xlu1 %11001 }
 0xd91   : > { %11166 = vadd.xlane.f32.xlu1 %v11165_v4  ;;  %v11162_v38 = vsel %vm10918_vm9, %v23248_v45, 0.0  ;;  %v11095_v31 = vmul.f32 1.442695, %v11039_v48  ;;  %v11042_v4 = vsub.f32 %v23120_v0, %v11002_v19  ;;  %v11037_v0 = vsub.f32 %v23096_v24, %v23212_v51 }
 0xd92   : > { %v11011_v43 = vpop.xlane.xlu0 %11010 }
 0xd93   : > { %19945 = vpow2.f32 %v11095_v31  ;;  %v11091_v48 = vmul.f32 1.442695, %v11037_v0 }
 0xd94   : > { %v11008_v9 = vpop.xlane.xlu1 %11007 }
 0xd95   : > { %11160 = vadd.xlane.f32.xlu1 %v11159_v20  ;;  %v23253_v47 = vpop.eup %19937  ;;  %v11101_v20 = vmul.f32 1.442695, %v11042_v4  ;;  %v11045_v4 = vsub.f32 %v23128_v40, %v11011_v43 }
 0xd96   : > { %v11171_v56 = vsel %vm10918_vm9, %v23253_v47, 0.0  ;;  %v11005_v25 = vpop.xlane.xlu0 %11004 }
 0xd97   : > { %v23259_v62 = vpop.eup %19939  ;;  %19947 = vpow2.f32 %v11101_v20 }
 0xd98   : > { %v23264_v37 = vpop.eup %19941  ;;  %v11014_v54 = vpop.xlane.xlu1 %11013  ;;  %19949 = vpow2.f32 %v11097_v17 }
 0xd99   : > { %11169 = vadd.xlane.f32.xlu1 %v11168_v28  ;;  %v11043_v28 = vsub.f32 %v23132_v27, %v11005_v25  ;;  %v11174_v12 = vsel %vm10918_vm9, %v23264_v37, 0.0  ;;  %v23271_v49 = vpop.eup %19943  ;;  %v11046_v19 = vsub.f32 %v23136_v46, %v11014_v54  ;;  %19951 = vpow2.f32 %v11091_v48 }
 0xd9a   : > { %v11189_v24 = vsel %vm10918_vm9, %v23271_v49, 0.0 }
 0xd9b   : > { %v11103_v31 = vmul.f32 1.442695, %v11043_v28  ;;  %v11109_v27 = vmul.f32 1.442695, %v11046_v19 }
 0xd9d   : > { %11288 = vrot.lane.b32.xlu0 %v22982_v1, %s20164_s3  ;;  %11163 = vadd.xlane.f32.xlu1 %v11162_v38  ;;  %v11180_v1 = vsel %vm10918_vm9, %v23259_v62, 0.0  ;;  %v11044_v38 = vsub.f32 %v23138_v55, %v11008_v9  ;;  %v23277_v51 = vpop.eup %19945  ;;  %19953 = vpow2.f32 %v11103_v31  ;;  %v11107_v55 = vmul.f32 1.442695, %v11045_v4 }
 0xd9e   : > { %v11183_v42 = vsel %vm10918_vm9, %v23277_v51, 0.0  ;;  %19955 = vpow2.f32 %v11109_v27 }
 0xda1   : > { %11172 = vadd.xlane.f32.xlu1 %v11171_v56  ;;  %v11105_v56 = vmul.f32 1.442695, %v11044_v38  ;;  %v23282_v46 = vpop.eup %19947 }
 0xda2   : > { %v11192_v9 = vsel %vm10918_vm9, %v23282_v46, 0.0  ;;  %v23286_v20 = vpop.eup %19949 }
 0xda3   : > { %19957 = vpow2.f32 %v11105_v56  ;;  %v23288_v25 = vpop.eup %19951  ;;  %v11186_v40 = vsel %vm10918_vm9, %v23286_v20, 0.0 }
 0xda4   : > { %19959 = vpow2.f32 %v11107_v55 }
 0xda5   : > { %11181 = vadd.xlane.f32.xlu1 %v11180_v1  ;;  %v11177_v1 = vsel %vm10918_vm9, %v23288_v25, 0.0 }
 0xda7   : > { %v23292_v43 = vpop.eup %19953 }
 0xda8   : > { %v23296_v0 = vpop.eup %19955  ;;  %v11195_v17 = vsel %vm10918_vm9, %v23292_v43, 0.0 }
 0xda9   : > { %11175 = vadd.xlane.f32.xlu1 %v11174_v12  ;;  %v11204_v54 = vsel %vm10918_vm9, %v23296_v0, 0.0 }
 0xdad   : > { %11190 = vadd.xlane.f32.xlu1 %v11189_v24  ;;  %v23300_v28 = vpop.eup %19957 }
 0xdae   : > { %v11198_v12 = vsel %vm10918_vm9, %v23300_v28, 0.0  ;;  %v23306_v48 = vpop.eup %19959 }
 0xdaf   : > { %v11201_v19 = vsel %vm10918_vm9, %v23306_v48, 0.0 }
 0xdb1   : > { %11184 = vadd.xlane.f32.xlu1 %v11183_v42 }
 0xdb5   : > { %11193 = vadd.xlane.f32.xlu1 %v11192_v9 }
 0xdb9   : > { %11187 = vadd.xlane.f32.xlu1 %v11186_v40 }
 0xdbc   : > { %11178 = vadd.xlane.f32.xlu0 %v11177_v1 }
 0xdbd   : > { %11196 = vadd.xlane.f32.xlu1 %v11195_v17 }
 0xdc0   : > { %11205 = vadd.xlane.f32.xlu0 %v11204_v54 }
 0xdc1   : > { %11199 = vadd.xlane.f32.xlu1 %v11198_v12 }
 0xdc5   : > { %11202 = vadd.xlane.f32.xlu1 %v11201_v19 }
 0xdf7   : > { %v11119_v38 = vpop.xlane.xlu0 %11118 }
 0xdfb   : > { %v11113_v31 = vpop.xlane.xlu0 %11112  ;;  %v11122_v24 = vpop.xlane.xlu1 %11121 }
 0xdfc   : > { %19961 = vrcp.f32 %v11113_v31 }
 0xdff   : > { %v11116_v27 = vpop.xlane.xlu1 %11115 }
 0xe00   : > { %19963 = vrcp.f32 %v11116_v27  ;;  %v11131_v4 = vpop.xlane.xlu0 %11130 }
 0xe01   : > { %19965 = vrcp.f32 %v11122_v24 }
 0xe04   : > { %v11125_v56 = vpop.xlane.xlu0 %11124 }
 0xe06   : > { %v11134_v42 = vpop.xlane.xlu1 %11133  ;;  %v19962_v55 = vpop.eup %19961 }
 0xe07   : > { %v11239_v17 = vmul.f32 %v19962_v55, %v23158_v60 }
 0xe08   : > { %v11143_v9 = vpop.xlane.xlu0 %11142 }
 0xe0a   : > { %v19964_v40 = vpop.eup %19963  ;;  %v11128_v1 = vpop.xlane.xlu1 %11127 }
 0xe0b   : > { %19967 = vrcp.f32 %v11128_v1  ;;  %v11240_v54 = vmul.f32 %v19964_v40, %v23167_v22  ;;  %v19966_v44 = vpop.eup %19965 }
 0xe0c   : > { %19969 = vrcp.f32 %v11119_v38  ;;  %v11137_v12 = vpop.xlane.xlu0 %11136  ;;  %v11242_v22 = vmul.f32 %v19966_v44, %v23161_v10  ;;  %v19617_v38 = vld [vmem:[%s24075_s20] sm:$0xff]  }
 0xe0d   : > { %19971 = vrcp.f32 %v11125_v56  ;;  %v11271_v19 = vpack.c.bf16 %v11240_v54, %v11239_v17 }
 0xe0e   : > { %v11146_v31 = vpop.xlane.xlu1 %11145  ;;  %19973 = vrcp.f32 %v11134_v42 }
 0xe0f   : > { %17762 = vmatprep.mubr.msk.bf16.mxu1 %vm10918_vm9, %v11271_v19 }
 0xe10   : > { %v11155_v27 = vpop.xlane.xlu0 %11154 }
 0xe12   : > { %v11140_v36 = vpop.xlane.xlu1 %11139 }
 0xe13   : > { %19975 = vrcp.f32 %v11140_v36 }
 0xe14   : > { %19977 = vrcp.f32 %v11131_v4  ;;  %v11149_v24 = vpop.xlane.xlu0 %11148 }
 0xe15   : > { %v19968_v58 = vpop.eup %19967  ;;  %19979 = vrcp.f32 %v11137_v12 }
 0xe16   : > { %v19970_v1 = vpop.eup %19969  ;;  %v11158_v60 = vpop.xlane.xlu1 %11157  ;;  %v11244_v40 = vmul.f32 %v19968_v58, %v23187_v52  ;;  %19981 = vrcp.f32 %v11146_v31 }
 0xe17   : > { %v19972_v55 = vpop.eup %19971  ;;  %v11241_v42 = vmul.f32 %v19970_v1, %v23153_v7 }
 0xe18   : > { %v11289_v56 = vpop.permute.xlu0 %11288  ;;  %v11243_v17 = vmul.f32 %v19972_v55, %v23179_v34  ;;  %v19974_v44 = vpop.eup %19973 }
 0xe19   : > { %v11339_v36 = vsel %vm1018_vm1, %v11289_v56, 0  ;;  %19542 = vmatprep.subr.msk.bf16.mxu1 %vm1018_vm1, %v11289_v56  ;;  %v11272_v54 = vpack.c.bf16 %v11242_v22, %v11241_v42  ;;  %v11246_v19 = vmul.f32 %v19974_v44, %v23183_v50 }
 0xe1a   : > { %17761 = vmatpush3.bf16.msra.mxu1 %v11339_v36  ;;  %v11152_v4 = vpop.xlane.xlu1 %11151  ;;  %v11273_v10 = vpack.c.bf16 %v11244_v40, %v11243_v17 }
 0xe1b   : > { %19983 = vrcp.f32 %v11152_v4  ;;  %17794 = vmatprep.subr.bf16.mxu1 %v19617_v38 }
 0xe1c   : > { %19985 = vrcp.f32 %v11143_v9 }
 0xe1d   : > { %v19976_v12 = vpop.eup %19975  ;;  %19987 = vrcp.f32 %v11149_v24  ;;  %17763 = vmatmul.mubr.msk.bf16.vlgmr.msra.gmra.mrb[140].mxu1 %vm10918_vm9, %v11272_v54 }
 0xe1e   : > { %v19978_v58 = vpop.eup %19977  ;;  %17766 = vmatprep.mubr.msk.bf16.mxu1 %vm10918_vm9, %v11273_v10  ;;  %v11167_v7 = vpop.xlane.xlu1 %11166  ;;  %17795 = vmatpush3.bf16.msra.mxu1 %v19617_v38  ;;  %v11248_v34 = vmul.f32 %v19976_v12, %v23206_v26  ;;  %19989 = vrcp.f32 %v11158_v60 }
 0xe1f   : > { %v19980_v52 = vpop.eup %19979  ;;  %v11245_v31 = vmul.f32 %v19978_v58, %v23171_v16  ;;  %19991 = vrcp.f32 %v11155_v27 }
 0xe20   : > { %v11247_v9 = vmul.f32 %v19980_v52, %v23199_v11  ;;  %v19982_v24 = vpop.eup %19981 }
 0xe21   : > { %v11274_v55 = vpack.c.bf16 %v11246_v19, %v11245_v31  ;;  %v11250_v26 = vmul.f32 %v19982_v24, %v23203_v14 }
 0xe22   : > { %v11161_v1 = vpop.xlane.xlu1 %11160  ;;  %v11275_v22 = vpack.c.bf16 %v11248_v34, %v11247_v9 }
 0xe23   : > { %19993 = vrcp.f32 %v11161_v1 }
 0xe25   : > { %v19984_v56 = vpop.eup %19983  ;;  %17767 = vmatmul.mubr.msk.bf16.gmra.mrb[144].mxu1 %vm10918_vm9, %v11274_v55 }
 0xe26   : > { %v19986_v40 = vpop.eup %19985  ;;  %17770 = vmatprep.mubr.msk.bf16.mxu1 %vm10918_vm9, %v11275_v22  ;;  %v11170_v38 = vpop.xlane.xlu1 %11169  ;;  %v11252_v16 = vmul.f32 %v19984_v56, %v23228_v5 }
 0xe27   : > { %v19988_v50 = vpop.eup %19987  ;;  %v11249_v60 = vmul.f32 %v19986_v40, %v23191_v57  ;;  %19995 = vrcp.f32 %v11170_v38 }
 0xe28   : > { %v11251_v27 = vmul.f32 %v19988_v50, %v23219_v18  ;;  %v19990_v36 = vpop.eup %19989 }
 0xe29   : > { %v11276_v42 = vpack.c.bf16 %v11250_v26, %v11249_v60  ;;  %v19992_v17 = vpop.eup %19991  ;;  %v11254_v5 = vmul.f32 %v19990_v36, %v23223_v29 }
 0xe2a   : > { %v11164_v11 = vpop.xlane.xlu1 %11163  ;;  %v11277_v4 = vpack.c.bf16 %v11252_v16, %v11251_v27  ;;  %v11253_v54 = vmul.f32 %v19992_v17, %v23210_v30 }
 0xe2b   : > { %19997 = vrcp.f32 %v11164_v11 }
 0xe2c   : > { %19999 = vrcp.f32 %v11167_v7  ;;  %v11278_v10 = vpack.c.bf16 %v11254_v5, %v11253_v54 }
 0xe2d   : > { %17771 = vmatmul.mubr.msk.bf16.gmra.mrb[148].mxu1 %vm10918_vm9, %v11276_v42  ;;  %v19994_v44 = vpop.eup %19993 }
 0xe2e   : > { %17774 = vmatprep.mubr.msk.bf16.mxu1 %vm10918_vm9, %v11277_v4  ;;  %v11173_v14 = vpop.xlane.xlu1 %11172  ;;  %v11255_v52 = vmul.f32 %v19994_v44, %v23238_v23 }
 0xe2f   : > { %20001 = vrcp.f32 %v11173_v14 }
 0xe31   : > { %v19996_v12 = vpop.eup %19995 }
 0xe32   : > { %v11182_v57 = vpop.xlane.xlu1 %11181  ;;  %v11258_v34 = vmul.f32 %v19996_v12, %v23243_v41 }
 0xe35   : > { %v19998_v18 = vpop.eup %19997  ;;  %17775 = vmatmul.mubr.msk.bf16.gmra.mrb[152].mxu1 %vm10918_vm9, %v11278_v10 }
 0xe36   : > { %v20000_v58 = vpop.eup %19999  ;;  %v11176_v7 = vpop.xlane.xlu1 %11175  ;;  %v11256_v19 = vmul.f32 %v19998_v18, %v23248_v45 }
 0xe37   : > { %20003 = vrcp.f32 %v11176_v7  ;;  %v11257_v30 = vmul.f32 %v20000_v58, %v23233_v32 }
 0xe38   : > { %v11279_v29 = vpack.c.bf16 %v11256_v19, %v11255_v52 }
 0xe39   : > { %v11280_v1 = vpack.c.bf16 %v11258_v34, %v11257_v30  ;;  %v20002_v55 = vpop.eup %20001 }
 0xe3a   : > { %17778 = vmatprep.mubr.msk.bf16.mxu1 %vm10918_vm9, %v11279_v29  ;;  %v11191_v31 = vpop.xlane.xlu1 %11190  ;;  %v11259_v23 = vmul.f32 %v20002_v55, %v23253_v47 }
 0xe3d   : > { %17779 = vmatmul.mubr.msk.bf16.gmra.mrb[156].mxu1 %vm10918_vm9, %v11280_v1 }
 0xe3e   : > { %v11185_v9 = vpop.xlane.xlu1 %11184 }
 0xe41   : > { %v20004_v24 = vpop.eup %20003 }
 0xe42   : > { %v11194_v22 = vpop.xlane.xlu1 %11193  ;;  %v11260_v45 = vmul.f32 %v20004_v24, %v23264_v37 }
 0xe44   : > { %v11281_v56 = vpack.c.bf16 %v11260_v45, %v11259_v23 }
 0xe46   : > { %17782 = vmatprep.mubr.msk.bf16.mxu1 %vm10918_vm9, %v11281_v56  ;;  %v11188_v41 = vpop.xlane.xlu1 %11187 }
 0xe47   : > { %20005 = vrcp.f32 %v11188_v41 }
 0xe48   : > { %20007 = vrcp.f32 %v11182_v57 }
 0xe49   : > { %20009 = vrcp.f32 %v11185_v9  ;;  %v11179_v32 = vpop.xlane.xlu0 %11178 }
 0xe4a   : > { %20011 = vrcp.f32 %v11179_v32  ;;  %v11197_v40 = vpop.xlane.xlu1 %11196 }
 0xe4b   : > { %20013 = vrcp.f32 %v11194_v22 }
 0xe4d   : > { %v11206_v11 = vpop.xlane.xlu0 %11205 }
 0xe4e   : > { %v11200_v38 = vpop.xlane.xlu1 %11199 }
 0xe4f   : > { %20015 = vrcp.f32 %v11200_v38 }
 0xe50   : > { %20017 = vrcp.f32 %v11191_v31 }
 0xe51   : > { %v20006_v50 = vpop.eup %20005  ;;  %20019 = vrcp.f32 %v11197_v40 }
 0xe52   : > { %v20008_v26 = vpop.eup %20007  ;;  %v11203_v16 = vpop.xlane.xlu1 %11202  ;;  %v11264_v60 = vmul.f32 %v20006_v50, %v23286_v20 }
 0xe53   : > { %v20010_v47 = vpop.eup %20009  ;;  %v11262_v42 = vmul.f32 %v20008_v26, %v23259_v62  ;;  %20021 = vrcp.f32 %v11203_v16 }
 0xe54   : > { %v20012_v37 = vpop.eup %20011  ;;  %v11263_v36 = vmul.f32 %v20010_v47, %v23277_v51  ;;  %20023 = vrcp.f32 %v11206_v11 }
 0xe55   : > { %v11261_v27 = vmul.f32 %v20012_v37, %v23288_v25  ;;  %v20014_v17 = vpop.eup %20013 }
 0xe56   : > { %v11283_v14 = vpack.c.bf16 %v11264_v60, %v11263_v36  ;;  %v11266_v20 = vmul.f32 %v20014_v17, %v23282_v46 }
 0xe57   : > { %v11282_v4 = vpack.c.bf16 %v11262_v42, %v11261_v27 }
 0xe59   : > { %v20016_v5 = vpop.eup %20015  ;;  %17783 = vmatmul.mubr.msk.bf16.gmra.mrb[160].mxu1 %vm10918_vm9, %v11282_v4 }
 0xe5a   : > { %v20018_v54 = vpop.eup %20017  ;;  %17786 = vmatprep.mubr.msk.bf16.mxu1 %vm10918_vm9, %v11283_v14  ;;  %v11268_v25 = vmul.f32 %v20016_v5, %v23300_v28 }
 0xe5b   : > { %v20020_v57 = vpop.eup %20019  ;;  %v11265_v62 = vmul.f32 %v20018_v54, %v23271_v49  ;;  %v19618_v49 = vld [vmem:[%s24075_s20 + $0x8] sm:$0xff]  }
 0xe5c   : > { %v11267_v44 = vmul.f32 %v20020_v57, %v23292_v43  ;;  %17796 = vmatprep.subr.bf16.mxu1 %v19618_v49 }
 0xe5d   : > { %v11284_v51 = vpack.c.bf16 %v11266_v20, %v11265_v62  ;;  %v20022_v10 = vpop.eup %20021  ;;  %17797 = vmatpush3.bf16.msra.mxu1 %v19618_v49  ;;  %v19620_v49 = vld [vmem:[%s24077_s22 + $0x38] sm:$0xff]  }
 0xe5e   : > { %v11285_v12 = vpack.c.bf16 %v11268_v25, %v11267_v44  ;;  %v20024_v18 = vpop.eup %20023  ;;  %v11269_v58 = vmul.f32 %v20022_v10, %v23306_v48 }
 0xe5f   : > { %v11270_v7 = vmul.f32 %v20024_v18, %v23296_v0 }
 0xe61   : > { %17787 = vmatmul.mubr.msk.bf16.gmra.mrb[164].mxu1 %vm10918_vm9, %v11284_v51  ;;  %v11286_v52 = vpack.c.bf16 %v11270_v7, %v11269_v58 }
 0xe62   : > { %17790 = vmatprep.mubr.msk.bf16.mxu1 %vm10918_vm9, %v11285_v12 }
 0xe69   : > { %17791 = vmatmul.mubr.msk.bf16.gmra.mrb[168].mxu1 %vm10918_vm9, %v11286_v52  ;;  %v19619_v52 = vld [vmem:[%s24077_s22 + $0x30] sm:$0xff]  }
 0xe6a   : > { %17830 = vmatprep.subr.bf16.mxu1 %v19619_v52 }
 0xef0   : > { %v17764_v46 = vpop.f32.mrb[140].mxu1 }
 0xef1   : > { %v11375_v43 = vpop.f32.mrb[141].mxu1 }
 0xef2   : > { %v17765_v28 = vpop.f32.mrb[142].mxu1 }
 0xef3   : > { %v11503_v19 = vpack.c.bf16 %v17765_v28, %v17764_v46  ;;  %v11378_v34 = vpop.f32.mrb[143].mxu1  ;;  %v23391_v46 = vld [vmem:[%s24077_s22] sm:$0xff]  }
 0xef4   : > { %v11502_v29 = vpack.c.bf16 %v11378_v34, %v11375_v43  ;;  %v23397_v43 = vld [vmem:[%s24076_s21] ss:$0 sm:$0xff] }
 0xef6   : > { %17798 = vmatprep.mubr.msk.bf16.mxu1 %vm8047_vm8, %v11502_v29 }
 0xef7   : > { %17799 = vmatmul.mubr.msk.bf16.vlgmr.msra.gmra.mrb[172].mxu1 %vm8047_vm8, %v11503_v19 }
 0xef8   : > { %v17768_v0 = vpop.f32.mrb[144].mxu1  ;;  %17831 = vmatpush3.bf16.msra.mxu1 %v19619_v52 }
 0xef9   : > { %v11391_v48 = vpop.f32.mrb[145].mxu1  ;;  %17832 = vmatprep.subr.bf16.mxu1 %v19620_v49 }
 0xefa   : > { %v17769_v30 = vpop.f32.mrb[146].mxu1 }
 0xefb   : > { %v11505_v31 = vpack.c.bf16 %v17769_v30, %v17768_v0  ;;  %v11394_v1 = vpop.f32.mrb[147].mxu1 }
 0xefc   : > { %v11504_v9 = vpack.c.bf16 %v11394_v1, %v11391_v48  ;;  %17833 = vmatpush3.bf16.msra.mxu1 %v19620_v49 }
 0xefd   : > { %17866 = vmatprep.subr.bf16.mxu1 %v23391_v46 }
 0xefe   : > { %17802 = vmatprep.mubr.msk.bf16.mxu1 %vm8047_vm8, %v11504_v9 }
 0xeff   : > { %17803 = vmatmul.mubr.msk.bf16.gmra.mrb[176].mxu1 %vm8047_vm8, %v11505_v31 }
 0xf00   : > { %v17772_v55 = vpop.f32.mrb[148].mxu1 }
 0xf01   : > { %v11407_v24 = vpop.f32.mrb[149].mxu1 }
 0xf02   : > { %v17773_v22 = vpop.f32.mrb[150].mxu1 }
 0xf03   : > { %v11507_v23 = vpack.c.bf16 %v17773_v22, %v17772_v55  ;;  %v11410_v45 = vpop.f32.mrb[151].mxu1 }
 0xf04   : > { %v11506_v56 = vpack.c.bf16 %v11410_v45, %v11407_v24 }
 0xf06   : > { %17806 = vmatprep.mubr.msk.bf16.mxu1 %vm8047_vm8, %v11506_v56 }
 0xf07   : > { %17807 = vmatmul.mubr.msk.bf16.gmra.mrb[180].mxu1 %vm8047_vm8, %v11507_v23 }
 0xf08   : > { %v17776_v41 = vpop.f32.mrb[152].mxu1 }
 0xf09   : > { %v11423_v32 = vpop.f32.mrb[153].mxu1 }
 0xf0a   : > { %v17777_v40 = vpop.f32.mrb[154].mxu1 }
 0xf0b   : > { %v11509_v38 = vpack.c.bf16 %v17777_v40, %v17776_v41  ;;  %v11426_v50 = vpop.f32.mrb[155].mxu1 }
 0xf0c   : > { %v11508_v26 = vpack.c.bf16 %v11426_v50, %v11423_v32 }
 0xf0e   : > { %17810 = vmatprep.mubr.msk.bf16.mxu1 %vm8047_vm8, %v11508_v26 }
 0xf0f   : > { %17811 = vmatmul.mubr.msk.bf16.gmra.mrb[184].mxu1 %vm8047_vm8, %v11509_v38 }
 0xf10   : > { %v17780_v47 = vpop.f32.mrb[156].mxu1 }
 0xf11   : > { %v11439_v16 = vpop.f32.mrb[157].mxu1 }
 0xf12   : > { %v17781_v37 = vpop.f32.mrb[158].mxu1 }
 0xf13   : > { %v11511_v60 = vpack.c.bf16 %v17781_v37, %v17780_v47  ;;  %v11442_v11 = vpop.f32.mrb[159].mxu1 }
 0xf14   : > { %v11510_v27 = vpack.c.bf16 %v11442_v11, %v11439_v16 }
 0xf16   : > { %17814 = vmatprep.mubr.msk.bf16.mxu1 %vm8047_vm8, %v11510_v27 }
 0xf17   : > { %17815 = vmatmul.mubr.msk.bf16.gmra.mrb[188].mxu1 %vm8047_vm8, %v11511_v60 }
 0xf2c   : > { %v17784_v42 = vpop.f32.mrb[160].mxu1 }
 0xf2d   : > { %v11455_v36 = vpop.f32.mrb[161].mxu1 }
 0xf2e   : > { %v17785_v4 = vpop.f32.mrb[162].mxu1 }
 0xf2f   : > { %v11513_v17 = vpack.c.bf16 %v17785_v4, %v17784_v42  ;;  %v11458_v14 = vpop.f32.mrb[163].mxu1 }
 0xf30   : > { %v11512_v5 = vpack.c.bf16 %v11458_v14, %v11455_v36 }
 0xf32   : > { %17818 = vmatprep.mubr.msk.bf16.mxu1 %vm8047_vm8, %v11512_v5 }
 0xf33   : > { %17819 = vmatmul.mubr.msk.bf16.gmra.mrb[192].mxu1 %vm8047_vm8, %v11513_v17 }
 0xf34   : > { %v17788_v54 = vpop.f32.mrb[164].mxu1 }
 0xf35   : > { %v11471_v57 = vpop.f32.mrb[165].mxu1 }
 0xf36   : > { %v17789_v20 = vpop.f32.mrb[166].mxu1 }
 0xf37   : > { %v11515_v25 = vpack.c.bf16 %v17789_v20, %v17788_v54  ;;  %v11474_v62 = vpop.f32.mrb[167].mxu1 }
 0xf38   : > { %v11514_v44 = vpack.c.bf16 %v11474_v62, %v11471_v57 }
 0xf3a   : > { %17822 = vmatprep.mubr.msk.bf16.mxu1 %vm8047_vm8, %v11514_v44 }
 0xf3b   : > { %17823 = vmatmul.mubr.msk.bf16.gmra.mrb[196].mxu1 %vm8047_vm8, %v11515_v25 }
 0xf3c   : > { %v17792_v51 = vpop.f32.mrb[168].mxu1 }
 0xf3d   : > { %v11487_v10 = vpop.f32.mrb[169].mxu1 }
 0xf3e   : > { %v17793_v12 = vpop.f32.mrb[170].mxu1 }
 0xf3f   : > { %v11517_v18 = vpack.c.bf16 %v17793_v12, %v17792_v51  ;;  %v11490_v58 = vpop.f32.mrb[171].mxu1 }
 0xf40   : > { %v11516_v7 = vpack.c.bf16 %v11490_v58, %v11487_v10 }
 0xf42   : > { %17826 = vmatprep.mubr.msk.bf16.mxu1 %vm8047_vm8, %v11516_v7 }
 0xf43   : > { %17827 = vmatmul.mubr.msk.bf16.gmra.mrb[200].mxu1 %vm8047_vm8, %v11517_v18 }
 0xfca   : > { %v17800_v28 = vpop.f32.mrb[172].mxu1 }
 0xfcb   : > { %v11632_v19 = vadd.f32 %v17800_v28, %v23397_v43  ;;  %v11623_v34 = vpop.f32.mrb[173].mxu1 }
 0xfcc   : > { %v11624_v29 = vadd.f32 %v23397_v43, %v11623_v34  ;;  %v17801_v0 = vpop.f32.mrb[174].mxu1 }
 0xfcd   : > { %v23402_v48 = vadd.f32 %v11632_v19, %v22690_v6  ;;  %v11635_v30 = vadd.f32 %v17801_v0, %v23397_v43  ;;  %v11626_v31 = vpop.f32.mrb[175].mxu1 }
 0xfce   : > { %v23406_v1 = vadd.f32 %v11624_v29, %v22694_v61  ;;  %v11627_v9 = vadd.f32 %v23397_v43, %v11626_v31 }
 0xfcf   : > { %v15251_v55 = vmul.f32 -1.442695, %v23402_v48  ;;  %v23411_v24 = vadd.f32 %v11635_v30, %v22698_v2 }
 0xfd0   : > { %v15249_v22 = vmul.f32 -1.442695, %v23406_v1  ;;  %v23415_v23 = vadd.f32 %v11627_v9, %v22701_v35 }
 0xfd1   : > { %20025 = vpow2.f32 %v15251_v55  ;;  %v15252_v6 = vmul.f32 -1.442695, %v23411_v24 }
 0xfd2   : > { %20027 = vpow2.f32 %v15249_v22  ;;  %v15250_v45 = vmul.f32 -1.442695, %v23415_v23  ;;  %v17804_v61 = vpop.f32.mrb[176].mxu1 }
 0xfd3   : > { %20029 = vpow2.f32 %v15252_v6  ;;  %v11648_v56 = vadd.f32 %v17804_v61, %v23397_v43  ;;  %v11639_v41 = vpop.f32.mrb[177].mxu1 }
 0xfd4   : > { %20031 = vpow2.f32 %v15250_v45  ;;  %v11640_v2 = vadd.f32 %v23397_v43, %v11639_v41  ;;  %v17805_v32 = vpop.f32.mrb[178].mxu1 }
 0xfd5   : > { %v23422_v40 = vadd.f32 %v11648_v56, %v22718_v13  ;;  %v11651_v35 = vadd.f32 %v17805_v32, %v23397_v43  ;;  %v11642_v38 = vpop.f32.mrb[179].mxu1 }
 0xfd6   : > { %v23426_v50 = vadd.f32 %v11640_v2, %v22723_v39  ;;  %v11643_v26 = vadd.f32 %v23397_v43, %v11642_v38  ;;  %v24142_v2 = vld [vmem:[#allocation3_spill] sm:$0xff]  ;;  %v24143_v38 = vld [vmem:[#allocation4_spill] sm:$0xff] }
 0xfd7   : > { %v15255_v47 = vmul.f32 -1.442695, %v23422_v40  ;;  %v23431_v16 = vadd.f32 %v11651_v35, %v22730_v3 }
 0xfd8   : > { %v15253_v37 = vmul.f32 -1.442695, %v23426_v50  ;;  %v23435_v60 = vadd.f32 %v11643_v26, %v22734_v8 }
 0xfd9   : > { %20033 = vpow2.f32 %v15255_v47  ;;  %v15256_v13 = vmul.f32 -1.442695, %v23431_v16 }
 0xfda   : > { %20035 = vpow2.f32 %v15253_v37  ;;  %v15254_v11 = vmul.f32 -1.442695, %v23435_v60  ;;  %v17808_v39 = vpop.f32.mrb[180].mxu1 }
 0xfdb   : > { %v20026_v27 = vpop.eup %20025  ;;  %20037 = vpow2.f32 %v15256_v13  ;;  %v11664_v42 = vadd.f32 %v17808_v39, %v23397_v43  ;;  %v11655_v36 = vpop.f32.mrb[181].mxu1 }
 0xfdc   : > { %v20028_v4 = vpop.eup %20027  ;;  %v11880_v3 = vadd.f32 1.0, %v20026_v27  ;;  %20039 = vpow2.f32 %v15254_v11  ;;  %v11656_v17 = vadd.f32 %v23397_v43, %v11655_v36  ;;  %v17809_v14 = vpop.f32.mrb[182].mxu1 }
 0xfdd   : > { %v20030_v8 = vpop.eup %20029  ;;  %v11878_v5 = vadd.f32 1.0, %v20028_v4  ;;  %v23442_v54 = vadd.f32 %v11664_v42, %v22748_v15  ;;  %v11667_v57 = vadd.f32 %v17809_v14, %v23397_v43  ;;  %v11658_v20 = vpop.f32.mrb[183].mxu1 }
 0xfde   : > { %v20032_v25 = vpop.eup %20031  ;;  %20041 = vrcp.f32 %v11880_v3  ;;  %v11881_v62 = vadd.f32 1.0, %v20030_v8  ;;  %v23446_v44 = vadd.f32 %v11656_v17, %v22753_v59  ;;  %v11659_v51 = vadd.f32 %v23397_v43, %v11658_v20 }
 0xfdf   : > { %20043 = vrcp.f32 %v11878_v5  ;;  %v11879_v10 = vadd.f32 1.0, %v20032_v25  ;;  %v15259_v12 = vmul.f32 -1.442695, %v23442_v54  ;;  %v23451_v18 = vadd.f32 %v11667_v57, %v22757_v21  ;;  %v24144_v57 = vld [vmem:[#allocation5_spill] sm:$0xff] }
 0xfe0   : > { %20045 = vrcp.f32 %v11881_v62  ;;  %v15257_v15 = vmul.f32 -1.442695, %v23446_v44  ;;  %v23455_v58 = vadd.f32 %v11659_v51, %v22760_v33 }
 0xfe1   : > { %20047 = vrcp.f32 %v11879_v10  ;;  %v15260_v7 = vmul.f32 -1.442695, %v23451_v18 }
 0xfe2   : > { %20049 = vpow2.f32 %v15259_v12  ;;  %v15258_v59 = vmul.f32 -1.442695, %v23455_v58  ;;  %v17812_v52 = vpop.f32.mrb[184].mxu1 }
 0xfe3   : > { %v20034_v49 = vpop.eup %20033  ;;  %20051 = vpow2.f32 %v15257_v15  ;;  %v11680_v28 = vadd.f32 %v17812_v52, %v23397_v43  ;;  %v11671_v19 = vpop.f32.mrb[185].mxu1  ;;  %v24146_v52 = vld [vmem:[#allocation7_spill] sm:$0xff] }
 0xfe4   : > { %v20036_v21 = vpop.eup %20035  ;;  %v11884_v34 = vadd.f32 1.0, %v20034_v49  ;;  %20053 = vpow2.f32 %v15260_v7  ;;  %v11672_v29 = vadd.f32 %v23397_v43, %v11671_v19  ;;  %v17813_v0 = vpop.f32.mrb[186].mxu1 }
 0xfe5   : > { %v20038_v33 = vpop.eup %20037  ;;  %v11882_v30 = vadd.f32 1.0, %v20036_v21  ;;  %20055 = vpow2.f32 %v15258_v59  ;;  %v23462_v31 = vadd.f32 %v11680_v28, %v22774_v63  ;;  %v11683_v9 = vadd.f32 %v17813_v0, %v23397_v43  ;;  %v11674_v55 = vpop.f32.mrb[187].mxu1 }
 0xfe6   : > { %v20040_v22 = vpop.eup %20039  ;;  %20057 = vrcp.f32 %v11884_v34  ;;  %v11885_v6 = vadd.f32 1.0, %v20038_v33  ;;  %v23466_v45 = vadd.f32 %v11672_v29, %v22779_v53  ;;  %v11675_v61 = vadd.f32 %v23397_v43, %v11674_v55  ;;  %v24147_v34 = vld [vmem:[#allocation8_spill] sm:$0xff] }
 0xfe7   : > { %20059 = vrcp.f32 %v11882_v30  ;;  %v11883_v56 = vadd.f32 1.0, %v20040_v22  ;;  %v15263_v41 = vmul.f32 -1.442695, %v23462_v31  ;;  %v23471_v32 = vadd.f32 %v11683_v9, %v24142_v2 }
 0xfe8   : > { %v20042_v63 = vpop.eup %20041  ;;  %20061 = vrcp.f32 %v11885_v6  ;;  %v15261_v35 = vmul.f32 -1.442695, %v23466_v45  ;;  %v23475_v26 = vadd.f32 %v11675_v61, %v24143_v38 }
 0xfe9   : > { %v20044_v47 = vpop.eup %20043  ;;  %v11976_v53 = vmul.f32 %v20042_v63, %v23402_v48  ;;  %20063 = vrcp.f32 %v11883_v56  ;;  %v15264_v37 = vmul.f32 -1.442695, %v23471_v32 }
 0xfea   : > { %v20046_v13 = vpop.eup %20045  ;;  %v11974_v11 = vmul.f32 %v20044_v47, %v23406_v1  ;;  %20065 = vpow2.f32 %v15263_v41  ;;  %v15262_v39 = vmul.f32 -1.442695, %v23475_v26  ;;  %v17816_v27 = vpop.f32.mrb[188].mxu1 }
 0xfeb   : > { %v20048_v42 = vpop.eup %20047  ;;  %12008 = vst.msk [vmem:[#allocation2 + $0x31] sm:$0xff] %vm8047_vm8, %v11976_v53  ;;  %v11977_v36 = vmul.f32 %v20046_v13, %v23411_v24  ;;  %20067 = vpow2.f32 %v15261_v35  ;;  %v11696_v4 = vadd.f32 %v17816_v27, %v23397_v43  ;;  %v11687_v3 = vpop.f32.mrb[189].mxu1 }
 0xfec   : > { %v20050_v48 = vpop.eup %20049  ;;  %12006 = vst.msk [vmem:[#allocation2 + $0x19] sm:$0xff] %vm8047_vm8, %v11974_v11  ;;  %v11975_v17 = vmul.f32 %v20048_v42, %v23415_v23  ;;  %20069 = vpow2.f32 %v15264_v37  ;;  %v11688_v1 = vadd.f32 %v23397_v43, %v11687_v3  ;;  %v17817_v14 = vpop.f32.mrb[190].mxu1  ;;  %v24145_v23 = vld [vmem:[#allocation6_spill] sm:$0xff] }
 0xfed   : > { %v20052_v8 = vpop.eup %20051  ;;  %12009 = vst.msk [vmem:[#allocation2 + $0x39] sm:$0xff] %vm8047_vm8, %v11977_v36  ;;  %v11888_v5 = vadd.f32 1.0, %v20050_v48  ;;  %20071 = vpow2.f32 %v15262_v39  ;;  %v23489_v24 = vadd.f32 %v11696_v4, %v24144_v57  ;;  %v11699_v20 = vadd.f32 %v17817_v14, %v23397_v43  ;;  %v11690_v25 = vpop.f32.mrb[191].mxu1  ;;  %v19622_v11 = vld [vmem:[%s24077_s22 + $0x8] sm:$0xff]   ;;  %v23532_v48 = vld [vmem:[%s24077_s22 + $0x60] sm:$0xff]  }
 0xfee   : > { %v20054_v62 = vpop.eup %20053  ;;  %12007 = vst.msk [vmem:[#allocation2 + $0x21] sm:$0xff] %vm8047_vm8, %v11975_v17  ;;  %v11886_v51 = vadd.f32 1.0, %v20052_v8  ;;  %v23494_v10 = vadd.f32 %v11688_v1, %v24145_v23  ;;  %v11691_v12 = vadd.f32 %v23397_v43, %v11690_v25 }
 0xfef   : > { %v20056_v15 = vpop.eup %20055  ;;  %20073 = vrcp.f32 %v11888_v5  ;;  %v11889_v7 = vadd.f32 1.0, %v20054_v62  ;;  %v15267_v59 = vmul.f32 -1.442695, %v23489_v24  ;;  %v23499_v49 = vadd.f32 %v11699_v20, %v24146_v52 }
 0xff0   : > { %v20058_v28 = vpop.eup %20057  ;;  %20075 = vrcp.f32 %v11886_v51  ;;  %v11887_v19 = vadd.f32 1.0, %v20056_v15  ;;  %v15265_v21 = vmul.f32 -1.442695, %v23494_v10  ;;  %v23503_v29 = vadd.f32 %v11691_v12, %v24147_v34 }
 0xff1   : > { %v20060_v0 = vpop.eup %20059  ;;  %v11980_v33 = vmul.f32 %v20058_v28, %v23422_v40  ;;  %20077 = vrcp.f32 %v11889_v7  ;;  %v15268_v30 = vmul.f32 -1.442695, %v23499_v49 }
 0xff2   : > { %v20062_v9 = vpop.eup %20061  ;;  %v11978_v55 = vmul.f32 %v20060_v0, %v23426_v50  ;;  %20079 = vrcp.f32 %v11887_v19  ;;  %v15266_v22 = vmul.f32 -1.442695, %v23503_v29  ;;  %v12042_v53 = vld [vmem:[#allocation2 + $0x30] sm:$0xff] }
 0xff3   : > { %v20064_v6 = vpop.eup %20063  ;;  %12012 = vst.msk [vmem:[#allocation2 + $0x61] sm:$0xff] %vm8047_vm8, %v11980_v33  ;;  %v11981_v61 = vmul.f32 %v20062_v9, %v23431_v16  ;;  %20081 = vpow2.f32 %v15267_v59  ;;  %v12040_v63 = vld [vmem:[#allocation2 + $0x18] sm:$0xff] }
 0xff4   : > { %v20066_v56 = vpop.eup %20065  ;;  %12010 = vst.msk [vmem:[#allocation2 + $0x49] sm:$0xff] %vm8047_vm8, %v11978_v55  ;;  %v11979_v40 = vmul.f32 %v20064_v6, %v23435_v60  ;;  %20083 = vpow2.f32 %v15265_v21  ;;  %v12043_v41 = vld [vmem:[#allocation2 + $0x38] sm:$0xff] }
 0xff5   : > { %v20068_v2 = vpop.eup %20067  ;;  %12013 = vst.msk [vmem:[#allocation2 + $0x69] sm:$0xff] %vm8047_vm8, %v11981_v61  ;;  %v11892_v50 = vadd.f32 1.0, %v20066_v56  ;;  %20085 = vpow2.f32 %v15268_v30  ;;  %v12041_v35 = vld [vmem:[#allocation2 + $0x20] sm:$0xff]  ;;  %v23517_v13 = vpack.c.bf16 %v12043_v41, %v12042_v53 }
 0xff6   : > { %v20070_v38 = vpop.eup %20069  ;;  %12011 = vst.msk [vmem:[#allocation2 + $0x51] sm:$0xff] %vm8047_vm8, %v11979_v40  ;;  %v11890_v47 = vadd.f32 1.0, %v20068_v2  ;;  %20087 = vpow2.f32 %v15266_v22  ;;  %v23515_v16 = vpack.c.bf16 %v12041_v35, %v12040_v63 }
 0xff7   : > { %v20072_v37 = vpop.eup %20071  ;;  %20089 = vrcp.f32 %v11892_v50  ;;  %v11893_v60 = vadd.f32 1.0, %v20070_v38  ;;  %v24149_v50 = vld [vmem:[#allocation10_spill] sm:$0xff] }
 0xff8   : > { %20091 = vrcp.f32 %v11890_v47  ;;  %v11891_v39 = vadd.f32 1.0, %v20072_v37  ;;  %17834 = vmatprep.mubr.msk.bf16.mxu1 %vm8047_vm8, %v23515_v16  ;;  %v24150_v37 = vld [vmem:[#allocation11_spill] sm:$0xff] }
 0xff9   : > { %v20074_v27 = vpop.eup %20073  ;;  %20093 = vrcp.f32 %v11893_v60  ;;  %17835 = vmatmul.mubr.msk.bf16.vlgmr.msra.gmra.mrb[204].mxu1 %vm8047_vm8, %v23517_v13 }
 0xffa   : > { %v20076_v42 = vpop.eup %20075  ;;  %v11984_v36 = vmul.f32 %v20074_v27, %v23442_v54  ;;  %20095 = vrcp.f32 %v11891_v39  ;;  %17867 = vmatpush3.bf16.msra.mxu1 %v23391_v46  ;;  %v12046_v25 = vld [vmem:[#allocation2 + $0x60] sm:$0xff] }
 0xffb   : > { %v20078_v4 = vpop.eup %20077  ;;  %v11982_v3 = vmul.f32 %v20076_v42, %v23446_v44  ;;  %17868 = vmatprep.subr.bf16.mxu1 %v19622_v11  ;;  %v12044_v54 = vld [vmem:[#allocation2 + $0x48] sm:$0xff]  ;;  %v24151_v42 = vld [vmem:[#allocation12_spill] sm:$0xff] }
 0xffc   : > { %v20080_v17 = vpop.eup %20079  ;;  %12016 = vst.msk [vmem:[#allocation2 + $0x91] sm:$0xff] %vm8047_vm8, %v11984_v36  ;;  %v11985_v1 = vmul.f32 %v20078_v4, %v23451_v18  ;;  %v12047_v14 = vld [vmem:[#allocation2 + $0x68] sm:$0xff] }
 0xffd   : > { %v20082_v8 = vpop.eup %20081  ;;  %12014 = vst.msk [vmem:[#allocation2 + $0x79] sm:$0xff] %vm8047_vm8, %v11982_v3  ;;  %v11983_v46 = vmul.f32 %v20080_v17, %v23455_v58  ;;  %v12045_v5 = vld [vmem:[#allocation2 + $0x50] sm:$0xff]  ;;  %v23542_v51 = vpack.c.bf16 %v12047_v14, %v12046_v25 }
 0xffe   : > { %v20084_v44 = vpop.eup %20083  ;;  %12017 = vst.msk [vmem:[#allocation2 + $0x99] sm:$0xff] %vm8047_vm8, %v11985_v1  ;;  %v11896_v57 = vadd.f32 1.0, %v20082_v8  ;;  %v23539_v20 = vpack.c.bf16 %v12045_v5, %v12044_v54  ;;  %17869 = vmatpush3.bf16.msra.mxu1 %v19622_v11 }
 0xfff   : > { %v20086_v62 = vpop.eup %20085  ;;  %12015 = vst.msk [vmem:[#allocation2 + $0x81] sm:$0xff] %vm8047_vm8, %v11983_v46  ;;  %v11894_v18 = vadd.f32 1.0, %v20084_v44  ;;  %17902 = vmatprep.subr.bf16.mxu1 %v23532_v48 }
0x1000   : > { %v20088_v23 = vpop.eup %20087  ;;  %20097 = vrcp.f32 %v11896_v57  ;;  %v11897_v58 = vadd.f32 1.0, %v20086_v62  ;;  %17838 = vmatprep.mubr.msk.bf16.mxu1 %vm8047_vm8, %v23539_v20  ;;  %v24152_v62 = vld [vmem:[#allocation13_spill] sm:$0xff] }
0x1001   : > { %v20090_v12 = vpop.eup %20089  ;;  %20099 = vrcp.f32 %v11894_v18  ;;  %v11895_v15 = vadd.f32 1.0, %v20088_v23  ;;  %17839 = vmatmul.mubr.msk.bf16.gmra.mrb[208].mxu1 %vm8047_vm8, %v23542_v51 }
0x1002   : > { %v20092_v7 = vpop.eup %20091  ;;  %v11988_v59 = vmul.f32 %v20090_v12, %v23462_v31  ;;  %20101 = vrcp.f32 %v11897_v58  ;;  %v24153_v12 = vld [vmem:[#allocation14_spill] sm:$0xff] }
0x1003   : > { %v20094_v52 = vpop.eup %20093  ;;  %v11986_v28 = vmul.f32 %v20092_v7, %v23466_v45  ;;  %20103 = vrcp.f32 %v11895_v15  ;;  %v12050_v22 = vld [vmem:[#allocation2 + $0x90] sm:$0xff] }
0x1004   : > { %v20096_v19 = vpop.eup %20095  ;;  %12020 = vst.msk [vmem:[#allocation2 + $0xc1] sm:$0xff] %vm8047_vm8, %v11988_v59  ;;  %v11989_v21 = vmul.f32 %v20094_v52, %v23471_v32  ;;  %v12048_v30 = vld [vmem:[#allocation2 + $0x78] sm:$0xff]  ;;  %v24154_v52 = vld [vmem:[#allocation15_spill] sm:$0xff] }
0x1005   : > { %12018 = vst.msk [vmem:[#allocation2 + $0xa9] sm:$0xff] %vm8047_vm8, %v11986_v28  ;;  %v11987_v34 = vmul.f32 %v20096_v19, %v23475_v26  ;;  %v12051_v0 = vld [vmem:[#allocation2 + $0x98] sm:$0xff]  ;;  %v24148_v26 = vld [vmem:[#allocation9_spill] sm:$0xff] }
0x1006   : > { %12021 = vst.msk [vmem:[#allocation2 + $0xc9] sm:$0xff] %vm8047_vm8, %v11989_v21  ;;  %v17820_v33 = vpop.f32.mrb[192].mxu1  ;;  %v12049_v31 = vld [vmem:[#allocation2 + $0x80] sm:$0xff]  ;;  %v23561_v61 = vpack.c.bf16 %v12051_v0, %v12050_v22  ;;  %v24155_v21 = vld [vmem:[#allocation16_spill] sm:$0xff] }
0x1007   : > { %12019 = vst.msk [vmem:[#allocation2 + $0xb1] sm:$0xff] %vm8047_vm8, %v11987_v34  ;;  %v11712_v45 = vadd.f32 %v17820_v33, %v23397_v43  ;;  %v11703_v9 = vpop.f32.mrb[193].mxu1  ;;  %v23558_v55 = vpack.c.bf16 %v12049_v31, %v12048_v30 }
0x1008   : > { %v11704_v32 = vadd.f32 %v23397_v43, %v11703_v9  ;;  %v17821_v6 = vpop.f32.mrb[194].mxu1 }
0x1009   : > { %v23564_v56 = vadd.f32 %v11712_v45, %v24148_v26  ;;  %v11715_v40 = vadd.f32 %v17821_v6, %v23397_v43  ;;  %17842 = vmatprep.mubr.msk.bf16.mxu1 %vm8047_vm8, %v23558_v55  ;;  %v11706_v41 = vpop.f32.mrb[195].mxu1 }
0x100a   : > { %v20098_v2 = vpop.eup %20097  ;;  %v23570_v63 = vadd.f32 %v11704_v32, %v24149_v50  ;;  %v11707_v35 = vadd.f32 %v23397_v43, %v11706_v41  ;;  %17843 = vmatmul.mubr.msk.bf16.gmra.mrb[212].mxu1 %vm8047_vm8, %v23561_v61 }
0x100b   : > { %v20100_v38 = vpop.eup %20099  ;;  %v11992_v47 = vmul.f32 %v20098_v2, %v23489_v24  ;;  %v15271_v53 = vmul.f32 -1.442695, %v23564_v56  ;;  %v23578_v60 = vadd.f32 %v11715_v40, %v24150_v37  ;;  %v12054_v44 = vld [vmem:[#allocation2 + $0xc0] sm:$0xff] }
0x100c   : > { %v20102_v11 = vpop.eup %20101  ;;  %v11990_v39 = vmul.f32 %v20100_v38, %v23494_v10  ;;  %v15269_v27 = vmul.f32 -1.442695, %v23570_v63  ;;  %v23583_v36 = vadd.f32 %v11707_v35, %v24151_v42  ;;  %v12052_v8 = vld [vmem:[#allocation2 + $0xa8] sm:$0xff] }
0x100d   : > { %v20104_v4 = vpop.eup %20103  ;;  %12024 = vst.msk [vmem:[#allocation2 + $0xf1] sm:$0xff] %vm8047_vm8, %v11992_v47  ;;  %v11993_v3 = vmul.f32 %v20102_v11, %v23499_v49  ;;  %20105 = vpow2.f32 %v15271_v53  ;;  %v15272_v24 = vmul.f32 -1.442695, %v23578_v60  ;;  %v12055_v17 = vld [vmem:[#allocation2 + $0xc8] sm:$0xff]  ;;  %v24156_v53 = vld [vmem:[#allocation17_spill] sm:$0xff] }
0x100e   : > { %12022 = vst.msk [vmem:[#allocation2 + $0xd9] sm:$0xff] %vm8047_vm8, %v11990_v39  ;;  %v11991_v1 = vmul.f32 %v20104_v4, %v23503_v29  ;;  %20107 = vpow2.f32 %v15269_v27  ;;  %v15270_v10 = vmul.f32 -1.442695, %v23583_v36  ;;  %v17824_v14 = vpop.f32.mrb[196].mxu1  ;;  %v12053_v46 = vld [vmem:[#allocation2 + $0xb0] sm:$0xff]  ;;  %v23597_v25 = vpack.c.bf16 %v12055_v17, %v12054_v44 }
0x100f   : > { %12025 = vst.msk [vmem:[#allocation2 + $0xf9] sm:$0xff] %vm8047_vm8, %v11993_v3  ;;  %20109 = vpow2.f32 %v15272_v24  ;;  %v11728_v54 = vadd.f32 %v17824_v14, %v23397_v43  ;;  %v11719_v49 = vpop.f32.mrb[197].mxu1  ;;  %v23593_v5 = vpack.c.bf16 %v12053_v46, %v12052_v8  ;;  %v24157_v3 = vld [vmem:[#allocation18_spill] sm:$0xff]  ;;  %v24158_v14 = vld [vmem:[#allocation19_spill] sm:$0xff] }
0x1010   : > { %12023 = vst.msk [vmem:[#allocation2 + $0xe1] sm:$0xff] %vm8047_vm8, %v11991_v1  ;;  %20111 = vpow2.f32 %v15270_v10  ;;  %v11720_v29 = vadd.f32 %v23397_v43, %v11719_v49  ;;  %v17825_v57 = vpop.f32.mrb[198].mxu1 }
0x1011   : > { %v23600_v18 = vadd.f32 %v11728_v54, %v24152_v62  ;;  %v11731_v23 = vadd.f32 %v17825_v57, %v23397_v43  ;;  %17846 = vmatprep.mubr.msk.bf16.mxu1 %vm8047_vm8, %v23593_v5  ;;  %v11722_v58 = vpop.f32.mrb[199].mxu1  ;;  %v24159_v54 = vld [vmem:[#allocation20_spill] sm:$0xff] }
0x1012   : > { %v23606_v15 = vadd.f32 %v11720_v29, %v24153_v12  ;;  %v11723_v7 = vadd.f32 %v23397_v43, %v11722_v58  ;;  %17847 = vmatmul.mubr.msk.bf16.gmra.mrb[216].mxu1 %vm8047_vm8, %v23597_v25 }
0x1013   : > { %v15275_v59 = vmul.f32 -1.442695, %v23600_v18  ;;  %v23613_v28 = vadd.f32 %v11731_v23, %v24154_v52 }
0x1014   : > { %v15273_v19 = vmul.f32 -1.442695, %v23606_v15  ;;  %v23617_v34 = vadd.f32 %v11723_v7, %v24155_v21  ;;  %v12058_v35 = vld [vmem:[#allocation2 + $0xf0] sm:$0xff] }
0x1015   : > { %20113 = vpow2.f32 %v15275_v59  ;;  %v15276_v0 = vmul.f32 -1.442695, %v23613_v28  ;;  %v12056_v32 = vld [vmem:[#allocation2 + $0xd8] sm:$0xff] }
0x1016   : > { %20115 = vpow2.f32 %v15273_v19  ;;  %v15274_v33 = vmul.f32 -1.442695, %v23617_v34  ;;  %v17828_v30 = vpop.f32.mrb[200].mxu1  ;;  %v12059_v31 = vld [vmem:[#allocation2 + $0xf8] sm:$0xff] }
0x1017   : > { %v20106_v45 = vpop.eup %20105  ;;  %20117 = vpow2.f32 %v15276_v0  ;;  %v11744_v9 = vadd.f32 %v17828_v30, %v23397_v43  ;;  %v11735_v22 = vpop.f32.mrb[201].mxu1  ;;  %v12057_v6 = vld [vmem:[#allocation2 + $0xe0] sm:$0xff]  ;;  %v23629_v27 = vpack.c.bf16 %v12059_v31, %v12058_v35 }
0x1018   : > { %v20108_v26 = vpop.eup %20107  ;;  %v11900_v40 = vadd.f32 1.0, %v20106_v45  ;;  %20119 = vpow2.f32 %v15274_v33  ;;  %v11736_v41 = vadd.f32 %v23397_v43, %v11735_v22  ;;  %v17829_v2 = vpop.f32.mrb[202].mxu1  ;;  %v23623_v50 = vpack.c.bf16 %v12057_v6, %v12056_v32 }
0x1019   : > { %v20110_v38 = vpop.eup %20109  ;;  %v11898_v47 = vadd.f32 1.0, %v20108_v26  ;;  %v23626_v37 = vadd.f32 %v11744_v9, %v24156_v53  ;;  %v11747_v11 = vadd.f32 %v17829_v2, %v23397_v43  ;;  %v11738_v39 = vpop.f32.mrb[203].mxu1 }
0x101a   : > { %v20112_v42 = vpop.eup %20111  ;;  %20121 = vrcp.f32 %v11900_v40  ;;  %v11901_v4 = vadd.f32 1.0, %v20110_v38  ;;  %v23632_v24 = vadd.f32 %v11736_v41, %v24157_v3  ;;  %17850 = vmatprep.mubr.msk.bf16.mxu1 %vm8047_vm8, %v23623_v50  ;;  %v11739_v17 = vadd.f32 %v23397_v43, %v11738_v39 }
0x101b   : > { %20123 = vrcp.f32 %v11898_v47  ;;  %v11899_v1 = vadd.f32 1.0, %v20112_v42  ;;  %v15279_v10 = vmul.f32 -1.442695, %v23626_v37  ;;  %v23639_v8 = vadd.f32 %v11747_v11, %v24158_v14  ;;  %17851 = vmatmul.mubr.msk.bf16.gmra.mrb[220].mxu1 %vm8047_vm8, %v23629_v27 }
0x101c   : > { %20125 = vrcp.f32 %v11901_v4  ;;  %v15277_v46 = vmul.f32 -1.442695, %v23632_v24  ;;  %v23645_v49 = vadd.f32 %v11739_v17, %v24159_v54 }
0x101d   : > { %20127 = vrcp.f32 %v11899_v1  ;;  %v15280_v44 = vmul.f32 -1.442695, %v23639_v8 }
0x101e   : > { %20129 = vpow2.f32 %v15279_v10  ;;  %v15278_v43 = vmul.f32 -1.442695, %v23645_v49 }
0x101f   : > { %v20114_v29 = vpop.eup %20113  ;;  %20131 = vpow2.f32 %v15277_v46 }
0x1020   : > { %v20116_v57 = vpop.eup %20115  ;;  %v11904_v62 = vadd.f32 1.0, %v20114_v29  ;;  %20133 = vpow2.f32 %v15280_v44 }
0x1021   : > { %v20118_v23 = vpop.eup %20117  ;;  %v11902_v58 = vadd.f32 1.0, %v20116_v57  ;;  %20135 = vpow2.f32 %v15278_v43 }
0x1022   : > { %v20120_v12 = vpop.eup %20119  ;;  %20137 = vrcp.f32 %v11904_v62  ;;  %v11905_v7 = vadd.f32 1.0, %v20118_v23 }
0x1023   : > { %20139 = vrcp.f32 %v11902_v58  ;;  %v11903_v59 = vadd.f32 1.0, %v20120_v12 }
0x1024   : > { %v20122_v52 = vpop.eup %20121  ;;  %20141 = vrcp.f32 %v11905_v7 }
0x1025   : > { %v20124_v19 = vpop.eup %20123  ;;  %v11996_v21 = vmul.f32 %v20122_v52, %v23564_v56  ;;  %20143 = vrcp.f32 %v11903_v59  ;;  %v19624_v52 = vld [vmem:[%s24077_s22 + $0x68] sm:$0xff]  }
0x1026   : > { %v20126_v0 = vpop.eup %20125  ;;  %v11994_v33 = vmul.f32 %v20124_v19, %v23570_v63  ;;  %v19625_v19 = vld [vmem:[%s24077_s22 + $0x10] sm:$0xff]  }
0x1027   : > { %v20128_v30 = vpop.eup %20127  ;;  %12028 = vst.msk [vmem:[#allocation2 + $0x121] sm:$0xff] %vm8047_vm8, %v11996_v21  ;;  %v11997_v31 = vmul.f32 %v20126_v0, %v23578_v60  ;;  %v12715_v0 = vld [vmem:[#allocation2 + $0x31] sm:$0xff] }
0x1028   : > { %v20130_v45 = vpop.eup %20129  ;;  %12026 = vst.msk [vmem:[#allocation2 + $0x109] sm:$0xff] %vm8047_vm8, %v11994_v33  ;;  %v11995_v9 = vmul.f32 %v20128_v30, %v23583_v36  ;;  %v19628_v33 = vld [vmem:[%s24077_s22 + $0x48] sm:$0xff]  }
0x1029   : > { %v20132_v22 = vpop.eup %20131  ;;  %12029 = vst.msk [vmem:[#allocation2 + $0x129] sm:$0xff] %vm8047_vm8, %v11997_v31  ;;  %v11908_v32 = vadd.f32 1.0, %v20130_v45  ;;  %v19629_v31 = vld [vmem:[%s24077_s22 + $0x70] sm:$0xff]  }
0x102a   : > { %v20134_v6 = vpop.eup %20133  ;;  %12027 = vst.msk [vmem:[#allocation2 + $0x111] sm:$0xff] %vm8047_vm8, %v11995_v9  ;;  %v11906_v56 = vadd.f32 1.0, %v20132_v22  ;;  %v12718_v45 = vld [vmem:[#allocation2 + $0x51] sm:$0xff]  ;;  %v12720_v9 = vld [vmem:[#allocation2 + $0x69] sm:$0xff] }
0x102b   : > { %v20136_v26 = vpop.eup %20135  ;;  %20145 = vrcp.f32 %v11908_v32  ;;  %v11909_v63 = vadd.f32 1.0, %v20134_v6  ;;  %v12717_v22 = vld [vmem:[#allocation2 + $0x49] sm:$0xff]  ;;  %v12719_v6 = vld [vmem:[#allocation2 + $0x61] sm:$0xff] }
0x102c   : > { %v20138_v40 = vpop.eup %20137  ;;  %20147 = vrcp.f32 %v11906_v56  ;;  %v11907_v41 = vadd.f32 1.0, %v20136_v26  ;;  %v23768_v32 = vpack.c.bf16 %v12718_v45, %v12717_v22  ;;  %v23770_v56 = vpack.c.bf16 %v12720_v9, %v12719_v6  ;;  %v12722_v26 = vld [vmem:[#allocation2 + $0x81] sm:$0xff]  ;;  %v13461_v6 = vld [vmem:[#allocation2 + $0x92] sm:$0xff] }
0x102d   : > { %v20140_v60 = vpop.eup %20139  ;;  %v12000_v2 = vmul.f32 %v20138_v40, %v23600_v18  ;;  %20149 = vrcp.f32 %v11909_v63  ;;  %v12724_v63 = vld [vmem:[#allocation2 + $0x99] sm:$0xff] }
0x102e   : > { %v20142_v35 = vpop.eup %20141  ;;  %v11998_v36 = vmul.f32 %v20140_v60, %v23606_v15  ;;  %20151 = vrcp.f32 %v11907_v41  ;;  %v12062_v15 = vld [vmem:[#allocation2 + $0x120] sm:$0xff]  ;;  %v12723_v60 = vld [vmem:[#allocation2 + $0x91] sm:$0xff] }
0x102f   : > { %v20144_v38 = vpop.eup %20143  ;;  %12032 = vst.msk [vmem:[#allocation2 + $0x151] sm:$0xff] %vm8047_vm8, %v12000_v2  ;;  %v12001_v47 = vmul.f32 %v20142_v35, %v23613_v28  ;;  %v12060_v39 = vld [vmem:[#allocation2 + $0x108] sm:$0xff]  ;;  %v12721_v40 = vld [vmem:[#allocation2 + $0x79] sm:$0xff]  ;;  %v23778_v2 = vpack.c.bf16 %v12724_v63, %v12723_v60  ;;  %v12726_v35 = vld [vmem:[#allocation2 + $0xb1] sm:$0xff] }
0x1030   : > { %12030 = vst.msk [vmem:[#allocation2 + $0x139] sm:$0xff] %vm8047_vm8, %v11998_v36  ;;  %v11999_v53 = vmul.f32 %v20144_v38, %v23617_v34  ;;  %v12063_v11 = vld [vmem:[#allocation2 + $0x128] sm:$0xff]  ;;  %v23776_v41 = vpack.c.bf16 %v12722_v26, %v12721_v40  ;;  %v13459_v22 = vld [vmem:[#allocation2 + $0x7a] sm:$0xff] }
0x1031   : > { %12033 = vst.msk [vmem:[#allocation2 + $0x159] sm:$0xff] %vm8047_vm8, %v12001_v47  ;;  %v12061_v42 = vld [vmem:[#allocation2 + $0x110] sm:$0xff]  ;;  %v23667_v4 = vpack.c.bf16 %v12063_v11, %v12062_v15  ;;  %v13465_v60 = vld [vmem:[#allocation2 + $0xc2] sm:$0xff] }
0x1032   : > { %12031 = vst.msk [vmem:[#allocation2 + $0x141] sm:$0xff] %vm8047_vm8, %v11999_v53  ;;  %v23665_v18 = vpack.c.bf16 %v12061_v42, %v12060_v39  ;;  %v12728_v36 = vld [vmem:[#allocation2 + $0xc9] sm:$0xff]  ;;  %v12727_v53 = vld [vmem:[#allocation2 + $0xc1] sm:$0xff]  ;;  %v12732_v42 = vld [vmem:[#allocation2 + $0xf9] sm:$0xff] }
0x1033   : > { %v12725_v38 = vld [vmem:[#allocation2 + $0xa9] sm:$0xff]  ;;  %v23786_v11 = vpack.c.bf16 %v12728_v36, %v12727_v53  ;;  %v12730_v39 = vld [vmem:[#allocation2 + $0xe1] sm:$0xff]  ;;  %v13469_v53 = vld [vmem:[#allocation2 + $0xf2] sm:$0xff] }
0x1034   : > { %17854 = vmatprep.mubr.msk.bf16.mxu1 %vm8047_vm8, %v23665_v18  ;;  %v23784_v47 = vpack.c.bf16 %v12726_v35, %v12725_v38  ;;  %v13463_v40 = vld [vmem:[#allocation2 + $0xaa] sm:$0xff]  ;;  %v13467_v38 = vld [vmem:[#allocation2 + $0xda] sm:$0xff] }
0x1035   : > { %v20146_v28 = vpop.eup %20145  ;;  %17855 = vmatmul.mubr.msk.bf16.gmra.mrb[224].mxu1 %vm8047_vm8, %v23667_v4 }
0x1036   : > { %v20148_v34 = vpop.eup %20147  ;;  %v12004_v3 = vmul.f32 %v20146_v28, %v23626_v37  ;;  %v12066_v57 = vld [vmem:[#allocation2 + $0x150] sm:$0xff] }
0x1037   : > { %v20150_v17 = vpop.eup %20149  ;;  %v12002_v1 = vmul.f32 %v20148_v34, %v23632_v24  ;;  %v12064_v44 = vld [vmem:[#allocation2 + $0x138] sm:$0xff]  ;;  %v12038_v24 = vld [vmem:[#allocation2] sm:$0xff] }
0x1038   : > { %v20152_v10 = vpop.eup %20151  ;;  %12036 = vst.msk [vmem:[#allocation2 + $0x181] sm:$0xff] %vm8047_vm8, %v12004_v3  ;;  %v12005_v14 = vmul.f32 %v20150_v17, %v23639_v8  ;;  %v12067_v46 = vld [vmem:[#allocation2 + $0x158] sm:$0xff]  ;;  %v12039_v8 = vld [vmem:[#allocation2 + $0x8] sm:$0xff] }
0x1039   : > { %12034 = vst.msk [vmem:[#allocation2 + $0x169] sm:$0xff] %vm8047_vm8, %v12002_v1  ;;  %v12003_v54 = vmul.f32 %v20152_v10, %v23645_v49  ;;  %v12065_v43 = vld [vmem:[#allocation2 + $0x140] sm:$0xff]  ;;  %v12088_v37 = vpack.c.bf16 %v12067_v46, %v12066_v57  ;;  %v12074_v7 = vpack.c.bf16 %v12039_v8, %v12038_v24  ;;  %v12734_v34 = vld [vmem:[#allocation2 + $0x111] sm:$0xff]  ;;  %v12736_v3 = vld [vmem:[#allocation2 + $0x129] sm:$0xff] }
0x103a   : > { %12037 = vst.msk [vmem:[#allocation2 + $0x189] sm:$0xff] %vm8047_vm8, %v12005_v14  ;;  %v12087_v29 = vpack.c.bf16 %v12065_v43, %v12064_v44  ;;  %v12733_v17 = vld [vmem:[#allocation2 + $0x109] sm:$0xff]  ;;  %v12735_v10 = vld [vmem:[#allocation2 + $0x121] sm:$0xff]  ;;  %v12737_v44 = vld [vmem:[#allocation2 + $0x139] sm:$0xff] }
0x103b   : > { %12035 = vst.msk [vmem:[#allocation2 + $0x171] sm:$0xff] %vm8047_vm8, %v12003_v54  ;;  %v12758_v1 = vpack.c.bf16 %v12734_v34, %v12733_v17  ;;  %v12759_v14 = vpack.c.bf16 %v12736_v3, %v12735_v10  ;;  %v12738_v46 = vld [vmem:[#allocation2 + $0x141] sm:$0xff]  ;;  %v12740_v54 = vld [vmem:[#allocation2 + $0x159] sm:$0xff] }
0x103c   : > { %17858 = vmatprep.mubr.msk.bf16.mxu1 %vm8047_vm8, %v12087_v29  ;;  %v12760_v43 = vpack.c.bf16 %v12738_v46, %v12737_v44  ;;  %v13475_v17 = vld [vmem:[#allocation2 + $0x13a] sm:$0xff]  ;;  %v13477_v10 = vld [vmem:[#allocation2 + $0x152] sm:$0xff] }
0x103d   : > { %17859 = vmatmul.mubr.msk.bf16.gmra.mrb[228].mxu1 %vm8047_vm8, %v12088_v37 }
0x103f   : > { %v12070_v49 = vld [vmem:[#allocation2 + $0x180] sm:$0xff] }
0x1040   : > { %v12068_v23 = vld [vmem:[#allocation2 + $0x168] sm:$0xff] }
0x1041   : > { %v12071_v62 = vld [vmem:[#allocation2 + $0x188] sm:$0xff] }
0x1042   : > { %v12069_v58 = vld [vmem:[#allocation2 + $0x170] sm:$0xff]  ;;  %v12090_v59 = vpack.c.bf16 %v12071_v62, %v12070_v49  ;;  %v19630_v62 = vld [vmem:[%s24077_s22 + $0x78] sm:$0xff]  }
0x1043   : > { %v12089_v12 = vpack.c.bf16 %v12069_v58, %v12068_v23  ;;  %v12741_v24 = vld [vmem:[#allocation2 + $0x169] sm:$0xff]  ;;  %v19631_v23 = vld [vmem:[%s24077_s22 + $0x20] sm:$0xff]  }
0x1044   : > { %v12744_v58 = vld [vmem:[#allocation2 + $0x189] sm:$0xff] }
0x1045   : > { %17862 = vmatprep.mubr.msk.bf16.mxu1 %vm8047_vm8, %v12089_v12  ;;  %v13479_v44 = vld [vmem:[#allocation2 + $0x16a] sm:$0xff] }
0x1046   : > { %17863 = vmatmul.mubr.msk.bf16.gmra.mrb[232].mxu1 %vm8047_vm8, %v12090_v59 }
0x1047   : > { %17870 = vmatprep.mubr.msk.bf16.mxu1 %vm8047_vm8, %v12074_v7  ;;  %v19632_v7 = vld [vmem:[%s24077_s22 + $0x28] sm:$0xff]  }
0x104e   : > { %17871 = vmatmul.mubr.msk.bf16.vlgmr.msra.gmra.mrb[204].mxu1 %vm8047_vm8, %v23515_v16  ;;  %v19626_v16 = vld [vmem:[%s24077_s22 + $0x18] sm:$0xff]  }
0x104f   : > { %17874 = vmatprep.mubr.msk.bf16.mxu1 %vm8047_vm8, %v23517_v13  ;;  %17903 = vmatpush3.bf16.msra.mxu1 %v23532_v48  ;;  %v19627_v48 = vld [vmem:[%s24077_s22 + $0x40] sm:$0xff]  }
0x1050   : > { %17904 = vmatprep.subr.bf16.mxu1 %v19624_v52 }
0x1053   : > { %17905 = vmatpush3.bf16.msra.mxu1 %v19624_v52  ;;  %v12745_v52 = vld [vmem:[#allocation2 + $0x199] sm:$0xff] }
0x1054   : > { %17938 = vmatprep.subr.bf16.mxu1 %v19625_v19 }
0x1056   : > { %17875 = vmatmul.mubr.msk.bf16.gmra.mrb[208].mxu1 %vm8047_vm8, %v23539_v20 }
0x1057   : > { %17878 = vmatprep.mubr.msk.bf16.mxu1 %vm8047_vm8, %v23542_v51 }
0x105e   : > { %17879 = vmatmul.mubr.msk.bf16.gmra.mrb[212].mxu1 %vm8047_vm8, %v23558_v55 }
0x105f   : > { %17882 = vmatprep.mubr.msk.bf16.mxu1 %vm8047_vm8, %v23561_v61 }
0x1066   : > { %17883 = vmatmul.mubr.msk.bf16.gmra.mrb[216].mxu1 %vm8047_vm8, %v23593_v5 }
0x1067   : > { %17886 = vmatprep.mubr.msk.bf16.mxu1 %vm8047_vm8, %v23597_v25 }
0x106e   : > { %17887 = vmatmul.mubr.msk.bf16.gmra.mrb[220].mxu1 %vm8047_vm8, %v23623_v50 }
0x106f   : > { %17890 = vmatprep.mubr.msk.bf16.mxu1 %vm8047_vm8, %v23629_v27 }
0x1076   : > { %17891 = vmatmul.mubr.msk.bf16.gmra.mrb[224].mxu1 %vm8047_vm8, %v23665_v18 }
0x1077   : > { %17894 = vmatprep.mubr.msk.bf16.mxu1 %vm8047_vm8, %v23667_v4 }
0x107e   : > { %17895 = vmatmul.mubr.msk.bf16.gmra.mrb[228].mxu1 %vm8047_vm8, %v12087_v29 }
0x107f   : > { %17898 = vmatprep.mubr.msk.bf16.mxu1 %vm8047_vm8, %v12088_v37 }
0x1086   : > { %17899 = vmatmul.mubr.msk.bf16.gmra.mrb[232].mxu1 %vm8047_vm8, %v12089_v12 }
0x1087   : > { %17906 = vmatprep.mubr.msk.bf16.mxu1 %vm8047_vm8, %v23517_v13  ;;  %v12072_v13 = vld [vmem:[#allocation2 + $0x198] sm:$0xff] }
0x108e   : > { %17907 = vmatmul.mubr.msk.bf16.vlgmr.msra.gmra.mrb[204].mxu1 %vm8047_vm8, %v23539_v20  ;;  %v12073_v20 = vld [vmem:[#allocation2 + $0x1a0] sm:$0xff] }
0x108f   : > { %17910 = vmatprep.mubr.msk.bf16.mxu1 %vm8047_vm8, %v23542_v51  ;;  %17939 = vmatpush3.bf16.msra.mxu1 %v19625_v19  ;;  %v12711_v51 = vld [vmem:[#allocation2 + $0x1] sm:$0xff] }
0x1090   : > { %17940 = vmatprep.subr.bf16.mxu1 %v19626_v16  ;;  %v12746_v19 = vld [vmem:[#allocation2 + $0x1a1] sm:$0xff] }
0x1093   : > { %17941 = vmatpush3.bf16.msra.mxu1 %v19626_v16  ;;  %v13449_v16 = vld [vmem:[#allocation2 + $0x2] sm:$0xff] }
0x1094   : > { %17974 = vmatprep.subr.bf16.mxu1 %v19627_v48 }
0x1096   : > { %17911 = vmatmul.mubr.msk.bf16.gmra.mrb[208].mxu1 %vm8047_vm8, %v23558_v55  ;;  %v12712_v55 = vld [vmem:[#allocation2 + $0x9] sm:$0xff] }
0x1097   : > { %17914 = vmatprep.mubr.msk.bf16.mxu1 %vm8047_vm8, %v23561_v61  ;;  %v12091_v61 = vpack.c.bf16 %v12073_v20, %v12072_v13  ;;  %v12764_v13 = vpack.c.bf16 %v12746_v19, %v12745_v52 }
0x109e   : > { %17915 = vmatmul.mubr.msk.bf16.gmra.mrb[212].mxu1 %vm8047_vm8, %v23593_v5  ;;  %v12747_v5 = vpack.c.bf16 %v12712_v55, %v12711_v51  ;;  %v13451_v51 = vld [vmem:[#allocation2 + $0x1a] sm:$0xff]  ;;  %v13452_v55 = vld [vmem:[#allocation2 + $0x22] sm:$0xff] }
0x109f   : > { %17918 = vmatprep.mubr.msk.bf16.mxu1 %vm8047_vm8, %v23597_v25  ;;  %v12714_v25 = vld [vmem:[#allocation2 + $0x21] sm:$0xff] }
0x10a6   : > { %17919 = vmatmul.mubr.msk.bf16.gmra.mrb[216].mxu1 %vm8047_vm8, %v23623_v50  ;;  %v12716_v50 = vld [vmem:[#allocation2 + $0x39] sm:$0xff] }
0x10a7   : > { %17922 = vmatprep.mubr.msk.bf16.mxu1 %vm8047_vm8, %v23629_v27  ;;  %v12713_v27 = vld [vmem:[#allocation2 + $0x19] sm:$0xff]  ;;  %v23759_v30 = vpack.c.bf16 %v12716_v50, %v12715_v0  ;;  %v13455_v0 = vld [vmem:[#allocation2 + $0x4a] sm:$0xff] }
0x10a8   : > { %v23754_v21 = vpack.c.bf16 %v12714_v25, %v12713_v27  ;;  %v13486_v25 = vpack.c.bf16 %v13452_v55, %v13451_v51  ;;  %v19634_v50 = vld [vmem:[%s24077_s22 + $0x58] sm:$0xff]  }
0x10ae   : > { %17923 = vmatmul.mubr.msk.bf16.gmra.mrb[220].mxu1 %vm8047_vm8, %v23665_v18  ;;  %v12729_v18 = vld [vmem:[#allocation2 + $0xd9] sm:$0xff] }
0x10af   : > { %17926 = vmatprep.mubr.msk.bf16.mxu1 %vm8047_vm8, %v23667_v4  ;;  %v23792_v15 = vpack.c.bf16 %v12730_v39, %v12729_v18  ;;  %v12731_v4 = vld [vmem:[#allocation2 + $0xf1] sm:$0xff] }
0x10b0   : > { %v12757_v28 = vpack.c.bf16 %v12732_v42, %v12731_v4  ;;  %v13471_v18 = vld [vmem:[#allocation2 + $0x10a] sm:$0xff]  ;;  %v13473_v4 = vld [vmem:[#allocation2 + $0x122] sm:$0xff] }
0x10b6   : > { %17927 = vmatmul.mubr.msk.bf16.gmra.mrb[224].mxu1 %vm8047_vm8, %v12087_v29  ;;  %v12739_v29 = vld [vmem:[#allocation2 + $0x151] sm:$0xff] }
0x10b7   : > { %17930 = vmatprep.mubr.msk.bf16.mxu1 %vm8047_vm8, %v12088_v37  ;;  %v12761_v57 = vpack.c.bf16 %v12740_v54, %v12739_v29  ;;  %v12742_v37 = vld [vmem:[#allocation2 + $0x171] sm:$0xff] }
0x10b8   : > { %v12762_v8 = vpack.c.bf16 %v12742_v37, %v12741_v24  ;;  %v13481_v37 = vld [vmem:[#allocation2 + $0x182] sm:$0xff]  ;;  %v13482_v24 = vld [vmem:[#allocation2 + $0x18a] sm:$0xff] }
0x10be   : > { %17931 = vmatmul.mubr.msk.bf16.gmra.mrb[228].mxu1 %vm8047_vm8, %v12089_v12  ;;  %v12743_v12 = vld [vmem:[#allocation2 + $0x181] sm:$0xff] }
0x10bf   : > { %17934 = vmatprep.mubr.msk.bf16.mxu1 %vm8047_vm8, %v12090_v59  ;;  %v12763_v49 = vpack.c.bf16 %v12744_v58, %v12743_v12  ;;  %v19633_v59 = vld [vmem:[%s24077_s22 + $0x50] sm:$0xff]   ;;  %v23948_v12 = vld [vmem:[%s24078_s23] ss:$0 sm:$0xff] }
0x10c6   : > { %17935 = vmatmul.mubr.msk.bf16.gmra.mrb[232].mxu1 %vm8047_vm8, %v12091_v61  ;;  %v13453_v61 = vld [vmem:[#allocation2 + $0x32] sm:$0xff] }
0x10c7   : > { %17942 = vmatprep.mubr.msk.bf16.mxu1 %vm8047_vm8, %v12747_v5  ;;  %v13454_v5 = vld [vmem:[#allocation2 + $0x3a] sm:$0xff] }
0x10c8   : > { %v23867_v27 = vpack.c.bf16 %v13454_v5, %v13453_v61 }
0x10ce   : > { %17943 = vmatmul.mubr.msk.bf16.vlgmr.msra.gmra.mrb[204].mxu1 %vm8047_vm8, %v23754_v21 }
0x10cf   : > { %17946 = vmatprep.mubr.msk.bf16.mxu1 %vm8047_vm8, %v23759_v30  ;;  %17975 = vmatpush3.bf16.msra.mxu1 %v19627_v48  ;;  %v13450_v48 = vld [vmem:[#allocation2 + $0xa] sm:$0xff] }
0x10d0   : > { %17976 = vmatprep.subr.bf16.mxu1 %v19628_v33  ;;  %v13485_v20 = vpack.c.bf16 %v13450_v48, %v13449_v16 }
0x10d3   : > { %17977 = vmatpush3.bf16.msra.mxu1 %v19628_v33  ;;  %v13456_v33 = vld [vmem:[#allocation2 + $0x52] sm:$0xff] }
0x10d4   : > { %18010 = vmatprep.subr.bf16.mxu1 %v19629_v31  ;;  %v23875_v45 = vpack.c.bf16 %v13456_v33, %v13455_v0 }
0x10d6   : > { %17947 = vmatmul.mubr.msk.bf16.gmra.mrb[208].mxu1 %vm8047_vm8, %v23768_v32 }
0x10d7   : > { %17950 = vmatprep.mubr.msk.bf16.mxu1 %vm8047_vm8, %v23770_v56 }
0x10de   : > { %17951 = vmatmul.mubr.msk.bf16.gmra.mrb[212].mxu1 %vm8047_vm8, %v23776_v41 }
0x10df   : > { %17954 = vmatprep.mubr.msk.bf16.mxu1 %vm8047_vm8, %v23778_v2 }
0x10e6   : > { %17955 = vmatmul.mubr.msk.bf16.gmra.mrb[216].mxu1 %vm8047_vm8, %v23784_v47 }
0x10e7   : > { %17958 = vmatprep.mubr.msk.bf16.mxu1 %vm8047_vm8, %v23786_v11 }
0x10ee   : > { %17959 = vmatmul.mubr.msk.bf16.gmra.mrb[220].mxu1 %vm8047_vm8, %v23792_v15 }
0x10ef   : > { %17962 = vmatprep.mubr.msk.bf16.mxu1 %vm8047_vm8, %v12757_v28 }
0x10f6   : > { %17963 = vmatmul.mubr.msk.bf16.gmra.mrb[224].mxu1 %vm8047_vm8, %v12758_v1 }
0x10f7   : > { %17966 = vmatprep.mubr.msk.bf16.mxu1 %vm8047_vm8, %v12759_v14 }
0x10fe   : > { %17967 = vmatmul.mubr.msk.bf16.gmra.mrb[228].mxu1 %vm8047_vm8, %v12760_v43 }
0x10ff   : > { %17970 = vmatprep.mubr.msk.bf16.mxu1 %vm8047_vm8, %v12761_v57 }
0x1106   : > { %17971 = vmatmul.mubr.msk.bf16.gmra.mrb[232].mxu1 %vm8047_vm8, %v12762_v8 }
0x1107   : > { %17978 = vmatprep.mubr.msk.bf16.mxu1 %vm8047_vm8, %v23754_v21  ;;  %v19635_v21 = vld [vmem:[%s24077_s22 + $0x80] sm:$0xff]  }
0x110e   : > { %17979 = vmatmul.mubr.msk.bf16.vlgmr.msra.gmra.mrb[204].mxu1 %vm8047_vm8, %v23759_v30 }
0x110f   : > { %17982 = vmatprep.mubr.msk.bf16.mxu1 %vm8047_vm8, %v23768_v32  ;;  %18011 = vmatpush3.bf16.msra.mxu1 %v19629_v31  ;;  %v13458_v31 = vld [vmem:[#allocation2 + $0x6a] sm:$0xff] }
0x1110   : > { %18012 = vmatprep.subr.bf16.mxu1 %v19630_v62 }
0x1113   : > { %18013 = vmatpush3.bf16.msra.mxu1 %v19630_v62  ;;  %v13483_v62 = vld [vmem:[#allocation2 + $0x19a] sm:$0xff] }
0x1114   : > { %18046 = vmatprep.subr.bf16.mxu1 %v19631_v23 }
0x1116   : > { %17983 = vmatmul.mubr.msk.bf16.gmra.mrb[208].mxu1 %vm8047_vm8, %v23770_v56 }
0x1117   : > { %17986 = vmatprep.mubr.msk.bf16.mxu1 %vm8047_vm8, %v23776_v41 }
0x111e   : > { %17987 = vmatmul.mubr.msk.bf16.gmra.mrb[212].mxu1 %vm8047_vm8, %v23778_v2 }
0x111f   : > { %17990 = vmatprep.mubr.msk.bf16.mxu1 %vm8047_vm8, %v23784_v47 }
0x1126   : > { %17991 = vmatmul.mubr.msk.bf16.gmra.mrb[216].mxu1 %vm8047_vm8, %v23786_v11 }
0x1127   : > { %17994 = vmatprep.mubr.msk.bf16.mxu1 %vm8047_vm8, %v23792_v15 }
0x112e   : > { %17995 = vmatmul.mubr.msk.bf16.gmra.mrb[220].mxu1 %vm8047_vm8, %v12757_v28 }
0x112f   : > { %17998 = vmatprep.mubr.msk.bf16.mxu1 %vm8047_vm8, %v12758_v1 }
0x1136   : > { %17999 = vmatmul.mubr.msk.bf16.gmra.mrb[224].mxu1 %vm8047_vm8, %v12759_v14 }
0x1137   : > { %18002 = vmatprep.mubr.msk.bf16.mxu1 %vm8047_vm8, %v12760_v43 }
0x113e   : > { %18003 = vmatmul.mubr.msk.bf16.gmra.mrb[228].mxu1 %vm8047_vm8, %v12761_v57 }
0x113f   : > { %18006 = vmatprep.mubr.msk.bf16.mxu1 %vm8047_vm8, %v12762_v8 }
0x1146   : > { %18007 = vmatmul.mubr.msk.bf16.gmra.mrb[232].mxu1 %vm8047_vm8, %v12763_v49 }
0x1147   : > { %18014 = vmatprep.mubr.msk.bf16.mxu1 %vm8047_vm8, %v23759_v30  ;;  %v13457_v30 = vld [vmem:[#allocation2 + $0x62] sm:$0xff] }
0x1148   : > { %v23877_v9 = vpack.c.bf16 %v13458_v31, %v13457_v30 }
0x114e   : > { %18015 = vmatmul.mubr.msk.bf16.vlgmr.msra.gmra.mrb[204].mxu1 %vm8047_vm8, %v23768_v32  ;;  %v13460_v32 = vld [vmem:[#allocation2 + $0x82] sm:$0xff] }
0x114f   : > { %18018 = vmatprep.mubr.msk.bf16.mxu1 %vm8047_vm8, %v23770_v56  ;;  %18047 = vmatpush3.bf16.msra.mxu1 %v19631_v23  ;;  %v13462_v56 = vld [vmem:[#allocation2 + $0x9a] sm:$0xff]  ;;  %v23883_v26 = vpack.c.bf16 %v13460_v32, %v13459_v22  ;;  %v13484_v23 = vld [vmem:[#allocation2 + $0x1a2] sm:$0xff] }
0x1150   : > { %18048 = vmatprep.subr.bf16.mxu1 %v19632_v7  ;;  %v23885_v63 = vpack.c.bf16 %v13462_v56, %v13461_v6  ;;  %v13502_v58 = vpack.c.bf16 %v13484_v23, %v13483_v62 }
0x1153   : > { %18049 = vmatpush3.bf16.msra.mxu1 %v19632_v7 }
0x1154   : > { %18082 = vmatprep.subr.bf16.mxu1 %v19633_v59 }
0x1156   : > { %18019 = vmatmul.mubr.msk.bf16.gmra.mrb[208].mxu1 %vm8047_vm8, %v23776_v41  ;;  %v13464_v41 = vld [vmem:[#allocation2 + $0xb2] sm:$0xff] }
0x1157   : > { %18022 = vmatprep.mubr.msk.bf16.mxu1 %vm8047_vm8, %v23778_v2  ;;  %v13466_v2 = vld [vmem:[#allocation2 + $0xca] sm:$0xff]  ;;  %v13492_v35 = vpack.c.bf16 %v13464_v41, %v13463_v40 }
0x1158   : > { %v13493_v36 = vpack.c.bf16 %v13466_v2, %v13465_v60 }
0x115e   : > { %18023 = vmatmul.mubr.msk.bf16.gmra.mrb[212].mxu1 %vm8047_vm8, %v23784_v47  ;;  %v13468_v47 = vld [vmem:[#allocation2 + $0xe2] sm:$0xff] }
0x115f   : > { %18026 = vmatprep.mubr.msk.bf16.mxu1 %vm8047_vm8, %v23786_v11  ;;  %v13470_v11 = vld [vmem:[#allocation2 + $0xfa] sm:$0xff]  ;;  %v13494_v39 = vpack.c.bf16 %v13468_v47, %v13467_v38 }
0x1160   : > { %v13495_v42 = vpack.c.bf16 %v13470_v11, %v13469_v53 }
0x1166   : > { %18027 = vmatmul.mubr.msk.bf16.gmra.mrb[216].mxu1 %vm8047_vm8, %v23792_v15  ;;  %v13472_v15 = vld [vmem:[#allocation2 + $0x112] sm:$0xff] }
0x1167   : > { %18030 = vmatprep.mubr.msk.bf16.mxu1 %vm8047_vm8, %v12757_v28  ;;  %v13474_v28 = vld [vmem:[#allocation2 + $0x12a] sm:$0xff]  ;;  %v13496_v34 = vpack.c.bf16 %v13472_v15, %v13471_v18 }
0x1168   : > { %v13497_v3 = vpack.c.bf16 %v13474_v28, %v13473_v4 }
0x116e   : > { %18031 = vmatmul.mubr.msk.bf16.gmra.mrb[220].mxu1 %vm8047_vm8, %v12758_v1  ;;  %v13476_v1 = vld [vmem:[#allocation2 + $0x142] sm:$0xff] }
0x116f   : > { %18034 = vmatprep.mubr.msk.bf16.mxu1 %vm8047_vm8, %v12759_v14  ;;  %v13478_v14 = vld [vmem:[#allocation2 + $0x15a] sm:$0xff]  ;;  %v13498_v46 = vpack.c.bf16 %v13476_v1, %v13475_v17 }
0x1170   : > { %v13499_v54 = vpack.c.bf16 %v13478_v14, %v13477_v10 }
0x1176   : > { %18035 = vmatmul.mubr.msk.bf16.gmra.mrb[224].mxu1 %vm8047_vm8, %v12760_v43  ;;  %v13480_v43 = vld [vmem:[#allocation2 + $0x172] sm:$0xff] }
0x1177   : > { %18038 = vmatprep.mubr.msk.bf16.mxu1 %vm8047_vm8, %v12761_v57  ;;  %v13500_v29 = vpack.c.bf16 %v13480_v43, %v13479_v44  ;;  %v19636_v57 = vld [vmem:[%s24077_s22 + $0x88] sm:$0xff]  }
0x117e   : > { %18039 = vmatmul.mubr.msk.bf16.gmra.mrb[228].mxu1 %vm8047_vm8, %v12762_v8  ;;  %v13501_v8 = vpack.c.bf16 %v13482_v24, %v13481_v37 }
0x117f   : > { %18042 = vmatprep.mubr.msk.bf16.mxu1 %vm8047_vm8, %v12763_v49 }
0x1186   : > { %18043 = vmatmul.mubr.msk.bf16.gmra.mrb[232].mxu1 %vm8047_vm8, %v12764_v13 }
0x1187   : > { %18050 = vmatprep.mubr.msk.bf16.mxu1 %vm8047_vm8, %v13485_v20 }
0x118e   : > { %18051 = vmatmul.mubr.msk.bf16.vlgmr.msra.gmra.mrb[204].mxu1 %vm8047_vm8, %v13486_v25 }
0x118f   : > { %18054 = vmatprep.mubr.msk.bf16.mxu1 %vm8047_vm8, %v23867_v27  ;;  %18083 = vmatpush3.bf16.msra.mxu1 %v19633_v59 }
0x1190   : > { %18084 = vmatprep.subr.bf16.mxu1 %v19634_v50 }
0x1193   : > { %18085 = vmatpush3.bf16.msra.mxu1 %v19634_v50 }
0x1194   : > { %18118 = vmatprep.subr.bf16.mxu1 %v19635_v21 }
0x1196   : > { %18055 = vmatmul.mubr.msk.bf16.gmra.mrb[208].mxu1 %vm8047_vm8, %v23875_v45 }
0x1197   : > { %18058 = vmatprep.mubr.msk.bf16.mxu1 %vm8047_vm8, %v23877_v9 }
0x119e   : > { %18059 = vmatmul.mubr.msk.bf16.gmra.mrb[212].mxu1 %vm8047_vm8, %v23883_v26 }
0x119f   : > { %18062 = vmatprep.mubr.msk.bf16.mxu1 %vm8047_vm8, %v23885_v63 }
0x11a6   : > { %18063 = vmatmul.mubr.msk.bf16.gmra.mrb[216].mxu1 %vm8047_vm8, %v13492_v35 }
0x11a7   : > { %18066 = vmatprep.mubr.msk.bf16.mxu1 %vm8047_vm8, %v13493_v36 }
0x11ae   : > { %18067 = vmatmul.mubr.msk.bf16.gmra.mrb[220].mxu1 %vm8047_vm8, %v13494_v39 }
0x11af   : > { %18070 = vmatprep.mubr.msk.bf16.mxu1 %vm8047_vm8, %v13495_v42 }
0x11b6   : > { %18071 = vmatmul.mubr.msk.bf16.gmra.mrb[224].mxu1 %vm8047_vm8, %v13496_v34 }
0x11b7   : > { %18074 = vmatprep.mubr.msk.bf16.mxu1 %vm8047_vm8, %v13497_v3 }
0x11be   : > { %18075 = vmatmul.mubr.msk.bf16.gmra.mrb[228].mxu1 %vm8047_vm8, %v13498_v46 }
0x11bf   : > { %18078 = vmatprep.mubr.msk.bf16.mxu1 %vm8047_vm8, %v13499_v54 }
0x11c6   : > { %18079 = vmatmul.mubr.msk.bf16.gmra.mrb[232].mxu1 %vm8047_vm8, %v13500_v29 }
0x11c7   : > { %18086 = vmatprep.mubr.msk.bf16.mxu1 %vm8047_vm8, %v13486_v25 }
0x11ce   : > { %18087 = vmatmul.mubr.msk.bf16.vlgmr.msra.gmra.mrb[204].mxu1 %vm8047_vm8, %v23867_v27 }
0x11cf   : > { %18090 = vmatprep.mubr.msk.bf16.mxu1 %vm8047_vm8, %v23875_v45  ;;  %18119 = vmatpush3.bf16.msra.mxu1 %v19635_v21 }
0x11d0   : > { %18120 = vmatprep.subr.bf16.mxu1 %v19636_v57 }
0x11d3   : > { %18121 = vmatpush3.bf16.msra.mxu1 %v19636_v57 }
0x11d6   : > { %18091 = vmatmul.mubr.msk.bf16.gmra.mrb[208].mxu1 %vm8047_vm8, %v23877_v9 }
0x11d7   : > { %18094 = vmatprep.mubr.msk.bf16.mxu1 %vm8047_vm8, %v23883_v26 }
0x11de   : > { %18095 = vmatmul.mubr.msk.bf16.gmra.mrb[212].mxu1 %vm8047_vm8, %v23885_v63 }
0x11df   : > { %18098 = vmatprep.mubr.msk.bf16.mxu1 %vm8047_vm8, %v13492_v35 }
0x11e6   : > { %18099 = vmatmul.mubr.msk.bf16.gmra.mrb[216].mxu1 %vm8047_vm8, %v13493_v36 }
0x11e7   : > { %18102 = vmatprep.mubr.msk.bf16.mxu1 %vm8047_vm8, %v13494_v39 }
0x11ee   : > { %18103 = vmatmul.mubr.msk.bf16.gmra.mrb[220].mxu1 %vm8047_vm8, %v13495_v42 }
0x11ef   : > { %18106 = vmatprep.mubr.msk.bf16.mxu1 %vm8047_vm8, %v13496_v34 }
0x11f6   : > { %18107 = vmatmul.mubr.msk.bf16.gmra.mrb[224].mxu1 %vm8047_vm8, %v13497_v3 }
0x11f7   : > { %18110 = vmatprep.mubr.msk.bf16.mxu1 %vm8047_vm8, %v13498_v46 }
0x11fe   : > { %18111 = vmatmul.mubr.msk.bf16.gmra.mrb[228].mxu1 %vm8047_vm8, %v13499_v54 }
0x11ff   : > { %18114 = vmatprep.mubr.msk.bf16.mxu1 %vm8047_vm8, %v13500_v29 }
0x1206   : > { %18115 = vmatmul.mubr.msk.bf16.gmra.mrb[232].mxu1 %vm8047_vm8, %v13501_v8 }
0x1207   : > { %18122 = vmatprep.mubr.msk.bf16.mxu1 %vm8047_vm8, %v23867_v27 }
0x120e   : > { %18123 = vmatmul.mubr.msk.bf16.vlgmr.msra.gmra.mrb[204].mxu1 %vm8047_vm8, %v23875_v45 }
0x120f   : > { %18126 = vmatprep.mubr.msk.bf16.mxu1 %vm8047_vm8, %v23877_v9 }
0x1216   : > { %18127 = vmatmul.mubr.msk.bf16.gmra.mrb[208].mxu1 %vm8047_vm8, %v23883_v26 }
0x1217   : > { %18130 = vmatprep.mubr.msk.bf16.mxu1 %vm8047_vm8, %v23885_v63 }
0x121e   : > { %18131 = vmatmul.mubr.msk.bf16.gmra.mrb[212].mxu1 %vm8047_vm8, %v13492_v35 }
0x121f   : > { %18134 = vmatprep.mubr.msk.bf16.mxu1 %vm8047_vm8, %v13493_v36 }
0x1226   : > { %18135 = vmatmul.mubr.msk.bf16.gmra.mrb[216].mxu1 %vm8047_vm8, %v13494_v39 }
0x1227   : > { %18138 = vmatprep.mubr.msk.bf16.mxu1 %vm8047_vm8, %v13495_v42 }
0x122e   : > { %18139 = vmatmul.mubr.msk.bf16.gmra.mrb[220].mxu1 %vm8047_vm8, %v13496_v34 }
0x122f   : > { %18142 = vmatprep.mubr.msk.bf16.mxu1 %vm8047_vm8, %v13497_v3 }
0x1236   : > { %18143 = vmatmul.mubr.msk.bf16.gmra.mrb[224].mxu1 %vm8047_vm8, %v13498_v46 }
0x1237   : > { %18146 = vmatprep.mubr.msk.bf16.mxu1 %vm8047_vm8, %v13499_v54 }
0x123e   : > { %18147 = vmatmul.mubr.msk.bf16.gmra.mrb[228].mxu1 %vm8047_vm8, %v13500_v29 }
0x123f   : > { %18150 = vmatprep.mubr.msk.bf16.mxu1 %vm8047_vm8, %v13501_v8 }
0x1246   : > { %18151 = vmatmul.mubr.msk.bf16.gmra.mrb[232].mxu1 %vm8047_vm8, %v13502_v58 }
0x12e1   : > { %v18124_v49 = vpop.f32.mrb[204].mxu1 }
0x12e2   : > { %v14196_v7 = vadd.f32 %v18124_v49, %v23948_v12  ;;  %v14028_v59 = vpop.f32.mrb[205].mxu1 }
0x12e3   : > { %v14194_v52 = vadd.f32 %v23948_v12, %v14028_v59  ;;  %v18125_v19 = vpop.f32.mrb[206].mxu1 }
0x12e4   : > { %14228 = vst.msk [vmem:[%s23954_s29 + $0x10] sm:$0xff] %vm8191_vm5, %v14196_v7  ;;  %v14197_v16 = vadd.f32 %v18125_v19, %v23948_v12  ;;  %v14031_v48 = vpop.f32.mrb[207].mxu1 }
0x12e5   : > { %14226 = vst.msk [vmem:[%s23954_s29] sm:$0xff] %vm8191_vm5, %v14194_v52  ;;  %v14195_v13 = vadd.f32 %v23948_v12, %v14031_v48 }
0x12e6   : > { %14229 = vst.msk [vmem:[%s23954_s29 + $0x18] sm:$0xff] %vm8191_vm5, %v14197_v16 }
0x12e7   : > { %14227 = vst.msk [vmem:[%s23954_s29 + $0x8] sm:$0xff] %vm8191_vm5, %v14195_v13 }
0x12e9   : > { %v18128_v20 = vpop.f32.mrb[208].mxu1 }
0x12ea   : > { %v14200_v51 = vadd.f32 %v18128_v20, %v23948_v12  ;;  %v14044_v55 = vpop.f32.mrb[209].mxu1 }
0x12eb   : > { %v14198_v61 = vadd.f32 %v23948_v12, %v14044_v55  ;;  %v18129_v5 = vpop.f32.mrb[210].mxu1 }
0x12ec   : > { %14232 = vst.msk [vmem:[%s23954_s29 + $0x30] sm:$0xff] %vm8191_vm5, %v14200_v51  ;;  %v14201_v25 = vadd.f32 %v18129_v5, %v23948_v12  ;;  %v14047_v50 = vpop.f32.mrb[211].mxu1 }
0x12ed   : > { %14230 = vst.msk [vmem:[%s23954_s29 + $0x20] sm:$0xff] %vm8191_vm5, %v14198_v61  ;;  %v14199_v27 = vadd.f32 %v23948_v12, %v14047_v50 }
0x12ee   : > { %14233 = vst.msk [vmem:[%s23954_s29 + $0x38] sm:$0xff] %vm8191_vm5, %v14201_v25 }
0x12ef   : > { %14231 = vst.msk [vmem:[%s23954_s29 + $0x28] sm:$0xff] %vm8191_vm5, %v14199_v27 }
0x12f1   : > { %v18132_v21 = vpop.f32.mrb[212].mxu1 }
0x12f2   : > { %v14204_v0 = vadd.f32 %v18132_v21, %v23948_v12  ;;  %v14060_v33 = vpop.f32.mrb[213].mxu1 }
0x12f3   : > { %v14202_v30 = vadd.f32 %v23948_v12, %v14060_v33  ;;  %v18133_v31 = vpop.f32.mrb[214].mxu1 }
0x12f4   : > { %14236 = vst.msk [vmem:[%s23954_s29 + $0x50] sm:$0xff] %vm8191_vm5, %v14204_v0  ;;  %v14205_v45 = vadd.f32 %v18133_v31, %v23948_v12  ;;  %v14063_v9 = vpop.f32.mrb[215].mxu1 }
0x12f5   : > { %14234 = vst.msk [vmem:[%s23954_s29 + $0x40] sm:$0xff] %vm8191_vm5, %v14202_v30  ;;  %v14203_v22 = vadd.f32 %v23948_v12, %v14063_v9 }
0x12f6   : > { %14237 = vst.msk [vmem:[%s23954_s29 + $0x58] sm:$0xff] %vm8191_vm5, %v14205_v45 }
0x12f7   : > { %14235 = vst.msk [vmem:[%s23954_s29 + $0x48] sm:$0xff] %vm8191_vm5, %v14203_v22 }
0x12f9   : > { %v18136_v32 = vpop.f32.mrb[216].mxu1 }
0x12fa   : > { %v14208_v6 = vadd.f32 %v18136_v32, %v23948_v12  ;;  %v14076_v56 = vpop.f32.mrb[217].mxu1 }
0x12fb   : > { %v14206_v26 = vadd.f32 %v23948_v12, %v14076_v56  ;;  %v18137_v63 = vpop.f32.mrb[218].mxu1 }
0x12fc   : > { %14240 = vst.msk [vmem:[%s23954_s29 + $0x70] sm:$0xff] %vm8191_vm5, %v14208_v6  ;;  %v14209_v40 = vadd.f32 %v18137_v63, %v23948_v12  ;;  %v14079_v41 = vpop.f32.mrb[219].mxu1 }
0x12fd   : > { %14238 = vst.msk [vmem:[%s23954_s29 + $0x60] sm:$0xff] %vm8191_vm5, %v14206_v26  ;;  %v14207_v60 = vadd.f32 %v23948_v12, %v14079_v41 }
0x12fe   : > { %14241 = vst.msk [vmem:[%s23954_s29 + $0x78] sm:$0xff] %vm8191_vm5, %v14209_v40 }
0x12ff   : > { %14239 = vst.msk [vmem:[%s23954_s29 + $0x68] sm:$0xff] %vm8191_vm5, %v14207_v60 }
0x1301   : > { %v18140_v2 = vpop.f32.mrb[220].mxu1 }
0x1302   : > { %v14212_v35 = vadd.f32 %v18140_v2, %v23948_v12  ;;  %v14092_v36 = vpop.f32.mrb[221].mxu1 }
0x1303   : > { %v14210_v38 = vadd.f32 %v23948_v12, %v14092_v36  ;;  %v18141_v47 = vpop.f32.mrb[222].mxu1 }
0x1304   : > { %14244 = vst.msk [vmem:[%s23954_s29 + $0x90] sm:$0xff] %vm8191_vm5, %v14212_v35  ;;  %v14213_v53 = vadd.f32 %v18141_v47, %v23948_v12  ;;  %v14095_v11 = vpop.f32.mrb[223].mxu1 }
0x1305   : > { %14242 = vst.msk [vmem:[%s23954_s29 + $0x80] sm:$0xff] %vm8191_vm5, %v14210_v38  ;;  %v14211_v39 = vadd.f32 %v23948_v12, %v14095_v11 }
0x1306   : > { %14245 = vst.msk [vmem:[%s23954_s29 + $0x98] sm:$0xff] %vm8191_vm5, %v14213_v53 }
0x1307   : > { %14243 = vst.msk [vmem:[%s23954_s29 + $0x88] sm:$0xff] %vm8191_vm5, %v14211_v39 }
0x1309   : > { %v18144_v42 = vpop.f32.mrb[224].mxu1 }
0x130a   : > { %v14216_v18 = vadd.f32 %v18144_v42, %v23948_v12  ;;  %v14108_v15 = vpop.f32.mrb[225].mxu1 }
0x130b   : > { %v14214_v4 = vadd.f32 %v23948_v12, %v14108_v15  ;;  %v18145_v28 = vpop.f32.mrb[226].mxu1 }
0x130c   : > { %14248 = vst.msk [vmem:[%s23954_s29 + $0xb0] sm:$0xff] %vm8191_vm5, %v14216_v18  ;;  %v14217_v34 = vadd.f32 %v18145_v28, %v23948_v12  ;;  %v14111_v3 = vpop.f32.mrb[227].mxu1 }
0x130d   : > { %14246 = vst.msk [vmem:[%s23954_s29 + $0xa0] sm:$0xff] %vm8191_vm5, %v14214_v4  ;;  %v14215_v17 = vadd.f32 %v23948_v12, %v14111_v3 }
0x130e   : > { %14249 = vst.msk [vmem:[%s23954_s29 + $0xb8] sm:$0xff] %vm8191_vm5, %v14217_v34 }
0x130f   : > { %14247 = vst.msk [vmem:[%s23954_s29 + $0xa8] sm:$0xff] %vm8191_vm5, %v14215_v17 }
0x1311   : > { %v18148_v1 = vpop.f32.mrb[228].mxu1 }
0x1312   : > { %v14220_v10 = vadd.f32 %v18148_v1, %v23948_v12  ;;  %v14124_v14 = vpop.f32.mrb[229].mxu1 }
0x1313   : > { %v14218_v46 = vadd.f32 %v23948_v12, %v14124_v14  ;;  %v18149_v54 = vpop.f32.mrb[230].mxu1 }
0x1314   : > { %14252 = vst.msk [vmem:[%s23954_s29 + $0xd0] sm:$0xff] %vm8191_vm5, %v14220_v10  ;;  %v14221_v44 = vadd.f32 %v18149_v54, %v23948_v12  ;;  %v14127_v43 = vpop.f32.mrb[231].mxu1 }
0x1315   : > { %14250 = vst.msk [vmem:[%s23954_s29 + $0xc0] sm:$0xff] %vm8191_vm5, %v14218_v46  ;;  %v14219_v29 = vadd.f32 %v23948_v12, %v14127_v43 }
0x1316   : > { %14253 = vst.msk [vmem:[%s23954_s29 + $0xd8] sm:$0xff] %vm8191_vm5, %v14221_v44 }
0x1317   : > { %14251 = vst.msk [vmem:[%s23954_s29 + $0xc8] sm:$0xff] %vm8191_vm5, %v14219_v29 }
0x1319   : > { %v18152_v57 = vpop.f32.mrb[232].mxu1 }
0x131a   : > { %v14224_v37 = vadd.f32 %v18152_v57, %v23948_v12  ;;  %v14140_v24 = vpop.f32.mrb[233].mxu1 }
0x131b   : > { %v14222_v8 = vadd.f32 %v23948_v12, %v14140_v24  ;;  %v18153_v62 = vpop.f32.mrb[234].mxu1 }
0x131c   : > { %14256 = vst.msk [vmem:[%s23954_s29 + $0xf0] sm:$0xff] %vm8191_vm5, %v14224_v37  ;;  %v14225_v23 = vadd.f32 %v18153_v62, %v23948_v12  ;;  %v14143_v58 = vpop.f32.mrb[235].mxu1 }
0x131d   : > { %14254 = vst.msk [vmem:[%s23954_s29 + $0xe0] sm:$0xff] %vm8191_vm5, %v14222_v8  ;;  %v14223_v49 = vadd.f32 %v23948_v12, %v14143_v58 }
0x131e   : > { %14257 = vst.msk [vmem:[%s23954_s29 + $0xf8] sm:$0xff] %vm8191_vm5, %v14225_v23 }
0x131f   : > { %14255 = vst.msk [vmem:[%s23954_s29 + $0xe8] sm:$0xff] %vm8191_vm5, %v14223_v49 }
0x1320 PF: > { %s34_s5 = sadd.s32 1, %s20159_s5  }
0x1321   : > { %p31_p4 = scmp.ge.s32.totalorder %s34_s5, 4  }
0x1323   :  { %33 = sbr.rel (!%p31_p4) target bundleno = 10 (0xa), region = 196 }

</bundles_post_ra>
